<compile_context>
chip_gen: v6e
topology: v6e:2x2x1
jax: 0.10.0
libtpu: 0.0.40
codegen_flags: <defaults>
</compile_context>

<pallas_src>
import functools
import math

import jax
import jax.numpy as jnp
from jax import lax
from jax.experimental import pallas as pl
from jax.experimental.pallas import tpu as pltpu

BN_EPS = 1e-5

POINT_DIMS = [3, 64, 128, 1024]
COORD_DIMS = [64 + 1024, 512, 256, 128, 3]


def _pick_tile(n, target):
    """Largest row tile <= target that divides n and is a multiple of 8 (or n)."""
    if n <= target:
        return n
    t = (target // 8) * 8
    while t >= 8:
        if n % t == 0:
            return t
        t -= 8
    return n


# ----------------------------------------------------------------------------
# Kernel 1: generic fused layer
#   y = relu(a*x + b) @ W  [+ per-batch row] [+ bias], optional BN-stat partials
# ----------------------------------------------------------------------------
def _make_layer_kernel(use_affine, use_rowadd, use_bias, collect_stats):
    def kernel(*refs):
        it = iter(refs)
        x_ref = next(it)
        w_ref = next(it)
        a_ref = next(it) if use_affine else None
        b_ref = next(it) if use_affine else None
        r_ref = next(it) if use_rowadd else None
        bias_ref = next(it) if use_bias else None
        y_ref = next(it)
        stats_ref = next(it) if collect_stats else None

        x = x_ref[0]                                     # (TR, Cin) f32
        if use_affine:                                   # prev layer's BN+ReLU, fused
            x = jnp.maximum(x * a_ref[...] + b_ref[...], 0.0)
        y = jnp.dot(x.astype(jnp.bfloat16), w_ref[...],
                    preferred_element_type=jnp.float32)  # (TR, Cout) f32
        if use_rowadd:
            y = y + r_ref[0]                             # (1, Cout) per-batch row
        if use_bias:
            y = y + bias_ref[...]
        y_ref[0] = y
        if collect_stats:
            s = jnp.sum(y, axis=0, keepdims=True)        # (1, Cout)
            ss = jnp.sum(y * y, axis=0, keepdims=True)
            stats_ref[0] = jnp.concatenate([s, ss], axis=0)   # (2, Cout)
    return kernel


def fused_layer(x, w_bf16, *, affine=None, rowadd=None, bias=None,
                collect_stats=False, tile_rows=512):
    """x: (B, N, Cin) f32; w_bf16: (Cin, Cout) bf16.  Returns y [, stats]."""
    B, N, Cin = x.shape
    Cout = w_bf16.shape[1]
    TR = _pick_tile(N, tile_rows)
    nt = N // TR

    in_specs = [
        pl.BlockSpec((1, TR, Cin), lambda b, t: (b, t, 0)),
        pl.BlockSpec((Cin, Cout), lambda b, t: (0, 0)),          # resident weight
    ]
    args = [x, w_bf16]
    use_affine = affine is not None
    use_rowadd = rowadd is not None
    use_bias = bias is not None
    if use_affine:
        a_vec, b_vec = affine
        in_specs += [pl.BlockSpec((1, Cin), lambda b, t: (0, 0)),
                     pl.BlockSpec((1, Cin), lambda b, t: (0, 0))]
        args += [a_vec, b_vec]
    if use_rowadd:
        in_specs.append(pl.BlockSpec((1, 1, Cout), lambda b, t: (b, 0, 0)))
        args.append(rowadd)
    if use_bias:
        in_specs.append(pl.BlockSpec((1, Cout), lambda b, t: (0, 0)))
        args.append(bias)

    out_shapes = [jax.ShapeDtypeStruct((B, N, Cout), jnp.float32)]
    out_specs = [pl.BlockSpec((1, TR, Cout), lambda b, t: (b, t, 0))]
    if collect_stats:
        out_shapes.append(jax.ShapeDtypeStruct((B * nt, 2, Cout), jnp.float32))
        out_specs.append(
            pl.BlockSpec((1, 2, Cout), lambda b, t, nt=nt: (b * nt + t, 0, 0)))

    kern = _make_layer_kernel(use_affine, use_rowadd, use_bias, collect_stats)
    call = pl.pallas_call(
        kern,
        grid=(B, nt),
        in_specs=in_specs,
        out_specs=tuple(out_specs) if collect_stats else out_specs[0],
        out_shape=tuple(out_shapes) if collect_stats else out_shapes[0],
        compiler_params=pltpu.CompilerParams(
            dimension_semantics=("parallel", "parallel")),
    )
    return call(*args)


# ----------------------------------------------------------------------------
# Kernel 2: last point-MLP layer fused with global max/min + BN stats.
# The (B, N, 1024) activation never touches HBM; output is (B*nt, 4, 1024)
# with rows [col_sum, col_sumsq, col_max, col_min] per tile.
# ----------------------------------------------------------------------------
def _maxmin_stats_kernel(x_ref, w_ref, a_ref, b_ref, o_ref):
    x = jnp.maximum(x_ref[0] * a_ref[...] + b_ref[...], 0.0)     # prev BN+ReLU
    y = jnp.dot(x.astype(jnp.bfloat16), w_ref[...],
                preferred_element_type=jnp.float32)              # (TR, 1024)
    s = jnp.sum(y, axis=0, keepdims=True)
    ss = jnp.sum(y * y, axis=0, keepdims=True)
    mx = jnp.max(y, axis=0, keepdims=True)
    mn = jnp.min(y, axis=0, keepdims=True)
    o_ref[0] = jnp.concatenate([s, ss, mx, mn], axis=0)          # (4, 1024)


def maxmin_layer(x, w_bf16, affine, *, tile_rows=512):
    B, N, Cin = x.shape
    Cout = w_bf16.shape[1]
    TR = _pick_tile(N, tile_rows)
    nt = N // TR
    a_vec, b_vec = affine
    return pl.pallas_call(
        _maxmin_stats_kernel,
        grid=(B, nt),
        in_specs=[
            pl.BlockSpec((1, TR, Cin), lambda b, t: (b, t, 0)),
            pl.BlockSpec((Cin, Cout), lambda b, t: (0, 0)),
            pl.BlockSpec((1, Cin), lambda b, t: (0, 0)),
            pl.BlockSpec((1, Cin), lambda b, t: (0, 0)),
        ],
        out_specs=pl.BlockSpec((1, 4, Cout), lambda b, t, nt=nt: (b * nt + t, 0, 0)),
        out_shape=jax.ShapeDtypeStruct((B * nt, 4, Cout), jnp.float32),
        compiler_params=pltpu.CompilerParams(
            dimension_semantics=("parallel", "parallel")),
    )(x, w_bf16, a_vec, b_vec)


# ----------------------------------------------------------------------------
# Kernel 3: pairwise distances + per-point error terms, tiled over query rows.
#   minr (B, N, 1): min_j ||pred_i - coord_j||
#   minc (B, 1, M): min_i ||pred_i - coord_j|| (accumulated across query tiles)
#   sq   (B, N, 1): sum_d (pred-coord)^2 per point
#   l1   (B, N, 1): sum_d smooth_l1(pred-coord) per point
# ----------------------------------------------------------------------------
def _dist_kernel(p_ref, c_ref, ct_ref, minr_ref, minc_ref, sq_ref, l1_ref):
    qi = pl.program_id(1)

    p = p_ref[0]                                           # (TQ, 3)
    c = c_ref[0]                                           # (TQ, 3) aligned rows
    ct = ct_ref[0]                                         # (3, M) lane-dense

    pn = jnp.sum(p * p, axis=-1, keepdims=True)            # (TQ, 1)
    cn = jnp.sum(ct * ct, axis=0, keepdims=True)           # (1, M)
    cross = jnp.dot(p, ct, preferred_element_type=jnp.float32)   # (TQ, M)
    dist = jnp.sqrt(jnp.maximum(pn + cn - 2.0 * cross, 0.0))

    minr_ref[0] = jnp.min(dist, axis=1, keepdims=True)     # (TQ, 1)

    col_min = jnp.min(dist, axis=0, keepdims=True)         # (1, M)

    @pl.when(qi == 0)
    def _():
        minc_ref[0] = col_min

    @pl.when(qi > 0)
    def _():
        minc_ref[0] = jnp.minimum(minc_ref[0], col_min)

    diff = p - c
    sq_ref[0] = jnp.sum(diff * diff, axis=-1, keepdims=True)
    ad = jnp.abs(diff)
    sl1 = jnp.where(ad < 1.0, 0.5 * ad * ad, ad - 0.5)      # beta = 1.0
    l1_ref[0] = jnp.sum(sl1, axis=-1, keepdims=True)


def dist_losses(pred, coord, *, tile_rows=512):
    B, N, _ = pred.shape
    M = coord.shape[1]
    TQ = _pick_tile(N, tile_rows)
    nq = N // TQ
    coord_t = jnp.transpose(coord, (0, 2, 1))               # (B, 3, M)

    return pl.pallas_call(
        _dist_kernel,
        grid=(B, nq),
        in_specs=[
            pl.BlockSpec((1, TQ, 3), lambda b, q: (b, q, 0)),
            pl.BlockSpec((1, TQ, 3), lambda b, q: (b, q, 0)),
            pl.BlockSpec((1, 3, M), lambda b, q: (b, 0, 0)),
        ],
        out_specs=(
            pl.BlockSpec((1, TQ, 1), lambda b, q: (b, q, 0)),
            pl.BlockSpec((1, 1, M), lambda b, q: (b, 0, 0)),
            pl.BlockSpec((1, TQ, 1), lambda b, q: (b, q, 0)),
            pl.BlockSpec((1, TQ, 1), lambda b, q: (b, q, 0)),
        ),
        out_shape=(
            jax.ShapeDtypeStruct((B, N, 1), jnp.float32),
            jax.ShapeDtypeStruct((B, 1, M), jnp.float32),
            jax.ShapeDtypeStruct((B, N, 1), jnp.float32),
            jax.ShapeDtypeStruct((B, N, 1), jnp.float32),
        ),
        compiler_params=pltpu.CompilerParams(
            dimension_semantics=("parallel", "arbitrary")),
    )(pred, coord, coord_t)


# ----------------------------------------------------------------------------
# BatchNorm helpers (tiny reductions / rsqrt in plain JAX, f32)
# ----------------------------------------------------------------------------
def _reduce_stats(st):
    tot = jnp.sum(st, axis=0)          # (2, C)
    return tot[0:1], tot[1:2]          # (1, C), (1, C)


def _bn_affine(s, ss, count, gamma, beta):
    mean = s / count
    var = jnp.maximum(ss / count - mean * mean, 0.0)        # biased variance
    a = gamma * lax.rsqrt(var + BN_EPS)
    b = beta - mean * a
    return a, b


# ----------------------------------------------------------------------------
# Parameters (shapes mirror the PyTorch module; weights stored (Cin, Cout))
# ----------------------------------------------------------------------------
def _init_layer(key, cin, cout):
    kw, kb = jax.random.split(key)
    bound = 1.0 / math.sqrt(cin)
    return dict(
        w=jax.random.uniform(kw, (cin, cout), jnp.float32, -bound, bound),
        b=jax.random.uniform(kb, (1, cout), jnp.float32, -bound, bound),
        gamma=jnp.ones((1, cout), jnp.float32),
        beta=jnp.zeros((1, cout), jnp.float32),
    )


def init_params(key):
    n_layers = (len(POINT_DIMS) - 1) + (len(COORD_DIMS) - 1)
    keys = jax.random.split(key, n_layers)
    params = {"point": [], "coord": []}
    idx = 0
    for i in range(len(POINT_DIMS) - 1):
        params["point"].append(_init_layer(keys[idx], POINT_DIMS[i], POINT_DIMS[i + 1]))
        idx += 1
    for i in range(len(COORD_DIMS) - 1):
        params["coord"].append(_init_layer(keys[idx], COORD_DIMS[i], COORD_DIMS[i + 1]))
        idx += 1
    return params


# ----------------------------------------------------------------------------
# Forward pass (mirrors EstCoordNet.forward)
# ----------------------------------------------------------------------------
def est_coord_forward(params, pc, coord, *, tile_rows=512):
    B, N, _ = pc.shape
    assert coord.shape[1] == N, "mse/smooth-l1 require index-aligned coord (M == N)"
    count = float(B * N)
    pw, cw = params["point"], params["coord"]

    # ---- point MLP -----------------------------------------------------
    # layer 1: 3 -> 64 (pre-BN output kept; conv bias cancelled by BN)
    y1, st1 = fused_layer(pc, pw[0]["w"].astype(jnp.bfloat16),
                          collect_stats=True, tile_rows=tile_rows)
    a1, b1 = _bn_affine(*_reduce_stats(st1), count, pw[0]["gamma"], pw[0]["beta"])

    # layer 2: 64 -> 128 (BN1+ReLU fused as input affine)
    y2, st2 = fused_layer(y1, pw[1]["w"].astype(jnp.bfloat16),
                          affine=(a1, b1), collect_stats=True, tile_rows=tile_rows)
    a2, b2 = _bn_affine(*_reduce_stats(st2), count, pw[1]["gamma"], pw[1]["beta"])

    # layer 3: 128 -> 1024, fused with global max-pool (activation stays in VMEM)
    stm = maxmin_layer(y2, pw[2]["w"].astype(jnp.bfloat16), (a2, b2),
                       tile_rows=tile_rows)                       # (B*nt, 4, 1024)
    nt3 = stm.shape[0] // B
    stm = stm.reshape(B, nt3, 4, -1)
    s3 = jnp.sum(stm[:, :, 0, :], axis=(0, 1))[None]              # (1, 1024)
    ss3 = jnp.sum(stm[:, :, 1, :], axis=(0, 1))[None]
    mx_b = jnp.max(stm[:, :, 2, :], axis=1)                       # (B, 1024)
    mn_b = jnp.min(stm[:, :, 3, :], axis=1)
    a3, b3 = _bn_affine(s3, ss3, count, pw[2]["gamma"], pw[2]["beta"])
    # exact post-BN+ReLU global max: per-channel affine is monotone
    glob = jnp.maximum(jnp.maximum(a3 * mx_b + b3, a3 * mn_b + b3), 0.0)   # (B, 1024)

    # ---- coord MLP ------------------------------------------------------
    # layer 1: split 1088-wide weight; global part is a per-batch row add
    wc1 = cw[0]["w"].astype(jnp.bfloat16)                          # (1088, 512)
    w_loc, w_glob = wc1[:64], wc1[64:]
    gcontrib = jnp.dot(glob.astype(jnp.bfloat16), w_glob,
                       preferred_element_type=jnp.float32)[:, None, :]   # (B,1,512)
    yc1, stc1 = fused_layer(y1, w_loc, affine=(a1, b1), rowadd=gcontrib,
                            collect_stats=True, tile_rows=tile_rows)
    ac1, bc1 = _bn_affine(*_reduce_stats(stc1), count, cw[0]["gamma"], cw[0]["beta"])

    yc2, stc2 = fused_layer(yc1, cw[1]["w"].astype(jnp.bfloat16),
                            affine=(ac1, bc1), collect_stats=True, tile_rows=tile_rows)
    ac2, bc2 = _bn_affine(*_reduce_stats(stc2), count, cw[1]["gamma"], cw[1]["beta"])

    yc3, stc3 = fused_layer(yc2, cw[2]["w"].astype(jnp.bfloat16),
                            affine=(ac2, bc2), collect_stats=True, tile_rows=tile_rows)
    ac3, bc3 = _bn_affine(*_reduce_stats(stc3), count, cw[2]["gamma"], cw[2]["beta"])

    # final layer: 128 -> 3, plain conv (bias used, no BN/ReLU)
    pred = fused_layer(yc3, cw[3]["w"].astype(jnp.bfloat16),
                       affine=(ac3, bc3), bias=cw[3]["b"],
                       collect_stats=False, tile_rows=tile_rows)   # (B, N, 3)

    # ---- losses ---------------------------------------------------------
    minr, minc, sq_pp, l1_pp = dist_losses(pred, coord, tile_rows=tile_rows)
    minr = minr[..., 0]                                            # (B, N)
    minc = minc[:, 0, :]                                           # (B, M)

    chamfer_loss = jnp.mean(minr) + jnp.mean(minc)
    hausdorff_loss = jnp.mean(jnp.maximum(jnp.max(minr, axis=1),
                                          jnp.max(minc, axis=1)))
    denom = B * N * 3
    mse = jnp.sum(sq_pp) / denom
    l1_loss = jnp.sum(l1_pp) / denom

    # NOTE: the reference forward computes repulsion_loss but never uses it
    # (not in `loss`, not in the returned metric dict) -> dropped here so the
    # O(N^2) self-distance matrix and top-k never exist.

    loss = 10.0 * jnp.sqrt(mse)
    metric = dict(
        loss=loss,
        chamfer_loss=chamfer_loss,
        mse_loss=jnp.sqrt(mse),
        hausdorff_loss=hausdorff_loss,
        l1_loss=l1_loss,
    )
    return loss, metric


if __name__ == "__main__":
    key = jax.random.PRNGKey(0)
    k_params, k_pc, k_coord = jax.random.split(key, 3)

    params = init_params(k_params)

    B, N = 2, 128
    pc = 0.1 * jax.random.normal(k_pc, (B, N, 3), dtype=jnp.float32)
    coord = 0.1 * jax.random.normal(k_coord, (B, N, 3), dtype=jnp.float32)

    fwd = jax.jit(functools.partial(est_coord_forward, tile_rows=512))
    loss, metric = fwd(params, pc, coord)
    jax.block_until_ready(loss)
    for v in metric.values():
        jax.block_until_ready(v)

    assert bool(jnp.isfinite(loss))
    print("KERNEL_OK")
</pallas_src>

<mosaic_0001>
module attributes {stable_mosaic.version = 11 : i64} {
  func.func @kernel(%arg0: i32, %arg1: i32, %arg2: memref<1x128x3xf32, #tpu.memory_space<vmem>>, %arg3: memref<3x64xbf16, #tpu.memory_space<vmem>>, %arg4: memref<1x128x64xf32, #tpu.memory_space<vmem>>, %arg5: memref<1x2x64xf32, #tpu.memory_space<vmem>>) attributes {dimension_semantics = [#tpu.dimension_semantics<parallel>, #tpu.dimension_semantics<parallel>], iteration_bounds = array<i64: 2, 1>, scalar_prefetch = 0 : i64, scratch_operands = 0 : i64, tpu.core_type = #tpu.core_type<tc>, window_params = [{transform_indices = @transform_0, window_bounds = array<i64: 1, 128, 3>}, {pipeline_mode = #tpu.pipeline_mode<synchronous>, transform_indices = @transform_1, window_bounds = array<i64: 3, 64>}, {transform_indices = @transform_2, window_bounds = array<i64: 1, 128, 64>}, {transform_indices = @transform_3, window_bounds = array<i64: 1, 2, 64>}]} {
    %c0 = arith.constant 0 : index
    %c0_0 = arith.constant 0 : index
    %c0_1 = arith.constant 0 : index
    %0 = vector.load %arg2[%c0, %c0_0, %c0_1] : memref<1x128x3xf32, #tpu.memory_space<vmem>>, vector<1x128x3xf32>
    %1 = vector.shape_cast %0 : vector<1x128x3xf32> to vector<128x3xf32>
    %2 = arith.truncf %1 : vector<128x3xf32> to vector<128x3xbf16>
    %c0_2 = arith.constant 0 : index
    %c0_3 = arith.constant 0 : index
    %3 = vector.load %arg3[%c0_2, %c0_3] : memref<3x64xbf16, #tpu.memory_space<vmem>>, vector<3x64xbf16>
    %cst = arith.constant dense<0.000000e+00> : vector<128x64xf32>
    %4 = tpu.matmul %2, %3, %cst {dimension_numbers = #tpu.dot_dimension_numbers<[1], [0], [0], [1], [0, 0, 1, 1], [], []>} : vector<128x3xbf16>, vector<3x64xbf16>, vector<128x64xf32> -> vector<128x64xf32>
    %c0_4 = arith.constant 0 : index
    %c0_5 = arith.constant 0 : index
    %c0_6 = arith.constant 0 : index
    %5 = vector.load %arg4[%c0_4, %c0_5, %c0_6] : memref<1x128x64xf32, #tpu.memory_space<vmem>>, vector<1x128x64xf32>
    %6 = vector.shape_cast %5 : vector<1x128x64xf32> to vector<128x64xf32>
    %7 = vector.shape_cast %4 : vector<128x64xf32> to vector<1x128x64xf32>
    tpu.vector_store %arg4[%c0_4, %c0_5, %c0_6], %7 {strides = array<i32>} : memref<1x128x64xf32, #tpu.memory_space<vmem>>, vector<1x128x64xf32>,
    %cst_7 = arith.constant dense<0.000000e+00> : vector<64xf32>
    %8 = vector.multi_reduction <add>, %4, %cst_7 [0] : vector<128x64xf32> to vector<64xf32>
    %9 = vector.shape_cast %8 : vector<64xf32> to vector<1x64xf32>
    %10 = arith.mulf %4, %4 : vector<128x64xf32>
    %cst_8 = arith.constant dense<0.000000e+00> : vector<64xf32>
    %11 = vector.multi_reduction <add>, %10, %cst_8 [0] : vector<128x64xf32> to vector<64xf32>
    %12 = vector.shape_cast %11 : vector<64xf32> to vector<1x64xf32>
    %13 = tpu.concatenate %9, %12 in 0 : vector<1x64xf32>, vector<1x64xf32> -> vector<2x64xf32>
    %c0_9 = arith.constant 0 : index
    %c0_10 = arith.constant 0 : index
    %c0_11 = arith.constant 0 : index
    %14 = vector.load %arg5[%c0_9, %c0_10, %c0_11] : memref<1x2x64xf32, #tpu.memory_space<vmem>>, vector<1x2x64xf32>
    %15 = vector.shape_cast %14 : vector<1x2x64xf32> to vector<2x64xf32>
    %16 = vector.shape_cast %13 : vector<2x64xf32> to vector<1x2x64xf32>
    tpu.vector_store %arg5[%c0_9, %c0_10, %c0_11], %16 {strides = array<i32>} : memref<1x2x64xf32, #tpu.memory_space<vmem>>, vector<1x2x64xf32>,
    return
  }
  func.func @transform_0(%arg0: i32, %arg1: i32) -> (i32, i32, i32) {
    %c0_i32 = arith.constant 0 : i32
    %c0_i32_0 = arith.constant 0 : i32
    return %arg0, %arg1, %c0_i32 : i32, i32, i32
  }
  func.func @transform_1(%arg0: i32, %arg1: i32) -> (i32, i32) {
    %c0_i32 = arith.constant 0 : i32
    %c0_i32_0 = arith.constant 0 : i32
    %c0_i32_1 = arith.constant 0 : i32
    return %c0_i32, %c0_i32_0 : i32, i32
  }
  func.func @transform_2(%arg0: i32, %arg1: i32) -> (i32, i32, i32) {
    %c0_i32 = arith.constant 0 : i32
    %c0_i32_0 = arith.constant 0 : i32
    return %arg0, %arg1, %c0_i32 : i32, i32, i32
  }
  func.func @transform_3(%arg0: i32, %arg1: i32) -> (i32, i32, i32) {
    %c1_i32 = arith.constant 1 : i32
    %0 = arith.muli %arg0, %c1_i32 : i32
    %1 = arith.addi %0, %arg1 : i32
    %c0_i32 = arith.constant 0 : i32
    %c0_i32_0 = arith.constant 0 : i32
    %c0_i32_1 = arith.constant 0 : i32
    return %1, %c0_i32, %c0_i32_0 : i32, i32, i32
  }
}

module attributes {stable_mosaic.version = 11 : i64} {
  func.func @kernel(%arg0: i32, %arg1: i32, %arg2: memref<1x128x64xf32, #tpu.memory_space<vmem>>, %arg3: memref<64x128xbf16, #tpu.memory_space<vmem>>, %arg4: memref<1x64xf32, #tpu.memory_space<vmem>>, %arg5: memref<1x64xf32, #tpu.memory_space<vmem>>, %arg6: memref<1x128x128xf32, #tpu.memory_space<vmem>>, %arg7: memref<1x2x128xf32, #tpu.memory_space<vmem>>) attributes {dimension_semantics = [#tpu.dimension_semantics<parallel>, #tpu.dimension_semantics<parallel>], iteration_bounds = array<i64: 2, 1>, scalar_prefetch = 0 : i64, scratch_operands = 0 : i64, tpu.core_type = #tpu.core_type<tc>, window_params = [{transform_indices = @transform_0, window_bounds = array<i64: 1, 128, 64>}, {pipeline_mode = #tpu.pipeline_mode<synchronous>, transform_indices = @transform_1, window_bounds = array<i64: 64, 128>}, {pipeline_mode = #tpu.pipeline_mode<synchronous>, transform_indices = @transform_2, window_bounds = array<i64: 1, 64>}, {pipeline_mode = #tpu.pipeline_mode<synchronous>, transform_indices = @transform_3, window_bounds = array<i64: 1, 64>}, {transform_indices = @transform_4, window_bounds = array<i64: 1, 128, 128>}, {transform_indices = @transform_5, window_bounds = array<i64: 1, 2, 128>}]} {
    %c0 = arith.constant 0 : index
    %c0_0 = arith.constant 0 : index
    %c0_1 = arith.constant 0 : index
    %0 = vector.load %arg2[%c0, %c0_0, %c0_1] : memref<1x128x64xf32, #tpu.memory_space<vmem>>, vector<1x128x64xf32>
    %1 = vector.shape_cast %0 : vector<1x128x64xf32> to vector<128x64xf32>
    %c0_2 = arith.constant 0 : index
    %c0_3 = arith.constant 0 : index
    %2 = vector.load %arg4[%c0_2, %c0_3] : memref<1x64xf32, #tpu.memory_space<vmem>>, vector<1x64xf32>
    %3 = vector.broadcast %2 : vector<1x64xf32> to vector<128x64xf32>
    %4 = arith.mulf %1, %3 : vector<128x64xf32>
    %c0_4 = arith.constant 0 : index
    %c0_5 = arith.constant 0 : index
    %5 = vector.load %arg5[%c0_4, %c0_5] : memref<1x64xf32, #tpu.memory_space<vmem>>, vector<1x64xf32>
    %6 = vector.broadcast %5 : vector<1x64xf32> to vector<128x64xf32>
    %7 = arith.addf %4, %6 : vector<128x64xf32>
    %cst = arith.constant 0.000000e+00 : f32
    %8 = vector.broadcast %cst : f32 to vector<128x64xf32>
    %9 = arith.maximumf %7, %8 : vector<128x64xf32>
    %10 = arith.truncf %9 : vector<128x64xf32> to vector<128x64xbf16>
    %c0_6 = arith.constant 0 : index
    %c0_7 = arith.constant 0 : index
    %11 = vector.load %arg3[%c0_6, %c0_7] : memref<64x128xbf16, #tpu.memory_space<vmem>>, vector<64x128xbf16>
    %cst_8 = arith.constant dense<0.000000e+00> : vector<128x128xf32>
    %12 = tpu.matmul %10, %11, %cst_8 {dimension_numbers = #tpu.dot_dimension_numbers<[1], [0], [0], [1], [0, 0, 1, 1], [], []>} : vector<128x64xbf16>, vector<64x128xbf16>, vector<128x128xf32> -> vector<128x128xf32>
    %c0_9 = arith.constant 0 : index
    %c0_10 = arith.constant 0 : index
    %c0_11 = arith.constant 0 : index
    %13 = vector.load %arg6[%c0_9, %c0_10, %c0_11] : memref<1x128x128xf32, #tpu.memory_space<vmem>>, vector<1x128x128xf32>
    %14 = vector.shape_cast %13 : vector<1x128x128xf32> to vector<128x128xf32>
    %15 = vector.shape_cast %12 : vector<128x128xf32> to vector<1x128x128xf32>
    tpu.vector_store %arg6[%c0_9, %c0_10, %c0_11], %15 {strides = array<i32>} : memref<1x128x128xf32, #tpu.memory_space<vmem>>, vector<1x128x128xf32>,
    %cst_12 = arith.constant dense<0.000000e+00> : vector<128xf32>
    %16 = vector.multi_reduction <add>, %12, %cst_12 [0] : vector<128x128xf32> to vector<128xf32>
    %17 = vector.shape_cast %16 : vector<128xf32> to vector<1x128xf32>
    %18 = arith.mulf %12, %12 : vector<128x128xf32>
    %cst_13 = arith.constant dense<0.000000e+00> : vector<128xf32>
    %19 = vector.multi_reduction <add>, %18, %cst_13 [0] : vector<128x128xf32> to vector<128xf32>
    %20 = vector.shape_cast %19 : vector<128xf32> to vector<1x128xf32>
    %21 = tpu.concatenate %17, %20 in 0 : vector<1x128xf32>, vector<1x128xf32> -> vector<2x128xf32>
    %c0_14 = arith.constant 0 : index
    %c0_15 = arith.constant 0 : index
    %c0_16 = arith.constant 0 : index
    %22 = vector.load %arg7[%c0_14, %c0_15, %c0_16] : memref<1x2x128xf32, #tpu.memory_space<vmem>>, vector<1x2x128xf32>
    %23 = vector.shape_cast %22 : vector<1x2x128xf32> to vector<2x128xf32>
    %24 = vector.shape_cast %21 : vector<2x128xf32> to vector<1x2x128xf32>
    tpu.vector_store %arg7[%c0_14, %c0_15, %c0_16], %24 {strides = array<i32>} : memref<1x2x128xf32, #tpu.memory_space<vmem>>, vector<1x2x128xf32>,
    return
  }
  func.func @transform_0(%arg0: i32, %arg1: i32) -> (i32, i32, i32) {
    %c0_i32 = arith.constant 0 : i32
    %c0_i32_0 = arith.constant 0 : i32
    return %arg0, %arg1, %c0_i32 : i32, i32, i32
  }
  func.func @transform_1(%arg0: i32, %arg1: i32) -> (i32, i32) {
    %c0_i32 = arith.constant 0 : i32
    %c0_i32_0 = arith.constant 0 : i32
    %c0_i32_1 = arith.constant 0 : i32
    return %c0_i32, %c0_i32_0 : i32, i32
  }
  func.func @transform_2(%arg0: i32, %arg1: i32) -> (i32, i32) {
    %c0_i32 = arith.constant 0 : i32
    %c0_i32_0 = arith.constant 0 : i32
    %c0_i32_1 = arith.constant 0 : i32
    return %c0_i32, %c0_i32_0 : i32, i32
  }
  func.func @transform_3(%arg0: i32, %arg1: i32) -> (i32, i32) {
    %c0_i32 = arith.constant 0 : i32
    %c0_i32_0 = arith.constant 0 : i32
    %c0_i32_1 = arith.constant 0 : i32
    return %c0_i32, %c0_i32_0 : i32, i32
  }
  func.func @transform_4(%arg0: i32, %arg1: i32) -> (i32, i32, i32) {
    %c0_i32 = arith.constant 0 : i32
    %c0_i32_0 = arith.constant 0 : i32
    return %arg0, %arg1, %c0_i32 : i32, i32, i32
  }
  func.func @transform_5(%arg0: i32, %arg1: i32) -> (i32, i32, i32) {
    %c1_i32 = arith.constant 1 : i32
    %0 = arith.muli %arg0, %c1_i32 : i32
    %1 = arith.addi %0, %arg1 : i32
    %c0_i32 = arith.constant 0 : i32
    %c0_i32_0 = arith.constant 0 : i32
    %c0_i32_1 = arith.constant 0 : i32
    return %1, %c0_i32, %c0_i32_0 : i32, i32, i32
  }
}

module attributes {stable_mosaic.version = 11 : i64} {
  func.func @_maxmin_stats_kernel(%arg0: i32, %arg1: i32, %arg2: memref<1x128x128xf32, #tpu.memory_space<vmem>>, %arg3: memref<128x1024xbf16, #tpu.memory_space<vmem>>, %arg4: memref<1x128xf32, #tpu.memory_space<vmem>>, %arg5: memref<1x128xf32, #tpu.memory_space<vmem>>, %arg6: memref<1x4x1024xf32, #tpu.memory_space<vmem>>) attributes {dimension_semantics = [#tpu.dimension_semantics<parallel>, #tpu.dimension_semantics<parallel>], iteration_bounds = array<i64: 2, 1>, scalar_prefetch = 0 : i64, scratch_operands = 0 : i64, tpu.core_type = #tpu.core_type<tc>, window_params = [{transform_indices = @transform_0, window_bounds = array<i64: 1, 128, 128>}, {pipeline_mode = #tpu.pipeline_mode<synchronous>, transform_indices = @transform_1, window_bounds = array<i64: 128, 1024>}, {pipeline_mode = #tpu.pipeline_mode<synchronous>, transform_indices = @transform_2, window_bounds = array<i64: 1, 128>}, {pipeline_mode = #tpu.pipeline_mode<synchronous>, transform_indices = @transform_3, window_bounds = array<i64: 1, 128>}, {transform_indices = @transform_4, window_bounds = array<i64: 1, 4, 1024>}]} {
    %c0 = arith.constant 0 : index
    %c0_0 = arith.constant 0 : index
    %c0_1 = arith.constant 0 : index
    %0 = vector.load %arg2[%c0, %c0_0, %c0_1] : memref<1x128x128xf32, #tpu.memory_space<vmem>>, vector<1x128x128xf32>
    %1 = vector.shape_cast %0 : vector<1x128x128xf32> to vector<128x128xf32>
    %c0_2 = arith.constant 0 : index
    %c0_3 = arith.constant 0 : index
    %2 = vector.load %arg4[%c0_2, %c0_3] : memref<1x128xf32, #tpu.memory_space<vmem>>, vector<1x128xf32>
    %3 = vector.broadcast %2 : vector<1x128xf32> to vector<128x128xf32>
    %4 = arith.mulf %1, %3 : vector<128x128xf32>
    %c0_4 = arith.constant 0 : index
    %c0_5 = arith.constant 0 : index
    %5 = vector.load %arg5[%c0_4, %c0_5] : memref<1x128xf32, #tpu.memory_space<vmem>>, vector<1x128xf32>
    %6 = vector.broadcast %5 : vector<1x128xf32> to vector<128x128xf32>
    %7 = arith.addf %4, %6 : vector<128x128xf32>
    %cst = arith.constant 0.000000e+00 : f32
    %8 = vector.broadcast %cst : f32 to vector<128x128xf32>
    %9 = arith.maximumf %7, %8 : vector<128x128xf32>
    %10 = arith.truncf %9 : vector<128x128xf32> to vector<128x128xbf16>
    %c0_6 = arith.constant 0 : index
    %c0_7 = arith.constant 0 : index
    %11 = vector.load %arg3[%c0_6, %c0_7] : memref<128x1024xbf16, #tpu.memory_space<vmem>>, vector<128x1024xbf16>
    %cst_8 = arith.constant dense<0.000000e+00> : vector<128x1024xf32>
    %12 = tpu.matmul %10, %11, %cst_8 {dimension_numbers = #tpu.dot_dimension_numbers<[1], [0], [0], [1], [0, 0, 1, 1], [], []>} : vector<128x128xbf16>, vector<128x1024xbf16>, vector<128x1024xf32> -> vector<128x1024xf32>
    %cst_9 = arith.constant dense<0.000000e+00> : vector<1024xf32>
    %13 = vector.multi_reduction <add>, %12, %cst_9 [0] : vector<128x1024xf32> to vector<1024xf32>
    %14 = vector.shape_cast %13 : vector<1024xf32> to vector<1x1024xf32>
    %15 = arith.mulf %12, %12 : vector<128x1024xf32>
    %cst_10 = arith.constant dense<0.000000e+00> : vector<1024xf32>
    %16 = vector.multi_reduction <add>, %15, %cst_10 [0] : vector<128x1024xf32> to vector<1024xf32>
    %17 = vector.shape_cast %16 : vector<1024xf32> to vector<1x1024xf32>
    %cst_11 = arith.constant dense<0xFF800000> : vector<1024xf32>
    %18 = vector.multi_reduction <maximumf>, %12, %cst_11 [0] : vector<128x1024xf32> to vector<1024xf32>
    %19 = vector.shape_cast %18 : vector<1024xf32> to vector<1x1024xf32>
    %cst_12 = arith.constant dense<0x7F800000> : vector<1024xf32>
    %20 = vector.multi_reduction <minimumf>, %12, %cst_12 [0] : vector<128x1024xf32> to vector<1024xf32>
    %21 = vector.shape_cast %20 : vector<1024xf32> to vector<1x1024xf32>
    %22 = tpu.concatenate %14, %17, %19, %21 in 0 : vector<1x1024xf32>, vector<1x1024xf32>, vector<1x1024xf32>, vector<1x1024xf32> -> vector<4x1024xf32>
    %c0_13 = arith.constant 0 : index
    %c0_14 = arith.constant 0 : index
    %c0_15 = arith.constant 0 : index
    %23 = vector.load %arg6[%c0_13, %c0_14, %c0_15] : memref<1x4x1024xf32, #tpu.memory_space<vmem>>, vector<1x4x1024xf32>
    %24 = vector.shape_cast %23 : vector<1x4x1024xf32> to vector<4x1024xf32>
    %25 = vector.shape_cast %22 : vector<4x1024xf32> to vector<1x4x1024xf32>
    tpu.vector_store %arg6[%c0_13, %c0_14, %c0_15], %25 {strides = array<i32>} : memref<1x4x1024xf32, #tpu.memory_space<vmem>>, vector<1x4x1024xf32>,
    return
  }
  func.func @transform_0(%arg0: i32, %arg1: i32) -> (i32, i32, i32) {
    %c0_i32 = arith.constant 0 : i32
    %c0_i32_0 = arith.constant 0 : i32
    return %arg0, %arg1, %c0_i32 : i32, i32, i32
  }
  func.func @transform_1(%arg0: i32, %arg1: i32) -> (i32, i32) {
    %c0_i32 = arith.constant 0 : i32
    %c0_i32_0 = arith.constant 0 : i32
    %c0_i32_1 = arith.constant 0 : i32
    return %c0_i32, %c0_i32_0 : i32, i32
  }
  func.func @transform_2(%arg0: i32, %arg1: i32) -> (i32, i32) {
    %c0_i32 = arith.constant 0 : i32
    %c0_i32_0 = arith.constant 0 : i32
    %c0_i32_1 = arith.constant 0 : i32
    return %c0_i32, %c0_i32_0 : i32, i32
  }
  func.func @transform_3(%arg0: i32, %arg1: i32) -> (i32, i32) {
    %c0_i32 = arith.constant 0 : i32
    %c0_i32_0 = arith.constant 0 : i32
    %c0_i32_1 = arith.constant 0 : i32
    return %c0_i32, %c0_i32_0 : i32, i32
  }
  func.func @transform_4(%arg0: i32, %arg1: i32) -> (i32, i32, i32) {
    %c1_i32 = arith.constant 1 : i32
    %0 = arith.muli %arg0, %c1_i32 : i32
    %1 = arith.addi %0, %arg1 : i32
    %c0_i32 = arith.constant 0 : i32
    %c0_i32_0 = arith.constant 0 : i32
    %c0_i32_1 = arith.constant 0 : i32
    return %1, %c0_i32, %c0_i32_0 : i32, i32, i32
  }
}

module attributes {stable_mosaic.version = 11 : i64} {
  func.func @kernel(%arg0: i32, %arg1: i32, %arg2: memref<1x128x64xf32, #tpu.memory_space<vmem>>, %arg3: memref<64x512xbf16, #tpu.memory_space<vmem>>, %arg4: memref<1x64xf32, #tpu.memory_space<vmem>>, %arg5: memref<1x64xf32, #tpu.memory_space<vmem>>, %arg6: memref<1x1x512xf32, #tpu.memory_space<vmem>>, %arg7: memref<1x128x512xf32, #tpu.memory_space<vmem>>, %arg8: memref<1x2x512xf32, #tpu.memory_space<vmem>>) attributes {dimension_semantics = [#tpu.dimension_semantics<parallel>, #tpu.dimension_semantics<parallel>], iteration_bounds = array<i64: 2, 1>, scalar_prefetch = 0 : i64, scratch_operands = 0 : i64, tpu.core_type = #tpu.core_type<tc>, window_params = [{transform_indices = @transform_0, window_bounds = array<i64: 1, 128, 64>}, {pipeline_mode = #tpu.pipeline_mode<synchronous>, transform_indices = @transform_1, window_bounds = array<i64: 64, 512>}, {pipeline_mode = #tpu.pipeline_mode<synchronous>, transform_indices = @transform_2, window_bounds = array<i64: 1, 64>}, {pipeline_mode = #tpu.pipeline_mode<synchronous>, transform_indices = @transform_3, window_bounds = array<i64: 1, 64>}, {transform_indices = @transform_4, window_bounds = array<i64: 1, 1, 512>}, {transform_indices = @transform_5, window_bounds = array<i64: 1, 128, 512>}, {transform_indices = @transform_6, window_bounds = array<i64: 1, 2, 512>}]} {
    %c0 = arith.constant 0 : index
    %c0_0 = arith.constant 0 : index
    %c0_1 = arith.constant 0 : index
    %0 = vector.load %arg2[%c0, %c0_0, %c0_1] : memref<1x128x64xf32, #tpu.memory_space<vmem>>, vector<1x128x64xf32>
    %1 = vector.shape_cast %0 : vector<1x128x64xf32> to vector<128x64xf32>
    %c0_2 = arith.constant 0 : index
    %c0_3 = arith.constant 0 : index
    %2 = vector.load %arg4[%c0_2, %c0_3] : memref<1x64xf32, #tpu.memory_space<vmem>>, vector<1x64xf32>
    %3 = vector.broadcast %2 : vector<1x64xf32> to vector<128x64xf32>
    %4 = arith.mulf %1, %3 : vector<128x64xf32>
    %c0_4 = arith.constant 0 : index
    %c0_5 = arith.constant 0 : index
    %5 = vector.load %arg5[%c0_4, %c0_5] : memref<1x64xf32, #tpu.memory_space<vmem>>, vector<1x64xf32>
    %6 = vector.broadcast %5 : vector<1x64xf32> to vector<128x64xf32>
    %7 = arith.addf %4, %6 : vector<128x64xf32>
    %cst = arith.constant 0.000000e+00 : f32
    %8 = vector.broadcast %cst : f32 to vector<128x64xf32>
    %9 = arith.maximumf %7, %8 : vector<128x64xf32>
    %10 = arith.truncf %9 : vector<128x64xf32> to vector<128x64xbf16>
    %c0_6 = arith.constant 0 : index
    %c0_7 = arith.constant 0 : index
    %11 = vector.load %arg3[%c0_6, %c0_7] : memref<64x512xbf16, #tpu.memory_space<vmem>>, vector<64x512xbf16>
    %cst_8 = arith.constant dense<0.000000e+00> : vector<128x512xf32>
    %12 = tpu.matmul %10, %11, %cst_8 {dimension_numbers = #tpu.dot_dimension_numbers<[1], [0], [0], [1], [0, 0, 1, 1], [], []>} : vector<128x64xbf16>, vector<64x512xbf16>, vector<128x512xf32> -> vector<128x512xf32>
    %c0_9 = arith.constant 0 : index
    %c0_10 = arith.constant 0 : index
    %c0_11 = arith.constant 0 : index
    %13 = vector.load %arg6[%c0_9, %c0_10, %c0_11] : memref<1x1x512xf32, #tpu.memory_space<vmem>>, vector<1x1x512xf32>
    %14 = vector.shape_cast %13 : vector<1x1x512xf32> to vector<1x512xf32>
    %15 = vector.broadcast %14 : vector<1x512xf32> to vector<128x512xf32>
    %16 = arith.addf %12, %15 : vector<128x512xf32>
    %c0_12 = arith.constant 0 : index
    %c0_13 = arith.constant 0 : index
    %c0_14 = arith.constant 0 : index
    %17 = vector.load %arg7[%c0_12, %c0_13, %c0_14] : memref<1x128x512xf32, #tpu.memory_space<vmem>>, vector<1x128x512xf32>
    %18 = vector.shape_cast %17 : vector<1x128x512xf32> to vector<128x512xf32>
    %19 = vector.shape_cast %16 : vector<128x512xf32> to vector<1x128x512xf32>
    tpu.vector_store %arg7[%c0_12, %c0_13, %c0_14], %19 {strides = array<i32>} : memref<1x128x512xf32, #tpu.memory_space<vmem>>, vector<1x128x512xf32>,
    %cst_15 = arith.constant dense<0.000000e+00> : vector<512xf32>
    %20 = vector.multi_reduction <add>, %16, %cst_15 [0] : vector<128x512xf32> to vector<512xf32>
    %21 = vector.shape_cast %20 : vector<512xf32> to vector<1x512xf32>
    %22 = arith.mulf %16, %16 : vector<128x512xf32>
    %cst_16 = arith.constant dense<0.000000e+00> : vector<512xf32>
    %23 = vector.multi_reduction <add>, %22, %cst_16 [0] : vector<128x512xf32> to vector<512xf32>
    %24 = vector.shape_cast %23 : vector<512xf32> to vector<1x512xf32>
    %25 = tpu.concatenate %21, %24 in 0 : vector<1x512xf32>, vector<1x512xf32> -> vector<2x512xf32>
    %c0_17 = arith.constant 0 : index
    %c0_18 = arith.constant 0 : index
    %c0_19 = arith.constant 0 : index
    %26 = vector.load %arg8[%c0_17, %c0_18, %c0_19] : memref<1x2x512xf32, #tpu.memory_space<vmem>>, vector<1x2x512xf32>
    %27 = vector.shape_cast %26 : vector<1x2x512xf32> to vector<2x512xf32>
    %28 = vector.shape_cast %25 : vector<2x512xf32> to vector<1x2x512xf32>
    tpu.vector_store %arg8[%c0_17, %c0_18, %c0_19], %28 {strides = array<i32>} : memref<1x2x512xf32, #tpu.memory_space<vmem>>, vector<1x2x512xf32>,
    return
  }
  func.func @transform_0(%arg0: i32, %arg1: i32) -> (i32, i32, i32) {
    %c0_i32 = arith.constant 0 : i32
    %c0_i32_0 = arith.constant 0 : i32
    return %arg0, %arg1, %c0_i32 : i32, i32, i32
  }
  func.func @transform_1(%arg0: i32, %arg1: i32) -> (i32, i32) {
    %c0_i32 = arith.constant 0 : i32
    %c0_i32_0 = arith.constant 0 : i32
    %c0_i32_1 = arith.constant 0 : i32
    return %c0_i32, %c0_i32_0 : i32, i32
  }
  func.func @transform_2(%arg0: i32, %arg1: i32) -> (i32, i32) {
    %c0_i32 = arith.constant 0 : i32
    %c0_i32_0 = arith.constant 0 : i32
    %c0_i32_1 = arith.constant 0 : i32
    return %c0_i32, %c0_i32_0 : i32, i32
  }
  func.func @transform_3(%arg0: i32, %arg1: i32) -> (i32, i32) {
    %c0_i32 = arith.constant 0 : i32
    %c0_i32_0 = arith.constant 0 : i32
    %c0_i32_1 = arith.constant 0 : i32
    return %c0_i32, %c0_i32_0 : i32, i32
  }
  func.func @transform_4(%arg0: i32, %arg1: i32) -> (i32, i32, i32) {
    %c0_i32 = arith.constant 0 : i32
    %c0_i32_0 = arith.constant 0 : i32
    %c0_i32_1 = arith.constant 0 : i32
    return %arg0, %c0_i32, %c0_i32_0 : i32, i32, i32
  }
  func.func @transform_5(%arg0: i32, %arg1: i32) -> (i32, i32, i32) {
    %c0_i32 = arith.constant 0 : i32
    %c0_i32_0 = arith.constant 0 : i32
    return %arg0, %arg1, %c0_i32 : i32, i32, i32
  }
  func.func @transform_6(%arg0: i32, %arg1: i32) -> (i32, i32, i32) {
    %c1_i32 = arith.constant 1 : i32
    %0 = arith.muli %arg0, %c1_i32 : i32
    %1 = arith.addi %0, %arg1 : i32
    %c0_i32 = arith.constant 0 : i32
    %c0_i32_0 = arith.constant 0 : i32
    %c0_i32_1 = arith.constant 0 : i32
    return %1, %c0_i32, %c0_i32_0 : i32, i32, i32
  }
}

module attributes {stable_mosaic.version = 11 : i64} {
  func.func @kernel(%arg0: i32, %arg1: i32, %arg2: memref<1x128x512xf32, #tpu.memory_space<vmem>>, %arg3: memref<512x256xbf16, #tpu.memory_space<vmem>>, %arg4: memref<1x512xf32, #tpu.memory_space<vmem>>, %arg5: memref<1x512xf32, #tpu.memory_space<vmem>>, %arg6: memref<1x128x256xf32, #tpu.memory_space<vmem>>, %arg7: memref<1x2x256xf32, #tpu.memory_space<vmem>>) attributes {dimension_semantics = [#tpu.dimension_semantics<parallel>, #tpu.dimension_semantics<parallel>], iteration_bounds = array<i64: 2, 1>, scalar_prefetch = 0 : i64, scratch_operands = 0 : i64, tpu.core_type = #tpu.core_type<tc>, window_params = [{transform_indices = @transform_0, window_bounds = array<i64: 1, 128, 512>}, {pipeline_mode = #tpu.pipeline_mode<synchronous>, transform_indices = @transform_1, window_bounds = array<i64: 512, 256>}, {pipeline_mode = #tpu.pipeline_mode<synchronous>, transform_indices = @transform_2, window_bounds = array<i64: 1, 512>}, {pipeline_mode = #tpu.pipeline_mode<synchronous>, transform_indices = @transform_3, window_bounds = array<i64: 1, 512>}, {transform_indices = @transform_4, window_bounds = array<i64: 1, 128, 256>}, {transform_indices = @transform_5, window_bounds = array<i64: 1, 2, 256>}]} {
    %c0 = arith.constant 0 : index
    %c0_0 = arith.constant 0 : index
    %c0_1 = arith.constant 0 : index
    %0 = vector.load %arg2[%c0, %c0_0, %c0_1] : memref<1x128x512xf32, #tpu.memory_space<vmem>>, vector<1x128x512xf32>
    %1 = vector.shape_cast %0 : vector<1x128x512xf32> to vector<128x512xf32>
    %c0_2 = arith.constant 0 : index
    %c0_3 = arith.constant 0 : index
    %2 = vector.load %arg4[%c0_2, %c0_3] : memref<1x512xf32, #tpu.memory_space<vmem>>, vector<1x512xf32>
    %3 = vector.broadcast %2 : vector<1x512xf32> to vector<128x512xf32>
    %4 = arith.mulf %1, %3 : vector<128x512xf32>
    %c0_4 = arith.constant 0 : index
    %c0_5 = arith.constant 0 : index
    %5 = vector.load %arg5[%c0_4, %c0_5] : memref<1x512xf32, #tpu.memory_space<vmem>>, vector<1x512xf32>
    %6 = vector.broadcast %5 : vector<1x512xf32> to vector<128x512xf32>
    %7 = arith.addf %4, %6 : vector<128x512xf32>
    %cst = arith.constant 0.000000e+00 : f32
    %8 = vector.broadcast %cst : f32 to vector<128x512xf32>
    %9 = arith.maximumf %7, %8 : vector<128x512xf32>
    %10 = arith.truncf %9 : vector<128x512xf32> to vector<128x512xbf16>
    %c0_6 = arith.constant 0 : index
    %c0_7 = arith.constant 0 : index
    %11 = vector.load %arg3[%c0_6, %c0_7] : memref<512x256xbf16, #tpu.memory_space<vmem>>, vector<512x256xbf16>
    %cst_8 = arith.constant dense<0.000000e+00> : vector<128x256xf32>
    %12 = tpu.matmul %10, %11, %cst_8 {dimension_numbers = #tpu.dot_dimension_numbers<[1], [0], [0], [1], [0, 0, 1, 1], [], []>} : vector<128x512xbf16>, vector<512x256xbf16>, vector<128x256xf32> -> vector<128x256xf32>
    %c0_9 = arith.constant 0 : index
    %c0_10 = arith.constant 0 : index
    %c0_11 = arith.constant 0 : index
    %13 = vector.load %arg6[%c0_9, %c0_10, %c0_11] : memref<1x128x256xf32, #tpu.memory_space<vmem>>, vector<1x128x256xf32>
    %14 = vector.shape_cast %13 : vector<1x128x256xf32> to vector<128x256xf32>
    %15 = vector.shape_cast %12 : vector<128x256xf32> to vector<1x128x256xf32>
    tpu.vector_store %arg6[%c0_9, %c0_10, %c0_11], %15 {strides = array<i32>} : memref<1x128x256xf32, #tpu.memory_space<vmem>>, vector<1x128x256xf32>,
    %cst_12 = arith.constant dense<0.000000e+00> : vector<256xf32>
    %16 = vector.multi_reduction <add>, %12, %cst_12 [0] : vector<128x256xf32> to vector<256xf32>
    %17 = vector.shape_cast %16 : vector<256xf32> to vector<1x256xf32>
    %18 = arith.mulf %12, %12 : vector<128x256xf32>
    %cst_13 = arith.constant dense<0.000000e+00> : vector<256xf32>
    %19 = vector.multi_reduction <add>, %18, %cst_13 [0] : vector<128x256xf32> to vector<256xf32>
    %20 = vector.shape_cast %19 : vector<256xf32> to vector<1x256xf32>
    %21 = tpu.concatenate %17, %20 in 0 : vector<1x256xf32>, vector<1x256xf32> -> vector<2x256xf32>
    %c0_14 = arith.constant 0 : index
    %c0_15 = arith.constant 0 : index
    %c0_16 = arith.constant 0 : index
    %22 = vector.load %arg7[%c0_14, %c0_15, %c0_16] : memref<1x2x256xf32, #tpu.memory_space<vmem>>, vector<1x2x256xf32>
    %23 = vector.shape_cast %22 : vector<1x2x256xf32> to vector<2x256xf32>
    %24 = vector.shape_cast %21 : vector<2x256xf32> to vector<1x2x256xf32>
    tpu.vector_store %arg7[%c0_14, %c0_15, %c0_16], %24 {strides = array<i32>} : memref<1x2x256xf32, #tpu.memory_space<vmem>>, vector<1x2x256xf32>,
    return
  }
  func.func @transform_0(%arg0: i32, %arg1: i32) -> (i32, i32, i32) {
    %c0_i32 = arith.constant 0 : i32
    %c0_i32_0 = arith.constant 0 : i32
    return %arg0, %arg1, %c0_i32 : i32, i32, i32
  }
  func.func @transform_1(%arg0: i32, %arg1: i32) -> (i32, i32) {
    %c0_i32 = arith.constant 0 : i32
    %c0_i32_0 = arith.constant 0 : i32
    %c0_i32_1 = arith.constant 0 : i32
    return %c0_i32, %c0_i32_0 : i32, i32
  }
  func.func @transform_2(%arg0: i32, %arg1: i32) -> (i32, i32) {
    %c0_i32 = arith.constant 0 : i32
    %c0_i32_0 = arith.constant 0 : i32
    %c0_i32_1 = arith.constant 0 : i32
    return %c0_i32, %c0_i32_0 : i32, i32
  }
  func.func @transform_3(%arg0: i32, %arg1: i32) -> (i32, i32) {
    %c0_i32 = arith.constant 0 : i32
    %c0_i32_0 = arith.constant 0 : i32
    %c0_i32_1 = arith.constant 0 : i32
    return %c0_i32, %c0_i32_0 : i32, i32
  }
  func.func @transform_4(%arg0: i32, %arg1: i32) -> (i32, i32, i32) {
    %c0_i32 = arith.constant 0 : i32
    %c0_i32_0 = arith.constant 0 : i32
    return %arg0, %arg1, %c0_i32 : i32, i32, i32
  }
  func.func @transform_5(%arg0: i32, %arg1: i32) -> (i32, i32, i32) {
    %c1_i32 = arith.constant 1 : i32
    %0 = arith.muli %arg0, %c1_i32 : i32
    %1 = arith.addi %0, %arg1 : i32
    %c0_i32 = arith.constant 0 : i32
    %c0_i32_0 = arith.constant 0 : i32
    %c0_i32_1 = arith.constant 0 : i32
    return %1, %c0_i32, %c0_i32_0 : i32, i32, i32
  }
}

module attributes {stable_mosaic.version = 11 : i64} {
  func.func @kernel(%arg0: i32, %arg1: i32, %arg2: memref<1x128x256xf32, #tpu.memory_space<vmem>>, %arg3: memref<256x128xbf16, #tpu.memory_space<vmem>>, %arg4: memref<1x256xf32, #tpu.memory_space<vmem>>, %arg5: memref<1x256xf32, #tpu.memory_space<vmem>>, %arg6: memref<1x128x128xf32, #tpu.memory_space<vmem>>, %arg7: memref<1x2x128xf32, #tpu.memory_space<vmem>>) attributes {dimension_semantics = [#tpu.dimension_semantics<parallel>, #tpu.dimension_semantics<parallel>], iteration_bounds = array<i64: 2, 1>, scalar_prefetch = 0 : i64, scratch_operands = 0 : i64, tpu.core_type = #tpu.core_type<tc>, window_params = [{transform_indices = @transform_0, window_bounds = array<i64: 1, 128, 256>}, {pipeline_mode = #tpu.pipeline_mode<synchronous>, transform_indices = @transform_1, window_bounds = array<i64: 256, 128>}, {pipeline_mode = #tpu.pipeline_mode<synchronous>, transform_indices = @transform_2, window_bounds = array<i64: 1, 256>}, {pipeline_mode = #tpu.pipeline_mode<synchronous>, transform_indices = @transform_3, window_bounds = array<i64: 1, 256>}, {transform_indices = @transform_4, window_bounds = array<i64: 1, 128, 128>}, {transform_indices = @transform_5, window_bounds = array<i64: 1, 2, 128>}]} {
    %c0 = arith.constant 0 : index
    %c0_0 = arith.constant 0 : index
    %c0_1 = arith.constant 0 : index
    %0 = vector.load %arg2[%c0, %c0_0, %c0_1] : memref<1x128x256xf32, #tpu.memory_space<vmem>>, vector<1x128x256xf32>
    %1 = vector.shape_cast %0 : vector<1x128x256xf32> to vector<128x256xf32>
    %c0_2 = arith.constant 0 : index
    %c0_3 = arith.constant 0 : index
    %2 = vector.load %arg4[%c0_2, %c0_3] : memref<1x256xf32, #tpu.memory_space<vmem>>, vector<1x256xf32>
    %3 = vector.broadcast %2 : vector<1x256xf32> to vector<128x256xf32>
    %4 = arith.mulf %1, %3 : vector<128x256xf32>
    %c0_4 = arith.constant 0 : index
    %c0_5 = arith.constant 0 : index
    %5 = vector.load %arg5[%c0_4, %c0_5] : memref<1x256xf32, #tpu.memory_space<vmem>>, vector<1x256xf32>
    %6 = vector.broadcast %5 : vector<1x256xf32> to vector<128x256xf32>
    %7 = arith.addf %4, %6 : vector<128x256xf32>
    %cst = arith.constant 0.000000e+00 : f32
    %8 = vector.broadcast %cst : f32 to vector<128x256xf32>
    %9 = arith.maximumf %7, %8 : vector<128x256xf32>
    %10 = arith.truncf %9 : vector<128x256xf32> to vector<128x256xbf16>
    %c0_6 = arith.constant 0 : index
    %c0_7 = arith.constant 0 : index
    %11 = vector.load %arg3[%c0_6, %c0_7] : memref<256x128xbf16, #tpu.memory_space<vmem>>, vector<256x128xbf16>
    %cst_8 = arith.constant dense<0.000000e+00> : vector<128x128xf32>
    %12 = tpu.matmul %10, %11, %cst_8 {dimension_numbers = #tpu.dot_dimension_numbers<[1], [0], [0], [1], [0, 0, 1, 1], [], []>} : vector<128x256xbf16>, vector<256x128xbf16>, vector<128x128xf32> -> vector<128x128xf32>
    %c0_9 = arith.constant 0 : index
    %c0_10 = arith.constant 0 : index
    %c0_11 = arith.constant 0 : index
    %13 = vector.load %arg6[%c0_9, %c0_10, %c0_11] : memref<1x128x128xf32, #tpu.memory_space<vmem>>, vector<1x128x128xf32>
    %14 = vector.shape_cast %13 : vector<1x128x128xf32> to vector<128x128xf32>
    %15 = vector.shape_cast %12 : vector<128x128xf32> to vector<1x128x128xf32>
    tpu.vector_store %arg6[%c0_9, %c0_10, %c0_11], %15 {strides = array<i32>} : memref<1x128x128xf32, #tpu.memory_space<vmem>>, vector<1x128x128xf32>,
    %cst_12 = arith.constant dense<0.000000e+00> : vector<128xf32>
    %16 = vector.multi_reduction <add>, %12, %cst_12 [0] : vector<128x128xf32> to vector<128xf32>
    %17 = vector.shape_cast %16 : vector<128xf32> to vector<1x128xf32>
    %18 = arith.mulf %12, %12 : vector<128x128xf32>
    %cst_13 = arith.constant dense<0.000000e+00> : vector<128xf32>
    %19 = vector.multi_reduction <add>, %18, %cst_13 [0] : vector<128x128xf32> to vector<128xf32>
    %20 = vector.shape_cast %19 : vector<128xf32> to vector<1x128xf32>
    %21 = tpu.concatenate %17, %20 in 0 : vector<1x128xf32>, vector<1x128xf32> -> vector<2x128xf32>
    %c0_14 = arith.constant 0 : index
    %c0_15 = arith.constant 0 : index
    %c0_16 = arith.constant 0 : index
    %22 = vector.load %arg7[%c0_14, %c0_15, %c0_16] : memref<1x2x128xf32, #tpu.memory_space<vmem>>, vector<1x2x128xf32>
    %23 = vector.shape_cast %22 : vector<1x2x128xf32> to vector<2x128xf32>
    %24 = vector.shape_cast %21 : vector<2x128xf32> to vector<1x2x128xf32>
    tpu.vector_store %arg7[%c0_14, %c0_15, %c0_16], %24 {strides = array<i32>} : memref<1x2x128xf32, #tpu.memory_space<vmem>>, vector<1x2x128xf32>,
    return
  }
  func.func @transform_0(%arg0: i32, %arg1: i32) -> (i32, i32, i32) {
    %c0_i32 = arith.constant 0 : i32
    %c0_i32_0 = arith.constant 0 : i32
    return %arg0, %arg1, %c0_i32 : i32, i32, i32
  }
  func.func @transform_1(%arg0: i32, %arg1: i32) -> (i32, i32) {
    %c0_i32 = arith.constant 0 : i32
    %c0_i32_0 = arith.constant 0 : i32
    %c0_i32_1 = arith.constant 0 : i32
    return %c0_i32, %c0_i32_0 : i32, i32
  }
  func.func @transform_2(%arg0: i32, %arg1: i32) -> (i32, i32) {
    %c0_i32 = arith.constant 0 : i32
    %c0_i32_0 = arith.constant 0 : i32
    %c0_i32_1 = arith.constant 0 : i32
    return %c0_i32, %c0_i32_0 : i32, i32
  }
  func.func @transform_3(%arg0: i32, %arg1: i32) -> (i32, i32) {
    %c0_i32 = arith.constant 0 : i32
    %c0_i32_0 = arith.constant 0 : i32
    %c0_i32_1 = arith.constant 0 : i32
    return %c0_i32, %c0_i32_0 : i32, i32
  }
  func.func @transform_4(%arg0: i32, %arg1: i32) -> (i32, i32, i32) {
    %c0_i32 = arith.constant 0 : i32
    %c0_i32_0 = arith.constant 0 : i32
    return %arg0, %arg1, %c0_i32 : i32, i32, i32
  }
  func.func @transform_5(%arg0: i32, %arg1: i32) -> (i32, i32, i32) {
    %c1_i32 = arith.constant 1 : i32
    %0 = arith.muli %arg0, %c1_i32 : i32
    %1 = arith.addi %0, %arg1 : i32
    %c0_i32 = arith.constant 0 : i32
    %c0_i32_0 = arith.constant 0 : i32
    %c0_i32_1 = arith.constant 0 : i32
    return %1, %c0_i32, %c0_i32_0 : i32, i32, i32
  }
}

module attributes {stable_mosaic.version = 11 : i64} {
  func.func @kernel(%arg0: i32, %arg1: i32, %arg2: memref<1x128x128xf32, #tpu.memory_space<vmem>>, %arg3: memref<128x3xbf16, #tpu.memory_space<vmem>>, %arg4: memref<1x128xf32, #tpu.memory_space<vmem>>, %arg5: memref<1x128xf32, #tpu.memory_space<vmem>>, %arg6: memref<1x3xf32, #tpu.memory_space<vmem>>, %arg7: memref<1x128x3xf32, #tpu.memory_space<vmem>>) attributes {dimension_semantics = [#tpu.dimension_semantics<parallel>, #tpu.dimension_semantics<parallel>], iteration_bounds = array<i64: 2, 1>, scalar_prefetch = 0 : i64, scratch_operands = 0 : i64, tpu.core_type = #tpu.core_type<tc>, window_params = [{transform_indices = @transform_0, window_bounds = array<i64: 1, 128, 128>}, {pipeline_mode = #tpu.pipeline_mode<synchronous>, transform_indices = @transform_1, window_bounds = array<i64: 128, 3>}, {pipeline_mode = #tpu.pipeline_mode<synchronous>, transform_indices = @transform_2, window_bounds = array<i64: 1, 128>}, {pipeline_mode = #tpu.pipeline_mode<synchronous>, transform_indices = @transform_3, window_bounds = array<i64: 1, 128>}, {pipeline_mode = #tpu.pipeline_mode<synchronous>, transform_indices = @transform_4, window_bounds = array<i64: 1, 3>}, {transform_indices = @transform_5, window_bounds = array<i64: 1, 128, 3>}]} {
    %c0 = arith.constant 0 : index
    %c0_0 = arith.constant 0 : index
    %c0_1 = arith.constant 0 : index
    %0 = vector.load %arg2[%c0, %c0_0, %c0_1] : memref<1x128x128xf32, #tpu.memory_space<vmem>>, vector<1x128x128xf32>
    %1 = vector.shape_cast %0 : vector<1x128x128xf32> to vector<128x128xf32>
    %c0_2 = arith.constant 0 : index
    %c0_3 = arith.constant 0 : index
    %2 = vector.load %arg4[%c0_2, %c0_3] : memref<1x128xf32, #tpu.memory_space<vmem>>, vector<1x128xf32>
    %3 = vector.broadcast %2 : vector<1x128xf32> to vector<128x128xf32>
    %4 = arith.mulf %1, %3 : vector<128x128xf32>
    %c0_4 = arith.constant 0 : index
    %c0_5 = arith.constant 0 : index
    %5 = vector.load %arg5[%c0_4, %c0_5] : memref<1x128xf32, #tpu.memory_space<vmem>>, vector<1x128xf32>
    %6 = vector.broadcast %5 : vector<1x128xf32> to vector<128x128xf32>
    %7 = arith.addf %4, %6 : vector<128x128xf32>
    %cst = arith.constant 0.000000e+00 : f32
    %8 = vector.broadcast %cst : f32 to vector<128x128xf32>
    %9 = arith.maximumf %7, %8 : vector<128x128xf32>
    %10 = arith.truncf %9 : vector<128x128xf32> to vector<128x128xbf16>
    %c0_6 = arith.constant 0 : index
    %c0_7 = arith.constant 0 : index
    %11 = vector.load %arg3[%c0_6, %c0_7] : memref<128x3xbf16, #tpu.memory_space<vmem>>, vector<128x3xbf16>
    %cst_8 = arith.constant dense<0.000000e+00> : vector<128x3xf32>
    %12 = tpu.matmul %10, %11, %cst_8 {dimension_numbers = #tpu.dot_dimension_numbers<[1], [0], [0], [1], [0, 0, 1, 1], [], []>} : vector<128x128xbf16>, vector<128x3xbf16>, vector<128x3xf32> -> vector<128x3xf32>
    %c0_9 = arith.constant 0 : index
    %c0_10 = arith.constant 0 : index
    %13 = vector.load %arg6[%c0_9, %c0_10] : memref<1x3xf32, #tpu.memory_space<vmem>>, vector<1x3xf32>
    %14 = vector.broadcast %13 : vector<1x3xf32> to vector<128x3xf32>
    %15 = arith.addf %12, %14 : vector<128x3xf32>
    %c0_11 = arith.constant 0 : index
    %c0_12 = arith.constant 0 : index
    %c0_13 = arith.constant 0 : index
    %16 = vector.load %arg7[%c0_11, %c0_12, %c0_13] : memref<1x128x3xf32, #tpu.memory_space<vmem>>, vector<1x128x3xf32>
    %17 = vector.shape_cast %16 : vector<1x128x3xf32> to vector<128x3xf32>
    %18 = vector.shape_cast %15 : vector<128x3xf32> to vector<1x128x3xf32>
    tpu.vector_store %arg7[%c0_11, %c0_12, %c0_13], %18 {strides = array<i32>} : memref<1x128x3xf32, #tpu.memory_space<vmem>>, vector<1x128x3xf32>,
    return
  }
  func.func @transform_0(%arg0: i32, %arg1: i32) -> (i32, i32, i32) {
    %c0_i32 = arith.constant 0 : i32
    %c0_i32_0 = arith.constant 0 : i32
    return %arg0, %arg1, %c0_i32 : i32, i32, i32
  }
  func.func @transform_1(%arg0: i32, %arg1: i32) -> (i32, i32) {
    %c0_i32 = arith.constant 0 : i32
    %c0_i32_0 = arith.constant 0 : i32
    %c0_i32_1 = arith.constant 0 : i32
    return %c0_i32, %c0_i32_0 : i32, i32
  }
  func.func @transform_2(%arg0: i32, %arg1: i32) -> (i32, i32) {
    %c0_i32 = arith.constant 0 : i32
    %c0_i32_0 = arith.constant 0 : i32
    %c0_i32_1 = arith.constant 0 : i32
    return %c0_i32, %c0_i32_0 : i32, i32
  }
  func.func @transform_3(%arg0: i32, %arg1: i32) -> (i32, i32) {
    %c0_i32 = arith.constant 0 : i32
    %c0_i32_0 = arith.constant 0 : i32
    %c0_i32_1 = arith.constant 0 : i32
    return %c0_i32, %c0_i32_0 : i32, i32
  }
  func.func @transform_4(%arg0: i32, %arg1: i32) -> (i32, i32) {
    %c0_i32 = arith.constant 0 : i32
    %c0_i32_0 = arith.constant 0 : i32
    %c0_i32_1 = arith.constant 0 : i32
    return %c0_i32, %c0_i32_0 : i32, i32
  }
  func.func @transform_5(%arg0: i32, %arg1: i32) -> (i32, i32, i32) {
    %c0_i32 = arith.constant 0 : i32
    %c0_i32_0 = arith.constant 0 : i32
    return %arg0, %arg1, %c0_i32 : i32, i32, i32
  }
}

module attributes {stable_mosaic.version = 11 : i64} {
  func.func @_dist_kernel(%arg0: i32, %arg1: i32, %arg2: memref<1x128x3xf32, #tpu.memory_space<vmem>>, %arg3: memref<1x128x3xf32, #tpu.memory_space<vmem>>, %arg4: memref<1x3x128xf32, #tpu.memory_space<vmem>>, %arg5: memref<1x128x1xf32, #tpu.memory_space<vmem>>, %arg6: memref<1x1x128xf32, #tpu.memory_space<vmem>>, %arg7: memref<1x128x1xf32, #tpu.memory_space<vmem>>, %arg8: memref<1x128x1xf32, #tpu.memory_space<vmem>>) attributes {dimension_semantics = [#tpu.dimension_semantics<parallel>, #tpu.dimension_semantics<arbitrary>], iteration_bounds = array<i64: 2, 1>, scalar_prefetch = 0 : i64, scratch_operands = 0 : i64, tpu.core_type = #tpu.core_type<tc>, window_params = [{transform_indices = @transform_0, window_bounds = array<i64: 1, 128, 3>}, {transform_indices = @transform_1, window_bounds = array<i64: 1, 128, 3>}, {transform_indices = @transform_2, window_bounds = array<i64: 1, 3, 128>}, {transform_indices = @transform_3, window_bounds = array<i64: 1, 128, 1>}, {transform_indices = @transform_4, window_bounds = array<i64: 1, 1, 128>}, {transform_indices = @transform_5, window_bounds = array<i64: 1, 128, 1>}, {transform_indices = @transform_6, window_bounds = array<i64: 1, 128, 1>}]} {
    %c0 = arith.constant 0 : index
    %c0_0 = arith.constant 0 : index
    %c0_1 = arith.constant 0 : index
    %0 = vector.load %arg2[%c0, %c0_0, %c0_1] : memref<1x128x3xf32, #tpu.memory_space<vmem>>, vector<1x128x3xf32>
    %1 = vector.shape_cast %0 : vector<1x128x3xf32> to vector<128x3xf32>
    %c0_2 = arith.constant 0 : index
    %c0_3 = arith.constant 0 : index
    %c0_4 = arith.constant 0 : index
    %2 = vector.load %arg3[%c0_2, %c0_3, %c0_4] : memref<1x128x3xf32, #tpu.memory_space<vmem>>, vector<1x128x3xf32>
    %3 = vector.shape_cast %2 : vector<1x128x3xf32> to vector<128x3xf32>
    %c0_5 = arith.constant 0 : index
    %c0_6 = arith.constant 0 : index
    %c0_7 = arith.constant 0 : index
    %4 = vector.load %arg4[%c0_5, %c0_6, %c0_7] : memref<1x3x128xf32, #tpu.memory_space<vmem>>, vector<1x3x128xf32>
    %5 = vector.shape_cast %4 : vector<1x3x128xf32> to vector<3x128xf32>
    %6 = arith.mulf %1, %1 : vector<128x3xf32>
    %cst = arith.constant dense<0.000000e+00> : vector<128xf32>
    %7 = vector.multi_reduction <add>, %6, %cst [1] : vector<128x3xf32> to vector<128xf32>
    %8 = vector.shape_cast %7 : vector<128xf32> to vector<128x1xf32>
    %9 = arith.mulf %5, %5 : vector<3x128xf32>
    %cst_8 = arith.constant dense<0.000000e+00> : vector<128xf32>
    %10 = vector.multi_reduction <add>, %9, %cst_8 [0] : vector<3x128xf32> to vector<128xf32>
    %11 = vector.shape_cast %10 : vector<128xf32> to vector<1x128xf32>
    %cst_9 = arith.constant dense<0.000000e+00> : vector<128x128xf32>
    %12 = tpu.matmul %1, %5, %cst_9 {dimension_numbers = #tpu.dot_dimension_numbers<[1], [0], [0], [1], [0, 0, 1, 1], [], []>} : vector<128x3xf32>, vector<3x128xf32>, vector<128x128xf32> -> vector<128x128xf32>
    %13 = vector.broadcast %8 : vector<128x1xf32> to vector<128x128xf32>
    %14 = vector.broadcast %11 : vector<1x128xf32> to vector<128x128xf32>
    %15 = arith.addf %13, %14 : vector<128x128xf32>
    %cst_10 = arith.constant 2.000000e+00 : f32
    %16 = vector.broadcast %cst_10 : f32 to vector<128x128xf32>
    %17 = arith.mulf %16, %12 : vector<128x128xf32>
    %18 = arith.subf %15, %17 : vector<128x128xf32>
    %cst_11 = arith.constant 0.000000e+00 : f32
    %19 = vector.broadcast %cst_11 : f32 to vector<128x128xf32>
    %20 = arith.maximumf %18, %19 : vector<128x128xf32>
    %21 = math.sqrt %20 : vector<128x128xf32>
    %cst_12 = arith.constant dense<0x7F800000> : vector<128xf32>
    %22 = vector.multi_reduction <minimumf>, %21, %cst_12 [1] : vector<128x128xf32> to vector<128xf32>
    %23 = vector.shape_cast %22 : vector<128xf32> to vector<128x1xf32>
    %c0_13 = arith.constant 0 : index
    %c0_14 = arith.constant 0 : index
    %c0_15 = arith.constant 0 : index
    %24 = vector.load %arg5[%c0_13, %c0_14, %c0_15] : memref<1x128x1xf32, #tpu.memory_space<vmem>>, vector<1x128x1xf32>
    %25 = vector.shape_cast %24 : vector<1x128x1xf32> to vector<128x1xf32>
    %26 = vector.shape_cast %23 : vector<128x1xf32> to vector<1x128x1xf32>
    tpu.vector_store %arg5[%c0_13, %c0_14, %c0_15], %26 {strides = array<i32>} : memref<1x128x1xf32, #tpu.memory_space<vmem>>, vector<1x128x1xf32>,
    %cst_16 = arith.constant dense<0x7F800000> : vector<128xf32>
    %27 = vector.multi_reduction <minimumf>, %21, %cst_16 [0] : vector<128x128xf32> to vector<128xf32>
    %28 = vector.shape_cast %27 : vector<128xf32> to vector<1x128xf32>
    %c0_i32 = arith.constant 0 : i32
    %29 = arith.cmpi eq, %arg1, %c0_i32 : i32
    %30 = arith.extui %29 : i1 to i32
    %c0_i32_17 = arith.constant 0 : i32
    %31 = arith.cmpi ne, %30, %c0_i32_17 : i32
    scf.if %31 {
      %c0_31 = arith.constant 0 : index
      %c0_32 = arith.constant 0 : index
      %c0_33 = arith.constant 0 : index
      %56 = vector.load %arg6[%c0_31, %c0_32, %c0_33] : memref<1x1x128xf32, #tpu.memory_space<vmem>>, vector<1x1x128xf32>
      %57 = vector.shape_cast %56 : vector<1x1x128xf32> to vector<1x128xf32>
      %58 = vector.shape_cast %28 : vector<1x128xf32> to vector<1x1x128xf32>
      tpu.vector_store %arg6[%c0_31, %c0_32, %c0_33], %58 {strides = array<i32>} : memref<1x1x128xf32, #tpu.memory_space<vmem>>, vector<1x1x128xf32>,
    } else {
    }
    %c0_i32_18 = arith.constant 0 : i32
    %32 = arith.cmpi sgt, %arg1, %c0_i32_18 : i32
    %33 = arith.extui %32 : i1 to i32
    %c0_i32_19 = arith.constant 0 : i32
    %34 = arith.cmpi ne, %33, %c0_i32_19 : i32
    scf.if %34 {
      %c0_31 = arith.constant 0 : index
      %c0_32 = arith.constant 0 : index
      %c0_33 = arith.constant 0 : index
      %56 = vector.load %arg6[%c0_31, %c0_32, %c0_33] : memref<1x1x128xf32, #tpu.memory_space<vmem>>, vector<1x1x128xf32>
      %57 = vector.shape_cast %56 : vector<1x1x128xf32> to vector<1x128xf32>
      %58 = arith.minimumf %57, %28 : vector<1x128xf32>
      %c0_34 = arith.constant 0 : index
      %c0_35 = arith.constant 0 : index
      %c0_36 = arith.constant 0 : index
      %59 = vector.load %arg6[%c0_34, %c0_35, %c0_36] : memref<1x1x128xf32, #tpu.memory_space<vmem>>, vector<1x1x128xf32>
      %60 = vector.shape_cast %59 : vector<1x1x128xf32> to vector<1x128xf32>
      %61 = vector.shape_cast %58 : vector<1x128xf32> to vector<1x1x128xf32>
      tpu.vector_store %arg6[%c0_34, %c0_35, %c0_36], %61 {strides = array<i32>} : memref<1x1x128xf32, #tpu.memory_space<vmem>>, vector<1x1x128xf32>,
    } else {
    }
    %35 = arith.subf %1, %3 : vector<128x3xf32>
    %36 = arith.mulf %35, %35 : vector<128x3xf32>
    %cst_20 = arith.constant dense<0.000000e+00> : vector<128xf32>
    %37 = vector.multi_reduction <add>, %36, %cst_20 [1] : vector<128x3xf32> to vector<128xf32>
    %38 = vector.shape_cast %37 : vector<128xf32> to vector<128x1xf32>
    %c0_21 = arith.constant 0 : index
    %c0_22 = arith.constant 0 : index
    %c0_23 = arith.constant 0 : index
    %39 = vector.load %arg7[%c0_21, %c0_22, %c0_23] : memref<1x128x1xf32, #tpu.memory_space<vmem>>, vector<1x128x1xf32>
    %40 = vector.shape_cast %39 : vector<1x128x1xf32> to vector<128x1xf32>
    %41 = vector.shape_cast %38 : vector<128x1xf32> to vector<1x128x1xf32>
    tpu.vector_store %arg7[%c0_21, %c0_22, %c0_23], %41 {strides = array<i32>} : memref<1x128x1xf32, #tpu.memory_space<vmem>>, vector<1x128x1xf32>,
    %42 = math.absf %35 : vector<128x3xf32>
    %cst_24 = arith.constant 1.000000e+00 : f32
    %43 = vector.broadcast %cst_24 : f32 to vector<128x3xf32>
    %44 = arith.cmpf olt, %42, %43 : vector<128x3xf32>
    %cst_25 = arith.constant 5.000000e-01 : f32
    %45 = vector.broadcast %cst_25 : f32 to vector<128x3xf32>
    %46 = arith.mulf %45, %42 : vector<128x3xf32>
    %47 = arith.mulf %46, %42 : vector<128x3xf32>
    %cst_26 = arith.constant 5.000000e-01 : f32
    %48 = vector.broadcast %cst_26 : f32 to vector<128x3xf32>
    %49 = arith.subf %42, %48 : vector<128x3xf32>
    %50 = arith.select %44, %47, %49 : vector<128x3xi1>, vector<128x3xf32>
    %cst_27 = arith.constant dense<0.000000e+00> : vector<128xf32>
    %51 = vector.multi_reduction <add>, %50, %cst_27 [1] : vector<128x3xf32> to vector<128xf32>
    %52 = vector.shape_cast %51 : vector<128xf32> to vector<128x1xf32>
    %c0_28 = arith.constant 0 : index
    %c0_29 = arith.constant 0 : index
    %c0_30 = arith.constant 0 : index
    %53 = vector.load %arg8[%c0_28, %c0_29, %c0_30] : memref<1x128x1xf32, #tpu.memory_space<vmem>>, vector<1x128x1xf32>
    %54 = vector.shape_cast %53 : vector<1x128x1xf32> to vector<128x1xf32>
    %55 = vector.shape_cast %52 : vector<128x1xf32> to vector<1x128x1xf32>
    tpu.vector_store %arg8[%c0_28, %c0_29, %c0_30], %55 {strides = array<i32>} : memref<1x128x1xf32, #tpu.memory_space<vmem>>, vector<1x128x1xf32>,
    return
  }
  func.func @transform_0(%arg0: i32, %arg1: i32) -> (i32, i32, i32) {
    %c0_i32 = arith.constant 0 : i32
    %c0_i32_0 = arith.constant 0 : i32
    return %arg0, %arg1, %c0_i32 : i32, i32, i32
  }
  func.func @transform_1(%arg0: i32, %arg1: i32) -> (i32, i32, i32) {
    %c0_i32 = arith.constant 0 : i32
    %c0_i32_0 = arith.constant 0 : i32
    return %arg0, %arg1, %c0_i32 : i32, i32, i32
  }
  func.func @transform_2(%arg0: i32, %arg1: i32) -> (i32, i32, i32) {
    %c0_i32 = arith.constant 0 : i32
    %c0_i32_0 = arith.constant 0 : i32
    %c0_i32_1 = arith.constant 0 : i32
    return %arg0, %c0_i32, %c0_i32_0 : i32, i32, i32
  }
  func.func @transform_3(%arg0: i32, %arg1: i32) -> (i32, i32, i32) {
    %c0_i32 = arith.constant 0 : i32
    %c0_i32_0 = arith.constant 0 : i32
    return %arg0, %arg1, %c0_i32 : i32, i32, i32
  }
  func.func @transform_4(%arg0: i32, %arg1: i32) -> (i32, i32, i32) {
    %c0_i32 = arith.constant 0 : i32
    %c0_i32_0 = arith.constant 0 : i32
    %c0_i32_1 = arith.constant 0 : i32
    return %arg0, %c0_i32, %c0_i32_0 : i32, i32, i32
  }
  func.func @transform_5(%arg0: i32, %arg1: i32) -> (i32, i32, i32) {
    %c0_i32 = arith.constant 0 : i32
    %c0_i32_0 = arith.constant 0 : i32
    return %arg0, %arg1, %c0_i32 : i32, i32, i32
  }
  func.func @transform_6(%arg0: i32, %arg1: i32) -> (i32, i32, i32) {
    %c0_i32 = arith.constant 0 : i32
    %c0_i32_0 = arith.constant 0 : i32
    return %arg0, %arg1, %c0_i32 : i32, i32, i32
  }
}

</mosaic_0001>

<bundles_post_ra>
// kernel: est_coord_forward.8
= control target key start
LH: loop header
LB: loop body
LE: loop exit
PB: predicated region body
PF: predicated region fallthrough
CT: control target
= control target key end

     0   :  { %s733_s12 = smov 0   ;;  %s735_s13 = smov 0   ;;  %s892_s0 = inlined_call_operand.vmem [shape: f32[2,128,3], index: 0, kind: input, shape index: {}]   ;;  %s893_s1 = inlined_call_operand.vmem [shape: bf16[3,64], index: 1, kind: input, shape index: {}]   ;;  %s894_s2 = inlined_call_operand.vmem [shape: f32[2,128,64], index: 2, kind: output, shape index: {0}]   ;;  %s895_s3 = inlined_call_operand.vmem [shape: f32[2,2,64], index: 3, kind: output, shape index: {1}]  }
   0x1   :  { %s737_s14 = smov 0  }
   0x2 LB: > { %s26_s15 = sadd.s32 1, %s706_s13  ;;  %p616_p0 = scmp.ge.s32.totalorder %s710_s14, 1  ;;  %s710_s14 = sphi %s737_s14, %s14_s14   ;;  %s706_s13 = sphi %s735_s13, %s897_s13   ;;  %s702_s12 = sphi %s733_s12, %s896_s12  }
   0x3   : > { %p28_p1 = scmp.ge.s32.totalorder %s26_s15, 2  ;;  %p163_p2 = scmp.lt.s32.totalorder %s710_s14, 3 }
   0x5   : > { %s899_s15 = smov (%p28_p1, %s26_s15), 0  ;;  %p164_p3 = pnand %p616_p0, %p163_p2 }
   0x6   : > { %p201_p4 = scmp.lt.s32.totalorder (!%p164_p3), %s702_s12, 1 }
   0x7   : > { %167 = sbr.rel (%p164_p3) target bundleno = 267 (0x10b), region = 28 }
   0xc   : > { %v251_v0 = vld [vmem:[%s893_s1] sm:$0x3]  ;;  %vm277_vm0 = vcmask 1040384   ;;  %vm278_vm1 = vcmask 1041408   ;;  %v712_v1 = vmov 65535   ;;  %s901_s12 = smov (!%p201_p4, %s702_s12), 1 }
   0xd   : > { %v279_v2 = vsel %vm277_vm0, 4294967295, %v712_v1  ;;  %s632_s18 = sshll.u32 %s901_s12, 7  ;;  %vm252_vm2 = vcmask 23552   ;;  %vm381_vm3 = vcmask 523264   ;;  %s621_s25 = sshll.u32 %s901_s12, 1  ;;  %vm489_vm4 = vcmask 517120  }
   0xe   : > { %v280_v3 = vsel %vm278_vm1, %v279_v2, 0  ;;  %s763_s21 = scalar_lea.vmem %s892_s0, %s632_s18  ;;  %s794_s24 = scalar_lea.vmem %s894_s2, %s632_s18 }
   0xf   : > { %v282_v4 = vand.u32 %v280_v3, %v251_v0  ;;  %v227_v5 = vld [vmem:[%s763_s21] sm:$0xff]  ;;  %v228_v6 = vld [vmem:[%s763_s21 + $0x8] sm:$0xff]  ;;  %v229_v7 = vld [vmem:[%s763_s21 + $0x10] sm:$0xff]  ;;  %s224_s28 = scalar_lea.vmem %s895_s3, %s621_s25 }
  0x10   : > { %v243_v8 = vpack.c.bf16 %v228_v6, %v227_v5  ;;  %v230_v9 = vld [vmem:[%s763_s21 + $0x18] sm:$0xff]  ;;  %v231_v10 = vld [vmem:[%s763_s21 + $0x20] sm:$0xff]  ;;  %v232_v11 = vld [vmem:[%s763_s21 + $0x28] sm:$0xff] }
  0x11   : > { %643 = vmatprep.subr.bf16.mxu0 %v282_v4  ;;  %661 = vmatprep.subr.bf16.mxu1 %v282_v4  ;;  %v244_v12 = vpack.c.bf16 %v230_v9, %v229_v7  ;;  %v245_v13 = vpack.c.bf16 %v232_v11, %v231_v10  ;;  %v235_v14 = vld [vmem:[%s763_s21 + $0x40] sm:$0xff]  ;;  %v236_v15 = vld [vmem:[%s763_s21 + $0x48] sm:$0xff]  ;;  %v237_v16 = vld [vmem:[%s763_s21 + $0x50] sm:$0xff] }
  0x12   : > { %644 = vmatpush3.bf16.msra.mxu0 %v282_v4  ;;  %662 = vmatpush3.bf16.msra.mxu1 %v282_v4  ;;  %v238_v17 = vld [vmem:[%s763_s21 + $0x58] sm:$0xff]  ;;  %v247_v18 = vpack.c.bf16 %v236_v15, %v235_v14  ;;  %v239_v20 = vld [vmem:[%s763_s21 + $0x60] sm:$0xff]  ;;  %v240_v21 = vld [vmem:[%s763_s21 + $0x68] sm:$0xff] }
  0x13   : > { %645 = vmatprep.mubr.msk.bf16.mxu0 %vm252_vm2, %v243_v8  ;;  %v248_v19 = vpack.c.bf16 %v238_v17, %v237_v16  ;;  %v233_v22 = vld [vmem:[%s763_s21 + $0x30] sm:$0xff]  ;;  %v234_v23 = vld [vmem:[%s763_s21 + $0x38] sm:$0xff]  ;;  %v249_v24 = vpack.c.bf16 %v240_v21, %v239_v20 }
  0x14   : > { %653 = vmatprep.mubr.msk.bf16.mxu1 %vm252_vm2, %v247_v18  ;;  %v246_v25 = vpack.c.bf16 %v234_v23, %v233_v22  ;;  %v241_v26 = vld [vmem:[%s763_s21 + $0x70] sm:$0xff]  ;;  %v242_v27 = vld [vmem:[%s763_s21 + $0x78] sm:$0xff] }
  0x15   : > { %646 = vmatmul.mubr.msk.bf16.vlgmr.msra.gmra.mxu0 %vm252_vm2, %v244_v12  ;;  %654 = vmatmul.mubr.msk.bf16.vlgmr.msra.gmra.mxu1 %vm252_vm2, %v248_v19  ;;  %v250_v28 = vpack.c.bf16 %v242_v27, %v241_v26 }
  0x16   : > { %649 = vmatprep.mubr.msk.bf16.mxu0 %vm252_vm2, %v245_v13  ;;  %657 = vmatprep.mubr.msk.bf16.mxu1 %vm252_vm2, %v249_v24 }
  0x1d   : > { %650 = vmatmul.mubr.msk.bf16.gmra.mxu0 %vm252_vm2, %v246_v25  ;;  %658 = vmatmul.mubr.msk.bf16.gmra.mxu1 %vm252_vm2, %v250_v28 }
  0xd5   : > { %v647_v29 = vpop.f32.mrf.mxu0  ;;  %v800_v31 = vpop.f32.mrf.mxu1 }
  0xd6   : > { %384 = vst.msk [vmem:[%s794_s24 + $0x10] sm:$0xff] %vm381_vm3, %v647_v29  ;;  %392 = vst.msk [vmem:[%s794_s24 + $0x50] sm:$0xff] %vm381_vm3, %v800_v31  ;;  %v437_v36 = vmul.f32 %v647_v29, %v647_v29  ;;  %v401_v43 = vsel %vm381_vm3, %v647_v29, 0.0  ;;  %v445_v23 = vmul.f32 %v800_v31, %v800_v31  ;;  %v417_v28 = vsel %vm381_vm3, %v800_v31, 0.0 }
  0xd7   : > { %v318_v30 = vpop.f32.mrf.mxu0  ;;  %v350_v34 = vpop.f32.mrf.mxu1 }
  0xd8   : > { %382 = vst.msk [vmem:[%s794_s24] sm:$0xff] %vm381_vm3, %v318_v30  ;;  %v435_v33 = vmul.f32 %v318_v30, %v318_v30  ;;  %390 = vst.msk [vmem:[%s794_s24 + $0x40] sm:$0xff] %vm381_vm3, %v350_v34  ;;  %v398_v37 = vsel %vm381_vm3, %v318_v30, 0.0  ;;  %v454_v51 = vsel %vm381_vm3, %v437_v36, 0.0  ;;  %v443_v15 = vmul.f32 %v350_v34, %v350_v34 }
  0xd9   : > { %v648_v32 = vpop.f32.mrf.mxu0  ;;  %v813_v40 = vpop.f32.mrf.mxu1  ;;  %v413_v19 = vsel %vm381_vm3, %v350_v34, 0.0  ;;  %v470_v34 = vsel %vm381_vm3, %v445_v23, 0.0 }
  0xda   : > { %385 = vst.msk [vmem:[%s794_s24 + $0x18] sm:$0xff] %vm381_vm3, %v648_v32  ;;  %393 = vst.msk [vmem:[%s794_s24 + $0x58] sm:$0xff] %vm381_vm3, %v813_v40  ;;  %v451_v44 = vsel %vm381_vm3, %v435_v33, 0.0  ;;  %v438_v45 = vmul.f32 %v648_v32, %v648_v32  ;;  %v403_v52 = vsel %vm381_vm3, %v648_v32, 0.0  ;;  %v466_v24 = vsel %vm381_vm3, %v443_v15, 0.0 }
  0xdb   : > { %v321_v35 = vpop.f32.mrf.mxu0  ;;  %v353_v47 = vpop.f32.mrf.mxu1  ;;  %v446_v29 = vmul.f32 %v813_v40, %v813_v40 }
  0xdc   : > { %383 = vst.msk [vmem:[%s794_s24 + $0x8] sm:$0xff] %vm381_vm3, %v321_v35  ;;  %v399_v38 = vsel %vm381_vm3, %v321_v35, 0.0  ;;  %v436_v39 = vmul.f32 %v321_v35, %v321_v35  ;;  %391 = vst.msk [vmem:[%s794_s24 + $0x48] sm:$0xff] %vm381_vm3, %v353_v47  ;;  %v456_v58 = vsel %vm381_vm3, %v438_v45, 0.0  ;;  %v444_v20 = vmul.f32 %v353_v47, %v353_v47 }
  0xdd   : > { %v400_v41 = vadd.f32 %v399_v38, %v398_v37  ;;  %v651_v42 = vpop.f32.mrf.mxu0  ;;  %v829_v54 = vpop.f32.mrf.mxu1  ;;  %v415_v25 = vsel %vm381_vm3, %v353_v47, 0.0  ;;  %v419_v35 = vsel %vm381_vm3, %v813_v40, 0.0 }
  0xde   : > { %v452_v46 = vsel %vm381_vm3, %v436_v39, 0.0  ;;  %388 = vst.msk [vmem:[%s794_s24 + $0x30] sm:$0xff] %vm381_vm3, %v651_v42  ;;  %396 = vst.msk [vmem:[%s794_s24 + $0x70] sm:$0xff] %vm381_vm3, %v829_v54  ;;  %v441_v0 = vmul.f32 %v651_v42, %v651_v42  ;;  %v409_v7 = vsel %vm381_vm3, %v651_v42, 0.0  ;;  %v468_v30 = vsel %vm381_vm3, %v444_v20, 0.0 }
  0xdf   : > { %v402_v48 = vadd.f32 %v401_v43, %v400_v41  ;;  %v453_v49 = vadd.f32 %v452_v46, %v451_v44  ;;  %v334_v50 = vpop.f32.mrf.mxu0  ;;  %v366_v60 = vpop.f32.mrf.mxu1  ;;  %v472_v39 = vsel %vm381_vm3, %v446_v29, 0.0  ;;  %v449_v44 = vmul.f32 %v829_v54, %v829_v54 }
  0xe0   : > { %386 = vst.msk [vmem:[%s794_s24 + $0x20] sm:$0xff] %vm381_vm3, %v334_v50  ;;  %v439_v53 = vmul.f32 %v334_v50, %v334_v50  ;;  %v405_v59 = vsel %vm381_vm3, %v334_v50, 0.0  ;;  %394 = vst.msk [vmem:[%s794_s24 + $0x60] sm:$0xff] %vm381_vm3, %v366_v60  ;;  %v462_v13 = vsel %vm381_vm3, %v441_v0, 0.0  ;;  %v447_v36 = vmul.f32 %v366_v60, %v366_v60 }
  0xe1   : > { %v455_v55 = vadd.f32 %v454_v51, %v453_v49  ;;  %v404_v56 = vadd.f32 %v403_v52, %v402_v48  ;;  %v652_v57 = vpop.f32.mrf.mxu0  ;;  %v660_v4 = vpop.f32.mrf.mxu1  ;;  %v421_v41 = vsel %vm381_vm3, %v366_v60, 0.0  ;;  %v425_v40 = vsel %vm381_vm3, %v829_v54, 0.0 }
  0xe2   : > { %389 = vst.msk [vmem:[%s794_s24 + $0x38] sm:$0xff] %vm381_vm3, %v652_v57  ;;  %v458_v1 = vsel %vm381_vm3, %v439_v53, 0.0  ;;  %397 = vst.msk [vmem:[%s794_s24 + $0x78] sm:$0xff] %vm381_vm3, %v660_v4  ;;  %v442_v8 = vmul.f32 %v652_v57, %v652_v57  ;;  %v411_v14 = vsel %vm381_vm3, %v652_v57, 0.0  ;;  %v474_v45 = vsel %vm381_vm3, %v447_v36, 0.0 }
  0xe3   : > { %v406_v61 = vadd.f32 %v405_v59, %v404_v56  ;;  %v457_v62 = vadd.f32 %v456_v58, %v455_v55  ;;  %v337_v63 = vpop.f32.mrf.mxu0  ;;  %v369_v10 = vpop.f32.mrf.mxu1  ;;  %v450_v49 = vmul.f32 %v660_v4, %v660_v4  ;;  %v478_v53 = vsel %vm381_vm3, %v449_v44, 0.0 }
  0xe4   : > { %387 = vst.msk [vmem:[%s794_s24 + $0x28] sm:$0xff] %vm381_vm3, %v337_v63  ;;  %v407_v2 = vsel %vm381_vm3, %v337_v63, 0.0  ;;  %v440_v3 = vmul.f32 %v337_v63, %v337_v63  ;;  %395 = vst.msk [vmem:[%s794_s24 + $0x68] sm:$0xff] %vm381_vm3, %v369_v10  ;;  %v464_v18 = vsel %vm381_vm3, %v442_v8, 0.0  ;;  %v448_v31 = vmul.f32 %v369_v10, %v369_v10 }
  0xe5   : > { %v459_v5 = vadd.f32 %v458_v1, %v457_v62  ;;  %v408_v6 = vadd.f32 %v407_v2, %v406_v61  ;;  %v423_v46 = vsel %vm381_vm3, %v369_v10, 0.0  ;;  %v427_v55 = vsel %vm381_vm3, %v660_v4, 0.0 }
  0xe6   : > { %v460_v9 = vsel %vm381_vm3, %v440_v3, 0.0  ;;  %v476_v50 = vsel %vm381_vm3, %v448_v31, 0.0  ;;  %v480_v58 = vsel %vm381_vm3, %v450_v49, 0.0 }
  0xe7   : > { %v410_v11 = vadd.f32 %v409_v7, %v408_v6  ;;  %v461_v12 = vadd.f32 %v460_v9, %v459_v5 }
  0xe9   : > { %v412_v16 = vadd.f32 %v411_v14, %v410_v11  ;;  %v463_v17 = vadd.f32 %v462_v13, %v461_v12 }
  0xeb   : > { %v465_v21 = vadd.f32 %v464_v18, %v463_v17  ;;  %v414_v22 = vadd.f32 %v413_v19, %v412_v16 }
  0xed   : > { %v416_v26 = vadd.f32 %v415_v25, %v414_v22  ;;  %v467_v27 = vadd.f32 %v466_v24, %v465_v21 }
  0xef   : > { %v418_v32 = vadd.f32 %v417_v28, %v416_v26  ;;  %v469_v33 = vadd.f32 %v468_v30, %v467_v27 }
  0xf1   : > { %v471_v37 = vadd.f32 %v470_v34, %v469_v33  ;;  %v420_v38 = vadd.f32 %v419_v35, %v418_v32 }
  0xf3   : > { %v422_v42 = vadd.f32 %v421_v41, %v420_v38  ;;  %v473_v43 = vadd.f32 %v472_v39, %v471_v37 }
  0xf5   : > { %v475_v47 = vadd.f32 %v474_v45, %v473_v43  ;;  %v424_v48 = vadd.f32 %v423_v46, %v422_v42 }
  0xf7   : > { %v426_v51 = vadd.f32 %v425_v40, %v424_v48  ;;  %v477_v52 = vadd.f32 %v476_v50, %v475_v47 }
  0xf9   : > { %v428_v56 = vadd.f32 %v427_v55, %v426_v51  ;;  %v479_v57 = vadd.f32 %v478_v53, %v477_v52 }
  0xfb   : > { %v429_v59 = vrot.slane %v428_v56, 4  ;;  %v481_v60 = vadd.f32 %v480_v58, %v479_v57 }
  0xfd   : > { %v430_v61 = vadd.f32 %v429_v59, %v428_v56  ;;  %v482_v62 = vrot.slane %v481_v60, 4 }
  0xff   : > { %v431_v63 = vrot.slane %v430_v61, 2  ;;  %v483_v54 = vadd.f32 %v482_v62, %v481_v60 }
 0x101   : > { %v432_v0 = vadd.f32 %v431_v63, %v430_v61  ;;  %v484_v1 = vrot.slane %v483_v54, 2 }
 0x103   : > { %v433_v2 = vrot.slane %v432_v0, 1  ;;  %v485_v3 = vadd.f32 %v484_v1, %v483_v54 }
 0x105   : > { %v486_v5 = vrot.slane %v485_v3, 1  ;;  %v434_v4 = vadd.f32 %v433_v2, %v432_v0 }
 0x107   : > { %v487_v6 = vadd.f32 %v486_v5, %v485_v3 }
 0x109   : > { %v488_v7 = vsel %vm277_vm0, %v434_v4, %v487_v6 }
 0x10a   : > { %490 = vst.msk [vmem:[%s224_s28] sm:$0x3] %vm489_vm4, %v488_v7 }
 0x10b PF: > { %s14_s14 = sadd.s32 1, %s710_s14   ;;  %s896_s12 = smov %s706_s13 }
 0x10c   : > { %p11_p5 = scmp.ge.s32.totalorder %s14_s14, 4   ;;  %s897_s13 = smov %s899_s15 }
 0x10e   :  { %13 = sbr.rel (!%p11_p5) target bundleno = 2 (0x2), region = 70 }

// kernel: est_coord_forward.9
= control target key start
LH: loop header
LB: loop body
LE: loop exit
PB: predicated region body
PF: predicated region fallthrough
CT: control target
= control target key end

     0   :  { %s873_s18 = smov 0   ;;  %s875_s19 = smov 0   ;;  %s1015_s0 = inlined_call_operand.vmem [shape: f32[2,128,64], index: 0, kind: input, shape index: {}]   ;;  %s1016_s1 = inlined_call_operand.vmem [shape: bf16[64,128], index: 1, kind: input, shape index: {}]   ;;  %s1017_s2 = inlined_call_operand.vmem [shape: f32[1,64], index: 2, kind: input, shape index: {}]   ;;  %s1018_s3 = inlined_call_operand.vmem [shape: f32[1,64], index: 3, kind: input, shape index: {}]   ;;  %s1019_s4 = inlined_call_operand.vmem [shape: f32[2,128,128], index: 4, kind: output, shape index: {0}]   ;;  %s1020_s5 = inlined_call_operand.vmem [shape: f32[2,2,128], index: 5, kind: output, shape index: {1}]  }
   0x1   :  { %s877_s20 = smov 0  }
   0x2 LB: > { %s28_s21 = sadd.s32 1, %s837_s19  ;;  %p723_p0 = scmp.ge.s32.totalorder %s841_s20, 1  ;;  %s841_s20 = sphi %s877_s20, %s16_s20   ;;  %s837_s19 = sphi %s875_s19, %s1022_s19   ;;  %s833_s18 = sphi %s873_s18, %s1021_s18  }
   0x3   : > { %p30_p1 = scmp.ge.s32.totalorder %s28_s21, 2  ;;  %p213_p2 = scmp.lt.s32.totalorder %s841_s20, 3 }
   0x5   : > { %s1024_s21 = smov (%p30_p1, %s28_s21), 0  ;;  %p214_p3 = pnand %p723_p0, %p213_p2 }
   0x6   : > { %p255_p4 = scmp.lt.s32.totalorder (!%p214_p3), %s833_s18, 1 }
   0x7   : > { %217 = sbr.rel (%p214_p3) target bundleno = 274 (0x112), region = 36 }
   0xc   : > { %v815_v0 = vld [vmem:[%s1016_s1 + $0x18] sm:$0xff]   ;;  %v816_v1 = vld [vmem:[%s1016_s1 + $0x10] sm:$0xff]   ;;  %s1026_s18 = smov (!%p255_p4, %s833_s18), 1  ;;  %v817_v2 = vld [vmem:[%s1016_s1 + $0x8] sm:$0xff]   ;;  %vm399_vm0 = vcmask 523264   ;;  %vm595_vm1 = vcmask 1040384  }
   0xd   : > { %759 = vmatprep.subr.bf16.mxu0 %v815_v0  ;;  %783 = vmatprep.subr.bf16.mxu1 %v815_v0  ;;  %s745_s28 = sshll.u32 %s1026_s18, 7  ;;  %v906_v3 = vld [vmem:[%s1017_s2] ss:$0 sm:$0xff]  ;;  %s728_s16 = sshll.u32 %s1026_s18, 1 }
   0xe   : > { %760 = vmatpush3.bf16.msra.mxu0 %v815_v0  ;;  %787 = vmatpush3.bf16.msra.mxu1 %v815_v0  ;;  %s913_s8 = scalar_lea.vmem %s1015_s0, %s745_s28  ;;  %v918_v4 = vld [vmem:[%s1018_s3] ss:$0 sm:$0xff]  ;;  %s984_s15 = scalar_lea.vmem %s1019_s4, %s745_s28 }
   0xf   : > { %761 = vmatprep.subr.bf16.mxu0 %v816_v1  ;;  %784 = vmatprep.subr.bf16.mxu1 %v816_v1  ;;  %v281_v5 = vld [vmem:[%s913_s8] sm:$0xff]  ;;  %v282_v6 = vld [vmem:[%s913_s8 + $0x8] sm:$0xff]  ;;  %v283_v7 = vld [vmem:[%s913_s8 + $0x10] sm:$0xff]  ;;  %s278_s23 = scalar_lea.vmem %s1020_s5, %s728_s16 }
  0x10   : > { %v304_v8 = vmul.f32 %v906_v3, %v281_v5  ;;  %v305_v9 = vmul.f32 %v906_v3, %v282_v6  ;;  %v284_v10 = vld [vmem:[%s913_s8 + $0x18] sm:$0xff]  ;;  %v306_v11 = vmul.f32 %v906_v3, %v283_v7  ;;  %v285_v12 = vld [vmem:[%s913_s8 + $0x20] sm:$0xff]  ;;  %v286_v13 = vld [vmem:[%s913_s8 + $0x28] sm:$0xff] }
  0x11   : > { %v818_v14 = vld [vmem:[%s1016_s1] sm:$0xff]   ;;  %v307_v15 = vmul.f32 %v906_v3, %v284_v10  ;;  %v308_v16 = vmul.f32 %v906_v3, %v285_v12  ;;  %v309_v17 = vmul.f32 %v906_v3, %v286_v13  ;;  %v287_v18 = vld [vmem:[%s913_s8 + $0x30] sm:$0xff]  ;;  %v288_v19 = vld [vmem:[%s913_s8 + $0x38] sm:$0xff] }
  0x12   : > { %762 = vmatpush3.bf16.msra.mxu0 %v816_v1  ;;  %788 = vmatpush3.bf16.msra.mxu1 %v816_v1  ;;  %v327_v20 = vadd.f32 %v918_v4, %v304_v8  ;;  %v328_v21 = vadd.f32 %v918_v4, %v305_v9  ;;  %v329_v22 = vadd.f32 %v918_v4, %v306_v11  ;;  %v289_v28 = vld [vmem:[%s913_s8 + $0x40] sm:$0xff]  ;;  %v290_v29 = vld [vmem:[%s913_s8 + $0x48] sm:$0xff]  ;;  %v291_v34 = vld [vmem:[%s913_s8 + $0x50] sm:$0xff] }
  0x13   : > { %763 = vmatprep.subr.bf16.mxu0 %v817_v2  ;;  %785 = vmatprep.subr.bf16.mxu1 %v817_v2  ;;  %v310_v23 = vmul.f32 %v906_v3, %v287_v18  ;;  %v330_v24 = vadd.f32 %v918_v4, %v307_v15  ;;  %v331_v25 = vadd.f32 %v918_v4, %v308_v16  ;;  %v292_v39 = vld [vmem:[%s913_s8 + $0x58] sm:$0xff]  ;;  %v293_v43 = vld [vmem:[%s913_s8 + $0x60] sm:$0xff]  ;;  %v294_v44 = vld [vmem:[%s913_s8 + $0x68] sm:$0xff] }
  0x14   : > { %v332_v26 = vadd.f32 %v918_v4, %v309_v17  ;;  %v311_v27 = vmul.f32 %v906_v3, %v288_v19  ;;  %v343_v30 = vmax.f32 %v327_v20, 0.0  ;;  %v344_v31 = vmax.f32 %v328_v21, 0.0  ;;  %v295_v48 = vld [vmem:[%s913_s8 + $0x70] sm:$0xff]  ;;  %v296_v53 = vld [vmem:[%s913_s8 + $0x78] sm:$0xff] }
  0x15   : > { %v345_v32 = vmax.f32 %v329_v22, 0.0  ;;  %v333_v33 = vadd.f32 %v918_v4, %v310_v23  ;;  %v346_v35 = vmax.f32 %v330_v24, 0.0  ;;  %v347_v36 = vmax.f32 %v331_v25, 0.0 }
  0x16   : > { %764 = vmatpush3.bf16.msra.mxu0 %v817_v2  ;;  %789 = vmatpush3.bf16.msra.mxu1 %v817_v2  ;;  %v348_v37 = vmax.f32 %v332_v26, 0.0  ;;  %v334_v38 = vadd.f32 %v918_v4, %v311_v27  ;;  %v359_v40 = vpack.c.bf16 %v344_v31, %v343_v30  ;;  %v312_v41 = vmul.f32 %v906_v3, %v289_v28 }
  0x17   : > { %765 = vmatprep.subr.bf16.mxu0 %v818_v14  ;;  %786 = vmatprep.subr.bf16.mxu1 %v818_v14  ;;  %v313_v42 = vmul.f32 %v906_v3, %v290_v29  ;;  %v360_v45 = vpack.c.bf16 %v346_v35, %v345_v32  ;;  %v314_v47 = vmul.f32 %v906_v3, %v291_v34  ;;  %v349_v49 = vmax.f32 %v333_v33, 0.0 }
  0x18   : > { %v361_v46 = vpack.c.bf16 %v348_v37, %v347_v36  ;;  %767 = vmatprep.mubr.msk.bf16.mxu0 %vm399_vm0, %v359_v40  ;;  %v335_v50 = vadd.f32 %v918_v4, %v312_v41  ;;  %v315_v52 = vmul.f32 %v906_v3, %v292_v39  ;;  %v350_v54 = vmax.f32 %v334_v38, 0.0 }
  0x19   : > { %v336_v51 = vadd.f32 %v918_v4, %v313_v42  ;;  %v337_v55 = vadd.f32 %v918_v4, %v314_v47  ;;  %v316_v56 = vmul.f32 %v906_v3, %v293_v43  ;;  %v317_v57 = vmul.f32 %v906_v3, %v294_v44 }
  0x1a   : > { %766 = vmatpush3.bf16.msra.mxu0 %v818_v14  ;;  %790 = vmatpush3.bf16.msra.mxu1 %v818_v14  ;;  %v351_v58 = vmax.f32 %v335_v50, 0.0  ;;  %v338_v60 = vadd.f32 %v918_v4, %v315_v52  ;;  %v318_v61 = vmul.f32 %v906_v3, %v295_v48  ;;  %v319_v1 = vmul.f32 %v906_v3, %v296_v53 }
  0x1b   : > { %v352_v59 = vmax.f32 %v336_v51, 0.0  ;;  %v353_v62 = vmax.f32 %v337_v55, 0.0  ;;  %v339_v63 = vadd.f32 %v918_v4, %v316_v56  ;;  %v340_v0 = vadd.f32 %v918_v4, %v317_v57 }
  0x1c   : > { %v354_v5 = vmax.f32 %v338_v60, 0.0  ;;  %v341_v6 = vadd.f32 %v918_v4, %v318_v61  ;;  %v342_v9 = vadd.f32 %v918_v4, %v319_v1  ;;  %v362_v11 = vpack.c.bf16 %v350_v54, %v349_v49 }
  0x1d   : > { %768 = vmatmul.mubr.msk.bf16.vlgmr.msra.gmra.mxu0 %vm399_vm0, %v360_v45  ;;  %v363_v2 = vpack.c.bf16 %v352_v59, %v351_v58  ;;  %v355_v7 = vmax.f32 %v339_v63, 0.0  ;;  %v356_v8 = vmax.f32 %v340_v0, 0.0 }
  0x1e   : > { %771 = vmatprep.mubr.msk.bf16.mxu0 %vm399_vm0, %v361_v46  ;;  %v364_v10 = vpack.c.bf16 %v354_v5, %v353_v62  ;;  %v357_v13 = vmax.f32 %v341_v6, 0.0  ;;  %v358_v3 = vmax.f32 %v342_v9, 0.0 }
  0x1f   : > { %775 = vmatprep.mubr.msk.bf16.mxu1 %vm399_vm0, %v363_v2  ;;  %v365_v12 = vpack.c.bf16 %v356_v8, %v355_v7 }
  0x20   : > { %776 = vmatmul.mubr.msk.bf16.vlgmr.msra.gmra.mxu1 %vm399_vm0, %v364_v10  ;;  %v366_v14 = vpack.c.bf16 %v358_v3, %v357_v13 }
  0x21   : > { %779 = vmatprep.mubr.msk.bf16.mxu1 %vm399_vm0, %v365_v12 }
  0x25   : > { %772 = vmatmul.mubr.msk.bf16.gmra.mxu0 %vm399_vm0, %v362_v11 }
  0x28   : > { %780 = vmatmul.mubr.msk.bf16.gmra.mxu1 %vm399_vm0, %v366_v14 }
  0xdd   : > { %v769_v4 = vpop.f32.mrf.mxu0 }
  0xde   : > { %523 = vst [vmem:[%s984_s15 + $0x10] sm:$0xff] %v769_v4  ;;  %v560_v24 = vmul.f32 %v769_v4, %v769_v4 }
  0xdf   : > { %v458_v15 = vpop.f32.mrf.mxu0 }
  0xe0   : > { %521 = vst [vmem:[%s984_s15] sm:$0xff] %v458_v15  ;;  %v777_v17 = vpop.f32.mrf.mxu1  ;;  %v558_v19 = vmul.f32 %v458_v15, %v458_v15 }
  0xe1   : > { %v770_v16 = vpop.f32.mrf.mxu0  ;;  %531 = vst [vmem:[%s984_s15 + $0x50] sm:$0xff] %v777_v17  ;;  %v568_v57 = vmul.f32 %v777_v17, %v777_v17 }
  0xe2   : > { %524 = vst [vmem:[%s984_s15 + $0x18] sm:$0xff] %v770_v16  ;;  %v490_v22 = vpop.f32.mrf.mxu1  ;;  %v561_v29 = vmul.f32 %v770_v16, %v770_v16 }
  0xe3   : > { %v461_v18 = vpop.f32.mrf.mxu0  ;;  %529 = vst [vmem:[%s984_s15 + $0x40] sm:$0xff] %v490_v22  ;;  %v566_v51 = vmul.f32 %v490_v22, %v490_v22 }
  0xe4   : > { %522 = vst [vmem:[%s984_s15 + $0x8] sm:$0xff] %v461_v18  ;;  %v537_v20 = vadd.f32 %v461_v18, %v458_v15  ;;  %v559_v21 = vmul.f32 %v461_v18, %v461_v18  ;;  %v778_v27 = vpop.f32.mrf.mxu1 }
  0xe5   : > { %v773_v23 = vpop.f32.mrf.mxu0  ;;  %532 = vst [vmem:[%s984_s15 + $0x58] sm:$0xff] %v778_v27  ;;  %v569_v60 = vmul.f32 %v778_v27, %v778_v27 }
  0xe6   : > { %v538_v25 = vadd.f32 %v769_v4, %v537_v20  ;;  %v574_v26 = vadd.f32 %v559_v21, %v558_v19  ;;  %527 = vst [vmem:[%s984_s15 + $0x30] sm:$0xff] %v773_v23  ;;  %v493_v32 = vpop.f32.mrf.mxu1  ;;  %v564_v43 = vmul.f32 %v773_v23, %v773_v23 }
  0xe7   : > { %v474_v28 = vpop.f32.mrf.mxu0  ;;  %530 = vst [vmem:[%s984_s15 + $0x48] sm:$0xff] %v493_v32  ;;  %v567_v55 = vmul.f32 %v493_v32, %v493_v32 }
  0xe8   : > { %v575_v30 = vadd.f32 %v574_v26, %v560_v24  ;;  %525 = vst [vmem:[%s984_s15 + $0x20] sm:$0xff] %v474_v28  ;;  %v539_v31 = vadd.f32 %v770_v16, %v538_v25  ;;  %v562_v35 = vmul.f32 %v474_v28, %v474_v28  ;;  %v781_v37 = vpop.f32.mrf.mxu1 }
  0xe9   : > { %v774_v33 = vpop.f32.mrf.mxu0  ;;  %535 = vst [vmem:[%s984_s15 + $0x70] sm:$0xff] %v781_v37  ;;  %v572_v7 = vmul.f32 %v781_v37, %v781_v37 }
  0xea   : > { %v540_v34 = vadd.f32 %v539_v31, %v474_v28  ;;  %v576_v36 = vadd.f32 %v575_v30, %v561_v29  ;;  %528 = vst [vmem:[%s984_s15 + $0x38] sm:$0xff] %v774_v33  ;;  %v506_v42 = vpop.f32.mrf.mxu1  ;;  %v565_v47 = vmul.f32 %v774_v33, %v774_v33 }
  0xeb   : > { %v477_v38 = vpop.f32.mrf.mxu0  ;;  %533 = vst [vmem:[%s984_s15 + $0x60] sm:$0xff] %v506_v42  ;;  %v570_v0 = vmul.f32 %v506_v42, %v506_v42 }
  0xec   : > { %v577_v39 = vadd.f32 %v576_v36, %v562_v35  ;;  %526 = vst [vmem:[%s984_s15 + $0x28] sm:$0xff] %v477_v38  ;;  %v541_v40 = vadd.f32 %v540_v34, %v477_v38  ;;  %v563_v41 = vmul.f32 %v477_v38, %v477_v38  ;;  %v782_v46 = vpop.f32.mrf.mxu1 }
  0xed   : > { %536 = vst [vmem:[%s984_s15 + $0x78] sm:$0xff] %v782_v46  ;;  %v573_v10 = vmul.f32 %v782_v46, %v782_v46 }
  0xee   : > { %v542_v44 = vadd.f32 %v773_v23, %v541_v40  ;;  %v578_v45 = vadd.f32 %v577_v39, %v563_v41  ;;  %v509_v50 = vpop.f32.mrf.mxu1 }
  0xef   : > { %534 = vst [vmem:[%s984_s15 + $0x68] sm:$0xff] %v509_v50  ;;  %v571_v6 = vmul.f32 %v509_v50, %v509_v50 }
  0xf0   : > { %v543_v48 = vadd.f32 %v774_v33, %v542_v44  ;;  %v579_v49 = vadd.f32 %v578_v45, %v564_v43 }
  0xf2   : > { %v580_v52 = vadd.f32 %v579_v49, %v565_v47  ;;  %v544_v53 = vadd.f32 %v543_v48, %v490_v22 }
  0xf4   : > { %v545_v54 = vadd.f32 %v544_v53, %v493_v32  ;;  %v581_v56 = vadd.f32 %v580_v52, %v566_v51 }
  0xf6   : > { %v546_v58 = vadd.f32 %v777_v17, %v545_v54  ;;  %v582_v59 = vadd.f32 %v581_v56, %v567_v55 }
  0xf8   : > { %v583_v61 = vadd.f32 %v582_v59, %v568_v57  ;;  %v547_v62 = vadd.f32 %v778_v27, %v546_v58 }
  0xfa   : > { %v548_v63 = vadd.f32 %v547_v62, %v506_v42  ;;  %v584_v1 = vadd.f32 %v583_v61, %v569_v60 }
  0xfc   : > { %v585_v2 = vadd.f32 %v584_v1, %v570_v0  ;;  %v549_v5 = vadd.f32 %v548_v63, %v509_v50 }
  0xfe   : > { %v550_v8 = vadd.f32 %v781_v37, %v549_v5  ;;  %v586_v9 = vadd.f32 %v585_v2, %v571_v6 }
 0x100   : > { %v551_v11 = vadd.f32 %v782_v46, %v550_v8  ;;  %v587_v12 = vadd.f32 %v586_v9, %v572_v7 }
 0x102   : > { %v552_v13 = vrot.slane %v551_v11, 4  ;;  %v588_v3 = vadd.f32 %v587_v12, %v573_v10 }
 0x104   : > { %v553_v14 = vadd.f32 %v552_v13, %v551_v11  ;;  %v589_v4 = vrot.slane %v588_v3, 4 }
 0x106   : > { %v554_v15 = vrot.slane %v553_v14, 2  ;;  %v590_v16 = vadd.f32 %v589_v4, %v588_v3 }
 0x108   : > { %v555_v17 = vadd.f32 %v554_v15, %v553_v14  ;;  %v591_v18 = vrot.slane %v590_v16, 2 }
 0x10a   : > { %v556_v19 = vrot.slane %v555_v17, 1  ;;  %v592_v20 = vadd.f32 %v591_v18, %v590_v16 }
 0x10c   : > { %v593_v21 = vrot.slane %v592_v20, 1  ;;  %v557_v22 = vadd.f32 %v556_v19, %v555_v17 }
 0x10e   : > { %v594_v23 = vadd.f32 %v593_v21, %v592_v20 }
 0x110   : > { %v596_v24 = vsel %vm595_vm1, %v557_v22, %v594_v23 }
 0x111   : > { %597 = vst [vmem:[%s278_s23] sm:$0x3] %v596_v24 }
 0x112 PF: > { %s16_s20 = sadd.s32 1, %s841_s20   ;;  %s1021_s18 = smov %s837_s19 }
 0x113   : > { %p13_p5 = scmp.ge.s32.totalorder %s16_s20, 4   ;;  %s1022_s19 = smov %s1024_s21 }
 0x115   :  { %15 = sbr.rel (!%p13_p5) target bundleno = 2 (0x2), region = 78 }

// kernel: est_coord_forward.10
= control target key start
LH: loop header
LB: loop body
LE: loop exit
PB: predicated region body
PF: predicated region fallthrough
CT: control target
= control target key end

     0   :  { %s2228_s15 = smov 0   ;;  %s2230_s16 = smov 0   ;;  %s3351_s0 = inlined_call_operand.vmem [shape: f32[2,128,128], index: 0, kind: input, shape index: {}]   ;;  %s3352_s1 = inlined_call_operand.vmem [shape: bf16[128,1024], index: 1, kind: input, shape index: {}]   ;;  %s3353_s2 = inlined_call_operand.vmem [shape: f32[1,128], index: 2, kind: input, shape index: {}]   ;;  %s3354_s3 = inlined_call_operand.vmem [shape: f32[1,128], index: 3, kind: input, shape index: {}]   ;;  %s3355_s4 = inlined_call_operand.vmem [shape: f32[2,4,1024], index: 4, kind: output, shape index: {}]  }
   0x1   :  { %s2232_s17 = smov 0  }
   0x2 LB: > { %s26_s18 = sadd.s32 1, %s2196_s16  ;;  %p2078_p0 = scmp.ge.s32.totalorder %s2200_s17, 1  ;;  %s2200_s17 = sphi %s2232_s17, %s14_s17   ;;  %s2196_s16 = sphi %s2230_s16, %s3357_s16   ;;  %s2192_s15 = sphi %s2228_s15, %s3356_s15  }
   0x3   : > { %p28_p1 = scmp.ge.s32.totalorder %s26_s18, 2  ;;  %p183_p2 = scmp.lt.s32.totalorder %s2200_s17, 3 }
   0x5   : > { %s3359_s18 = smov (%p28_p1, %s26_s18), 0  ;;  %p184_p3 = pnand %p2078_p0, %p183_p2 }
   0x6   : > { %p215_p4 = scmp.lt.s32.totalorder (!%p184_p3), %s2192_s15, 1 }
   0x7   : > { %187 = sbr.rel (%p184_p3) target bundleno = 456 (0x1c8), region = 36 }
   0xc   : > { %v374_v0 = vld [vmem:[%s3352_s1 + $0x1c0] sm:$0xff]  ;;  %v375_v2 = vld [vmem:[%s3352_s1 + $0x1c8] sm:$0xff]  ;;  %v2202_v8 = vmov 0   ;;  %s3361_s15 = smov (!%p215_p4, %s2192_s15), 1  ;;  %vm1954_vm0 = vcmask 1040384   ;;  %vm1963_vm1 = vcmask 1041408  }
   0xd   : > { %v378_v1 = vld [vmem:[%s3352_s1 + $0x1e0] sm:$0xff]  ;;  %v379_v4 = vld [vmem:[%s3352_s1 + $0x1e8] sm:$0xff]  ;;  %734 = vmatprep.mubr.bf16.mxu0 %v2202_v8  ;;  %847 = vmatprep.mubr.bf16.mxu1 %v2202_v8  ;;  %s2151_s7 = sshll.u32 %s3361_s15, 7  ;;  %vm1972_vm2 = vcmask 1042432  }
   0xe   : > { %v2142_v3 = vcombine.high %v374_v0, %v378_v1  ;;  %v2141_v5 = vcombine.low %v374_v0, %v378_v1  ;;  %v366_v6 = vld [vmem:[%s3352_s1 + $0x180] sm:$0xff]  ;;  %v2144_v9 = vcombine.high %v375_v2, %v379_v4  ;;  %v2143_v10 = vcombine.low %v375_v2, %v379_v4  ;;  %v367_v12 = vld [vmem:[%s3352_s1 + $0x188] sm:$0xff]  ;;  %s2320_s14 = scalar_lea.vmem %s3351_s0, %s2151_s7 }
   0xf   : > { %v370_v7 = vld [vmem:[%s3352_s1 + $0x1a0] sm:$0xff]  ;;  %v371_v13 = vld [vmem:[%s3352_s1 + $0x1a8] sm:$0xff]  ;;  %v234_v4 = vld [vmem:[%s2320_s14 + $0x10] sm:$0xff] }
  0x10   : > { %v2134_v11 = vcombine.high %v366_v6, %v370_v7  ;;  %v358_v14 = vld [vmem:[%s3352_s1 + $0x140] sm:$0xff]  ;;  %702 = vmatprep.subr.bf16.mxu0 %v2142_v3  ;;  %v2136_v15 = vcombine.high %v367_v12, %v371_v13  ;;  %v359_v17 = vld [vmem:[%s3352_s1 + $0x148] sm:$0xff]  ;;  %815 = vmatprep.subr.bf16.mxu1 %v2144_v9  ;;  %v2133_v19 = vcombine.low %v366_v6, %v370_v7 }
  0x11   : > { %v362_v16 = vld [vmem:[%s3352_s1 + $0x160] sm:$0xff]  ;;  %v363_v18 = vld [vmem:[%s3352_s1 + $0x168] sm:$0xff]  ;;  %703 = vmatpush1.bf16.msra.mxu0 %v2141_v5  ;;  %816 = vmatpush1.bf16.msra.mxu1 %v2143_v10  ;;  %v2135_v20 = vcombine.low %v367_v12, %v371_v13  ;;  %v235_v5 = vld [vmem:[%s2320_s14 + $0x18] sm:$0xff] }
  0x12   : > { %704 = vmatprep.subr.bf16.mxu0 %v2134_v11  ;;  %v2126_v21 = vcombine.high %v358_v14, %v362_v16  ;;  %817 = vmatprep.subr.bf16.mxu1 %v2136_v15  ;;  %v2128_v22 = vcombine.high %v359_v17, %v363_v18  ;;  %v350_v23 = vld [vmem:[%s3352_s1 + $0x100] sm:$0xff]  ;;  %v351_v25 = vld [vmem:[%s3352_s1 + $0x108] sm:$0xff]  ;;  %v2125_v27 = vcombine.low %v358_v14, %v362_v16  ;;  %v376_v10 = vld [vmem:[%s3352_s1 + $0x1d0] sm:$0xff] }
  0x13   : > { %v354_v24 = vld [vmem:[%s3352_s1 + $0x120] sm:$0xff]  ;;  %v355_v26 = vld [vmem:[%s3352_s1 + $0x128] sm:$0xff]  ;;  %v2127_v28 = vcombine.low %v359_v17, %v363_v18  ;;  %v380_v11 = vld [vmem:[%s3352_s1 + $0x1f0] sm:$0xff] }
  0x14   : > { %v2118_v29 = vcombine.high %v350_v23, %v354_v24  ;;  %v2120_v30 = vcombine.high %v351_v25, %v355_v26  ;;  %v342_v31 = vld [vmem:[%s3352_s1 + $0xc0] sm:$0xff]  ;;  %v343_v33 = vld [vmem:[%s3352_s1 + $0xc8] sm:$0xff]  ;;  %v2117_v35 = vcombine.low %v350_v23, %v354_v24  ;;  %v2119_v36 = vcombine.low %v351_v25, %v355_v26  ;;  %v377_v14 = vld [vmem:[%s3352_s1 + $0x1d8] sm:$0xff] }
  0x15   : > { %705 = vmatpush1.bf16.msra.mxu0 %v2133_v19  ;;  %818 = vmatpush1.bf16.msra.mxu1 %v2135_v20  ;;  %v346_v32 = vld [vmem:[%s3352_s1 + $0xe0] sm:$0xff]  ;;  %v347_v34 = vld [vmem:[%s3352_s1 + $0xe8] sm:$0xff]  ;;  %v381_v15 = vld [vmem:[%s3352_s1 + $0x1f8] sm:$0xff]  ;;  %v2146_v20 = vcombine.high %v376_v10, %v380_v11 }
  0x16   : > { %706 = vmatprep.subr.bf16.mxu0 %v2126_v21  ;;  %819 = vmatprep.subr.bf16.mxu1 %v2128_v22  ;;  %v2110_v37 = vcombine.high %v342_v31, %v346_v32  ;;  %v2112_v38 = vcombine.high %v343_v33, %v347_v34  ;;  %v334_v39 = vld [vmem:[%s3352_s1 + $0x80] sm:$0xff]  ;;  %v335_v41 = vld [vmem:[%s3352_s1 + $0x88] sm:$0xff]  ;;  %v2109_v43 = vcombine.low %v342_v31, %v346_v32  ;;  %v368_v22 = vld [vmem:[%s3352_s1 + $0x190] sm:$0xff] }
  0x17   : > { %v338_v40 = vld [vmem:[%s3352_s1 + $0xa0] sm:$0xff]  ;;  %v339_v42 = vld [vmem:[%s3352_s1 + $0xa8] sm:$0xff]  ;;  %v2111_v47 = vcombine.low %v343_v33, %v347_v34  ;;  %v2148_v21 = vcombine.high %v377_v14, %v381_v15  ;;  %v372_v26 = vld [vmem:[%s3352_s1 + $0x1b0] sm:$0xff]  ;;  %v2147_v32 = vcombine.low %v377_v14, %v381_v15 }
  0x18   : > { %v232_v44 = vld [vmem:[%s2320_s14] sm:$0xff]  ;;  %v233_v45 = vld [vmem:[%s2320_s14 + $0x8] sm:$0xff]  ;;  %v2102_v48 = vcombine.high %v334_v39, %v338_v40  ;;  %v2104_v49 = vcombine.high %v335_v41, %v339_v42  ;;  %v2101_v56 = vcombine.low %v334_v39, %v338_v40  ;;  %v2103_v58 = vcombine.low %v335_v41, %v339_v42  ;;  %v361_v41 = vld [vmem:[%s3352_s1 + $0x158] sm:$0xff] }
  0x19   : > { %707 = vmatpush1.bf16.msra.mxu0 %v2125_v27  ;;  %820 = vmatpush1.bf16.msra.mxu1 %v2127_v28  ;;  %v2339_v46 = vld [vmem:[%s3353_s2] ss:$0 sm:$0xff]  ;;  %v327_v52 = vld [vmem:[%s3352_s1 + $0x48] sm:$0xff]  ;;  %v369_v27 = vld [vmem:[%s3352_s1 + $0x198] sm:$0xff]  ;;  %v2138_v33 = vcombine.high %v368_v22, %v372_v26 }
  0x1a   : > { %708 = vmatprep.subr.bf16.mxu0 %v2118_v29  ;;  %821 = vmatprep.subr.bf16.mxu1 %v2120_v30  ;;  %v326_v50 = vld [vmem:[%s3352_s1 + $0x40] sm:$0xff]  ;;  %v331_v53 = vld [vmem:[%s3352_s1 + $0x68] sm:$0xff]  ;;  %v255_v54 = vmul.f32 %v2339_v46, %v232_v44  ;;  %v256_v55 = vmul.f32 %v2339_v46, %v233_v45  ;;  %v257_v16 = vmul.f32 %v2339_v46, %v234_v4  ;;  %v373_v28 = vld [vmem:[%s3352_s1 + $0x1b8] sm:$0xff] }
  0x1b   : > { %v330_v51 = vld [vmem:[%s3352_s1 + $0x60] sm:$0xff]  ;;  %v2096_v60 = vcombine.high %v327_v52, %v331_v53  ;;  %v319_v63 = vld [vmem:[%s3352_s1 + $0x8] sm:$0xff]  ;;  %v2095_v6 = vcombine.low %v327_v52, %v331_v53  ;;  %v258_v17 = vmul.f32 %v2339_v46, %v235_v5  ;;  %v2145_v29 = vcombine.low %v376_v10, %v380_v11  ;;  %v365_v42 = vld [vmem:[%s3352_s1 + $0x178] sm:$0xff] }
  0x1c   : > { %v2358_v57 = vld [vmem:[%s3354_s3] ss:$0 sm:$0xff]  ;;  %v2094_v59 = vcombine.high %v326_v50, %v330_v51  ;;  %v323_v0 = vld [vmem:[%s3352_s1 + $0x28] sm:$0xff]  ;;  %v2093_v3 = vcombine.low %v326_v50, %v330_v51  ;;  %v2140_v34 = vcombine.high %v369_v27, %v373_v28  ;;  %v2139_v44 = vcombine.low %v369_v27, %v373_v28  ;;  %v238_v51 = vld [vmem:[%s2320_s14 + $0x30] sm:$0xff] }
  0x1d   : > { %709 = vmatpush1.bf16.msra.mxu0 %v2117_v35  ;;  %822 = vmatpush1.bf16.msra.mxu1 %v2119_v36  ;;  %v318_v61 = vld [vmem:[%s3352_s1] sm:$0xff]  ;;  %v278_v1 = vadd.f32 %v2358_v57, %v255_v54  ;;  %v279_v2 = vadd.f32 %v2358_v57, %v256_v55  ;;  %v2088_v9 = vcombine.high %v319_v63, %v323_v0  ;;  %v237_v31 = vld [vmem:[%s2320_s14 + $0x28] sm:$0xff]  ;;  %v360_v35 = vld [vmem:[%s3352_s1 + $0x150] sm:$0xff] }
  0x1e   : > { %710 = vmatprep.subr.bf16.mxu0 %v2110_v37  ;;  %823 = vmatprep.subr.bf16.mxu1 %v2112_v38  ;;  %v322_v62 = vld [vmem:[%s3352_s1 + $0x20] sm:$0xff]  ;;  %v2087_v19 = vcombine.low %v319_v63, %v323_v0  ;;  %v280_v24 = vadd.f32 %v2358_v57, %v257_v16  ;;  %v281_v25 = vadd.f32 %v2358_v57, %v258_v17  ;;  %v364_v36 = vld [vmem:[%s3352_s1 + $0x170] sm:$0xff]  ;;  %v239_v54 = vld [vmem:[%s2320_s14 + $0x38] sm:$0xff] }
  0x1f   : > { %v2086_v7 = vcombine.high %v318_v61, %v322_v62  ;;  %v294_v12 = vmax.f32 %v278_v1, 0.0  ;;  %v295_v13 = vmax.f32 %v279_v2, 0.0  ;;  %v2085_v18 = vcombine.low %v318_v61, %v322_v62  ;;  %v236_v30 = vld [vmem:[%s2320_s14 + $0x20] sm:$0xff]  ;;  %v352_v52 = vld [vmem:[%s3352_s1 + $0x110] sm:$0xff]  ;;  %v353_v55 = vld [vmem:[%s3352_s1 + $0x118] sm:$0xff] }
  0x20   : > { %v296_v37 = vmax.f32 %v280_v24, 0.0  ;;  %v297_v38 = vmax.f32 %v281_v25, 0.0  ;;  %v259_v39 = vmul.f32 %v2339_v46, %v236_v30  ;;  %v260_v40 = vmul.f32 %v2339_v46, %v237_v31  ;;  %v356_v53 = vld [vmem:[%s3352_s1 + $0x130] sm:$0xff]  ;;  %v345_v4 = vld [vmem:[%s3352_s1 + $0xd8] sm:$0xff]  ;;  %v241_v17 = vld [vmem:[%s2320_s14 + $0x48] sm:$0xff] }
  0x21   : > { %711 = vmatpush1.bf16.msra.mxu0 %v2109_v43  ;;  %824 = vmatpush1.bf16.msra.mxu1 %v2111_v47  ;;  %v2393_v23 = vpack.c.bf16 %v295_v13, %v294_v12  ;;  %v2137_v43 = vcombine.low %v368_v22, %v372_v26  ;;  %v2130_v45 = vcombine.high %v360_v35, %v364_v36  ;;  %v344_v2 = vld [vmem:[%s3352_s1 + $0xd0] sm:$0xff]  ;;  %v349_v5 = vld [vmem:[%s3352_s1 + $0xf8] sm:$0xff]  ;;  %v240_v13 = vld [vmem:[%s2320_s14 + $0x40] sm:$0xff] }
  0x22   : > { %712 = vmatprep.subr.bf16.mxu0 %v2102_v48  ;;  %825 = vmatprep.subr.bf16.mxu1 %v2104_v49  ;;  %v2132_v47 = vcombine.high %v361_v41, %v365_v42  ;;  %v2426_v48 = vpack.c.bf16 %v297_v38, %v296_v37  ;;  %v282_v49 = vadd.f32 %v2358_v57, %v259_v39  ;;  %v336_v15 = vld [vmem:[%s3352_s1 + $0x90] sm:$0xff]  ;;  %v329_v31 = vld [vmem:[%s3352_s1 + $0x58] sm:$0xff] }
  0x23   : > { %v283_v50 = vadd.f32 %v2358_v57, %v260_v40  ;;  %v2122_v61 = vcombine.high %v352_v52, %v356_v53  ;;  %v262_v0 = vmul.f32 %v2339_v46, %v239_v54  ;;  %v2116_v14 = vcombine.high %v345_v4, %v349_v5  ;;  %v340_v16 = vld [vmem:[%s3352_s1 + $0xb0] sm:$0xff] }
  0x24   : > { %v298_v62 = vmax.f32 %v282_v49, 0.0  ;;  %v2115_v22 = vcombine.low %v345_v4, %v349_v5  ;;  %v2106_v24 = vcombine.high %v336_v15, %v340_v16  ;;  %v264_v27 = vmul.f32 %v2339_v46, %v241_v17  ;;  %v332_v30 = vld [vmem:[%s3352_s1 + $0x70] sm:$0xff] }
  0x25   : > { %713 = vmatpush1.bf16.msra.mxu0 %v2101_v56  ;;  %826 = vmatpush1.bf16.msra.mxu1 %v2103_v58  ;;  %v357_v56 = vld [vmem:[%s3352_s1 + $0x138] sm:$0xff]  ;;  %v2129_v58 = vcombine.low %v360_v35, %v364_v36  ;;  %v299_v63 = vmax.f32 %v283_v50, 0.0  ;;  %v285_v12 = vadd.f32 %v2358_v57, %v262_v0  ;;  %v242_v39 = vld [vmem:[%s2320_s14 + $0x50] sm:$0xff] }
  0x26   : > { %714 = vmatprep.subr.bf16.mxu0 %v2094_v59  ;;  %827 = vmatprep.subr.bf16.mxu1 %v2096_v60  ;;  %v2131_v59 = vcombine.low %v361_v41, %v365_v42  ;;  %v261_v60 = vmul.f32 %v2339_v46, %v238_v51  ;;  %v2124_v1 = vcombine.high %v353_v55, %v357_v56  ;;  %v320_v41 = vld [vmem:[%s3352_s1 + $0x10] sm:$0xff] }
  0x27   : > { %v2462_v10 = vpack.c.bf16 %v299_v63, %v298_v62  ;;  %v301_v26 = vmax.f32 %v285_v12, 0.0  ;;  %v287_v38 = vadd.f32 %v2358_v57, %v264_v27  ;;  %v324_v42 = vld [vmem:[%s3352_s1 + $0x30] sm:$0xff]  ;;  %v265_v49 = vmul.f32 %v2339_v46, %v242_v39  ;;  %v244_v62 = vld [vmem:[%s2320_s14 + $0x60] sm:$0xff]  ;;  %v245_v63 = vld [vmem:[%s2320_s14 + $0x68] sm:$0xff] }
  0x28   : > { %v284_v11 = vadd.f32 %v2358_v57, %v261_v60  ;;  %v2090_v51 = vcombine.high %v320_v41, %v324_v42 }
  0x29   : > { %715 = vmatpush1.bf16.msra.mxu0 %v2093_v3  ;;  %828 = vmatpush1.bf16.msra.mxu1 %v2095_v6  ;;  %v348_v3 = vld [vmem:[%s3352_s1 + $0xf0] sm:$0xff]  ;;  %v2121_v6 = vcombine.low %v352_v52, %v356_v53  ;;  %v303_v53 = vmax.f32 %v287_v38, 0.0  ;;  %v288_v60 = vadd.f32 %v2358_v57, %v265_v49 }
  0x2a   : > { %716 = vmatprep.subr.bf16.mxu0 %v2086_v7  ;;  %829 = vmatprep.subr.bf16.mxu1 %v2088_v9  ;;  %v2123_v7 = vcombine.low %v353_v55, %v357_v56  ;;  %v2114_v9 = vcombine.high %v344_v2, %v348_v3  ;;  %v300_v25 = vmax.f32 %v284_v11, 0.0  ;;  %v2089_v56 = vcombine.low %v320_v41, %v324_v42 }
  0x2b   : > { %v304_v0 = vmax.f32 %v288_v60, 0.0 }
  0x2c   : > { %v2498_v36 = vpack.c.bf16 %v301_v26, %v300_v25 }
  0x2d   : > { %717 = vmatpush1.bf16.msra.mxu0 %v2085_v18  ;;  %830 = vmatpush1.bf16.msra.mxu1 %v2087_v19  ;;  %v337_v18 = vld [vmem:[%s3352_s1 + $0x98] sm:$0xff] }
  0x2e   : > { %928 = vmatprep.subr.bf16.mxu0 %v2146_v20  ;;  %1041 = vmatprep.subr.bf16.mxu1 %v2148_v21  ;;  %v341_v19 = vld [vmem:[%s3352_s1 + $0xb8] sm:$0xff]  ;;  %v2113_v20 = vcombine.low %v344_v2, %v348_v3  ;;  %v263_v21 = vmul.f32 %v2339_v46, %v240_v13  ;;  %v267_v2 = vmul.f32 %v2339_v46, %v244_v62 }
  0x2f   : > { %v2108_v28 = vcombine.high %v337_v18, %v341_v19  ;;  %v268_v3 = vmul.f32 %v2339_v46, %v245_v63 }
  0x30   : > { %735 = vmatmul.mubr.bf16.vlgmr.msra.gmra.mxu0 %v2393_v23  ;;  %848 = vmatmul.mubr.bf16.vlgmr.msra.gmra.mxu1 %v2393_v23  ;;  %v286_v37 = vadd.f32 %v2358_v57, %v263_v21  ;;  %v290_v5 = vadd.f32 %v2358_v57, %v267_v2 }
  0x31   : > { %929 = vmatpush1.bf16.msra.mxu0 %v2145_v29  ;;  %1042 = vmatpush1.bf16.msra.mxu1 %v2147_v32  ;;  %v328_v29 = vld [vmem:[%s3352_s1 + $0x50] sm:$0xff]  ;;  %v333_v32 = vld [vmem:[%s3352_s1 + $0x78] sm:$0xff] }
  0x32   : > { %744 = vmatprep.mubr.bf16.mxu0 %v2202_v8  ;;  %857 = vmatprep.mubr.bf16.mxu1 %v2202_v8  ;;  %v2098_v35 = vcombine.high %v328_v29, %v332_v30  ;;  %v2100_v40 = vcombine.high %v329_v31, %v333_v32  ;;  %v2099_v50 = vcombine.low %v329_v31, %v333_v32  ;;  %v302_v52 = vmax.f32 %v286_v37, 0.0 }
  0x33   : > { %930 = vmatprep.subr.bf16.mxu0 %v2138_v33  ;;  %1043 = vmatprep.subr.bf16.mxu1 %v2140_v34  ;;  %v2105_v33 = vcombine.low %v336_v15, %v340_v16  ;;  %v2107_v34 = vcombine.low %v337_v18, %v341_v19  ;;  %v306_v11 = vmax.f32 %v290_v5, 0.0 }
  0x35   : > { %931 = vmatpush1.bf16.msra.mxu0 %v2137_v43  ;;  %1044 = vmatpush1.bf16.msra.mxu1 %v2139_v44  ;;  %v243_v43 = vld [vmem:[%s2320_s14 + $0x58] sm:$0xff] }
  0x36   : > { %932 = vmatprep.subr.bf16.mxu0 %v2130_v45  ;;  %1045 = vmatprep.subr.bf16.mxu1 %v2132_v47  ;;  %v321_v44 = vld [vmem:[%s3352_s1 + $0x18] sm:$0xff]  ;;  %v2097_v47 = vcombine.low %v328_v29, %v332_v30  ;;  %v266_v54 = vmul.f32 %v2339_v46, %v243_v43 }
  0x37   : > { %v325_v45 = vld [vmem:[%s3352_s1 + $0x38] sm:$0xff] }
  0x38   : > { %745 = vmatmul.mubr.bf16.gmra.mxu0 %v2426_v48  ;;  %858 = vmatmul.mubr.bf16.gmra.mxu1 %v2426_v48  ;;  %v2092_v55 = vcombine.high %v321_v44, %v325_v45 }
  0x39   : > { %754 = vmatprep.mubr.bf16.mxu0 %v2202_v8  ;;  %867 = vmatprep.mubr.bf16.mxu1 %v2202_v8 }
  0x3a   : > { %933 = vmatpush1.bf16.msra.mxu0 %v2129_v58  ;;  %1046 = vmatpush1.bf16.msra.mxu1 %v2131_v59  ;;  %v2091_v58 = vcombine.low %v321_v44, %v325_v45  ;;  %v314_v59 = vpack.c.bf16 %v303_v53, %v302_v52 }
  0x3b   : > { %934 = vmatprep.subr.bf16.mxu0 %v2122_v61  ;;  %1047 = vmatprep.subr.bf16.mxu1 %v2124_v1  ;;  %v289_v61 = vadd.f32 %v2358_v57, %v266_v54 }
  0x3d   : > { %v305_v1 = vmax.f32 %v289_v61, 0.0 }
  0x3e   : > { %935 = vmatpush1.bf16.msra.mxu0 %v2121_v6  ;;  %1048 = vmatpush1.bf16.msra.mxu1 %v2123_v7  ;;  %v291_v6 = vadd.f32 %v2358_v57, %v268_v3  ;;  %v246_v7 = vld [vmem:[%s2320_s14 + $0x70] sm:$0xff] }
  0x3f   : > { %936 = vmatprep.subr.bf16.mxu0 %v2114_v9  ;;  %1049 = vmatprep.subr.bf16.mxu1 %v2116_v14  ;;  %v315_v4 = vpack.c.bf16 %v305_v1, %v304_v0  ;;  %v247_v9 = vld [vmem:[%s2320_s14 + $0x78] sm:$0xff]  ;;  %v269_v13 = vmul.f32 %v2339_v46, %v246_v7  ;;  %s2152_s14 = sshll.u32 %s3361_s15, 5 }
  0x40   : > { %755 = vmatmul.mubr.bf16.gmra.mxu0 %v2462_v10  ;;  %868 = vmatmul.mubr.bf16.gmra.mxu1 %v2462_v10  ;;  %v307_v12 = vmax.f32 %v291_v6, 0.0  ;;  %v270_v14 = vmul.f32 %v2339_v46, %v247_v9  ;;  %s2922_s28 = scalar_lea.vmem %s3355_s4, %s2152_s14 }
  0x41   : > { %764 = vmatprep.mubr.bf16.mxu0 %v2202_v8  ;;  %877 = vmatprep.mubr.bf16.mxu1 %v2202_v8  ;;  %v292_v16 = vadd.f32 %v2358_v57, %v269_v13 }
  0x42   : > { %937 = vmatpush1.bf16.msra.mxu0 %v2113_v20  ;;  %1050 = vmatpush1.bf16.msra.mxu1 %v2115_v22  ;;  %v316_v15 = vpack.c.bf16 %v307_v12, %v306_v11  ;;  %v293_v17 = vadd.f32 %v2358_v57, %v270_v14 }
  0x43   : > { %938 = vmatprep.subr.bf16.mxu0 %v2106_v24  ;;  %1051 = vmatprep.subr.bf16.mxu1 %v2108_v28  ;;  %v308_v18 = vmax.f32 %v292_v16, 0.0 }
  0x44   : > { %v309_v19 = vmax.f32 %v293_v17, 0.0 }
  0x46   : > { %939 = vmatpush1.bf16.msra.mxu0 %v2105_v33  ;;  %1052 = vmatpush1.bf16.msra.mxu1 %v2107_v34  ;;  %v317_v20 = vpack.c.bf16 %v309_v19, %v308_v18 }
  0x47   : > { %940 = vmatprep.subr.bf16.mxu0 %v2098_v35  ;;  %1053 = vmatprep.subr.bf16.mxu1 %v2100_v40 }
  0x48   : > { %765 = vmatmul.mubr.bf16.gmra.mxu0 %v2498_v36  ;;  %878 = vmatmul.mubr.bf16.gmra.mxu1 %v2498_v36 }
  0x49   : > { %774 = vmatprep.mubr.bf16.mxu0 %v2202_v8  ;;  %887 = vmatprep.mubr.bf16.mxu1 %v2202_v8 }
  0x4a   : > { %941 = vmatpush1.bf16.msra.mxu0 %v2097_v47  ;;  %1054 = vmatpush1.bf16.msra.mxu1 %v2099_v50 }
  0x4b   : > { %942 = vmatprep.subr.bf16.mxu0 %v2090_v51  ;;  %1055 = vmatprep.subr.bf16.mxu1 %v2092_v55 }
  0x4e   : > { %943 = vmatpush1.bf16.msra.mxu0 %v2089_v56  ;;  %1056 = vmatpush1.bf16.msra.mxu1 %v2091_v58 }
  0x50   : > { %775 = vmatmul.mubr.bf16.gmra.mxu0 %v314_v59  ;;  %888 = vmatmul.mubr.bf16.gmra.mxu1 %v314_v59 }
  0x51   : > { %784 = vmatprep.mubr.bf16.mxu0 %v2202_v8  ;;  %897 = vmatprep.mubr.bf16.mxu1 %v2202_v8 }
  0x58   : > { %785 = vmatmul.mubr.bf16.gmra.mxu0 %v315_v4  ;;  %898 = vmatmul.mubr.bf16.gmra.mxu1 %v315_v4 }
  0x59   : > { %794 = vmatprep.mubr.bf16.mxu0 %v2202_v8  ;;  %907 = vmatprep.mubr.bf16.mxu1 %v2202_v8 }
  0x60   : > { %795 = vmatmul.mubr.bf16.gmra.mxu0 %v316_v15  ;;  %908 = vmatmul.mubr.bf16.gmra.mxu1 %v316_v15 }
  0x61   : > { %804 = vmatprep.mubr.bf16.mxu0 %v2202_v8  ;;  %917 = vmatprep.mubr.bf16.mxu1 %v2202_v8 }
  0x68   : > { %805 = vmatmul.mubr.bf16.gmra.mxu0 %v317_v20  ;;  %918 = vmatmul.mubr.bf16.gmra.mxu1 %v317_v20 }
  0x69   : > { %960 = vmatprep.mubr.bf16.mxu0 %v2202_v8  ;;  %1073 = vmatprep.mubr.bf16.mxu1 %v2202_v8 }
  0x70   : > { %961 = vmatmul.mubr.bf16.vlgmr.msra.gmra.mxu0 %v2393_v23  ;;  %1074 = vmatmul.mubr.bf16.vlgmr.msra.gmra.mxu1 %v2393_v23 }
  0x71   : > { %970 = vmatprep.mubr.bf16.mxu0 %v2202_v8  ;;  %1083 = vmatprep.mubr.bf16.mxu1 %v2202_v8 }
  0x78   : > { %971 = vmatmul.mubr.bf16.gmra.mxu0 %v2426_v48  ;;  %1084 = vmatmul.mubr.bf16.gmra.mxu1 %v2426_v48 }
  0x79   : > { %980 = vmatprep.mubr.bf16.mxu0 %v2202_v8  ;;  %1093 = vmatprep.mubr.bf16.mxu1 %v2202_v8 }
  0x80   : > { %981 = vmatmul.mubr.bf16.gmra.mxu0 %v2462_v10  ;;  %1094 = vmatmul.mubr.bf16.gmra.mxu1 %v2462_v10 }
  0x81   : > { %990 = vmatprep.mubr.bf16.mxu0 %v2202_v8  ;;  %1103 = vmatprep.mubr.bf16.mxu1 %v2202_v8 }
  0x88   : > { %991 = vmatmul.mubr.bf16.gmra.mxu0 %v2498_v36  ;;  %1104 = vmatmul.mubr.bf16.gmra.mxu1 %v2498_v36 }
  0x89   : > { %1000 = vmatprep.mubr.bf16.mxu0 %v2202_v8  ;;  %1113 = vmatprep.mubr.bf16.mxu1 %v2202_v8 }
  0x90   : > { %1001 = vmatmul.mubr.bf16.gmra.mxu0 %v314_v59  ;;  %1114 = vmatmul.mubr.bf16.gmra.mxu1 %v314_v59 }
  0x91   : > { %1010 = vmatprep.mubr.bf16.mxu0 %v2202_v8  ;;  %1123 = vmatprep.mubr.bf16.mxu1 %v2202_v8 }
  0x98   : > { %1011 = vmatmul.mubr.bf16.gmra.mxu0 %v315_v4  ;;  %1124 = vmatmul.mubr.bf16.gmra.mxu1 %v315_v4 }
  0x99   : > { %1020 = vmatprep.mubr.bf16.mxu0 %v2202_v8  ;;  %1133 = vmatprep.mubr.bf16.mxu1 %v2202_v8 }
  0xa0   : > { %1021 = vmatmul.mubr.bf16.gmra.mxu0 %v316_v15  ;;  %1134 = vmatmul.mubr.bf16.gmra.mxu1 %v316_v15 }
  0xa1   : > { %1030 = vmatprep.mubr.bf16.mxu0 %v2202_v8  ;;  %1143 = vmatprep.mubr.bf16.mxu1 %v2202_v8 }
  0xa8   : > { %1031 = vmatmul.mubr.bf16.gmra.mxu0 %v317_v20  ;;  %1144 = vmatmul.mubr.bf16.gmra.mxu1 %v317_v20 }
  0xf0   : > { %v736_v46 = vpop.f32.mrf.mxu0  ;;  %v849_v57 = vpop.f32.mrf.mxu1 }
  0xf1   : > { %v1322_v24 = vmul.f32 %v736_v46, %v736_v46  ;;  %v1324_v25 = vmul.f32 %v849_v57, %v849_v57 }
  0xf2   : > { %v738_v23 = vpop.f32.mrf.mxu0  ;;  %v851_v48 = vpop.f32.mrf.mxu1 }
  0xf3   : > { %v1323_v28 = vmul.f32 %v738_v23, %v738_v23  ;;  %v1325_v29 = vmul.f32 %v851_v48, %v851_v48 }
  0xf4   : > { %v740_v10 = vpop.f32.mrf.mxu0  ;;  %v853_v22 = vpop.f32.mrf.mxu1 }
  0xf5   : > { %v1330_v21 = vmul.f32 %v740_v10, %v740_v10  ;;  %v1332_v26 = vmul.f32 %v853_v22, %v853_v22  ;;  %v1154_v30 = vadd.f32 %v740_v10, %v736_v46  ;;  %v1618_v33 = vmax.f32 %v736_v46, %v740_v10 }
  0xf6   : > { %v742_v27 = vpop.f32.mrf.mxu0  ;;  %v855_v32 = vpop.f32.mrf.mxu1  ;;  %v1786_v8 = vmin.f32 %v736_v46, %v740_v10  ;;  %v1196_v34 = vadd.f32 %v853_v22, %v849_v57  ;;  %v1660_v38 = vmax.f32 %v849_v57, %v853_v22  ;;  %v1828_v39 = vmin.f32 %v849_v57, %v853_v22 }
  0xf7   : > { %v1331_v31 = vmul.f32 %v742_v27, %v742_v27  ;;  %v1333_v35 = vmul.f32 %v855_v32, %v855_v32  ;;  %v1450_v37 = vadd.f32 %v1330_v21, %v1322_v24  ;;  %v1175_v40 = vadd.f32 %v742_v27, %v738_v23 }
  0xf8   : > { %v746_v36 = vpop.f32.mrf.mxu0  ;;  %v859_v41 = vpop.f32.mrf.mxu1  ;;  %v1492_v42 = vadd.f32 %v1332_v26, %v1324_v25  ;;  %v1639_v43 = vmax.f32 %v738_v23, %v742_v27  ;;  %v1807_v44 = vmin.f32 %v738_v23, %v742_v27  ;;  %v1217_v50 = vadd.f32 %v855_v32, %v851_v48 }
  0xf9   : > { %v1338_v45 = vmul.f32 %v746_v36, %v746_v36  ;;  %v1471_v49 = vadd.f32 %v1331_v31, %v1323_v28  ;;  %v1681_v51 = vmax.f32 %v851_v48, %v855_v32  ;;  %v1340_v52 = vmul.f32 %v859_v41, %v859_v41 }
  0xfa   : > { %v748_v47 = vpop.f32.mrf.mxu0  ;;  %v861_v53 = vpop.f32.mrf.mxu1  ;;  %v1513_v54 = vadd.f32 %v1333_v35, %v1325_v29  ;;  %v1849_v55 = vmin.f32 %v851_v48, %v855_v32  ;;  %v1155_v56 = vadd.f32 %v1154_v30, %v746_v36  ;;  %v1619_v60 = vmax.f32 %v1618_v33, %v746_v36 }
  0xfb   : > { %v1339_v58 = vmul.f32 %v748_v47, %v748_v47  ;;  %v1787_v61 = vmin.f32 %v1786_v8, %v746_v36  ;;  %v1197_v62 = vadd.f32 %v1196_v34, %v859_v41  ;;  %v1341_v63 = vmul.f32 %v861_v53, %v861_v53 }
  0xfc   : > { %v750_v59 = vpop.f32.mrf.mxu0  ;;  %v863_v0 = vpop.f32.mrf.mxu1  ;;  %v1451_v1 = vadd.f32 %v1450_v37, %v1338_v45  ;;  %v1661_v2 = vmax.f32 %v1660_v38, %v859_v41  ;;  %v1829_v3 = vmin.f32 %v1828_v39, %v859_v41  ;;  %v1176_v4 = vadd.f32 %v1175_v40, %v748_v47 }
  0xfd   : > { %v1493_v6 = vadd.f32 %v1492_v42, %v1340_v52  ;;  %v1640_v7 = vmax.f32 %v1639_v43, %v748_v47  ;;  %v1808_v9 = vmin.f32 %v1807_v44, %v748_v47  ;;  %v1346_v11 = vmul.f32 %v750_v59, %v750_v59 }
  0xfe   : > { %v752_v5 = vpop.f32.mrf.mxu0  ;;  %v865_v12 = vpop.f32.mrf.mxu1  ;;  %v1472_v13 = vadd.f32 %v1471_v49, %v1339_v58  ;;  %v1218_v14 = vadd.f32 %v1217_v50, %v861_v53  ;;  %v1682_v15 = vmax.f32 %v1681_v51, %v861_v53  ;;  %v1348_v16 = vmul.f32 %v863_v0, %v863_v0 }
  0xff   : > { %v1514_v18 = vadd.f32 %v1513_v54, %v1341_v63  ;;  %v1850_v19 = vmin.f32 %v1849_v55, %v861_v53  ;;  %v1156_v20 = vadd.f32 %v1155_v56, %v750_v59  ;;  %v1347_v46 = vmul.f32 %v752_v5, %v752_v5 }
 0x100   : > { %v756_v17 = vpop.f32.mrf.mxu0  ;;  %v869_v57 = vpop.f32.mrf.mxu1  ;;  %v1620_v23 = vmax.f32 %v1619_v60, %v750_v59  ;;  %v1788_v48 = vmin.f32 %v1787_v61, %v750_v59  ;;  %v1198_v10 = vadd.f32 %v1197_v62, %v863_v0  ;;  %v1349_v21 = vmul.f32 %v865_v12, %v865_v12 }
 0x101   : > { %v1452_v24 = vadd.f32 %v1451_v1, %v1346_v11  ;;  %v1662_v25 = vmax.f32 %v1661_v2, %v863_v0  ;;  %v1830_v26 = vmin.f32 %v1829_v3, %v863_v0  ;;  %v1177_v27 = vadd.f32 %v1176_v4, %v752_v5 }
 0x102   : > { %v758_v22 = vpop.f32.mrf.mxu0  ;;  %v871_v28 = vpop.f32.mrf.mxu1  ;;  %v1494_v29 = vadd.f32 %v1493_v6, %v1348_v16  ;;  %v1641_v30 = vmax.f32 %v1640_v7, %v752_v5  ;;  %v1809_v31 = vmin.f32 %v1808_v9, %v752_v5  ;;  %v1354_v32 = vmul.f32 %v756_v17, %v756_v17 }
 0x103   : > { %v1473_v8 = vadd.f32 %v1472_v13, %v1347_v46  ;;  %v1219_v34 = vadd.f32 %v1218_v14, %v865_v12  ;;  %v1683_v35 = vmax.f32 %v1682_v15, %v865_v12  ;;  %v1356_v36 = vmul.f32 %v869_v57, %v869_v57 }
 0x104   : > { %v2566_v33 = vpop.f32.mrf.mxu0  ;;  %v2568_v37 = vpop.f32.mrf.mxu1  ;;  %v1515_v38 = vadd.f32 %v1514_v18, %v1349_v21  ;;  %v1851_v39 = vmin.f32 %v1850_v19, %v865_v12  ;;  %v1157_v40 = vadd.f32 %v1156_v20, %v756_v17  ;;  %v1355_v41 = vmul.f32 %v758_v22, %v758_v22 }
 0x105   : > { %v1621_v43 = vmax.f32 %v1620_v23, %v756_v17  ;;  %v1789_v44 = vmin.f32 %v1788_v48, %v756_v17  ;;  %v1199_v45 = vadd.f32 %v1198_v10, %v869_v57  ;;  %v1357_v47 = vmul.f32 %v871_v28, %v871_v28 }
 0x106   : > { %v2570_v42 = vpop.f32.mrf.mxu0  ;;  %v2572_v49 = vpop.f32.mrf.mxu1  ;;  %v1453_v50 = vadd.f32 %v1452_v24, %v1354_v32  ;;  %v1663_v51 = vmax.f32 %v1662_v25, %v869_v57  ;;  %v1831_v52 = vmin.f32 %v1830_v26, %v869_v57  ;;  %v1178_v53 = vadd.f32 %v1177_v27, %v758_v22 }
 0x107   : > { %v1495_v55 = vadd.f32 %v1494_v29, %v1356_v36  ;;  %v1642_v56 = vmax.f32 %v1641_v30, %v758_v22  ;;  %v1810_v58 = vmin.f32 %v1809_v31, %v758_v22  ;;  %v1362_v59 = vmul.f32 %v2566_v33, %v2566_v33 }
 0x108   : > { %v766_v54 = vpop.f32.mrf.mxu0  ;;  %v879_v60 = vpop.f32.mrf.mxu1  ;;  %v1474_v61 = vadd.f32 %v1473_v8, %v1355_v41  ;;  %v1220_v62 = vadd.f32 %v1219_v34, %v871_v28  ;;  %v1684_v63 = vmax.f32 %v1683_v35, %v871_v28  ;;  %v1364_v0 = vmul.f32 %v2568_v37, %v2568_v37 }
 0x109   : > { %v1516_v2 = vadd.f32 %v1515_v38, %v1357_v47  ;;  %v1852_v3 = vmin.f32 %v1851_v39, %v871_v28  ;;  %v1158_v4 = vadd.f32 %v1157_v40, %v2566_v33  ;;  %v1363_v5 = vmul.f32 %v2570_v42, %v2570_v42 }
 0x10a   : > { %v768_v1 = vpop.f32.mrf.mxu0  ;;  %v881_v6 = vpop.f32.mrf.mxu1  ;;  %v1622_v7 = vmax.f32 %v1621_v43, %v2566_v33  ;;  %v1790_v9 = vmin.f32 %v1789_v44, %v2566_v33  ;;  %v1200_v11 = vadd.f32 %v1199_v45, %v2568_v37  ;;  %v1365_v12 = vmul.f32 %v2572_v49, %v2572_v49 }
 0x10b   : > { %v1454_v14 = vadd.f32 %v1453_v50, %v1362_v59  ;;  %v1664_v15 = vmax.f32 %v1663_v51, %v2568_v37  ;;  %v1832_v16 = vmin.f32 %v1831_v52, %v2568_v37  ;;  %v1179_v17 = vadd.f32 %v1178_v53, %v2570_v42 }
 0x10c   : > { %v2586_v13 = vpop.f32.mrf.mxu0  ;;  %v2591_v18 = vpop.f32.mrf.mxu1  ;;  %v1496_v19 = vadd.f32 %v1495_v55, %v1364_v0  ;;  %v1643_v20 = vmax.f32 %v1642_v56, %v2570_v42  ;;  %v1811_v46 = vmin.f32 %v1810_v58, %v2570_v42  ;;  %v1370_v57 = vmul.f32 %v766_v54, %v766_v54 }
 0x10d   : > { %v1475_v48 = vadd.f32 %v1474_v61, %v1363_v5  ;;  %v1221_v10 = vadd.f32 %v1220_v62, %v2572_v49  ;;  %v1685_v21 = vmax.f32 %v1684_v63, %v2572_v49  ;;  %v1372_v22 = vmul.f32 %v879_v60, %v879_v60 }
 0x10e   : > { %v2595_v23 = vpop.f32.mrf.mxu0  ;;  %v2599_v24 = vpop.f32.mrf.mxu1  ;;  %v1517_v25 = vadd.f32 %v1516_v2, %v1365_v12  ;;  %v1853_v26 = vmin.f32 %v1852_v3, %v2572_v49  ;;  %v1159_v27 = vadd.f32 %v1158_v4, %v766_v54  ;;  %v1371_v28 = vmul.f32 %v768_v1, %v768_v1 }
 0x10f   : > { %v1623_v30 = vmax.f32 %v1622_v7, %v766_v54  ;;  %v1791_v31 = vmin.f32 %v1790_v9, %v766_v54  ;;  %v1201_v32 = vadd.f32 %v1200_v11, %v879_v60  ;;  %v1373_v33 = vmul.f32 %v881_v6, %v881_v6 }
 0x110   : > { %v776_v29 = vpop.f32.mrf.mxu0  ;;  %v889_v8 = vpop.f32.mrf.mxu1  ;;  %v1455_v34 = vadd.f32 %v1454_v14, %v1370_v57  ;;  %v1665_v35 = vmax.f32 %v1664_v15, %v879_v60  ;;  %v1833_v36 = vmin.f32 %v1832_v16, %v879_v60  ;;  %v1180_v37 = vadd.f32 %v1179_v17, %v768_v1 }
 0x111   : > { %v1497_v39 = vadd.f32 %v1496_v19, %v1372_v22  ;;  %v1644_v40 = vmax.f32 %v1643_v20, %v768_v1  ;;  %v1812_v41 = vmin.f32 %v1811_v46, %v768_v1  ;;  %v1378_v42 = vmul.f32 %v2586_v13, %v2586_v13 }
 0x112   : > { %v778_v38 = vpop.f32.mrf.mxu0  ;;  %v891_v43 = vpop.f32.mrf.mxu1  ;;  %v1476_v44 = vadd.f32 %v1475_v48, %v1371_v28  ;;  %v1222_v45 = vadd.f32 %v1221_v10, %v881_v6  ;;  %v1686_v47 = vmax.f32 %v1685_v21, %v881_v6  ;;  %v1380_v49 = vmul.f32 %v2591_v18, %v2591_v18 }
 0x113   : > { %v1518_v51 = vadd.f32 %v1517_v25, %v1373_v33  ;;  %v1854_v52 = vmin.f32 %v1853_v26, %v881_v6  ;;  %v1160_v53 = vadd.f32 %v1159_v27, %v2586_v13  ;;  %v1379_v54 = vmul.f32 %v2595_v23, %v2595_v23 }
 0x114   : > { %v2606_v50 = vpop.f32.mrf.mxu0  ;;  %v2611_v55 = vpop.f32.mrf.mxu1  ;;  %v1624_v56 = vmax.f32 %v1623_v30, %v2586_v13  ;;  %v1792_v58 = vmin.f32 %v1791_v31, %v2586_v13  ;;  %v1202_v59 = vadd.f32 %v1201_v32, %v2591_v18  ;;  %v1381_v60 = vmul.f32 %v2599_v24, %v2599_v24 }
 0x115   : > { %v1456_v62 = vadd.f32 %v1455_v34, %v1378_v42  ;;  %v1666_v63 = vmax.f32 %v1665_v35, %v2591_v18  ;;  %v1834_v0 = vmin.f32 %v1833_v36, %v2591_v18  ;;  %v1181_v1 = vadd.f32 %v1180_v37, %v2595_v23 }
 0x116   : > { %v2618_v61 = vpop.f32.mrf.mxu0  ;;  %v2623_v2 = vpop.f32.mrf.mxu1  ;;  %v1498_v3 = vadd.f32 %v1497_v39, %v1380_v49  ;;  %v1645_v4 = vmax.f32 %v1644_v40, %v2595_v23  ;;  %v1813_v5 = vmin.f32 %v1812_v41, %v2595_v23  ;;  %v1386_v6 = vmul.f32 %v776_v29, %v776_v29 }
 0x117   : > { %v1477_v9 = vadd.f32 %v1476_v44, %v1379_v54  ;;  %v1223_v11 = vadd.f32 %v1222_v45, %v2599_v24  ;;  %v1687_v12 = vmax.f32 %v1686_v47, %v2599_v24  ;;  %v1388_v13 = vmul.f32 %v889_v8, %v889_v8 }
 0x118   : > { %v786_v7 = vpop.f32.mrf.mxu0  ;;  %v2629_v14 = vpop.f32.mrf.mxu1  ;;  %v1519_v15 = vadd.f32 %v1518_v51, %v1381_v60  ;;  %v1855_v16 = vmin.f32 %v1854_v52, %v2599_v24  ;;  %v1161_v17 = vadd.f32 %v1160_v53, %v776_v29  ;;  %v1387_v18 = vmul.f32 %v778_v38, %v778_v38 }
 0x119   : > { %v1625_v20 = vmax.f32 %v1624_v56, %v776_v29  ;;  %v1793_v46 = vmin.f32 %v1792_v58, %v776_v29  ;;  %v1203_v57 = vadd.f32 %v1202_v59, %v889_v8  ;;  %v1389_v23 = vmul.f32 %v891_v43, %v891_v43 }
 0x11a   : > { %v2632_v19 = vpop.f32.mrf.mxu0  ;;  %v2634_v48 = vpop.f32.mrf.mxu1  ;;  %v1457_v10 = vadd.f32 %v1456_v62, %v1386_v6  ;;  %v1667_v21 = vmax.f32 %v1666_v63, %v889_v8  ;;  %v1835_v22 = vmin.f32 %v1834_v0, %v889_v8  ;;  %v1182_v25 = vadd.f32 %v1181_v1, %v778_v38 }
 0x11b   : > { %v1499_v27 = vadd.f32 %v1498_v3, %v1388_v13  ;;  %v1646_v28 = vmax.f32 %v1645_v4, %v778_v38  ;;  %v1814_v30 = vmin.f32 %v1813_v5, %v778_v38  ;;  %v1394_v24 = vmul.f32 %v2606_v50, %v2606_v50 }
 0x11c   : > { %v2636_v26 = vpop.f32.mrf.mxu0  ;;  %v2640_v31 = vpop.f32.mrf.mxu1  ;;  %v1478_v32 = vadd.f32 %v1477_v9, %v1387_v18  ;;  %v1224_v29 = vadd.f32 %v1223_v11, %v891_v43  ;;  %v1688_v33 = vmax.f32 %v1687_v12, %v891_v43  ;;  %v1396_v34 = vmul.f32 %v2611_v55, %v2611_v55 }
 0x11d   : > { %v1520_v8 = vadd.f32 %v1519_v15, %v1389_v23  ;;  %v1856_v36 = vmin.f32 %v1855_v16, %v891_v43  ;;  %v1162_v37 = vadd.f32 %v1161_v17, %v2606_v50  ;;  %v1395_v38 = vmul.f32 %v2618_v61, %v2618_v61 }
 0x11e   : > { %v2644_v35 = vpop.f32.mrf.mxu0  ;;  %v2649_v39 = vpop.f32.mrf.mxu1  ;;  %v1626_v40 = vmax.f32 %v1625_v20, %v2606_v50  ;;  %v1794_v41 = vmin.f32 %v1793_v46, %v2606_v50  ;;  %v1204_v42 = vadd.f32 %v1203_v57, %v2611_v55  ;;  %v1397_v44 = vmul.f32 %v2623_v2, %v2623_v2 }
 0x11f   : > { %v1458_v47 = vadd.f32 %v1457_v10, %v1394_v24  ;;  %v1668_v43 = vmax.f32 %v1667_v21, %v2611_v55  ;;  %v1836_v49 = vmin.f32 %v1835_v22, %v2611_v55  ;;  %v1183_v51 = vadd.f32 %v1182_v25, %v2618_v61 }
 0x120   : > { %v2656_v45 = vpop.f32.mrf.mxu0  ;;  %v2661_v52 = vpop.f32.mrf.mxu1  ;;  %v1500_v53 = vadd.f32 %v1499_v27, %v1396_v34  ;;  %v1647_v54 = vmax.f32 %v1646_v28, %v2618_v61  ;;  %v1815_v50 = vmin.f32 %v1814_v30, %v2618_v61  ;;  %v1402_v56 = vmul.f32 %v786_v7, %v786_v7 }
 0x121   : > { %v1479_v59 = vadd.f32 %v1478_v32, %v1395_v38  ;;  %v1225_v60 = vadd.f32 %v1224_v29, %v2623_v2  ;;  %v1689_v62 = vmax.f32 %v1688_v33, %v2623_v2  ;;  %v1404_v55 = vmul.f32 %v2629_v14, %v2629_v14 }
 0x122   : > { %v2665_v58 = vpop.f32.mrf.mxu0  ;;  %v2671_v63 = vpop.f32.mrf.mxu1  ;;  %v1521_v0 = vadd.f32 %v1520_v8, %v1397_v44  ;;  %v1857_v1 = vmin.f32 %v1856_v36, %v2623_v2  ;;  %v1163_v3 = vadd.f32 %v1162_v37, %v786_v7  ;;  %v1403_v61 = vmul.f32 %v2632_v19, %v2632_v19 }
 0x123   : > { %v1627_v5 = vmax.f32 %v1626_v40, %v786_v7  ;;  %v1795_v6 = vmin.f32 %v1794_v41, %v786_v7  ;;  %v1205_v9 = vadd.f32 %v1204_v42, %v2629_v14  ;;  %v1405_v11 = vmul.f32 %v2634_v48, %v2634_v48 }
 0x124   : > { %v2676_v4 = vpop.f32.mrf.mxu0  ;;  %v2681_v12 = vpop.f32.mrf.mxu1  ;;  %v1459_v13 = vadd.f32 %v1458_v47, %v1402_v56  ;;  %v1669_v15 = vmax.f32 %v1668_v43, %v2629_v14  ;;  %v1837_v2 = vmin.f32 %v1836_v49, %v2629_v14  ;;  %v1184_v16 = vadd.f32 %v1183_v51, %v2632_v19 }
 0x125   : > { %v1501_v18 = vadd.f32 %v1500_v53, %v1404_v55  ;;  %v1648_v20 = vmax.f32 %v1647_v54, %v2632_v19  ;;  %v1816_v7 = vmin.f32 %v1815_v50, %v2632_v19  ;;  %v1410_v46 = vmul.f32 %v2636_v26, %v2636_v26 }
 0x126   : > { %v2686_v17 = vpop.f32.mrf.mxu0  ;;  %v2692_v57 = vpop.f32.mrf.mxu1  ;;  %v1480_v23 = vadd.f32 %v1479_v59, %v1403_v61  ;;  %v1226_v10 = vadd.f32 %v1225_v60, %v2634_v48  ;;  %v1690_v21 = vmax.f32 %v1689_v62, %v2634_v48  ;;  %v1412_v14 = vmul.f32 %v2640_v31, %v2640_v31 }
 0x127   : > { %v1522_v25 = vadd.f32 %v1521_v0, %v1405_v11  ;;  %v1858_v27 = vmin.f32 %v1857_v1, %v2634_v48  ;;  %v1164_v19 = vadd.f32 %v1163_v3, %v2636_v26  ;;  %v1411_v28 = vmul.f32 %v2644_v35, %v2644_v35 }
 0x128   : > { %v2698_v22 = vpop.f32.mrf.mxu0  ;;  %v2704_v30 = vpop.f32.mrf.mxu1  ;;  %v1628_v24 = vmax.f32 %v1627_v5, %v2636_v26  ;;  %v1796_v32 = vmin.f32 %v1795_v6, %v2636_v26  ;;  %v1206_v29 = vadd.f32 %v1205_v9, %v2640_v31  ;;  %v1413_v33 = vmul.f32 %v2649_v39, %v2649_v39 }
 0x129   : > { %v1460_v8 = vadd.f32 %v1459_v13, %v1410_v46  ;;  %v1670_v48 = vmax.f32 %v1669_v15, %v2640_v31  ;;  %v1838_v36 = vmin.f32 %v1837_v2, %v2640_v31  ;;  %v1185_v37 = vadd.f32 %v1184_v16, %v2644_v35 }
 0x12a   : > { %v2711_v34 = vpop.f32.mrf.mxu0  ;;  %v2716_v38 = vpop.f32.mrf.mxu1  ;;  %v1502_v40 = vadd.f32 %v1501_v18, %v1412_v14  ;;  %v1649_v41 = vmax.f32 %v1648_v20, %v2644_v35  ;;  %v1817_v26 = vmin.f32 %v1816_v7, %v2644_v35  ;;  %v1418_v42 = vmul.f32 %v2656_v45, %v2656_v45 }
 0x12b   : > { %v1481_v47 = vadd.f32 %v1480_v23, %v1411_v28  ;;  %v1227_v43 = vadd.f32 %v1226_v10, %v2649_v39  ;;  %v1691_v49 = vmax.f32 %v1690_v21, %v2649_v39  ;;  %v1420_v31 = vmul.f32 %v2661_v52, %v2661_v52 }
 0x12c   : > { %v2722_v44 = vpop.f32.mrf.mxu0  ;;  %v2728_v51 = vpop.f32.mrf.mxu1  ;;  %v1523_v53 = vadd.f32 %v1522_v25, %v1413_v33  ;;  %v1859_v54 = vmin.f32 %v1858_v27, %v2649_v39  ;;  %v1165_v35 = vadd.f32 %v1164_v19, %v2656_v45  ;;  %v1419_v50 = vmul.f32 %v2665_v58, %v2665_v58 }
 0x12d   : > { %v1629_v59 = vmax.f32 %v1628_v24, %v2656_v45  ;;  %v1797_v60 = vmin.f32 %v1796_v32, %v2656_v45  ;;  %v1207_v62 = vadd.f32 %v1206_v29, %v2661_v52  ;;  %v1421_v55 = vmul.f32 %v2671_v63, %v2671_v63 }
 0x12e   : > { %v2734_v56 = vpop.f32.mrf.mxu0  ;;  %v2741_v0 = vpop.f32.mrf.mxu1  ;;  %v1461_v1 = vadd.f32 %v1460_v8, %v1418_v42  ;;  %v1671_v39 = vmax.f32 %v1670_v48, %v2661_v52  ;;  %v1839_v3 = vmin.f32 %v1838_v36, %v2661_v52  ;;  %v1186_v61 = vadd.f32 %v1185_v37, %v2665_v58 }
 0x12f   : > { %v1503_v6 = vadd.f32 %v1502_v40, %v1420_v31  ;;  %v2749_v9 = vmax.f32 %v1649_v41, %v2665_v58  ;;  %v2752_v45 = vmin.f32 %v1817_v26, %v2665_v58  ;;  %v1426_v11 = vmul.f32 %v2676_v4, %v2676_v4 }
 0x130   : > { %v2746_v5 = vpop.f32.mrf.mxu0  ;;  %v2756_v13 = vpop.f32.mrf.mxu1  ;;  %v1482_v15 = vadd.f32 %v1481_v47, %v1419_v50  ;;  %v1228_v2 = vadd.f32 %v1227_v43, %v2671_v63  ;;  %v2760_v52 = vmax.f32 %v1691_v49, %v2671_v63  ;;  %v1428_v16 = vmul.f32 %v2681_v12, %v2681_v12 }
 0x131   : > { %v1524_v20 = vadd.f32 %v1523_v53, %v1421_v55  ;;  %v2767_v58 = vmin.f32 %v1859_v54, %v2671_v63  ;;  %v1166_v7 = vadd.f32 %v1165_v35, %v2676_v4  ;;  %v1427_v46 = vmul.f32 %v2686_v17, %v2686_v17 }
 0x132   : > { %v2764_v18 = vpop.f32.mrf.mxu0  ;;  %v2772_v23 = vpop.f32.mrf.mxu1  ;;  %v1630_v10 = vmax.f32 %v1629_v59, %v2676_v4  ;;  %v1798_v21 = vmin.f32 %v1797_v60, %v2676_v4  ;;  %v1208_v14 = vadd.f32 %v1207_v62, %v2681_v12  ;;  %v1429_v25 = vmul.f32 %v2692_v57, %v2692_v57 }
 0x133   : > { %v1462_v63 = vadd.f32 %v1461_v1, %v1426_v11  ;;  %v1672_v19 = vmax.f32 %v1671_v39, %v2681_v12  ;;  %v1840_v28 = vmin.f32 %v1839_v3, %v2681_v12  ;;  %v1187_v24 = vadd.f32 %v1186_v61, %v2686_v17 }
 0x134   : > { %v2779_v27 = vpop.f32.mrf.mxu0  ;;  %v2784_v32 = vpop.f32.mrf.mxu1  ;;  %v1504_v29 = vadd.f32 %v1503_v6, %v1428_v16  ;;  %v1651_v4 = vmax.f32 %v2749_v9, %v2686_v17  ;;  %v1819_v33 = vmin.f32 %v2752_v45, %v2686_v17  ;;  %v1434_v8 = vmul.f32 %v2698_v22, %v2698_v22 }
 0x135   : > { %v2794_v36 = vadd.f32 %v1482_v15, %v1427_v46  ;;  %v2797_v12 = vadd.f32 %v1228_v2, %v2692_v57  ;;  %v1693_v37 = vmax.f32 %v2760_v52, %v2692_v57  ;;  %v1436_v40 = vmul.f32 %v2704_v30, %v2704_v30 }
 0x136   : > { %v2792_v48 = vpop.f32.mrf.mxu0  ;;  %v2803_v41 = vpop.f32.mrf.mxu1  ;;  %v2805_v26 = vadd.f32 %v1524_v20, %v1429_v25  ;;  %v1861_v42 = vmin.f32 %v2767_v58, %v2692_v57  ;;  %v1167_v47 = vadd.f32 %v1166_v7, %v2698_v22  ;;  %v1631_v43 = vmax.f32 %v1630_v10, %v2698_v22 }
 0x137   : > { %v1799_v31 = vmin.f32 %v1798_v21, %v2698_v22  ;;  %v1209_v53 = vadd.f32 %v1208_v14, %v2704_v30  ;;  %v1673_v54 = vmax.f32 %v1672_v19, %v2704_v30  ;;  %v1841_v35 = vmin.f32 %v1840_v28, %v2704_v30 }
 0x138   : > { %v2811_v49 = vpop.f32.mrf.mxu0  ;;  %v2817_v50 = vpop.f32.mrf.mxu1  ;;  %v1463_v59 = vadd.f32 %v1462_v63, %v1434_v8  ;;  %v2820_v60 = vadd.f32 %v1187_v24, %v2711_v34  ;;  %v1435_v62 = vmul.f32 %v2711_v34, %v2711_v34  ;;  %v1168_v55 = vadd.f32 %v1167_v47, %v2722_v44 }
 0x139   : > { %v1505_v22 = vadd.f32 %v1504_v29, %v1436_v40  ;;  %v1442_v39 = vmul.f32 %v2722_v44, %v2722_v44  ;;  %v1632_v3 = vmax.f32 %v1631_v43, %v2722_v44  ;;  %v1800_v30 = vmin.f32 %v1799_v31, %v2722_v44 }
 0x13a   : > { %v2825_v1 = vpop.f32.mrf.mxu0  ;;  %v2831_v61 = vpop.f32.mrf.mxu1  ;;  %v1169_v6 = vrot.slane %v1168_v55, 4  ;;  %v1210_v9 = vadd.f32 %v1209_v53, %v2728_v51  ;;  %v1444_v11 = vmul.f32 %v2728_v51, %v2728_v51  ;;  %v1674_v15 = vmax.f32 %v1673_v54, %v2728_v51 }
 0x13b   : > { %v1464_v2 = vadd.f32 %v1463_v59, %v1442_v39  ;;  %v1633_v16 = vrot.slane %v1632_v3, 4  ;;  %v1801_v20 = vrot.slane %v1800_v30, 4  ;;  %v1842_v7 = vmin.f32 %v1841_v35, %v2728_v51 }
 0x13c   : > { %v2838_v46 = vpop.f32.mrf.mxu0  ;;  %v1170_v10 = vadd.f32 %v1169_v6, %v1168_v55  ;;  %v1211_v21 = vrot.slane %v1210_v9, 4  ;;  %v1506_v44 = vadd.f32 %v1505_v22, %v1444_v11  ;;  %v1675_v14 = vrot.slane %v1674_v15, 4  ;;  %v2840_v25 = vpop.f32.mrf.mxu1 }
 0x13d   : > { %v1465_v63 = vrot.slane %v1464_v2, 4  ;;  %v1634_v19 = vmax.f32 %v1632_v3, %v1633_v16  ;;  %v1802_v28 = vmin.f32 %v1800_v30, %v1801_v20  ;;  %v1843_v24 = vrot.slane %v1842_v7, 4 }
 0x13e   : > { %v1171_v29 = vrot.slane %v1170_v10, 2  ;;  %v1212_v8 = vadd.f32 %v1211_v21, %v1210_v9  ;;  %v1507_v40 = vrot.slane %v1506_v44, 4  ;;  %v1676_v47 = vmax.f32 %v1674_v15, %v1675_v14  ;;  %v2842_v54 = vpop.f32.mrf.mxu0  ;;  %v2845_v39 = vpop.f32.mrf.mxu1 }
 0x13f   : > { %v1466_v43 = vadd.f32 %v1465_v63, %v1464_v2  ;;  %v1635_v31 = vrot.slane %v1634_v19, 2  ;;  %v1803_v53 = vrot.slane %v1802_v28, 2  ;;  %v1844_v51 = vmin.f32 %v1842_v7, %v1843_v24 }
 0x140   : > { %v1652_v35 = vmax.f32 %v1651_v4, %v2711_v34  ;;  %v1172_v59 = vadd.f32 %v1171_v29, %v1170_v10  ;;  %v1213_v55 = vrot.slane %v1212_v8, 2  ;;  %v1508_v22 = vadd.f32 %v1507_v40, %v1506_v44  ;;  %v2857_v21 = vpop.f32.mrf.mxu0  ;;  %v2868_v45 = vpop.f32.mrf.mxu1 }
 0x141   : > { %v1437_v3 = vmul.f32 %v2716_v38, %v2716_v38  ;;  %v1467_v30 = vrot.slane %v1466_v43, 2  ;;  %v1636_v6 = vmax.f32 %v1634_v19, %v1635_v31  ;;  %v1677_v9 = vrot.slane %v1676_v47, 2 }
 0x142   : > { %v1173_v11 = vrot.slane %v1172_v59, 1  ;;  %v2849_v15 = vmin.f32 %v1802_v28, %v1803_v53  ;;  %v1509_v2 = vrot.slane %v1508_v22, 2  ;;  %v1845_v16 = vrot.slane %v1844_v51, 2  ;;  %v2879_v58 = vpop.f32.mrf.mxu0  ;;  %v2883_v40 = vpop.f32.mrf.mxu1 }
 0x143   : > { %v1820_v4 = vmin.f32 %v1819_v33, %v2711_v34  ;;  %v1230_v20 = vadd.f32 %v2797_v12, %v2716_v38  ;;  %v1468_v7 = vadd.f32 %v1467_v30, %v1466_v43  ;;  %v1214_v10 = vadd.f32 %v1213_v55, %v1212_v8 }
 0x144   : > { %v1484_v44 = vadd.f32 %v2794_v36, %v1435_v62  ;;  %v1694_v14 = vmax.f32 %v1693_v37, %v2716_v38  ;;  %v1862_v17 = vmin.f32 %v1861_v42, %v2716_v38  ;;  %v1510_v34 = vadd.f32 %v1509_v2, %v1508_v22  ;;  %v2888_v30 = vpop.f32.mrf.mxu0 }
 0x145   : > { %v1526_v33 = vadd.f32 %v2805_v26, %v1437_v3  ;;  %v1469_v12 = vrot.slane %v1468_v7, 1  ;;  %v1637_v63 = vrot.slane %v1636_v6, 1  ;;  %v1678_v19 = vmax.f32 %v1676_v47, %v1677_v9 }
 0x146   : > { %v1174_v28 = vadd.f32 %v1173_v11, %v1172_v59  ;;  %v1805_v36 = vrot.slane %v2849_v15, 1  ;;  %v2872_v62 = vmin.f32 %v1844_v51, %v1845_v16  ;;  %v1189_v52 = vadd.f32 %v2820_v60, %v2734_v56 }
 0x147   : > { %v1215_v37 = vrot.slane %v1214_v10, 1  ;;  %v1511_v24 = vrot.slane %v1510_v34, 1  ;;  %v1443_v57 = vmul.f32 %v2734_v56, %v2734_v56  ;;  %v1653_v38 = vmax.f32 %v1652_v35, %v2734_v56 }
 0x148   : > { %v1470_v26 = vadd.f32 %v1469_v12, %v1468_v7  ;;  %v1190_v42 = vrot.slane %v1189_v52, 4  ;;  %v1821_v29 = vmin.f32 %v1820_v4, %v2734_v56  ;;  %v1231_v8 = vadd.f32 %v1230_v20, %v2741_v0  ;;  %v2891_v4 = vpop.f32.mrf.mxu1 }
 0x149   : > { %v1679_v47 = vrot.slane %v1678_v19, 1  ;;  %v1485_v60 = vadd.f32 %v1484_v44, %v1443_v57  ;;  %v1654_v43 = vrot.slane %v1653_v38, 4  ;;  %v1445_v31 = vmul.f32 %v2741_v0, %v2741_v0  ;;  %v2895_v57 = vpop.f32.mrf.mxu0 }
 0x14a   : > { %v1638_v53 = vmax.f32 %v1636_v6, %v1637_v63  ;;  %v1847_v51 = vrot.slane %v2872_v62, 1  ;;  %v1191_v35 = vadd.f32 %v1190_v42, %v1189_v52  ;;  %v1822_v59 = vrot.slane %v1821_v29, 4 }
 0x14b   : > { %v1216_v55 = vadd.f32 %v1215_v37, %v1214_v10  ;;  %v1512_v22 = vadd.f32 %v1511_v24, %v1510_v34  ;;  %v1486_v3 = vrot.slane %v1485_v60, 4  ;;  %v1655_v56 = vmax.f32 %v1653_v38, %v1654_v43 }
 0x14c   : > { %v1955_v9 = vsel %vm1954_vm0, %v1174_v28, %v1470_v26  ;;  %v1192_v11 = vrot.slane %v1191_v35, 2  ;;  %v1823_v2 = vmin.f32 %v1821_v29, %v1822_v59  ;;  %v1232_v16 = vrot.slane %v1231_v8, 4 }
 0x14d   : > { %v1487_v20 = vadd.f32 %v1486_v3, %v1485_v60  ;;  %v1656_v6 = vrot.slane %v1655_v56, 2  ;;  %v1527_v7 = vadd.f32 %v1526_v33, %v1445_v31  ;;  %v1695_v44 = vmax.f32 %v1694_v14, %v2741_v0  ;;  %v2897_v60 = vpop.f32.mrf.mxu1 }
 0x14e   : > { %v1193_v12 = vadd.f32 %v1192_v11, %v1191_v35  ;;  %v1824_v10 = vrot.slane %v1823_v2, 2  ;;  %v1233_v34 = vadd.f32 %v1232_v16, %v1231_v8  ;;  %v1863_v63 = vmin.f32 %v1862_v17, %v2741_v0  ;;  %v2900_v16 = vpop.f32.mrf.mxu0 }
 0x14f   : > { %v1488_v52 = vrot.slane %v1487_v20, 2  ;;  %v1657_v37 = vmax.f32 %v1655_v56, %v1656_v6  ;;  %v1528_v24 = vrot.slane %v1527_v7, 4  ;;  %v1696_v28 = vrot.slane %v1695_v44, 4 }
 0x150   : > { %v1194_v38 = vrot.slane %v1193_v12, 1  ;;  %v1825_v26 = vmin.f32 %v1823_v2, %v1824_v10  ;;  %v1234_v42 = vrot.slane %v1233_v34, 2  ;;  %v1864_v29 = vrot.slane %v1863_v63, 4 }
 0x151   : > { %v1957_v33 = vsel %vm1954_vm0, %v1216_v55, %v1512_v22  ;;  %v1489_v14 = vadd.f32 %v1488_v52, %v1487_v20  ;;  %v1529_v43 = vadd.f32 %v1528_v24, %v1527_v7  ;;  %v1697_v31 = vmax.f32 %v1695_v44, %v1696_v28  ;;  %v2904_v22 = vpop.f32.mrf.mxu1  ;;  %v2912_v28 = vpop.f32.mrf.mxu0 }
 0x152   : > { %v1680_v8 = vmax.f32 %v1678_v19, %v1679_v47  ;;  %v1658_v35 = vrot.slane %v1657_v37, 1  ;;  %v1235_v0 = vadd.f32 %v1234_v42, %v1233_v34  ;;  %v1865_v17 = vmin.f32 %v1863_v63, %v1864_v29 }
 0x153   : > { %v1490_v59 = vrot.slane %v1489_v14, 1  ;;  %v1826_v3 = vrot.slane %v1825_v26, 1  ;;  %v1530_v56 = vrot.slane %v1529_v43, 2  ;;  %v1698_v11 = vrot.slane %v1697_v31, 2 }
 0x154   : > { %v1964_v2 = vsel %vm1963_vm1, %v1955_v9, %v1638_v53  ;;  %v1966_v6 = vsel %vm1963_vm1, %v1957_v33, %v1680_v8  ;;  %v1195_v10 = vadd.f32 %v1194_v38, %v1193_v12  ;;  %v1866_v55 = vrot.slane %v1865_v17, 2 }
 0x155   : > { %v1491_v20 = vadd.f32 %v1490_v59, %v1489_v14  ;;  %v1236_v19 = vrot.slane %v1235_v0, 1  ;;  %v1531_v47 = vadd.f32 %v1530_v56, %v1529_v43  ;;  %v1699_v7 = vmax.f32 %v1697_v31, %v1698_v11  ;;  %v2936_v59 = vpop.f32.mrf.mxu0 }
 0x156   : > { %v1806_v44 = vmin.f32 %v2849_v15, %v1805_v36  ;;  %v1848_v34 = vmin.f32 %v2872_v62, %v1847_v51  ;;  %v1659_v63 = vmax.f32 %v1657_v37, %v1658_v35  ;;  %v1867_v52 = vmin.f32 %v1865_v17, %v1866_v55  ;;  %v2917_v15 = vpop.f32.mrf.mxu1 }
 0x157   : > { %v1827_v53 = vmin.f32 %v1825_v26, %v1826_v3  ;;  %v1956_v9 = vsel %vm1954_vm0, %v1195_v10, %v1491_v20  ;;  %v1532_v12 = vrot.slane %v1531_v47, 1  ;;  %v1700_v24 = vrot.slane %v1699_v7, 1 }
 0x158   : > { %v1973_v38 = vsel %vm1972_vm2, %v1964_v2, %v1806_v44  ;;  %v1975_v42 = vsel %vm1972_vm2, %v1966_v6, %v1848_v34  ;;  %v1965_v29 = vsel %vm1963_vm1, %v1956_v9, %v1659_v63  ;;  %v1868_v33 = vrot.slane %v1867_v52, 1  ;;  %v2946_v6 = vpop.f32.mrf.mxu1 }
 0x159   : > { %v1974_v36 = vsel %vm1972_vm2, %v1965_v29, %v1827_v53  ;;  %v1237_v62 = vadd.f32 %v1236_v19, %v1235_v0  ;;  %v1533_v51 = vadd.f32 %v1532_v12, %v1531_v47  ;;  %v1334_v37 = vmul.f32 %v2779_v27, %v2779_v27  ;;  %v2967_v53 = vpop.f32.mrf.mxu0 }
 0x15a   : > { %v1989_v26 = vcombine.low %v1973_v38, %v1974_v36  ;;  %v1701_v14 = vmax.f32 %v1699_v7, %v1700_v24  ;;  %v1326_v43 = vmul.f32 %v2746_v5, %v2746_v5  ;;  %v1328_v31 = vmul.f32 %v2756_v13, %v2756_v13 }
 0x15b   : > { %v1869_v8 = vmin.f32 %v1867_v52, %v1868_v33  ;;  %v1958_v35 = vsel %vm1954_vm0, %v1237_v62, %v1533_v51  ;;  %v1327_v17 = vmul.f32 %v2764_v18, %v2764_v18  ;;  %v1329_v0 = vmul.f32 %v2772_v23, %v2772_v23 }
 0x15c   : > { %1997 = vst [vmem:[%s2922_s28] sm:$0xff] %v1989_v26  ;;  %v1967_v3 = vsel %vm1963_vm1, %v1958_v35, %v1701_v14  ;;  %v1238_v56 = vadd.f32 %v2779_v27, %v2746_v5  ;;  %v1702_v11 = vmax.f32 %v2746_v5, %v2779_v27  ;;  %v1336_v2 = vmul.f32 %v2784_v32, %v2784_v32 }
 0x15d   : > { %v1976_v10 = vsel %vm1972_vm2, %v1967_v3, %v1869_v8  ;;  %v1534_v55 = vadd.f32 %v1334_v37, %v1326_v43  ;;  %v1870_v20 = vmin.f32 %v2746_v5, %v2779_v27  ;;  %v1335_v19 = vmul.f32 %v2792_v48, %v2792_v48  ;;  %v2991_v43 = vpop.f32.mrf.mxu0 }
 0x15e   : > { %v1990_v47 = vcombine.low %v1975_v42, %v1976_v10  ;;  %v1280_v7 = vadd.f32 %v2784_v32, %v2756_v13  ;;  %v1744_v44 = vmax.f32 %v2756_v13, %v2784_v32  ;;  %v1337_v34 = vmul.f32 %v2803_v41, %v2803_v41 }
 0x15f   : > { %v1912_v63 = vmin.f32 %v2756_v13, %v2784_v32  ;;  %v1259_v52 = vadd.f32 %v2792_v48, %v2764_v18  ;;  %v1723_v5 = vmax.f32 %v2764_v18, %v2792_v48  ;;  %v1342_v27 = vmul.f32 %v2811_v49, %v2811_v49  ;;  %v2976_v32 = vpop.f32.mrf.mxu1 }
 0x160   : > { %1998 = vst [vmem:[%s2922_s28 + $0x8] sm:$0xff] %v1990_v47  ;;  %v1576_v9 = vadd.f32 %v1336_v2, %v1328_v31  ;;  %v1891_v12 = vmin.f32 %v2764_v18, %v2792_v48  ;;  %v1301_v24 = vadd.f32 %v2803_v41, %v2772_v23  ;;  %v1344_v13 = vmul.f32 %v2817_v50, %v2817_v50 }
 0x161   : > { %v1555_v38 = vadd.f32 %v1335_v19, %v1327_v17  ;;  %v1765_v42 = vmax.f32 %v2772_v23, %v2803_v41  ;;  %v1933_v29 = vmin.f32 %v2772_v23, %v2803_v41  ;;  %v1239_v33 = vadd.f32 %v1238_v56, %v2811_v49  ;;  %v2997_v8 = vpop.f32.mrf.mxu1  ;;  %v3011_v19 = vpop.f32.mrf.mxu0 }
 0x162   : > { %v1597_v36 = vadd.f32 %v1337_v34, %v1329_v0  ;;  %v1703_v18 = vmax.f32 %v1702_v11, %v2811_v49  ;;  %v1871_v48 = vmin.f32 %v1870_v20, %v2811_v49  ;;  %v1343_v62 = vmul.f32 %v2825_v1, %v2825_v1 }
 0x163   : > { %v1535_v51 = vadd.f32 %v1534_v55, %v1342_v27  ;;  %v1281_v37 = vadd.f32 %v1280_v7, %v2817_v50  ;;  %v1745_v26 = vmax.f32 %v1744_v44, %v2817_v50  ;;  %v1345_v14 = vmul.f32 %v2831_v61, %v2831_v61  ;;  %v3017_v34 = vpop.f32.mrf.mxu1 }
 0x164   : > { %v1577_v23 = vadd.f32 %v1576_v9, %v1344_v13  ;;  %v1913_v41 = vmin.f32 %v1912_v63, %v2817_v50  ;;  %v1260_v31 = vadd.f32 %v1259_v52, %v2825_v1  ;;  %v1350_v49 = vmul.f32 %v2838_v46, %v2838_v46 }
 0x165   : > { %v1724_v35 = vmax.f32 %v1723_v5, %v2825_v1  ;;  %v1892_v17 = vmin.f32 %v1891_v12, %v2825_v1  ;;  %v1302_v0 = vadd.f32 %v1301_v24, %v2831_v61  ;;  %v1352_v3 = vmul.f32 %v2840_v25, %v2840_v25 }
 0x166   : > { %v1556_v56 = vadd.f32 %v1555_v38, %v1343_v62  ;;  %v1766_v11 = vmax.f32 %v1765_v42, %v2831_v61  ;;  %v1934_v50 = vmin.f32 %v1933_v29, %v2831_v61  ;;  %v1240_v2 = vadd.f32 %v1239_v33, %v2838_v46  ;;  %v3031_v29 = vpop.f32.mrf.mxu0 }
 0x167   : > { %v1598_v10 = vadd.f32 %v1597_v36, %v1345_v14  ;;  %v1704_v55 = vmax.f32 %v1703_v18, %v2838_v46  ;;  %v1872_v20 = vmin.f32 %v1871_v48, %v2838_v46  ;;  %v1351_v1 = vmul.f32 %v2842_v54, %v2842_v54  ;;  %v3037_v48 = vpop.f32.mrf.mxu1 }
 0x168   : > { %v1536_v47 = vadd.f32 %v1535_v51, %v1350_v49  ;;  %v1282_v7 = vadd.f32 %v1281_v37, %v2840_v25  ;;  %v1746_v44 = vmax.f32 %v1745_v26, %v2840_v25  ;;  %v1353_v61 = vmul.f32 %v2845_v39, %v2845_v39 }
 0x169   : > { %v1578_v63 = vadd.f32 %v1577_v23, %v1352_v3  ;;  %v1914_v52 = vmin.f32 %v1913_v41, %v2840_v25  ;;  %v1261_v46 = vadd.f32 %v1260_v31, %v2842_v54  ;;  %v1358_v5 = vmul.f32 %v2857_v21, %v2857_v21 }
 0x16a   : > { %v1725_v27 = vmax.f32 %v1724_v35, %v2842_v54  ;;  %v1893_v9 = vmin.f32 %v1892_v17, %v2842_v54  ;;  %v1303_v12 = vadd.f32 %v1302_v0, %v2845_v39  ;;  %v1360_v24 = vmul.f32 %v2868_v45, %v2868_v45  ;;  %v3052_v17 = vpop.f32.mrf.mxu0 }
 0x16b   : > { %v1557_v13 = vadd.f32 %v1556_v56, %v1351_v1  ;;  %v1767_v38 = vmax.f32 %v1766_v11, %v2845_v39  ;;  %v1935_v42 = vmin.f32 %v1934_v50, %v2845_v39  ;;  %v1241_v25 = vadd.f32 %v1240_v2, %v2857_v21  ;;  %v3057_v11 = vpop.f32.mrf.mxu1 }
 0x16c   : > { %v1599_v33 = vadd.f32 %v1598_v10, %v1353_v61  ;;  %v1705_v36 = vmax.f32 %v1704_v55, %v2857_v21  ;;  %v1873_v18 = vmin.f32 %v1872_v20, %v2857_v21  ;;  %v1359_v54 = vmul.f32 %v2879_v58, %v2879_v58 }
 0x16d   : > { %v1537_v62 = vadd.f32 %v1536_v47, %v1358_v5  ;;  %v1283_v51 = vadd.f32 %v1282_v7, %v2868_v45  ;;  %v1747_v37 = vmax.f32 %v1746_v44, %v2868_v45  ;;  %v1361_v39 = vmul.f32 %v2883_v40, %v2883_v40 }
 0x16e   : > { %v1579_v26 = vadd.f32 %v1578_v63, %v1360_v24  ;;  %v1915_v14 = vmin.f32 %v1914_v52, %v2868_v45  ;;  %v1262_v23 = vadd.f32 %v1261_v46, %v2879_v58  ;;  %v1366_v21 = vmul.f32 %v2888_v30, %v2888_v30 }
 0x16f   : > { %v1726_v41 = vmax.f32 %v1725_v27, %v2879_v58  ;;  %v1894_v31 = vmin.f32 %v1893_v9, %v2879_v58  ;;  %v1304_v49 = vadd.f32 %v1303_v12, %v2883_v40  ;;  %v1368_v35 = vmul.f32 %v2891_v4, %v2891_v4  ;;  %v3078_v27 = vpop.f32.mrf.mxu1 }
 0x170   : > { %v1558_v0 = vadd.f32 %v1557_v13, %v1359_v54  ;;  %v1768_v3 = vmax.f32 %v1767_v38, %v2883_v40  ;;  %v1936_v45 = vmin.f32 %v1935_v42, %v2883_v40  ;;  %v1242_v56 = vadd.f32 %v1241_v25, %v2888_v30 }
 0x171   : > { %v1600_v50 = vadd.f32 %v1599_v33, %v1361_v39  ;;  %v1706_v2 = vmax.f32 %v1705_v36, %v2888_v30  ;;  %v1874_v58 = vmin.f32 %v1873_v18, %v2888_v30  ;;  %v1367_v10 = vmul.f32 %v2895_v57, %v2895_v57  ;;  %v3071_v30 = vpop.f32.mrf.mxu0 }
 0x172   : > { %v1538_v55 = vadd.f32 %v1537_v62, %v1366_v21  ;;  %v1284_v20 = vadd.f32 %v1283_v51, %v2891_v4  ;;  %v1748_v1 = vmax.f32 %v1747_v37, %v2891_v4  ;;  %v1369_v40 = vmul.f32 %v2897_v60, %v2897_v60  ;;  %v3097_v37 = vpop.f32.mrf.mxu1 }
 0x173   : > { %v1580_v47 = vadd.f32 %v1579_v26, %v1368_v35  ;;  %v1916_v7 = vmin.f32 %v1915_v14, %v2891_v4  ;;  %v1263_v44 = vadd.f32 %v1262_v23, %v2895_v57  ;;  %v1374_v61 = vmul.f32 %v2900_v16, %v2900_v16  ;;  %v3091_v54 = vpop.f32.mrf.mxu0 }
 0x174   : > { %v1727_v63 = vmax.f32 %v1726_v41, %v2895_v57  ;;  %v1895_v52 = vmin.f32 %v1894_v31, %v2895_v57  ;;  %v1305_v46 = vadd.f32 %v1304_v49, %v2897_v60  ;;  %v1376_v5 = vmul.f32 %v2904_v22, %v2904_v22 }
 0x175   : > { %v1559_v9 = vadd.f32 %v1558_v0, %v1367_v10  ;;  %v1769_v4 = vmax.f32 %v1768_v3, %v2897_v60  ;;  %v1937_v12 = vmin.f32 %v1936_v45, %v2897_v60  ;;  %v1243_v24 = vadd.f32 %v1242_v56, %v2900_v16  ;;  %v3111_v3 = vpop.f32.mrf.mxu0 }
 0x176   : > { %v1601_v13 = vadd.f32 %v1600_v50, %v1369_v40  ;;  %v1707_v38 = vmax.f32 %v1706_v2, %v2900_v16  ;;  %v1875_v42 = vmin.f32 %v1874_v58, %v2900_v16  ;;  %v1375_v57 = vmul.f32 %v2912_v28, %v2912_v28  ;;  %v3117_v2 = vpop.f32.mrf.mxu1 }
 0x177   : > { %v1539_v25 = vadd.f32 %v1538_v55, %v1374_v61  ;;  %v1285_v33 = vadd.f32 %v1284_v20, %v2904_v22  ;;  %v1749_v36 = vmax.f32 %v1748_v1, %v2904_v22  ;;  %v1377_v18 = vmul.f32 %v2917_v15, %v2917_v15 }
 0x178   : > { %v1581_v60 = vadd.f32 %v1580_v47, %v1376_v5  ;;  %v1917_v62 = vmin.f32 %v1916_v7, %v2904_v22  ;;  %v1264_v51 = vadd.f32 %v1263_v44, %v2912_v28  ;;  %v1382_v16 = vmul.f32 %v2936_v59, %v2936_v59 }
 0x179   : > { %v1728_v39 = vmax.f32 %v1727_v63, %v2912_v28  ;;  %v1896_v26 = vmin.f32 %v1895_v52, %v2912_v28  ;;  %v1306_v14 = vadd.f32 %v1305_v46, %v2917_v15  ;;  %v1384_v23 = vmul.f32 %v2946_v6, %v2946_v6  ;;  %v3131_v63 = vpop.f32.mrf.mxu0 }
 0x17a   : > { %v1560_v21 = vadd.f32 %v1559_v9, %v1375_v57  ;;  %v1770_v41 = vmax.f32 %v1769_v4, %v2917_v15  ;;  %v1938_v22 = vmin.f32 %v1937_v12, %v2917_v15  ;;  %v1244_v31 = vadd.f32 %v1243_v24, %v2936_v59  ;;  %v3137_v9 = vpop.f32.mrf.mxu1 }
 0x17b   : > { %v1602_v49 = vadd.f32 %v1601_v13, %v1377_v18  ;;  %v1708_v35 = vmax.f32 %v1707_v38, %v2936_v59  ;;  %v1876_v0 = vmin.f32 %v1875_v42, %v2936_v59  ;;  %v1383_v28 = vmul.f32 %v2967_v53, %v2967_v53  ;;  %v3152_v18 = vpop.f32.mrf.mxu0 }
 0x17c   : > { %v1540_v45 = vadd.f32 %v1539_v25, %v1382_v16  ;;  %v1286_v56 = vadd.f32 %v1285_v33, %v2946_v6  ;;  %v1750_v50 = vmax.f32 %v1749_v36, %v2946_v6  ;;  %v1385_v15 = vmul.f32 %v2976_v32, %v2976_v32  ;;  %v3157_v16 = vpop.f32.mrf.mxu1 }
 0x17d   : > { %v1582_v58 = vadd.f32 %v1581_v60, %v1384_v23  ;;  %v1918_v10 = vmin.f32 %v1917_v62, %v2946_v6  ;;  %v1265_v59 = vadd.f32 %v1264_v51, %v2967_v53  ;;  %v1390_v55 = vmul.f32 %v2991_v43, %v2991_v43 }
 0x17e   : > { %v1729_v20 = vmax.f32 %v1728_v39, %v2967_v53  ;;  %v1897_v1 = vmin.f32 %v1896_v26, %v2967_v53  ;;  %v1307_v40 = vadd.f32 %v1306_v14, %v2976_v32  ;;  %v1392_v47 = vmul.f32 %v2997_v8, %v2997_v8 }
 0x17f   : > { %v1561_v7 = vadd.f32 %v1560_v21, %v1383_v28  ;;  %v1771_v44 = vmax.f32 %v1770_v41, %v2976_v32  ;;  %v1939_v61 = vmin.f32 %v1938_v22, %v2976_v32  ;;  %v1245_v6 = vadd.f32 %v1244_v31, %v2991_v43 }
 0x180   : > { %v1603_v52 = vadd.f32 %v1602_v49, %v1385_v15  ;;  %v1709_v46 = vmax.f32 %v1708_v35, %v2991_v43  ;;  %v1877_v5 = vmin.f32 %v1876_v0, %v2991_v43  ;;  %v1391_v53 = vmul.f32 %v3011_v19, %v3011_v19 }
 0x181   : > { %v1541_v4 = vadd.f32 %v1540_v45, %v1390_v55  ;;  %v1287_v12 = vadd.f32 %v1286_v56, %v2997_v8  ;;  %v1751_v24 = vmax.f32 %v1750_v50, %v2997_v8  ;;  %v1393_v32 = vmul.f32 %v3017_v34, %v3017_v34  ;;  %v3178_v50 = vpop.f32.mrf.mxu1 }
 0x182   : > { %v1583_v13 = vadd.f32 %v1582_v58, %v1392_v47  ;;  %v1919_v38 = vmin.f32 %v1918_v10, %v2997_v8  ;;  %v1266_v42 = vadd.f32 %v1265_v59, %v3011_v19  ;;  %v1398_v43 = vmul.f32 %v3031_v29, %v3031_v29 }
 0x183   : > { %v1730_v57 = vmax.f32 %v1729_v20, %v3011_v19  ;;  %v1898_v25 = vmin.f32 %v1897_v1, %v3011_v19  ;;  %v1308_v33 = vadd.f32 %v1307_v40, %v3017_v34  ;;  %v1400_v36 = vmul.f32 %v3037_v48, %v3037_v48 }
 0x184   : > { %v1562_v60 = vadd.f32 %v1561_v7, %v1391_v53  ;;  %v1772_v62 = vmax.f32 %v1771_v44, %v3017_v34  ;;  %v1940_v8 = vmin.f32 %v1939_v61, %v3017_v34  ;;  %v1246_v51 = vadd.f32 %v1245_v6, %v3031_v29 }
 0x185   : > { %v1604_v39 = vadd.f32 %v1603_v52, %v1393_v32  ;;  %v1710_v26 = vmax.f32 %v1709_v46, %v3031_v29  ;;  %v1878_v19 = vmin.f32 %v1877_v5, %v3031_v29  ;;  %v1399_v14 = vmul.f32 %v3052_v17, %v3052_v17  ;;  %v3171_v29 = vpop.f32.mrf.mxu0  ;;  %v3197_v52 = vpop.f32.mrf.mxu1 }
 0x186   : > { %v1542_v23 = vadd.f32 %v1541_v4, %v1398_v43  ;;  %v1288_v21 = vadd.f32 %v1287_v12, %v3037_v48  ;;  %v1752_v41 = vmax.f32 %v1751_v24, %v3037_v48  ;;  %v1401_v34 = vmul.f32 %v3057_v11, %v3057_v11 }
 0x187   : > { %v1584_v22 = vadd.f32 %v1583_v13, %v1400_v36  ;;  %v1920_v31 = vmin.f32 %v1919_v38, %v3037_v48  ;;  %v1267_v49 = vadd.f32 %v1266_v42, %v3052_v17  ;;  %v1406_v35 = vmul.f32 %v3071_v30, %v3071_v30  ;;  %v3191_v44 = vpop.f32.mrf.mxu0  ;;  %v3217_v36 = vpop.f32.mrf.mxu1 }
 0x188   : > { %v1731_v0 = vmax.f32 %v1730_v57, %v3052_v17  ;;  %v1899_v28 = vmin.f32 %v1898_v25, %v3052_v17  ;;  %v1309_v45 = vadd.f32 %v1308_v33, %v3057_v11  ;;  %v1408_v56 = vmul.f32 %v3078_v27, %v3078_v27 }
 0x189   : > { %v1563_v15 = vadd.f32 %v1562_v60, %v1399_v14  ;;  %v1773_v48 = vmax.f32 %v1772_v62, %v3057_v11  ;;  %v1941_v58 = vmin.f32 %v1940_v8, %v3057_v11  ;;  %v1247_v10 = vadd.f32 %v1246_v51, %v3071_v30  ;;  %v3211_v43 = vpop.f32.mrf.mxu0 }
 0x18a   : > { %v1605_v59 = vadd.f32 %v1604_v39, %v1401_v34  ;;  %v1711_v55 = vmax.f32 %v1710_v26, %v3071_v30  ;;  %v1879_v20 = vmin.f32 %v1878_v19, %v3071_v30  ;;  %v1407_v17 = vmul.f32 %v3091_v54, %v3091_v54 }
 0x18b   : > { %v1543_v1 = vadd.f32 %v1542_v23, %v1406_v35  ;;  %v1289_v40 = vadd.f32 %v1288_v21, %v3078_v27  ;;  %v1753_v47 = vmax.f32 %v1752_v41, %v3078_v27  ;;  %v1409_v7 = vmul.f32 %v3097_v37, %v3097_v37  ;;  %v1032_v41 = vpop.f32.mrf.mxu0 }
 0x18c   : > { %v1585_v11 = vadd.f32 %v1584_v22, %v1408_v56  ;;  %v1921_v61 = vmin.f32 %v1920_v31, %v3078_v27  ;;  %v1268_v6 = vadd.f32 %v1267_v49, %v3091_v54  ;;  %v1414_v30 = vmul.f32 %v3111_v3, %v3111_v3  ;;  %v1145_v49 = vpop.f32.mrf.mxu1 }
 0x18d   : > { %v1732_v46 = vmax.f32 %v1731_v0, %v3091_v54  ;;  %v1900_v5 = vmin.f32 %v1899_v28, %v3091_v54  ;;  %v1310_v53 = vadd.f32 %v1309_v45, %v3097_v37  ;;  %v1416_v4 = vmul.f32 %v3117_v2, %v3117_v2 }
 0x18e   : > { %v1564_v12 = vadd.f32 %v1563_v15, %v1407_v17  ;;  %v1774_v24 = vmax.f32 %v1773_v48, %v3097_v37  ;;  %v1942_v27 = vmin.f32 %v1941_v58, %v3097_v37  ;;  %v1248_v32 = vadd.f32 %v1247_v10, %v3111_v3 }
 0x18f   : > { %v1606_v13 = vadd.f32 %v1605_v59, %v1409_v7  ;;  %v1712_v38 = vmax.f32 %v1711_v55, %v3111_v3  ;;  %v1880_v42 = vmin.f32 %v1879_v20, %v3111_v3  ;;  %v1415_v54 = vmul.f32 %v3131_v63, %v3131_v63  ;;  %v3254_v55 = vpop.f32.mrf.mxu0 }
 0x190   : > { %v1544_v57 = vadd.f32 %v1543_v1, %v1414_v30  ;;  %v1290_v25 = vadd.f32 %v1289_v40, %v3117_v2  ;;  %v1754_v33 = vmax.f32 %v1753_v47, %v3117_v2  ;;  %v1417_v37 = vmul.f32 %v3137_v9, %v3137_v9 }
 0x191   : > { %v1586_v60 = vadd.f32 %v1585_v11, %v1416_v4  ;;  %v1922_v62 = vmin.f32 %v1921_v61, %v3117_v2  ;;  %v1269_v3 = vadd.f32 %v1268_v6, %v3131_v63  ;;  %v1422_v8 = vmul.f32 %v3152_v18, %v3152_v18 }
 0x192   : > { %v1733_v51 = vmax.f32 %v1732_v46, %v3131_v63  ;;  %v1901_v39 = vmin.f32 %v1900_v5, %v3131_v63  ;;  %v1311_v26 = vadd.f32 %v1310_v53, %v3137_v9  ;;  %v1424_v19 = vmul.f32 %v3157_v16, %v3157_v16 }
 0x193   : > { %v1565_v14 = vadd.f32 %v1564_v12, %v1415_v54  ;;  %v1775_v23 = vmax.f32 %v1774_v24, %v3137_v9  ;;  %v1943_v21 = vmin.f32 %v1942_v27, %v3137_v9  ;;  %v1249_v2 = vadd.f32 %v1248_v32, %v3152_v18  ;;  %v1036_v12 = vpop.f32.mrf.mxu0 }
 0x194   : > { %v1607_v34 = vadd.f32 %v1606_v13, %v1417_v37  ;;  %v1713_v22 = vmax.f32 %v1712_v38, %v3152_v18  ;;  %v1881_v31 = vmin.f32 %v1880_v42, %v3152_v18  ;;  %v1423_v63 = vmul.f32 %v3171_v29, %v3171_v29 }
 0x195   : > { %v1545_v35 = vadd.f32 %v1544_v57, %v1422_v8  ;;  %v1291_v0 = vadd.f32 %v1290_v25, %v3157_v16  ;;  %v1755_v28 = vmax.f32 %v1754_v33, %v3157_v16  ;;  %v1425_v9 = vmul.f32 %v3178_v50, %v3178_v50 }
 0x196   : > { %v1587_v45 = vadd.f32 %v1586_v60, %v1424_v19  ;;  %v1923_v56 = vmin.f32 %v1922_v62, %v3157_v16  ;;  %v1270_v15 = vadd.f32 %v1269_v3, %v3171_v29  ;;  %v1430_v18 = vmul.f32 %v3191_v44, %v3191_v44 }
 0x197   : > { %v3244_v48 = vmax.f32 %v1733_v51, %v3171_v29  ;;  %v3247_v58 = vmin.f32 %v1901_v39, %v3171_v29  ;;  %v3250_v10 = vadd.f32 %v1311_v26, %v3178_v50  ;;  %v1432_v59 = vmul.f32 %v3197_v52, %v3197_v52  ;;  %v3265_v29 = vpop.f32.mrf.mxu1 }
 0x198   : > { %v3256_v16 = vadd.f32 %v1565_v14, %v1423_v63  ;;  %v3259_v20 = vmax.f32 %v1775_v23, %v3178_v50  ;;  %v3262_v17 = vmin.f32 %v1943_v21, %v3178_v50  ;;  %v1250_v1 = vadd.f32 %v1249_v2, %v3191_v44 }
 0x199   : > { %v3267_v40 = vadd.f32 %v1607_v34, %v1425_v9  ;;  %v1714_v47 = vmax.f32 %v1713_v22, %v3191_v44  ;;  %v1882_v7 = vmin.f32 %v1881_v31, %v3191_v44  ;;  %v1292_v11 = vadd.f32 %v1291_v0, %v3197_v52  ;;  %v1149_v13 = vpop.f32.mrf.mxu1 }
 0x19a   : > { %v1546_v61 = vadd.f32 %v1545_v35, %v1430_v18  ;;  %v1756_v6 = vmax.f32 %v1755_v28, %v3197_v52  ;;  %v1924_v30 = vmin.f32 %v1923_v56, %v3197_v52  ;;  %v3275_v50 = vadd.f32 %v1270_v15, %v3211_v43 }
 0x19b   : > { %v1588_v46 = vadd.f32 %v1587_v45, %v1432_v59  ;;  %v1431_v5 = vmul.f32 %v3211_v43, %v3211_v43  ;;  %v1735_v53 = vmax.f32 %v3244_v48, %v3211_v43  ;;  %v1438_v4 = vmul.f32 %v1032_v41, %v1032_v41 }
 0x19c   : > { %v1903_v44 = vmin.f32 %v3247_v58, %v3211_v43  ;;  %v1251_v24 = vadd.f32 %v1250_v1, %v1032_v41  ;;  %v1715_v27 = vmax.f32 %v1714_v47, %v1032_v41  ;;  %v1440_v32 = vmul.f32 %v1145_v49, %v1145_v49 }
 0x19d   : > { %v1547_v52 = vadd.f32 %v1546_v61, %v1438_v4  ;;  %v1883_v38 = vmin.f32 %v1882_v7, %v1032_v41  ;;  %v1293_v42 = vadd.f32 %v1292_v11, %v1145_v49  ;;  %v1757_v54 = vmax.f32 %v1756_v6, %v1145_v49 }
 0x19e   : > { %v1589_v57 = vadd.f32 %v1588_v46, %v1440_v32  ;;  %v1925_v25 = vmin.f32 %v1924_v30, %v1145_v49  ;;  %v1252_v33 = vadd.f32 %v1251_v24, %v1036_v12  ;;  %v1446_v37 = vmul.f32 %v1036_v12, %v1036_v12 }
 0x19f   : > { %v1716_v60 = vmax.f32 %v1715_v27, %v1036_v12  ;;  %v1884_v62 = vmin.f32 %v1883_v38, %v1036_v12  ;;  %v1294_v3 = vadd.f32 %v1293_v42, %v1149_v13  ;;  %v1448_v8 = vmul.f32 %v1149_v13, %v1149_v13 }
 0x1a0   : > { %v1253_v51 = vrot.slane %v1252_v33, 4  ;;  %v1548_v39 = vadd.f32 %v1547_v52, %v1446_v37  ;;  %v1758_v26 = vmax.f32 %v1757_v54, %v1149_v13  ;;  %v1926_v19 = vmin.f32 %v1925_v25, %v1149_v13 }
 0x1a1   : > { %v1717_v14 = vrot.slane %v1716_v60, 4  ;;  %v1885_v23 = vrot.slane %v1884_v62, 4  ;;  %v1295_v21 = vrot.slane %v1294_v3, 4  ;;  %v1590_v2 = vadd.f32 %v1589_v57, %v1448_v8 }
 0x1a2   : > { %v1254_v34 = vadd.f32 %v1253_v51, %v1252_v33  ;;  %v1549_v41 = vrot.slane %v1548_v39, 4  ;;  %v1759_v22 = vrot.slane %v1758_v26, 4  ;;  %v1927_v31 = vrot.slane %v1926_v19, 4 }
 0x1a3   : > { %v1718_v63 = vmax.f32 %v1716_v60, %v1717_v14  ;;  %v1886_v49 = vmin.f32 %v1884_v62, %v1885_v23  ;;  %v1296_v35 = vadd.f32 %v1295_v21, %v1294_v3  ;;  %v1591_v0 = vrot.slane %v1590_v2, 4  ;;  %v1151_v23 = vpop.f32.mrf.mxu1 }
 0x1a4   : > { %v1255_v28 = vrot.slane %v1254_v34, 2  ;;  %v1550_v9 = vadd.f32 %v1549_v41, %v1548_v39  ;;  %v1760_v45 = vmax.f32 %v1758_v26, %v1759_v22  ;;  %v1928_v56 = vmin.f32 %v1926_v19, %v1927_v31 }
 0x1a5   : > { %v1719_v15 = vrot.slane %v1718_v63, 2  ;;  %v1887_v18 = vrot.slane %v1886_v49, 2  ;;  %v1297_v59 = vrot.slane %v1296_v35, 2  ;;  %v1592_v1 = vadd.f32 %v1591_v0, %v1590_v2 }
 0x1a6   : > { %v1256_v47 = vadd.f32 %v1255_v28, %v1254_v34  ;;  %v1551_v7 = vrot.slane %v1550_v9, 2  ;;  %v1761_v11 = vrot.slane %v1760_v45, 2  ;;  %v1929_v61 = vrot.slane %v1928_v56, 2 }
 0x1a7   : > { %v1433_v6 = vmul.f32 %v3217_v36, %v3217_v36  ;;  %v1720_v30 = vmax.f32 %v1718_v63, %v1719_v15  ;;  %v3285_v46 = vmin.f32 %v1886_v49, %v1887_v18  ;;  %v1298_v4 = vadd.f32 %v1297_v59, %v1296_v35 }
 0x1a8   : > { %v1313_v12 = vadd.f32 %v3250_v10, %v3217_v36  ;;  %v1257_v24 = vrot.slane %v1256_v47, 1  ;;  %v1552_v27 = vadd.f32 %v1551_v7, %v1550_v9  ;;  %v1593_v32 = vrot.slane %v1592_v1, 2  ;;  %v1038_v10 = vpop.f32.mrf.mxu0 }
 0x1a9   : > { %v1777_v13 = vmax.f32 %v3259_v20, %v3217_v36  ;;  %v1945_v52 = vmin.f32 %v3262_v17, %v3217_v36  ;;  %v1439_v38 = vmul.f32 %v3254_v55, %v3254_v55  ;;  %v3295_v42 = vmax.f32 %v1760_v45, %v1761_v11 }
 0x1aa   : > { %v1567_v54 = vadd.f32 %v3256_v16, %v1431_v5  ;;  %v1553_v57 = vrot.slane %v1552_v27, 1  ;;  %v1721_v25 = vrot.slane %v1720_v30, 1  ;;  %v3298_v33 = vmin.f32 %v1928_v56, %v1929_v61 }
 0x1ab   : > { %v1609_v37 = vadd.f32 %v3267_v40, %v1433_v6  ;;  %v1441_v20 = vmul.f32 %v3265_v29, %v3265_v29  ;;  %v1889_v60 = vrot.slane %v3285_v46, 1  ;;  %v1299_v36 = vrot.slane %v1298_v4, 1 }
 0x1ac   : > { %v1258_v17 = vadd.f32 %v1257_v24, %v1256_v47  ;;  %v1554_v62 = vadd.f32 %v1553_v57, %v1552_v27  ;;  %v1594_v3 = vadd.f32 %v1593_v32, %v1592_v1  ;;  %v1272_v8 = vadd.f32 %v3275_v50, %v3254_v55 }
 0x1ad   : > { %v1763_v16 = vrot.slane %v3295_v42, 1  ;;  %v1447_v5 = vmul.f32 %v1038_v10, %v1038_v10  ;;  %v1568_v51 = vadd.f32 %v1567_v54, %v1439_v38  ;;  %v1736_v40 = vmax.f32 %v1735_v53, %v3254_v55 }
 0x1ae   : > { %v1722_v39 = vmax.f32 %v1720_v30, %v1721_v25  ;;  %v1931_v26 = vrot.slane %v3298_v33, 1  ;;  %v1273_v19 = vadd.f32 %v1272_v8, %v1038_v10  ;;  %v1904_v14 = vmin.f32 %v1903_v44, %v3254_v55 }
 0x1af   : > { %v1300_v50 = vadd.f32 %v1299_v36, %v1298_v4  ;;  %v1569_v21 = vadd.f32 %v1568_v51, %v1447_v5  ;;  %v1737_v2 = vmax.f32 %v1736_v40, %v1038_v10  ;;  %v1314_v34 = vadd.f32 %v1313_v12, %v3265_v29 }
 0x1b0   : > { %v1959_v41 = vsel %vm1954_vm0, %v1258_v17, %v1554_v62  ;;  %v1595_v22 = vrot.slane %v1594_v3, 1  ;;  %v1274_v48 = vrot.slane %v1273_v19, 4  ;;  %v1905_v53 = vmin.f32 %v1904_v14, %v1038_v10 }
 0x1b1   : > { %v1570_v31 = vrot.slane %v1569_v21, 4  ;;  %v1738_v63 = vrot.slane %v1737_v2, 4  ;;  %v1315_v49 = vadd.f32 %v1314_v34, %v1151_v23  ;;  %v1449_v35 = vmul.f32 %v1151_v23, %v1151_v23 }
 0x1b2   : > { %v1275_v0 = vadd.f32 %v1274_v48, %v1273_v19  ;;  %v1906_v28 = vrot.slane %v1905_v53, 4  ;;  %v1610_v9 = vadd.f32 %v1609_v37, %v1441_v20  ;;  %v1778_v43 = vmax.f32 %v1777_v13, %v3265_v29 }
 0x1b3   : > { %v1571_v58 = vadd.f32 %v1570_v31, %v1569_v21  ;;  %v1739_v55 = vmax.f32 %v1737_v2, %v1738_v63  ;;  %v1316_v44 = vrot.slane %v1315_v49, 4  ;;  %v1946_v45 = vmin.f32 %v1945_v52, %v3265_v29 }
 0x1b4   : > { %v1276_v56 = vrot.slane %v1275_v0, 2  ;;  %v1907_v15 = vmin.f32 %v1905_v53, %v1906_v28  ;;  %v1611_v18 = vadd.f32 %v1610_v9, %v1449_v35  ;;  %v1779_v59 = vmax.f32 %v1778_v43, %v1151_v23 }
 0x1b5   : > { %v1572_v1 = vrot.slane %v1571_v58, 2  ;;  %v1740_v47 = vrot.slane %v1739_v55, 2  ;;  %v1317_v7 = vadd.f32 %v1316_v44, %v1315_v49  ;;  %v1947_v11 = vmin.f32 %v1946_v45, %v1151_v23 }
 0x1b6   : > { %v1277_v61 = vadd.f32 %v1276_v56, %v1275_v0  ;;  %v1908_v6 = vrot.slane %v1907_v15, 2  ;;  %v1612_v30 = vrot.slane %v1611_v18, 4  ;;  %v1780_v4 = vrot.slane %v1779_v59, 4 }
 0x1b7   : > { %v1573_v12 = vadd.f32 %v1572_v1, %v1571_v58  ;;  %v1741_v24 = vmax.f32 %v1739_v55, %v1740_v47  ;;  %v1318_v27 = vrot.slane %v1317_v7, 2  ;;  %v1948_v32 = vrot.slane %v1947_v11, 4 }
 0x1b8   : > { %v1278_v13 = vrot.slane %v1277_v61, 1  ;;  %v1909_v38 = vmin.f32 %v1907_v15, %v1908_v6  ;;  %v1613_v54 = vadd.f32 %v1612_v30, %v1611_v18  ;;  %v1781_v29 = vmax.f32 %v1779_v59, %v1780_v4 }
 0x1b9   : > { %v1574_v52 = vrot.slane %v1573_v12, 1  ;;  %v1742_v57 = vrot.slane %v1741_v24, 1  ;;  %v1319_v25 = vadd.f32 %v1318_v27, %v1317_v7  ;;  %v1949_v10 = vmin.f32 %v1947_v11, %v1948_v32 }
 0x1ba   : > { %v1596_v37 = vadd.f32 %v1595_v22, %v1594_v3  ;;  %v1910_v20 = vrot.slane %v1909_v38, 1  ;;  %v1614_v36 = vrot.slane %v1613_v54, 2  ;;  %v1782_v17 = vrot.slane %v1781_v29, 2 }
 0x1bb   : > { %v1968_v62 = vsel %vm1963_vm1, %v1959_v41, %v1722_v39  ;;  %v1279_v8 = vadd.f32 %v1278_v13, %v1277_v61  ;;  %v1575_v5 = vadd.f32 %v1574_v52, %v1573_v12  ;;  %v1950_v51 = vrot.slane %v1949_v10, 2 }
 0x1bc   : > { %v1743_v40 = vmax.f32 %v1741_v24, %v1742_v57  ;;  %v1320_v19 = vrot.slane %v1319_v25, 1  ;;  %v1615_v14 = vadd.f32 %v1614_v36, %v1613_v54  ;;  %v1783_v23 = vmax.f32 %v1781_v29, %v1782_v17 }
 0x1bd   : > { %v1890_v21 = vmin.f32 %v3285_v46, %v1889_v60  ;;  %v1911_v2 = vmin.f32 %v1909_v38, %v1910_v20  ;;  %v1960_v34 = vsel %vm1954_vm0, %v1279_v8, %v1575_v5  ;;  %v1951_v3 = vmin.f32 %v1949_v10, %v1950_v51 }
 0x1be   : > { %v1961_v22 = vsel %vm1954_vm0, %v1300_v50, %v1596_v37  ;;  %v1969_v39 = vsel %vm1963_vm1, %v1960_v34, %v1743_v40  ;;  %v1616_v41 = vrot.slane %v1615_v14, 1  ;;  %v1784_v48 = vrot.slane %v1783_v23, 1 }
 0x1bf   : > { %v1764_v53 = vmax.f32 %v3295_v42, %v1763_v16  ;;  %v1977_v31 = vsel %vm1972_vm2, %v1968_v62, %v1890_v21  ;;  %v1978_v46 = vsel %vm1972_vm2, %v1969_v39, %v1911_v2  ;;  %v1952_v60 = vrot.slane %v1951_v3, 1 }
 0x1c0   : > { %v1991_v63 = vcombine.low %v1977_v31, %v1978_v46  ;;  %v1321_v49 = vadd.f32 %v1320_v19, %v1319_v25  ;;  %v1617_v35 = vadd.f32 %v1616_v41, %v1615_v14  ;;  %v1785_v50 = vmax.f32 %v1783_v23, %v1784_v48 }
 0x1c1   : > { %v1970_v0 = vsel %vm1963_vm1, %v1961_v22, %v1764_v53  ;;  %v1932_v28 = vmin.f32 %v3298_v33, %v1931_v26  ;;  %v1953_v9 = vmin.f32 %v1951_v3, %v1952_v60 }
 0x1c2   : > { %1999 = vst [vmem:[%s2922_s28 + $0x10] sm:$0xff] %v1991_v63  ;;  %v1962_v42 = vsel %vm1954_vm0, %v1321_v49, %v1617_v35 }
 0x1c3   : > { %v1971_v16 = vsel %vm1963_vm1, %v1962_v42, %v1785_v50  ;;  %v1979_v43 = vsel %vm1972_vm2, %v1970_v0, %v1932_v28 }
 0x1c4   : > { %v1980_v58 = vsel %vm1972_vm2, %v1971_v16, %v1953_v9 }
 0x1c5   : > { %v1992_v55 = vcombine.low %v1979_v43, %v1980_v58 }
 0x1c7   : > { %2000 = vst [vmem:[%s2922_s28 + $0x18] sm:$0xff] %v1992_v55 }
 0x1c8 PF: > { %s14_s17 = sadd.s32 1, %s2200_s17   ;;  %s3356_s15 = smov %s2196_s16 }
 0x1c9   : > { %p11_p5 = scmp.ge.s32.totalorder %s14_s17, 4   ;;  %s3357_s16 = smov %s3359_s18 }
 0x1cb   :  { %13 = sbr.rel (!%p11_p5) target bundleno = 2 (0x2), region = 66 }

// kernel: est_coord_forward.11
= control target key start
LH: loop header
LB: loop body
LE: loop exit
PB: predicated region body
PF: predicated region fallthrough
CT: control target
= control target key end

     0   :  { %s1411_s21 = smov 0   ;;  %s1413_s22 = smov 0   ;;  %s1741_s0 = inlined_call_operand.vmem [shape: f32[2,128,64], index: 0, kind: input, shape index: {}]   ;;  %s1742_s1 = inlined_call_operand.vmem [shape: bf16[64,512], index: 1, kind: input, shape index: {}]   ;;  %s1743_s2 = inlined_call_operand.vmem [shape: f32[1,64], index: 2, kind: input, shape index: {}]   ;;  %s1744_s3 = inlined_call_operand.vmem [shape: f32[1,64], index: 3, kind: input, shape index: {}]   ;;  %s1745_s4 = inlined_call_operand.vmem [shape: f32[2,1,512], index: 4, kind: input, shape index: {}]   ;;  %s1746_s5 = inlined_call_operand.vmem [shape: f32[2,128,512], index: 5, kind: output, shape index: {0}]   ;;  %s1747_s6 = inlined_call_operand.vmem [shape: f32[2,2,512], index: 6, kind: output, shape index: {1}]  }
   0x1   :  { %s1415_s23 = smov 0  }
   0x2 LB: > { %s29_s24 = sadd.s32 1, %s1368_s22  ;;  %p1253_p0 = scmp.ge.s32.totalorder %s1372_s23, 1  ;;  %s1372_s23 = sphi %s1415_s23, %s17_s23   ;;  %s1368_s22 = sphi %s1413_s22, %s1749_s22   ;;  %s1364_s21 = sphi %s1411_s21, %s1748_s21  }
   0x3   : > { %p31_p1 = scmp.ge.s32.totalorder %s29_s24, 2  ;;  %p247_p2 = scmp.lt.s32.totalorder %s1372_s23, 3 }
   0x5   : > { %s1751_s24 = smov (%p31_p1, %s29_s24), 0  ;;  %p248_p3 = pnand %p1253_p0, %p247_p2 }
   0x6   : > { %p297_p4 = scmp.lt.s32.totalorder (!%p248_p3), %s1364_s21, 1 }
   0x7   : > { %251 = sbr.rel (%p248_p3) target bundleno = 318 (0x13e), region = 40 }
   0xc   : > { %v1326_v0 = vld [vmem:[%s1742_s1 + $0x64] ss:$16 sps:$4 sm:$0xff]   ;;  %v1328_v1 = vld [vmem:[%s1742_s1 + $0x6c] ss:$16 sps:$4 sm:$0xff]   ;;  %v1374_v2 = vmov 0   ;;  %s1753_s21 = smov (!%p297_p4, %s1364_s21), 1 }
   0xd   : > { %590 = vmatprep.mubr.bf16.mxu0 %v1374_v2  ;;  %703 = vmatprep.mubr.bf16.mxu1 %v1374_v2  ;;  %v1330_v3 = vld [vmem:[%s1742_s1 + $0x60] ss:$16 sps:$4 sm:$0xff]   ;;  %v1331_v4 = vld [vmem:[%s1742_s1 + $0x68] ss:$16 sps:$4 sm:$0xff]   ;;  %v1332_v5 = vld [vmem:[%s1742_s1 + $0x44] ss:$16 sps:$4 sm:$0xff]  }
   0xe   : > { %566 = vmatprep.subr.bf16.mxu0 %v1326_v0  ;;  %679 = vmatprep.subr.bf16.mxu1 %v1328_v1  ;;  %v1334_v6 = vld [vmem:[%s1742_s1 + $0x4c] ss:$16 sps:$4 sm:$0xff]   ;;  %v1336_v7 = vld [vmem:[%s1742_s1 + $0x40] ss:$16 sps:$4 sm:$0xff]   ;;  %s1297_s15 = sshll.u32 %s1753_s21, 7  ;;  %vm533_vm0 = vcmask 523264  }
   0xf   : > { %567 = vmatpush1.bf16.msra.mxu0 %v1330_v3  ;;  %680 = vmatpush1.bf16.msra.mxu1 %v1331_v4  ;;  %v1337_v8 = vld [vmem:[%s1742_s1 + $0x48] ss:$16 sps:$4 sm:$0xff]   ;;  %v1338_v9 = vld [vmem:[%s1742_s1 + $0x24] ss:$16 sps:$4 sm:$0xff]   ;;  %v1340_v10 = vld [vmem:[%s1742_s1 + $0x2c] ss:$16 sps:$4 sm:$0xff]   ;;  %s1473_s8 = scalar_lea.vmem %s1741_s0, %s1297_s15 }
  0x10   : > { %568 = vmatprep.subr.bf16.mxu0 %v1332_v5  ;;  %681 = vmatprep.subr.bf16.mxu1 %v1334_v6  ;;  %v1342_v11 = vld [vmem:[%s1742_s1 + $0x20] ss:$16 sps:$4 sm:$0xff]   ;;  %v1343_v12 = vld [vmem:[%s1742_s1 + $0x28] ss:$16 sps:$4 sm:$0xff]   ;;  %v1344_v13 = vld [vmem:[%s1742_s1 + $0x4] ss:$16 sps:$4 sm:$0xff]  }
  0x11   : > { %v1346_v14 = vld [vmem:[%s1742_s1 + $0xc] ss:$16 sps:$4 sm:$0xff]   ;;  %v1348_v15 = vld [vmem:[%s1742_s1] ss:$16 sps:$4 sm:$0xff]   ;;  %v1349_v20 = vld [vmem:[%s1742_s1 + $0x8] ss:$16 sps:$4 sm:$0xff]  }
  0x12   : > { %v329_v16 = vld [vmem:[%s1473_s8] sm:$0xff]  ;;  %v330_v17 = vld [vmem:[%s1473_s8 + $0x8] sm:$0xff]  ;;  %v331_v23 = vld [vmem:[%s1473_s8 + $0x10] sm:$0xff]  ;;  %s1256_s25 = sshll.u32 %s1753_s21, 2  ;;  %s1298_s29 = sshll.u32 %s1753_s21, 9  ;;  %vm1080_vm1 = vcmask 1040384  }
  0x13   : > { %569 = vmatpush1.bf16.msra.mxu0 %v1336_v7  ;;  %682 = vmatpush1.bf16.msra.mxu1 %v1337_v8  ;;  %v1489_v18 = vld [vmem:[%s1743_s2] ss:$0 sm:$0xff]  ;;  %v332_v24 = vld [vmem:[%s1473_s8 + $0x18] sm:$0xff]  ;;  %v334_v34 = vld [vmem:[%s1473_s8 + $0x28] sm:$0xff]  ;;  %s309_s28 = scalar_lea.vmem %s1745_s4, %s1256_s25  ;;  %s1299_s9 = sshll.u32 %s1753_s21, 3 }
  0x14   : > { %570 = vmatprep.subr.bf16.mxu0 %v1338_v9  ;;  %683 = vmatprep.subr.bf16.mxu1 %v1340_v10  ;;  %v1494_v19 = vld [vmem:[%s1744_s3] ss:$0 sm:$0xff]  ;;  %v352_v21 = vmul.f32 %v1489_v18, %v329_v16  ;;  %v353_v22 = vmul.f32 %v1489_v18, %v330_v17  ;;  %v354_v25 = vmul.f32 %v1489_v18, %v331_v23  ;;  %v335_v43 = vld [vmem:[%s1473_s8 + $0x30] sm:$0xff]  ;;  %v336_v44 = vld [vmem:[%s1473_s8 + $0x38] sm:$0xff]  ;;  %s326_s12 = scalar_lea.vmem %s1747_s6, %s1299_s9 }
  0x15   : > { %v355_v26 = vmul.f32 %v1489_v18, %v332_v24  ;;  %v333_v33 = vld [vmem:[%s1473_s8 + $0x20] sm:$0xff]  ;;  %v357_v39 = vmul.f32 %v1489_v18, %v334_v34  ;;  %v358_v47 = vmul.f32 %v1489_v18, %v335_v43  ;;  %v359_v48 = vmul.f32 %v1489_v18, %v336_v44  ;;  %v338_v53 = vld [vmem:[%s1473_s8 + $0x48] sm:$0xff]  ;;  %v339_v61 = vld [vmem:[%s1473_s8 + $0x50] sm:$0xff] }
  0x16   : > { %v375_v27 = vadd.f32 %v1494_v19, %v352_v21  ;;  %v376_v28 = vadd.f32 %v1494_v19, %v353_v22  ;;  %v377_v31 = vadd.f32 %v1494_v19, %v354_v25  ;;  %v356_v38 = vmul.f32 %v1489_v18, %v333_v33  ;;  %v337_v52 = vld [vmem:[%s1473_s8 + $0x40] sm:$0xff]  ;;  %v340_v62 = vld [vmem:[%s1473_s8 + $0x58] sm:$0xff]  ;;  %v342_v8 = vld [vmem:[%s1473_s8 + $0x68] sm:$0xff] }
  0x17   : > { %571 = vmatpush1.bf16.msra.mxu0 %v1342_v11  ;;  %684 = vmatpush1.bf16.msra.mxu1 %v1343_v12  ;;  %v378_v32 = vadd.f32 %v1494_v19, %v355_v26  ;;  %v380_v42 = vadd.f32 %v1494_v19, %v357_v39  ;;  %v381_v50 = vadd.f32 %v1494_v19, %v358_v47  ;;  %v341_v7 = vld [vmem:[%s1473_s8 + $0x60] sm:$0xff]  ;;  %v343_v16 = vld [vmem:[%s1473_s8 + $0x70] sm:$0xff]  ;;  %v344_v17 = vld [vmem:[%s1473_s8 + $0x78] sm:$0xff]  ;;  %s1597_s8 = scalar_lea.vmem %s1746_s5, %s1298_s29 }
  0x18   : > { %572 = vmatprep.subr.bf16.mxu0 %v1344_v13  ;;  %685 = vmatprep.subr.bf16.mxu1 %v1346_v14  ;;  %v391_v29 = vmax.f32 %v375_v27, 0.0  ;;  %v392_v30 = vmax.f32 %v376_v28, 0.0  ;;  %v393_v36 = vmax.f32 %v377_v31, 0.0  ;;  %v379_v41 = vadd.f32 %v1494_v19, %v356_v38 }
  0x19   : > { %v394_v37 = vmax.f32 %v378_v32, 0.0  ;;  %v396_v46 = vmax.f32 %v380_v42, 0.0  ;;  %v382_v51 = vadd.f32 %v1494_v19, %v359_v48  ;;  %v397_v54 = vmax.f32 %v381_v50, 0.0  ;;  %v431_v32 = vld [vmem:[%s309_s28] sm:$0xf] }
  0x1a   : > { %v407_v35 = vpack.c.bf16 %v392_v30, %v391_v29  ;;  %v395_v45 = vmax.f32 %v379_v41, 0.0  ;;  %v360_v56 = vmul.f32 %v1489_v18, %v337_v52  ;;  %v361_v57 = vmul.f32 %v1489_v18, %v338_v53 }
  0x1b   : > { %573 = vmatpush1.bf16.msra.mxu0 %v1348_v15  ;;  %686 = vmatpush1.bf16.msra.mxu1 %v1349_v20  ;;  %v408_v40 = vpack.c.bf16 %v394_v37, %v393_v36  ;;  %v398_v55 = vmax.f32 %v382_v51, 0.0  ;;  %v362_v1 = vmul.f32 %v1489_v18, %v339_v61  ;;  %v363_v3 = vmul.f32 %v1489_v18, %v340_v62 }
  0x1c   : > { %v409_v49 = vpack.c.bf16 %v396_v46, %v395_v45  ;;  %v383_v59 = vadd.f32 %v1494_v19, %v360_v56  ;;  %v384_v60 = vadd.f32 %v1494_v19, %v361_v57  ;;  %v364_v11 = vmul.f32 %v1489_v18, %v341_v7 }
  0x1d   : > { %v410_v58 = vpack.c.bf16 %v398_v55, %v397_v54  ;;  %v385_v5 = vadd.f32 %v1494_v19, %v362_v1  ;;  %v386_v6 = vadd.f32 %v1494_v19, %v363_v3  ;;  %v365_v12 = vmul.f32 %v1489_v18, %v342_v8 }
  0x1e   : > { %1279 = vmatmul.mubr.msk.bf16.vlgmr.msra.gmra.mxu0 %vm533_vm0, %v407_v35  ;;  %1287 = vmatmul.mubr.msk.bf16.vlgmr.msra.gmra.mxu1 %vm533_vm0, %v407_v35  ;;  %v399_v63 = vmax.f32 %v383_v59, 0.0  ;;  %v400_v0 = vmax.f32 %v384_v60, 0.0  ;;  %v387_v14 = vadd.f32 %v1494_v19, %v364_v11  ;;  %v366_v22 = vmul.f32 %v1489_v18, %v343_v16 }
  0x1f   : > { %600 = vmatprep.mubr.bf16.mxu0 %v1374_v2  ;;  %713 = vmatprep.mubr.bf16.mxu1 %v1374_v2  ;;  %v401_v9 = vmax.f32 %v385_v5, 0.0  ;;  %v402_v10 = vmax.f32 %v386_v6, 0.0  ;;  %v388_v15 = vadd.f32 %v1494_v19, %v365_v12  ;;  %v367_v23 = vmul.f32 %v1489_v18, %v344_v17 }
  0x20   : > { %v411_v4 = vpack.c.bf16 %v400_v0, %v399_v63  ;;  %v403_v20 = vmax.f32 %v387_v14, 0.0  ;;  %v389_v25 = vadd.f32 %v1494_v19, %v366_v22  ;;  %v433_v29 = vlaneseq }
  0x21   : > { %v412_v13 = vpack.c.bf16 %v402_v10, %v401_v9  ;;  %v404_v21 = vmax.f32 %v388_v15, 0.0  ;;  %v390_v26 = vadd.f32 %v1494_v19, %v367_v23 }
  0x22   : > { %v405_v27 = vmax.f32 %v389_v25, 0.0  ;;  %v1576_v30 = vshrl.u32 %v433_v29, 7 }
  0x23   : > { %v413_v24 = vpack.c.bf16 %v404_v21, %v403_v20  ;;  %v406_v28 = vmax.f32 %v390_v26, 0.0 }
  0x24   : > { %v435_v19 = vsub.s32 0, %v1576_v30  ;;  %v443_v31 = vsub.s32 2, %v1576_v30  ;;  %v447_v33 = vsub.s32 3, %v1576_v30 }
  0x25   : > { %v414_v18 = vpack.c.bf16 %v406_v28, %v405_v27 }
  0x26   : > { %1280 = vmatmul.mubr.msk.bf16.gmra.mxu0 %vm533_vm0, %v408_v40  ;;  %1288 = vmatmul.mubr.msk.bf16.gmra.mxu1 %vm533_vm0, %v408_v40  ;;  %v1586_v34 = vrot.slane %v431_v32, %v435_v19  ;;  %v1588_v35 = vrot.slane %v431_v32, %v443_v31  ;;  %v1592_v37 = vrot.slane %v431_v32, %v447_v33 }
  0x27   : > { %610 = vmatprep.mubr.bf16.mxu0 %v1374_v2  ;;  %723 = vmatprep.mubr.bf16.mxu1 %v1374_v2 }
  0x2e   : > { %1281 = vmatmul.mubr.msk.bf16.gmra.mxu0 %vm533_vm0, %v409_v49  ;;  %1289 = vmatmul.mubr.msk.bf16.gmra.mxu1 %vm533_vm0, %v409_v49 }
  0x2f   : > { %620 = vmatprep.mubr.bf16.mxu0 %v1374_v2  ;;  %733 = vmatprep.mubr.bf16.mxu1 %v1374_v2 }
  0x36   : > { %1282 = vmatmul.mubr.msk.bf16.gmra.mxu0 %vm533_vm0, %v410_v58  ;;  %1290 = vmatmul.mubr.msk.bf16.gmra.mxu1 %vm533_vm0, %v410_v58 }
  0x37   : > { %630 = vmatprep.mubr.bf16.mxu0 %v1374_v2  ;;  %743 = vmatprep.mubr.bf16.mxu1 %v1374_v2 }
  0x3e   : > { %1283 = vmatmul.mubr.msk.bf16.gmra.mxu0 %vm533_vm0, %v411_v4  ;;  %1291 = vmatmul.mubr.msk.bf16.gmra.mxu1 %vm533_vm0, %v411_v4 }
  0x3f   : > { %640 = vmatprep.mubr.bf16.mxu0 %v1374_v2  ;;  %753 = vmatprep.mubr.bf16.mxu1 %v1374_v2 }
  0x46   : > { %1284 = vmatmul.mubr.msk.bf16.gmra.mxu0 %vm533_vm0, %v412_v13  ;;  %1292 = vmatmul.mubr.msk.bf16.gmra.mxu1 %vm533_vm0, %v412_v13 }
  0x47   : > { %650 = vmatprep.mubr.bf16.mxu0 %v1374_v2  ;;  %763 = vmatprep.mubr.bf16.mxu1 %v1374_v2 }
  0x4e   : > { %1285 = vmatmul.mubr.msk.bf16.gmra.mxu0 %vm533_vm0, %v413_v24  ;;  %1293 = vmatmul.mubr.msk.bf16.gmra.mxu1 %vm533_vm0, %v413_v24 }
  0x4f   : > { %660 = vmatprep.mubr.bf16.mxu0 %v1374_v2  ;;  %773 = vmatprep.mubr.bf16.mxu1 %v1374_v2  ;;  %v439_v2 = vsub.s32 1, %v1576_v30 }
  0x51   : > { %v1590_v36 = vrot.slane %v431_v32, %v439_v2 }
  0x56   : > { %1286 = vmatmul.mubr.msk.bf16.gmra.mxu0 %vm533_vm0, %v414_v18  ;;  %1294 = vmatmul.mubr.msk.bf16.gmra.mxu1 %vm533_vm0, %v414_v18 }
  0xde   : > { %v592_v38 = vpop.f32.mrf.mxu0  ;;  %v705_v39 = vpop.f32.mrf.mxu1 }
  0xdf   : > { %v593_v40 = vadd.f32 %v592_v38, %v1586_v34  ;;  %v706_v41 = vadd.f32 %v705_v39, %v1588_v35 }
  0xe0   : > { %v594_v42 = vpop.f32.mrf.mxu0  ;;  %v707_v43 = vpop.f32.mrf.mxu1 }
  0xe1   : > { %784 = vst [vmem:[%s1597_s8] sm:$0xff] %v593_v40  ;;  %786 = vst [vmem:[%s1597_s8 + $0x10] sm:$0xff] %v706_v41  ;;  %v595_v44 = vadd.f32 %v594_v42, %v1590_v36  ;;  %v708_v45 = vadd.f32 %v707_v43, %v1592_v37  ;;  %v932_v50 = vmul.f32 %v593_v40, %v593_v40 }
  0xe2   : > { %v596_v46 = vpop.f32.mrf.mxu0  ;;  %v709_v47 = vpop.f32.mrf.mxu1  ;;  %v934_v51 = vmul.f32 %v706_v41, %v706_v41 }
  0xe3   : > { %785 = vst [vmem:[%s1597_s8 + $0x8] sm:$0xff] %v595_v44  ;;  %787 = vst [vmem:[%s1597_s8 + $0x18] sm:$0xff] %v708_v45  ;;  %v597_v48 = vadd.f32 %v596_v46, %v1586_v34  ;;  %v710_v49 = vadd.f32 %v709_v47, %v1588_v35  ;;  %v933_v54 = vmul.f32 %v595_v44, %v595_v44 }
  0xe4   : > { %v598_v52 = vpop.f32.mrf.mxu0  ;;  %v711_v53 = vpop.f32.mrf.mxu1  ;;  %v935_v55 = vmul.f32 %v708_v45, %v708_v45 }
  0xe5   : > { %788 = vst [vmem:[%s1597_s8 + $0x20] sm:$0xff] %v597_v48  ;;  %v936_v56 = vmul.f32 %v597_v48, %v597_v48  ;;  %790 = vst [vmem:[%s1597_s8 + $0x30] sm:$0xff] %v710_v49  ;;  %v938_v57 = vmul.f32 %v710_v49, %v710_v49  ;;  %v848_v58 = vadd.f32 %v597_v48, %v593_v40 }
  0xe6   : > { %v890_v59 = vadd.f32 %v710_v49, %v706_v41  ;;  %v599_v60 = vadd.f32 %v598_v52, %v1590_v36  ;;  %v712_v61 = vadd.f32 %v711_v53, %v1592_v37  ;;  %v602_v62 = vpop.f32.mrf.mxu0  ;;  %v715_v63 = vpop.f32.mrf.mxu1 }
  0xe7   : > { %v996_v0 = vadd.f32 %v936_v56, %v932_v50  ;;  %v1038_v1 = vadd.f32 %v938_v57, %v934_v51  ;;  %v603_v3 = vadd.f32 %v602_v62, %v1586_v34  ;;  %v716_v4 = vadd.f32 %v715_v63, %v1588_v35 }
  0xe8   : > { %789 = vst [vmem:[%s1597_s8 + $0x28] sm:$0xff] %v599_v60  ;;  %v869_v5 = vadd.f32 %v599_v60, %v595_v44  ;;  %v937_v6 = vmul.f32 %v599_v60, %v599_v60  ;;  %791 = vst [vmem:[%s1597_s8 + $0x38] sm:$0xff] %v712_v61  ;;  %v911_v7 = vadd.f32 %v712_v61, %v708_v45  ;;  %v604_v9 = vpop.f32.mrf.mxu0  ;;  %v717_v10 = vpop.f32.mrf.mxu1 }
  0xe9   : > { %v939_v8 = vmul.f32 %v712_v61, %v712_v61  ;;  %792 = vst [vmem:[%s1597_s8 + $0x40] sm:$0xff] %v603_v3  ;;  %v849_v11 = vadd.f32 %v848_v58, %v603_v3  ;;  %v940_v12 = vmul.f32 %v603_v3, %v603_v3  ;;  %794 = vst [vmem:[%s1597_s8 + $0x50] sm:$0xff] %v716_v4 }
  0xea   : > { %v891_v13 = vadd.f32 %v890_v59, %v716_v4  ;;  %v942_v14 = vmul.f32 %v716_v4, %v716_v4  ;;  %v1017_v15 = vadd.f32 %v937_v6, %v933_v54  ;;  %v605_v17 = vadd.f32 %v604_v9, %v1590_v36  ;;  %v606_v21 = vpop.f32.mrf.mxu0  ;;  %v719_v22 = vpop.f32.mrf.mxu1 }
  0xeb   : > { %v1059_v16 = vadd.f32 %v939_v8, %v935_v55  ;;  %v718_v20 = vadd.f32 %v717_v10, %v1592_v37  ;;  %v997_v23 = vadd.f32 %v996_v0, %v940_v12  ;;  %v607_v25 = vadd.f32 %v606_v21, %v1586_v34 }
  0xec   : > { %v1039_v24 = vadd.f32 %v1038_v1, %v942_v14  ;;  %v720_v26 = vadd.f32 %v719_v22, %v1588_v35  ;;  %793 = vst [vmem:[%s1597_s8 + $0x48] sm:$0xff] %v605_v17  ;;  %v870_v27 = vadd.f32 %v869_v5, %v605_v17  ;;  %v941_v28 = vmul.f32 %v605_v17, %v605_v17  ;;  %v608_v19 = vpop.f32.mrf.mxu0  ;;  %v721_v31 = vpop.f32.mrf.mxu1 }
  0xed   : > { %795 = vst [vmem:[%s1597_s8 + $0x58] sm:$0xff] %v718_v20  ;;  %v912_v18 = vadd.f32 %v911_v7, %v718_v20  ;;  %v943_v29 = vmul.f32 %v718_v20, %v718_v20  ;;  %796 = vst [vmem:[%s1597_s8 + $0x60] sm:$0xff] %v607_v25  ;;  %v850_v32 = vadd.f32 %v849_v11, %v607_v25 }
  0xee   : > { %v944_v2 = vmul.f32 %v607_v25, %v607_v25  ;;  %798 = vst [vmem:[%s1597_s8 + $0x70] sm:$0xff] %v720_v26  ;;  %v892_v33 = vadd.f32 %v891_v13, %v720_v26  ;;  %v946_v38 = vmul.f32 %v720_v26, %v720_v26  ;;  %v1018_v39 = vadd.f32 %v1017_v15, %v941_v28  ;;  %v612_v43 = vpop.f32.mrf.mxu0  ;;  %v725_v44 = vpop.f32.mrf.mxu1 }
  0xef   : > { %v1060_v40 = vadd.f32 %v1059_v16, %v943_v29  ;;  %v609_v41 = vadd.f32 %v608_v19, %v1590_v36  ;;  %v722_v42 = vadd.f32 %v721_v31, %v1592_v37  ;;  %v613_v47 = vadd.f32 %v612_v43, %v1586_v34 }
  0xf0   : > { %v998_v45 = vadd.f32 %v997_v23, %v944_v2  ;;  %v1040_v46 = vadd.f32 %v1039_v24, %v946_v38  ;;  %v726_v48 = vadd.f32 %v725_v44, %v1588_v35  ;;  %v614_v53 = vpop.f32.mrf.mxu0  ;;  %v727_v54 = vpop.f32.mrf.mxu1 }
  0xf1   : > { %797 = vst [vmem:[%s1597_s8 + $0x68] sm:$0xff] %v609_v41  ;;  %v871_v49 = vadd.f32 %v870_v27, %v609_v41  ;;  %v945_v50 = vmul.f32 %v609_v41, %v609_v41  ;;  %799 = vst [vmem:[%s1597_s8 + $0x78] sm:$0xff] %v722_v42  ;;  %v913_v51 = vadd.f32 %v912_v18, %v722_v42 }
  0xf2   : > { %v947_v52 = vmul.f32 %v722_v42, %v722_v42  ;;  %800 = vst [vmem:[%s1597_s8 + $0x80] sm:$0xff] %v613_v47  ;;  %v851_v55 = vadd.f32 %v850_v32, %v613_v47  ;;  %v948_v56 = vmul.f32 %v613_v47, %v613_v47  ;;  %802 = vst [vmem:[%s1597_s8 + $0x90] sm:$0xff] %v726_v48  ;;  %v616_v63 = vpop.f32.mrf.mxu0  ;;  %v729_v0 = vpop.f32.mrf.mxu1 }
  0xf3   : > { %v893_v57 = vadd.f32 %v892_v33, %v726_v48  ;;  %v950_v58 = vmul.f32 %v726_v48, %v726_v48  ;;  %v1019_v59 = vadd.f32 %v1018_v39, %v945_v50  ;;  %v615_v61 = vadd.f32 %v614_v53, %v1590_v36 }
  0xf4   : > { %v1061_v60 = vadd.f32 %v1060_v40, %v947_v52  ;;  %v728_v62 = vadd.f32 %v727_v54, %v1592_v37  ;;  %v999_v1 = vadd.f32 %v998_v45, %v948_v56  ;;  %v617_v4 = vadd.f32 %v616_v63, %v1586_v34  ;;  %v618_v10 = vpop.f32.mrf.mxu0  ;;  %v731_v11 = vpop.f32.mrf.mxu1 }
  0xf5   : > { %v1041_v3 = vadd.f32 %v1040_v46, %v950_v58  ;;  %v730_v5 = vadd.f32 %v729_v0, %v1588_v35  ;;  %801 = vst [vmem:[%s1597_s8 + $0x88] sm:$0xff] %v615_v61  ;;  %v872_v6 = vadd.f32 %v871_v49, %v615_v61  ;;  %v949_v7 = vmul.f32 %v615_v61, %v615_v61 }
  0xf6   : > { %803 = vst [vmem:[%s1597_s8 + $0x98] sm:$0xff] %v728_v62  ;;  %v914_v8 = vadd.f32 %v913_v51, %v728_v62  ;;  %v951_v9 = vmul.f32 %v728_v62, %v728_v62  ;;  %804 = vst [vmem:[%s1597_s8 + $0xa0] sm:$0xff] %v617_v4  ;;  %v852_v12 = vadd.f32 %v851_v55, %v617_v4  ;;  %v622_v22 = vpop.f32.mrf.mxu0  ;;  %v735_v23 = vpop.f32.mrf.mxu1 }
  0xf7   : > { %v952_v13 = vmul.f32 %v617_v4, %v617_v4  ;;  %806 = vst [vmem:[%s1597_s8 + $0xb0] sm:$0xff] %v730_v5  ;;  %v894_v14 = vadd.f32 %v893_v57, %v730_v5  ;;  %v954_v15 = vmul.f32 %v730_v5, %v730_v5  ;;  %v1020_v16 = vadd.f32 %v1019_v59, %v949_v7 }
  0xf8   : > { %v1062_v17 = vadd.f32 %v1061_v60, %v951_v9  ;;  %v619_v20 = vadd.f32 %v618_v10, %v1590_v36  ;;  %v732_v21 = vadd.f32 %v731_v11, %v1592_v37  ;;  %v623_v26 = vadd.f32 %v622_v22, %v1586_v34  ;;  %v624_v31 = vpop.f32.mrf.mxu0  ;;  %v737_v32 = vpop.f32.mrf.mxu1 }
  0xf9   : > { %v1000_v24 = vadd.f32 %v999_v1, %v952_v13  ;;  %v1042_v25 = vadd.f32 %v1041_v3, %v954_v15  ;;  %v736_v27 = vadd.f32 %v735_v23, %v1588_v35  ;;  %v625_v42 = vadd.f32 %v624_v31, %v1590_v36 }
  0xfa   : > { %805 = vst [vmem:[%s1597_s8 + $0xa8] sm:$0xff] %v619_v20  ;;  %v873_v28 = vadd.f32 %v872_v6, %v619_v20  ;;  %v953_v18 = vmul.f32 %v619_v20, %v619_v20  ;;  %807 = vst [vmem:[%s1597_s8 + $0xb8] sm:$0xff] %v732_v21  ;;  %v915_v29 = vadd.f32 %v914_v8, %v732_v21  ;;  %v626_v44 = vpop.f32.mrf.mxu0  ;;  %v739_v45 = vpop.f32.mrf.mxu1 }
  0xfb   : > { %v955_v19 = vmul.f32 %v732_v21, %v732_v21  ;;  %808 = vst [vmem:[%s1597_s8 + $0xc0] sm:$0xff] %v623_v26  ;;  %v853_v2 = vadd.f32 %v852_v12, %v623_v26  ;;  %v956_v33 = vmul.f32 %v623_v26, %v623_v26  ;;  %810 = vst [vmem:[%s1597_s8 + $0xd0] sm:$0xff] %v736_v27 }
  0xfc   : > { %v895_v38 = vadd.f32 %v894_v14, %v736_v27  ;;  %v958_v39 = vmul.f32 %v736_v27, %v736_v27  ;;  %v1021_v40 = vadd.f32 %v1020_v16, %v953_v18  ;;  %v738_v43 = vadd.f32 %v737_v32, %v1592_v37  ;;  %809 = vst [vmem:[%s1597_s8 + $0xc8] sm:$0xff] %v625_v42  ;;  %v628_v54 = vpop.f32.mrf.mxu0  ;;  %v741_v55 = vpop.f32.mrf.mxu1 }
  0xfd   : > { %v1063_v41 = vadd.f32 %v1062_v17, %v955_v19  ;;  %v1001_v46 = vadd.f32 %v1000_v24, %v956_v33  ;;  %v627_v48 = vadd.f32 %v626_v44, %v1586_v34  ;;  %v740_v49 = vadd.f32 %v739_v45, %v1588_v35 }
  0xfe   : > { %v1043_v47 = vadd.f32 %v1042_v25, %v958_v39  ;;  %v874_v50 = vadd.f32 %v873_v28, %v625_v42  ;;  %v957_v51 = vmul.f32 %v625_v42, %v625_v42  ;;  %811 = vst [vmem:[%s1597_s8 + $0xd8] sm:$0xff] %v738_v43  ;;  %v916_v52 = vadd.f32 %v915_v29, %v738_v43  ;;  %v632_v0 = vpop.f32.mrf.mxu0  ;;  %v745_v1 = vpop.f32.mrf.mxu1 }
  0xff   : > { %v959_v53 = vmul.f32 %v738_v43, %v738_v43  ;;  %812 = vst [vmem:[%s1597_s8 + $0xe0] sm:$0xff] %v627_v48  ;;  %v854_v56 = vadd.f32 %v853_v2, %v627_v48  ;;  %v960_v57 = vmul.f32 %v627_v48, %v627_v48  ;;  %814 = vst [vmem:[%s1597_s8 + $0xf0] sm:$0xff] %v740_v49 }
 0x100   : > { %v896_v58 = vadd.f32 %v895_v38, %v740_v49  ;;  %v962_v59 = vmul.f32 %v740_v49, %v740_v49  ;;  %v1022_v60 = vadd.f32 %v1021_v40, %v957_v51  ;;  %v629_v62 = vadd.f32 %v628_v54, %v1590_v36  ;;  %v634_v11 = vpop.f32.mrf.mxu0  ;;  %v747_v12 = vpop.f32.mrf.mxu1 }
 0x101   : > { %v1064_v61 = vadd.f32 %v1063_v41, %v959_v53  ;;  %v742_v63 = vadd.f32 %v741_v55, %v1592_v37  ;;  %v1002_v3 = vadd.f32 %v1001_v46, %v960_v57  ;;  %v633_v5 = vadd.f32 %v632_v0, %v1586_v34 }
 0x102   : > { %v1044_v4 = vadd.f32 %v1043_v47, %v962_v59  ;;  %v746_v6 = vadd.f32 %v745_v1, %v1588_v35  ;;  %813 = vst [vmem:[%s1597_s8 + $0xe8] sm:$0xff] %v629_v62  ;;  %v875_v7 = vadd.f32 %v874_v50, %v629_v62  ;;  %v961_v8 = vmul.f32 %v629_v62, %v629_v62  ;;  %v636_v23 = vpop.f32.mrf.mxu0  ;;  %v749_v24 = vpop.f32.mrf.mxu1 }
 0x103   : > { %815 = vst [vmem:[%s1597_s8 + $0xf8] sm:$0xff] %v742_v63  ;;  %v917_v9 = vadd.f32 %v916_v52, %v742_v63  ;;  %v963_v10 = vmul.f32 %v742_v63, %v742_v63  ;;  %816 = vst [vmem:[%s1597_s8 + $0x100] sm:$0xff] %v633_v5  ;;  %v855_v13 = vadd.f32 %v854_v56, %v633_v5 }
 0x104   : > { %v964_v14 = vmul.f32 %v633_v5, %v633_v5  ;;  %818 = vst [vmem:[%s1597_s8 + $0x110] sm:$0xff] %v746_v6  ;;  %v897_v15 = vadd.f32 %v896_v58, %v746_v6  ;;  %v966_v16 = vmul.f32 %v746_v6, %v746_v6  ;;  %v1023_v17 = vadd.f32 %v1022_v60, %v961_v8  ;;  %v638_v32 = vpop.f32.mrf.mxu0  ;;  %v751_v2 = vpop.f32.mrf.mxu1 }
 0x105   : > { %v1065_v20 = vadd.f32 %v1064_v61, %v963_v10  ;;  %v635_v21 = vadd.f32 %v634_v11, %v1590_v36  ;;  %v748_v22 = vadd.f32 %v747_v12, %v1592_v37  ;;  %v637_v27 = vadd.f32 %v636_v23, %v1586_v34 }
 0x106   : > { %v1003_v25 = vadd.f32 %v1002_v3, %v964_v14  ;;  %v1045_v26 = vadd.f32 %v1044_v4, %v966_v16  ;;  %v750_v28 = vadd.f32 %v749_v24, %v1588_v35  ;;  %v639_v43 = vadd.f32 %v638_v32, %v1590_v36  ;;  %v642_v45 = vpop.f32.mrf.mxu0  ;;  %v755_v46 = vpop.f32.mrf.mxu1 }
 0x107   : > { %817 = vst [vmem:[%s1597_s8 + $0x108] sm:$0xff] %v635_v21  ;;  %v876_v18 = vadd.f32 %v875_v7, %v635_v21  ;;  %v965_v29 = vmul.f32 %v635_v21, %v635_v21  ;;  %819 = vst [vmem:[%s1597_s8 + $0x118] sm:$0xff] %v748_v22  ;;  %v918_v19 = vadd.f32 %v917_v9, %v748_v22 }
 0x108   : > { %v967_v31 = vmul.f32 %v748_v22, %v748_v22  ;;  %820 = vst [vmem:[%s1597_s8 + $0x120] sm:$0xff] %v637_v27  ;;  %v856_v33 = vadd.f32 %v855_v13, %v637_v27  ;;  %v968_v38 = vmul.f32 %v637_v27, %v637_v27  ;;  %822 = vst [vmem:[%s1597_s8 + $0x130] sm:$0xff] %v750_v28  ;;  %v644_v55 = vpop.f32.mrf.mxu0  ;;  %v757_v56 = vpop.f32.mrf.mxu1 }
 0x109   : > { %v898_v39 = vadd.f32 %v897_v15, %v750_v28  ;;  %v970_v40 = vmul.f32 %v750_v28, %v750_v28  ;;  %v1024_v41 = vadd.f32 %v1023_v17, %v965_v29  ;;  %v752_v44 = vadd.f32 %v751_v2, %v1592_v37  ;;  %821 = vst [vmem:[%s1597_s8 + $0x128] sm:$0xff] %v639_v43 }
 0x10a   : > { %v1066_v42 = vadd.f32 %v1065_v20, %v967_v31  ;;  %v1004_v47 = vadd.f32 %v1003_v25, %v968_v38  ;;  %v643_v49 = vadd.f32 %v642_v45, %v1586_v34  ;;  %v756_v50 = vadd.f32 %v755_v46, %v1588_v35  ;;  %v646_v1 = vpop.f32.mrf.mxu0  ;;  %v759_v3 = vpop.f32.mrf.mxu1 }
 0x10b   : > { %v1046_v48 = vadd.f32 %v1045_v26, %v970_v40  ;;  %v877_v51 = vadd.f32 %v876_v18, %v639_v43  ;;  %v969_v52 = vmul.f32 %v639_v43, %v639_v43  ;;  %823 = vst [vmem:[%s1597_s8 + $0x138] sm:$0xff] %v752_v44  ;;  %v919_v53 = vadd.f32 %v918_v19, %v752_v44 }
 0x10c   : > { %v971_v54 = vmul.f32 %v752_v44, %v752_v44  ;;  %824 = vst [vmem:[%s1597_s8 + $0x140] sm:$0xff] %v643_v49  ;;  %v857_v57 = vadd.f32 %v856_v33, %v643_v49  ;;  %v972_v58 = vmul.f32 %v643_v49, %v643_v49  ;;  %826 = vst [vmem:[%s1597_s8 + $0x150] sm:$0xff] %v756_v50  ;;  %v648_v12 = vpop.f32.mrf.mxu0  ;;  %v761_v13 = vpop.f32.mrf.mxu1 }
 0x10d   : > { %v899_v59 = vadd.f32 %v898_v39, %v756_v50  ;;  %v974_v60 = vmul.f32 %v756_v50, %v756_v50  ;;  %v1025_v61 = vadd.f32 %v1024_v41, %v969_v52  ;;  %v645_v63 = vadd.f32 %v644_v55, %v1590_v36 }
 0x10e   : > { %v1067_v62 = vadd.f32 %v1066_v42, %v971_v54  ;;  %v758_v0 = vadd.f32 %v757_v56, %v1592_v37  ;;  %v1005_v4 = vadd.f32 %v1004_v47, %v972_v58  ;;  %v647_v6 = vadd.f32 %v646_v1, %v1586_v34  ;;  %v652_v24 = vpop.f32.mrf.mxu0  ;;  %v765_v25 = vpop.f32.mrf.mxu1 }
 0x10f   : > { %v1047_v5 = vadd.f32 %v1046_v48, %v974_v60  ;;  %v760_v7 = vadd.f32 %v759_v3, %v1588_v35  ;;  %825 = vst [vmem:[%s1597_s8 + $0x148] sm:$0xff] %v645_v63  ;;  %v878_v8 = vadd.f32 %v877_v51, %v645_v63  ;;  %v973_v9 = vmul.f32 %v645_v63, %v645_v63 }
 0x110   : > { %827 = vst [vmem:[%s1597_s8 + $0x158] sm:$0xff] %v758_v0  ;;  %v920_v10 = vadd.f32 %v919_v53, %v758_v0  ;;  %v975_v11 = vmul.f32 %v758_v0, %v758_v0  ;;  %828 = vst [vmem:[%s1597_s8 + $0x160] sm:$0xff] %v647_v6  ;;  %v858_v14 = vadd.f32 %v857_v57, %v647_v6  ;;  %v654_v2 = vpop.f32.mrf.mxu0  ;;  %v767_v33 = vpop.f32.mrf.mxu1 }
 0x111   : > { %v976_v15 = vmul.f32 %v647_v6, %v647_v6  ;;  %830 = vst [vmem:[%s1597_s8 + $0x170] sm:$0xff] %v760_v7  ;;  %v900_v16 = vadd.f32 %v899_v59, %v760_v7  ;;  %v978_v17 = vmul.f32 %v760_v7, %v760_v7  ;;  %v1026_v20 = vadd.f32 %v1025_v61, %v973_v9 }
 0x112   : > { %v1068_v21 = vadd.f32 %v1067_v62, %v975_v11  ;;  %v649_v22 = vadd.f32 %v648_v12, %v1590_v36  ;;  %v762_v23 = vadd.f32 %v761_v13, %v1592_v37  ;;  %v653_v28 = vadd.f32 %v652_v24, %v1586_v34  ;;  %v656_v46 = vpop.f32.mrf.mxu0  ;;  %v769_v47 = vpop.f32.mrf.mxu1 }
 0x113   : > { %v1006_v26 = vadd.f32 %v1005_v4, %v976_v15  ;;  %v1048_v27 = vadd.f32 %v1047_v5, %v978_v17  ;;  %v766_v18 = vadd.f32 %v765_v25, %v1588_v35  ;;  %v655_v44 = vadd.f32 %v654_v2, %v1590_v36 }
 0x114   : > { %829 = vst [vmem:[%s1597_s8 + $0x168] sm:$0xff] %v649_v22  ;;  %v879_v29 = vadd.f32 %v878_v8, %v649_v22  ;;  %v977_v19 = vmul.f32 %v649_v22, %v649_v22  ;;  %831 = vst [vmem:[%s1597_s8 + $0x178] sm:$0xff] %v762_v23  ;;  %v921_v31 = vadd.f32 %v920_v10, %v762_v23  ;;  %v658_v56 = vpop.f32.mrf.mxu0  ;;  %v771_v57 = vpop.f32.mrf.mxu1 }
 0x115   : > { %v979_v32 = vmul.f32 %v762_v23, %v762_v23  ;;  %832 = vst [vmem:[%s1597_s8 + $0x180] sm:$0xff] %v653_v28  ;;  %v859_v38 = vadd.f32 %v858_v14, %v653_v28  ;;  %v980_v39 = vmul.f32 %v653_v28, %v653_v28  ;;  %834 = vst [vmem:[%s1597_s8 + $0x190] sm:$0xff] %v766_v18 }
 0x116   : > { %v901_v40 = vadd.f32 %v900_v16, %v766_v18  ;;  %v982_v41 = vmul.f32 %v766_v18, %v766_v18  ;;  %v1027_v42 = vadd.f32 %v1026_v20, %v977_v19  ;;  %v768_v45 = vadd.f32 %v767_v33, %v1592_v37  ;;  %833 = vst [vmem:[%s1597_s8 + $0x188] sm:$0xff] %v655_v44  ;;  %v662_v3 = vpop.f32.mrf.mxu0  ;;  %v775_v4 = vpop.f32.mrf.mxu1 }
 0x117   : > { %v1069_v43 = vadd.f32 %v1068_v21, %v979_v32  ;;  %v1007_v48 = vadd.f32 %v1006_v26, %v980_v39  ;;  %v657_v50 = vadd.f32 %v656_v46, %v1586_v34  ;;  %v770_v51 = vadd.f32 %v769_v47, %v1588_v35 }
 0x118   : > { %v1049_v49 = vadd.f32 %v1048_v27, %v982_v41  ;;  %v880_v52 = vadd.f32 %v879_v29, %v655_v44  ;;  %v981_v53 = vmul.f32 %v655_v44, %v655_v44  ;;  %835 = vst [vmem:[%s1597_s8 + $0x198] sm:$0xff] %v768_v45  ;;  %v922_v54 = vadd.f32 %v921_v31, %v768_v45  ;;  %v664_v13 = vpop.f32.mrf.mxu0  ;;  %v777_v14 = vpop.f32.mrf.mxu1 }
 0x119   : > { %v983_v55 = vmul.f32 %v768_v45, %v768_v45  ;;  %836 = vst [vmem:[%s1597_s8 + $0x1a0] sm:$0xff] %v657_v50  ;;  %v860_v58 = vadd.f32 %v859_v38, %v657_v50  ;;  %v984_v59 = vmul.f32 %v657_v50, %v657_v50  ;;  %838 = vst [vmem:[%s1597_s8 + $0x1b0] sm:$0xff] %v770_v51 }
 0x11a   : > { %v902_v60 = vadd.f32 %v901_v40, %v770_v51  ;;  %v986_v61 = vmul.f32 %v770_v51, %v770_v51  ;;  %v1028_v62 = vadd.f32 %v1027_v42, %v981_v53  ;;  %v659_v0 = vadd.f32 %v658_v56, %v1590_v36  ;;  %v666_v25 = vpop.f32.mrf.mxu0  ;;  %v779_v26 = vpop.f32.mrf.mxu1 }
 0x11b   : > { %v1070_v63 = vadd.f32 %v1069_v43, %v983_v55  ;;  %v772_v1 = vadd.f32 %v771_v57, %v1592_v37  ;;  %v1008_v5 = vadd.f32 %v1007_v48, %v984_v59  ;;  %v663_v7 = vadd.f32 %v662_v3, %v1586_v34 }
 0x11c   : > { %v1050_v6 = vadd.f32 %v1049_v49, %v986_v61  ;;  %v776_v8 = vadd.f32 %v775_v4, %v1588_v35  ;;  %837 = vst [vmem:[%s1597_s8 + $0x1a8] sm:$0xff] %v659_v0  ;;  %v881_v9 = vadd.f32 %v880_v52, %v659_v0  ;;  %v985_v10 = vmul.f32 %v659_v0, %v659_v0  ;;  %v668_v33 = vpop.f32.mrf.mxu0  ;;  %v781_v38 = vpop.f32.mrf.mxu1 }
 0x11d   : > { %839 = vst [vmem:[%s1597_s8 + $0x1b8] sm:$0xff] %v772_v1  ;;  %v923_v11 = vadd.f32 %v922_v54, %v772_v1  ;;  %v987_v12 = vmul.f32 %v772_v1, %v772_v1  ;;  %840 = vst [vmem:[%s1597_s8 + $0x1c0] sm:$0xff] %v663_v7  ;;  %v861_v15 = vadd.f32 %v860_v58, %v663_v7 }
 0x11e   : > { %v988_v16 = vmul.f32 %v663_v7, %v663_v7  ;;  %842 = vst [vmem:[%s1597_s8 + $0x1d0] sm:$0xff] %v776_v8  ;;  %v903_v17 = vadd.f32 %v902_v60, %v776_v8  ;;  %v990_v20 = vmul.f32 %v776_v8, %v776_v8  ;;  %v1029_v21 = vadd.f32 %v1028_v62, %v985_v10 }
 0x11f   : > { %v1071_v22 = vadd.f32 %v1070_v63, %v987_v12  ;;  %v665_v23 = vadd.f32 %v664_v13, %v1590_v36  ;;  %v778_v24 = vadd.f32 %v777_v14, %v1592_v37  ;;  %v667_v18 = vadd.f32 %v666_v25, %v1586_v34 }
 0x120   : > { %v1009_v27 = vadd.f32 %v1008_v5, %v988_v16  ;;  %v1051_v28 = vadd.f32 %v1050_v6, %v990_v20  ;;  %v780_v29 = vadd.f32 %v779_v26, %v1588_v35  ;;  %v669_v35 = vadd.f32 %v668_v33, %v1590_v36 }
 0x121   : > { %841 = vst [vmem:[%s1597_s8 + $0x1c8] sm:$0xff] %v665_v23  ;;  %v882_v19 = vadd.f32 %v881_v9, %v665_v23  ;;  %v989_v31 = vmul.f32 %v665_v23, %v665_v23  ;;  %843 = vst [vmem:[%s1597_s8 + $0x1d8] sm:$0xff] %v778_v24  ;;  %v924_v32 = vadd.f32 %v923_v11, %v778_v24  ;;  %v1375_v14 = vmov 1983009808  }
 0x122   : > { %v991_v2 = vmul.f32 %v778_v24, %v778_v24  ;;  %844 = vst [vmem:[%s1597_s8 + $0x1e0] sm:$0xff] %v667_v18  ;;  %v862_v39 = vadd.f32 %v861_v15, %v667_v18  ;;  %v992_v40 = vmul.f32 %v667_v18, %v667_v18  ;;  %846 = vst [vmem:[%s1597_s8 + $0x1f0] sm:$0xff] %v780_v29  ;;  %v1092_v15 = vunpack.c.l.s4 %v1375_v14 }
 0x123   : > { %v904_v41 = vadd.f32 %v903_v17, %v780_v29  ;;  %v994_v42 = vmul.f32 %v780_v29, %v780_v29  ;;  %v1030_v43 = vadd.f32 %v1029_v21, %v989_v31  ;;  %v782_v44 = vadd.f32 %v781_v38, %v1592_v37  ;;  %845 = vst [vmem:[%s1597_s8 + $0x1e8] sm:$0xff] %v669_v35 }
 0x124   : > { %v1072_v34 = vadd.f32 %v1071_v22, %v991_v2  ;;  %v863_v45 = vrot.slane %v862_v39, 4  ;;  %v1010_v46 = vadd.f32 %v1009_v27, %v992_v40  ;;  %v883_v49 = vadd.f32 %v882_v19, %v669_v35 }
 0x125   : > { %v905_v47 = vrot.slane %v904_v41, 4  ;;  %v1052_v48 = vadd.f32 %v1051_v28, %v994_v42  ;;  %v993_v50 = vmul.f32 %v669_v35, %v669_v35  ;;  %847 = vst [vmem:[%s1597_s8 + $0x1f8] sm:$0xff] %v782_v44  ;;  %v925_v51 = vadd.f32 %v924_v32, %v782_v44 }
 0x126   : > { %v995_v52 = vmul.f32 %v782_v44, %v782_v44  ;;  %v864_v53 = vadd.f32 %v863_v45, %v862_v39  ;;  %v1011_v54 = vrot.slane %v1010_v46, 4  ;;  %v884_v57 = vrot.slane %v883_v49, 4 }
 0x127   : > { %v906_v55 = vadd.f32 %v905_v47, %v904_v41  ;;  %v1053_v56 = vrot.slane %v1052_v48, 4  ;;  %v1031_v58 = vadd.f32 %v1030_v43, %v993_v50  ;;  %v926_v59 = vrot.slane %v925_v51, 4 }
 0x128   : > { %v1073_v36 = vadd.f32 %v1072_v34, %v995_v52  ;;  %v865_v60 = vrot.slane %v864_v53, 2  ;;  %v1012_v37 = vadd.f32 %v1011_v54, %v1010_v46  ;;  %v885_v63 = vadd.f32 %v884_v57, %v883_v49 }
 0x129   : > { %v907_v61 = vrot.slane %v906_v55, 2  ;;  %v1054_v62 = vadd.f32 %v1053_v56, %v1052_v48  ;;  %v1032_v0 = vrot.slane %v1031_v58, 4  ;;  %v927_v1 = vadd.f32 %v926_v59, %v925_v51 }
 0x12a   : > { %v1074_v3 = vrot.slane %v1073_v36, 4  ;;  %v866_v4 = vadd.f32 %v865_v60, %v864_v53  ;;  %v1013_v5 = vrot.slane %v1012_v37, 2  ;;  %v886_v8 = vrot.slane %v885_v63, 2 }
 0x12b   : > { %v908_v6 = vadd.f32 %v907_v61, %v906_v55  ;;  %v1055_v7 = vrot.slane %v1054_v62, 2  ;;  %v1033_v9 = vadd.f32 %v1032_v0, %v1031_v58  ;;  %v928_v10 = vrot.slane %v927_v1, 2 }
 0x12c   : > { %v1075_v11 = vadd.f32 %v1074_v3, %v1073_v36  ;;  %v1014_v12 = vadd.f32 %v1013_v5, %v1012_v37  ;;  %v887_v16 = vadd.f32 %v886_v8, %v885_v63  ;;  %v867_v22 = vrot.slane %v866_v4, 1 }
 0x12d   : > { %v1056_v13 = vadd.f32 %v1055_v7, %v1054_v62  ;;  %v1034_v17 = vrot.slane %v1033_v9, 2  ;;  %v929_v20 = vadd.f32 %v928_v10, %v927_v1  ;;  %v909_v24 = vrot.slane %v908_v6, 1 }
 0x12e   : > { %v1076_v21 = vrot.slane %v1075_v11, 2  ;;  %v1015_v23 = vrot.slane %v1014_v12, 1  ;;  %v888_v26 = vrot.slane %v887_v16, 1  ;;  %v1093_v29 = vunpack.c.0.s8 %v1092_v15 }
 0x12f   : > { %v1057_v25 = vrot.slane %v1056_v13, 1  ;;  %v1035_v27 = vadd.f32 %v1034_v17, %v1033_v9  ;;  %v930_v28 = vrot.slane %v929_v20, 1  ;;  %v868_v33 = vadd.f32 %v867_v22, %v866_v4 }
 0x130   : > { %v1077_v18 = vadd.f32 %v1076_v21, %v1075_v11  ;;  %v1016_v19 = vadd.f32 %v1015_v23, %v1014_v12  ;;  %v910_v38 = vadd.f32 %v909_v24, %v908_v6  ;;  %v889_v39 = vadd.f32 %v888_v26, %v887_v16 }
 0x131   : > { %v1058_v31 = vadd.f32 %v1057_v25, %v1056_v13  ;;  %v1036_v32 = vrot.slane %v1035_v27, 1  ;;  %v931_v41 = vadd.f32 %v930_v28, %v929_v20  ;;  %v1096_v43 = vsub.s32 %v1093_v29, %v1576_v30 }
 0x132   : > { %v1078_v2 = vrot.slane %v1077_v18, 1  ;;  %v1081_v34 = vsel %vm1080_vm1, %v868_v33, %v1016_v19 }
 0x133   : > { %v1037_v40 = vadd.f32 %v1036_v32, %v1035_v27  ;;  %v1083_v35 = vsel %vm1080_vm1, %v910_v38, %v1058_v31 }
 0x134   : > { %v1079_v42 = vadd.f32 %v1078_v2, %v1077_v18 }
 0x135   : > { %v1082_v44 = vsel %vm1080_vm1, %v889_v39, %v1037_v40 }
 0x136   : > { %v1084_v45 = vsel %vm1080_vm1, %v931_v41, %v1079_v42  ;;  %v1089_v46 = vcombine.low %v1081_v34, %v1082_v44 }
 0x137   : > { %v1090_v47 = vcombine.low %v1083_v35, %v1084_v45 }
 0x138   : > { %v1097_v48 = vrot.slane %v1089_v46, %v1096_v43 }
 0x139   : > { %v1104_v49 = vrot.slane %v1090_v47, %v1096_v43 }
 0x13b   : > { %v1105_v50 = vcombine.low %v1097_v48, %v1104_v49 }
 0x13d   : > { %1107 = vst [vmem:[%s326_s12] sm:$0xff] %v1105_v50 }
 0x13e PF: > { %s17_s23 = sadd.s32 1, %s1372_s23   ;;  %s1748_s21 = smov %s1368_s22 }
 0x13f   : > { %p14_p5 = scmp.ge.s32.totalorder %s17_s23, 4   ;;  %s1749_s22 = smov %s1751_s24 }
 0x141   :  { %16 = sbr.rel (!%p14_p5) target bundleno = 2 (0x2), region = 85 }

// kernel: est_coord_forward.12
= control target key start
LH: loop header
LB: loop body
LE: loop exit
PB: predicated region body
PF: predicated region fallthrough
CT: control target
= control target key end

     0   :  { %s1779_s18 = smov 0   ;;  %s1781_s19 = smov 0   ;;  %s2392_s0 = inlined_call_operand.vmem [shape: f32[2,128,512], index: 0, kind: input, shape index: {}]   ;;  %s2393_s1 = inlined_call_operand.vmem [shape: bf16[512,256], index: 1, kind: input, shape index: {}]   ;;  %s2394_s2 = inlined_call_operand.vmem [shape: f32[1,512], index: 2, kind: input, shape index: {}]   ;;  %s2395_s3 = inlined_call_operand.vmem [shape: f32[1,512], index: 3, kind: input, shape index: {}]   ;;  %s2396_s4 = inlined_call_operand.vmem [shape: f32[2,128,256], index: 4, kind: output, shape index: {0}]   ;;  %s2397_s5 = inlined_call_operand.vmem [shape: f32[2,2,256], index: 5, kind: output, shape index: {1}]  }
   0x1   :  { %s1783_s20 = smov 0  }
   0x2 LB: > { %s28_s21 = sadd.s32 1, %s1743_s19  ;;  %p1528_p0 = scmp.ge.s32.totalorder %s1747_s20, 1  ;;  %s1747_s20 = sphi %s1783_s20, %s16_s20   ;;  %s1743_s19 = sphi %s1781_s19, %s2399_s19   ;;  %s1739_s18 = sphi %s1779_s18, %s2398_s18  }
   0x3   : > { %p30_p1 = scmp.ge.s32.totalorder %s28_s21, 2  ;;  %p214_p2 = scmp.lt.s32.totalorder %s1747_s20, 3 }
   0x5   : > { %s2401_s21 = smov (%p30_p1, %s28_s21), 0  ;;  %p215_p3 = pnand %p1528_p0, %p214_p2 }
   0x6   : > { %p259_p4 = scmp.lt.s32.totalorder (!%p215_p3), %s1739_s18, 1 }
   0x7   : > { %218 = sbr.rel (%p215_p3) target bundleno = 355 (0x163), region = 36 }
   0xc   : > { %v1629_v0 = vld [vmem:[%s2393_s1 + $0x74] ss:$8 sps:$4 sm:$0xff]   ;;  %v1633_v2 = vld [vmem:[%s2393_s1 + $0x70] ss:$8 sps:$4 sm:$0xff]   ;;  %v1635_v4 = vld [vmem:[%s2393_s1 + $0x64] ss:$8 sps:$4 sm:$0xff]   ;;  %v353_v36 = vlaneseq }
   0xd   : > { %v1631_v1 = vld [vmem:[%s2393_s1 + $0x174] ss:$8 sps:$4 sm:$0xff]   ;;  %1003 = vmatprep.subr.bf16.mxu0 %v1629_v0  ;;  %v1634_v3 = vld [vmem:[%s2393_s1 + $0x170] ss:$8 sps:$4 sm:$0xff]   ;;  %v1637_v5 = vld [vmem:[%s2393_s1 + $0x164] ss:$8 sps:$4 sm:$0xff]  }
   0xe   : > { %1116 = vmatprep.subr.bf16.mxu1 %v1631_v1  ;;  %1004 = vmatpush1.bf16.msra.mxu0 %v1633_v2  ;;  %v1639_v6 = vld [vmem:[%s2393_s1 + $0x60] ss:$8 sps:$4 sm:$0xff]   ;;  %v1641_v8 = vld [vmem:[%s2393_s1 + $0x54] ss:$8 sps:$4 sm:$0xff]   ;;  %v1645_v10 = vld [vmem:[%s2393_s1 + $0x50] ss:$8 sps:$4 sm:$0xff]  }
   0xf   : > { %1117 = vmatpush1.bf16.msra.mxu1 %v1634_v3  ;;  %1005 = vmatprep.subr.bf16.mxu0 %v1635_v4  ;;  %v1640_v7 = vld [vmem:[%s2393_s1 + $0x160] ss:$8 sps:$4 sm:$0xff]   ;;  %v1643_v9 = vld [vmem:[%s2393_s1 + $0x154] ss:$8 sps:$4 sm:$0xff]   ;;  %v1646_v11 = vld [vmem:[%s2393_s1 + $0x150] ss:$8 sps:$4 sm:$0xff]  }
  0x10   : > { %1118 = vmatprep.subr.bf16.mxu1 %v1637_v5  ;;  %v1647_v12 = vld [vmem:[%s2393_s1 + $0x44] ss:$8 sps:$4 sm:$0xff]   ;;  %v1651_v14 = vld [vmem:[%s2393_s1 + $0x40] ss:$8 sps:$4 sm:$0xff]   ;;  %v1653_v16 = vld [vmem:[%s2393_s1 + $0x34] ss:$8 sps:$4 sm:$0xff]  }
  0x11   : > { %v1649_v13 = vld [vmem:[%s2393_s1 + $0x144] ss:$8 sps:$4 sm:$0xff]   ;;  %v1652_v15 = vld [vmem:[%s2393_s1 + $0x140] ss:$8 sps:$4 sm:$0xff]   ;;  %v1655_v17 = vld [vmem:[%s2393_s1 + $0x134] ss:$8 sps:$4 sm:$0xff]  }
  0x12   : > { %1006 = vmatpush1.bf16.msra.mxu0 %v1639_v6  ;;  %v1657_v18 = vld [vmem:[%s2393_s1 + $0x30] ss:$8 sps:$4 sm:$0xff]   ;;  %v1659_v20 = vld [vmem:[%s2393_s1 + $0x24] ss:$8 sps:$4 sm:$0xff]   ;;  %v1663_v22 = vld [vmem:[%s2393_s1 + $0x20] ss:$8 sps:$4 sm:$0xff]  }
  0x13   : > { %1119 = vmatpush1.bf16.msra.mxu1 %v1640_v7  ;;  %1007 = vmatprep.subr.bf16.mxu0 %v1641_v8  ;;  %v1658_v19 = vld [vmem:[%s2393_s1 + $0x130] ss:$8 sps:$4 sm:$0xff]   ;;  %v1661_v21 = vld [vmem:[%s2393_s1 + $0x124] ss:$8 sps:$4 sm:$0xff]   ;;  %v1664_v23 = vld [vmem:[%s2393_s1 + $0x120] ss:$8 sps:$4 sm:$0xff]  }
  0x14   : > { %1120 = vmatprep.subr.bf16.mxu1 %v1643_v9  ;;  %v1665_v24 = vld [vmem:[%s2393_s1 + $0x14] ss:$8 sps:$4 sm:$0xff]   ;;  %v1669_v26 = vld [vmem:[%s2393_s1 + $0x10] ss:$8 sps:$4 sm:$0xff]   ;;  %v1671_v28 = vld [vmem:[%s2393_s1 + $0x4] ss:$8 sps:$4 sm:$0xff]  }
  0x15   : > { %v1667_v25 = vld [vmem:[%s2393_s1 + $0x114] ss:$8 sps:$4 sm:$0xff]   ;;  %v1670_v27 = vld [vmem:[%s2393_s1 + $0x110] ss:$8 sps:$4 sm:$0xff]   ;;  %v1673_v29 = vld [vmem:[%s2393_s1 + $0x104] ss:$8 sps:$4 sm:$0xff]  }
  0x16   : > { %1008 = vmatpush1.bf16.msra.mxu0 %v1645_v10  ;;  %v1675_v30 = vld [vmem:[%s2393_s1] ss:$8 sps:$4 sm:$0xff]   ;;  %v1677_v32 = vld [vmem:[%s2393_s1 + $0xf4] ss:$8 sps:$4 sm:$0xff]   ;;  %v1681_v34 = vld [vmem:[%s2393_s1 + $0xf0] ss:$8 sps:$4 sm:$0xff]  }
  0x17   : > { %1121 = vmatpush1.bf16.msra.mxu1 %v1646_v11  ;;  %1009 = vmatprep.subr.bf16.mxu0 %v1647_v12  ;;  %v1676_v31 = vld [vmem:[%s2393_s1 + $0x100] ss:$8 sps:$4 sm:$0xff]   ;;  %v1679_v33 = vld [vmem:[%s2393_s1 + $0x1f4] ss:$8 sps:$4 sm:$0xff]   ;;  %v1682_v35 = vld [vmem:[%s2393_s1 + $0x1f0] ss:$8 sps:$4 sm:$0xff]  }
  0x18   : > { %1122 = vmatprep.subr.bf16.mxu1 %v1649_v13  ;;  %v1683_v37 = vld [vmem:[%s2393_s1 + $0xe4] ss:$8 sps:$4 sm:$0xff]   ;;  %s2403_s18 = smov (!%p259_p4, %s1739_s18), 1  ;;  %v1687_v39 = vld [vmem:[%s2393_s1 + $0xe0] ss:$8 sps:$4 sm:$0xff]   ;;  %v1920_v40 = vshrl.u32 %v353_v36, 7 }
  0x19   : > { %v1685_v38 = vld [vmem:[%s2393_s1 + $0x1e4] ss:$8 sps:$4 sm:$0xff]   ;;  %v1688_v41 = vld [vmem:[%s2393_s1 + $0x1e0] ss:$8 sps:$4 sm:$0xff]   ;;  %v1689_v42 = vld [vmem:[%s2393_s1 + $0xd4] ss:$8 sps:$4 sm:$0xff]  }
  0x1a   : > { %1010 = vmatpush1.bf16.msra.mxu0 %v1651_v14  ;;  %s1602_s16 = sshll.u32 %s2403_s18, 9  ;;  %v1691_v43 = vld [vmem:[%s2393_s1 + $0x1d4] ss:$8 sps:$4 sm:$0xff]   ;;  %v1693_v44 = vld [vmem:[%s2393_s1 + $0xd0] ss:$8 sps:$4 sm:$0xff]   ;;  %v359_v47 = vsub.s32 1, %v1920_v40 }
  0x1b   : > { %1123 = vmatpush1.bf16.msra.mxu1 %v1652_v15  ;;  %1011 = vmatprep.subr.bf16.mxu0 %v1653_v16  ;;  %v1694_v45 = vld [vmem:[%s2393_s1 + $0x1d0] ss:$8 sps:$4 sm:$0xff]   ;;  %s1941_s29 = scalar_lea.vmem %s2392_s0, %s1602_s16  ;;  %v1695_v46 = vld [vmem:[%s2393_s1 + $0xc4] ss:$8 sps:$4 sm:$0xff]   ;;  %v367_v48 = vsub.s32 3, %v1920_v40  ;;  %v355_v50 = vsub.s32 0, %v1920_v40 }
  0x1c   : > { %1124 = vmatprep.subr.bf16.mxu1 %v1655_v17  ;;  %v1697_v49 = vld [vmem:[%s2393_s1 + $0x1c4] ss:$8 sps:$4 sm:$0xff]   ;;  %v1699_v51 = vld [vmem:[%s2393_s1 + $0xc0] ss:$8 sps:$4 sm:$0xff]   ;;  %v363_v57 = vsub.s32 2, %v1920_v40  ;;  %v290_v60 = vld [vmem:[%s1941_s29 + $0x18] sm:$0xff] }
  0x1d   : > { %v1700_v52 = vld [vmem:[%s2393_s1 + $0x1c0] ss:$8 sps:$4 sm:$0xff]   ;;  %v294_v61 = vld [vmem:[%s1941_s29 + $0x38] sm:$0xff]  ;;  %v289_v11 = vld [vmem:[%s1941_s29 + $0x10] sm:$0xff]  ;;  %vm1377_vm0 = vcmask 1040384   ;;  %s1604_s12 = sshll.u32 %s2403_s18, 2 }
  0x1e   : > { %1012 = vmatpush1.bf16.msra.mxu0 %v1657_v18  ;;  %v288_v53 = vld [vmem:[%s1941_s29 + $0x8] sm:$0xff]  ;;  %v351_v55 = vld [vmem:[%s2394_s2] sm:$0xf]  ;;  %v1701_v0 = vld [vmem:[%s2393_s1 + $0xb4] ss:$8 sps:$4 sm:$0xff]   ;;  %s285_s15 = scalar_lea.vmem %s2397_s5, %s1604_s12 }
  0x1f   : > { %1125 = vmatpush1.bf16.msra.mxu1 %v1658_v19  ;;  %1013 = vmatprep.subr.bf16.mxu0 %v1659_v20  ;;  %v292_v54 = vld [vmem:[%s1941_s29 + $0x28] sm:$0xff]  ;;  %v437_v56 = vld [vmem:[%s2395_s3] sm:$0xf]  ;;  %v1967_v58 = vrot.slane %v351_v55, %v359_v47  ;;  %v1973_v62 = vrot.slane %v351_v55, %v367_v48  ;;  %v1703_v1 = vld [vmem:[%s2393_s1 + $0x1b4] ss:$8 sps:$4 sm:$0xff]   ;;  %v1984_v3 = vrot.slane %v351_v55, %v355_v50 }
  0x20   : > { %1126 = vmatprep.subr.bf16.mxu1 %v1661_v21  ;;  %v1969_v59 = vrot.slane %v437_v56, %v359_v47  ;;  %v287_v63 = vld [vmem:[%s1941_s29] sm:$0xff]  ;;  %v1982_v2 = vrot.slane %v437_v56, %v367_v48  ;;  %v1992_v10 = vrot.slane %v437_v56, %v355_v50  ;;  %v1995_v12 = vrot.slane %v351_v55, %v363_v57  ;;  %v1705_v13 = vld [vmem:[%s2393_s1 + $0xb0] ss:$8 sps:$4 sm:$0xff]  }
  0x21   : > { %v374_v4 = vmul.f32 %v1967_v58, %v288_v53  ;;  %v378_v5 = vmul.f32 %v1967_v58, %v292_v54  ;;  %v376_v6 = vmul.f32 %v1973_v62, %v290_v60  ;;  %v380_v7 = vmul.f32 %v1973_v62, %v294_v61  ;;  %v291_v8 = vld [vmem:[%s1941_s29 + $0x20] sm:$0xff]  ;;  %v1706_v14 = vld [vmem:[%s2393_s1 + $0x1b0] ss:$8 sps:$4 sm:$0xff]   ;;  %v304_v60 = vld [vmem:[%s1941_s29 + $0x88] sm:$0xff] }
  0x22   : > { %1014 = vmatpush1.bf16.msra.mxu0 %v1663_v22  ;;  %v373_v9 = vmul.f32 %v1984_v3, %v287_v63  ;;  %v293_v18 = vld [vmem:[%s1941_s29 + $0x30] sm:$0xff]  ;;  %v1707_v19 = vld [vmem:[%s2393_s1 + $0xa4] ss:$8 sps:$4 sm:$0xff]   ;;  %v377_v22 = vmul.f32 %v1984_v3, %v291_v8 }
  0x23   : > { %1127 = vmatpush1.bf16.msra.mxu1 %v1664_v23  ;;  %1015 = vmatprep.subr.bf16.mxu0 %v1665_v24  ;;  %v460_v15 = vadd.f32 %v1969_v59, %v374_v4  ;;  %v464_v16 = vadd.f32 %v1969_v59, %v378_v5  ;;  %v462_v17 = vadd.f32 %v1982_v2, %v376_v6  ;;  %v1709_v20 = vld [vmem:[%s2393_s1 + $0x1a4] ss:$8 sps:$4 sm:$0xff]   ;;  %v297_v48 = vld [vmem:[%s1941_s29 + $0x50] sm:$0xff] }
  0x24   : > { %1128 = vmatprep.subr.bf16.mxu1 %v1667_v25  ;;  %v466_v21 = vadd.f32 %v1982_v2, %v380_v7  ;;  %v2015_v23 = vrot.slane %v437_v56, %v363_v57  ;;  %v296_v24 = vld [vmem:[%s1941_s29 + $0x48] sm:$0xff]  ;;  %v299_v47 = vld [vmem:[%s1941_s29 + $0x60] sm:$0xff]  ;;  %v1717_v53 = vld [vmem:[%s2393_s1 + $0x90] ss:$8 sps:$4 sm:$0xff]   ;;  %v383_v4 = vmul.f32 %v1995_v12, %v297_v48 }
  0x25   : > { %v524_v25 = vmax.f32 %v460_v15, 0.0  ;;  %v382_v36 = vmul.f32 %v1967_v58, %v296_v24  ;;  %v1718_v54 = vld [vmem:[%s2393_s1 + $0x190] ss:$8 sps:$4 sm:$0xff]   ;;  %v1719_v61 = vld [vmem:[%s2393_s1 + $0x84] ss:$8 sps:$4 sm:$0xff]  }
  0x26   : > { %1016 = vmatpush1.bf16.msra.mxu0 %v1669_v26  ;;  %v528_v26 = vmax.f32 %v464_v16, 0.0  ;;  %v1721_v63 = vld [vmem:[%s2393_s1 + $0x184] ss:$8 sps:$4 sm:$0xff]   ;;  %v390_v16 = vmul.f32 %v1967_v58, %v304_v60  ;;  %v314_v48 = vld [vmem:[%s1941_s29 + $0xd8] sm:$0xff] }
  0x27   : > { %1129 = vmatpush1.bf16.msra.mxu1 %v1670_v27  ;;  %1017 = vmatprep.subr.bf16.mxu0 %v1671_v28  ;;  %v526_v27 = vmax.f32 %v462_v17, 0.0  ;;  %v375_v28 = vmul.f32 %v1995_v12, %v289_v11  ;;  %v468_v50 = vadd.f32 %v1969_v59, %v382_v36  ;;  %v308_v5 = vld [vmem:[%s1941_s29 + $0xa8] sm:$0xff]  ;;  %v306_v11 = vld [vmem:[%s1941_s29 + $0x98] sm:$0xff]  ;;  %v307_v36 = vld [vmem:[%s1941_s29 + $0xa0] sm:$0xff] }
  0x28   : > { %1130 = vmatprep.subr.bf16.mxu1 %v1673_v29  ;;  %v530_v29 = vmax.f32 %v466_v21, 0.0  ;;  %v310_v17 = vld [vmem:[%s1941_s29 + $0xb8] sm:$0xff]  ;;  %v394_v24 = vmul.f32 %v1967_v58, %v308_v5 }
  0x2a   : > { %1018 = vmatpush1.bf16.msra.mxu0 %v1675_v30  ;;  %v379_v30 = vmul.f32 %v1995_v12, %v293_v18  ;;  %v590_v40 = vpack.c.bf16 %v530_v29, %v526_v27  ;;  %v1723_v18 = vld [vmem:[%s2393_s1 + $0x80] ss:$8 sps:$4 sm:$0xff]   ;;  %v392_v27 = vmul.f32 %v1973_v62, %v306_v11  ;;  %v313_v11 = vld [vmem:[%s1941_s29 + $0xd0] sm:$0xff] }
  0x2b   : > { %1131 = vmatpush1.bf16.msra.mxu1 %v1676_v31  ;;  %1019 = vmatprep.subr.bf16.mxu0 %v1677_v32  ;;  %v300_v31 = vld [vmem:[%s1941_s29 + $0x68] sm:$0xff]  ;;  %v298_v32 = vld [vmem:[%s1941_s29 + $0x58] sm:$0xff] }
  0x2c   : > { %1132 = vmatprep.subr.bf16.mxu1 %v1679_v33  ;;  %v1711_v33 = vld [vmem:[%s2393_s1 + $0xa0] ss:$8 sps:$4 sm:$0xff]   ;;  %1148 = vmatprep.mubr.bf16.mxu1 %v590_v40  ;;  %v478_v40 = vadd.f32 %v1982_v2, %v392_v27 }
  0x2e   : > { %1020 = vmatpush2.bf16.msra.mxu0 %v1681_v34  ;;  %v1712_v34 = vld [vmem:[%s2393_s1 + $0x1a0] ss:$8 sps:$4 sm:$0xff]   ;;  %v542_v60 = vmax.f32 %v478_v40, 0.0 }
  0x2f   : > { %1133 = vmatpush2.bf16.msra.mxu1 %v1682_v35  ;;  %1021 = vmatprep.subr.bf16.mxu0 %v1683_v37  ;;  %v588_v35 = vpack.c.bf16 %v528_v26, %v524_v25  ;;  %v302_v37 = vld [vmem:[%s1941_s29 + $0x78] sm:$0xff]  ;;  %v469_v26 = vadd.f32 %v2015_v23, %v383_v4  ;;  %v311_v4 = vld [vmem:[%s1941_s29 + $0xc0] sm:$0xff] }
  0x30   : > { %1134 = vmatprep.subr.bf16.mxu1 %v1685_v38  ;;  %v1713_v38 = vld [vmem:[%s2393_s1 + $0x94] ss:$8 sps:$4 sm:$0xff]  }
  0x31   : > { %1035 = vmatprep.mubr.bf16.mxu0 %v588_v35  ;;  %v480_v35 = vadd.f32 %v1969_v59, %v394_v24  ;;  %v324_v24 = vld [vmem:[%s1941_s29 + $0x128] sm:$0xff] }
  0x32   : > { %1022 = vmatpush2.bf16.msra.mxu0 %v1687_v39  ;;  %v1715_v39 = vld [vmem:[%s2393_s1 + $0x194] ss:$8 sps:$4 sm:$0xff]  }
  0x33   : > { %1135 = vmatpush2.bf16.msra.mxu1 %v1688_v41  ;;  %1023 = vmatprep.subr.bf16.mxu0 %v1689_v42  ;;  %v459_v41 = vadd.f32 %v1992_v10, %v373_v9  ;;  %v295_v42 = vld [vmem:[%s1941_s29 + $0x40] sm:$0xff] }
  0x34   : > { %1136 = vmatprep.subr.bf16.mxu1 %v1691_v43  ;;  %v463_v43 = vadd.f32 %v1992_v10, %v377_v22  ;;  %v381_v57 = vmul.f32 %v1984_v3, %v295_v42  ;;  %v312_v42 = vld [vmem:[%s1941_s29 + $0xc8] sm:$0xff] }
  0x35   : > { %v523_v6 = vmax.f32 %v459_v41, 0.0 }
  0x36   : > { %1024 = vmatpush2.bf16.msra.mxu0 %v1693_v44  ;;  %v461_v44 = vadd.f32 %v2015_v23, %v375_v28  ;;  %v527_v7 = vmax.f32 %v463_v43, 0.0  ;;  %v467_v22 = vadd.f32 %v1992_v10, %v381_v57  ;;  %v316_v43 = vld [vmem:[%s1941_s29 + $0xe8] sm:$0xff] }
  0x37   : > { %1137 = vmatpush2.bf16.msra.mxu1 %v1694_v45  ;;  %1025 = vmatprep.subr.bf16.mxu0 %v1695_v46  ;;  %v386_v45 = vmul.f32 %v1967_v58, %v300_v31  ;;  %v384_v46 = vmul.f32 %v1973_v62, %v298_v32  ;;  %v303_v31 = vld [vmem:[%s1941_s29 + $0x80] sm:$0xff]  ;;  %v402_v57 = vmul.f32 %v1967_v58, %v316_v43 }
  0x38   : > { %1138 = vmatprep.subr.bf16.mxu1 %v1697_v49  ;;  %v465_v49 = vadd.f32 %v2015_v23, %v379_v30  ;;  %v525_v8 = vmax.f32 %v461_v44, 0.0  ;;  %v587_v28 = vpack.c.bf16 %v527_v7, %v523_v6  ;;  %v396_v30 = vmul.f32 %v1973_v62, %v310_v17 }
  0x39   : > { %v472_v55 = vadd.f32 %v1969_v59, %v386_v45  ;;  %v470_v56 = vadd.f32 %v1982_v2, %v384_v46  ;;  %v531_v44 = vmax.f32 %v467_v22, 0.0  ;;  %v533_v46 = vmax.f32 %v469_v26, 0.0 }
  0x3a   : > { %1026 = vmatpush2.bf16.msra.mxu0 %v1699_v51  ;;  %v388_v51 = vmul.f32 %v1973_v62, %v302_v37  ;;  %v305_v37 = vld [vmem:[%s1941_s29 + $0x90] sm:$0xff]  ;;  %v482_v41 = vadd.f32 %v1982_v2, %v396_v30  ;;  %v488_v17 = vadd.f32 %v1969_v59, %v402_v57  ;;  %v397_v22 = vmul.f32 %v1984_v3, %v311_v4  ;;  %v326_v30 = vld [vmem:[%s1941_s29 + $0x138] sm:$0xff] }
  0x3b   : > { %1139 = vmatpush2.bf16.msra.mxu1 %v1700_v52  ;;  %1027 = vmatprep.subr.bf16.mxu0 %v1701_v0  ;;  %v301_v52 = vld [vmem:[%s1941_s29 + $0x70] sm:$0xff]  ;;  %v536_v15 = vmax.f32 %v472_v55, 0.0  ;;  %v544_v55 = vmax.f32 %v480_v35, 0.0 }
  0x3c   : > { %1140 = vmatprep.subr.bf16.mxu1 %v1703_v1  ;;  %v474_v0 = vadd.f32 %v1982_v2, %v388_v51  ;;  %v385_v1 = vmul.f32 %v1984_v3, %v299_v47  ;;  %v387_v9 = vmul.f32 %v1995_v12, %v301_v52  ;;  %v389_v47 = vmul.f32 %v1984_v3, %v303_v31 }
  0x3d   : > { %v391_v51 = vmul.f32 %v1995_v12, %v305_v37  ;;  %v410_v37 = vmul.f32 %v1967_v58, %v324_v24 }
  0x3e   : > { %1028 = vmatpush2.bf16.msra.mxu0 %v1705_v13  ;;  %v529_v13 = vmax.f32 %v465_v49, 0.0  ;;  %v538_v21 = vmax.f32 %v474_v0, 0.0  ;;  %v471_v25 = vadd.f32 %v1992_v10, %v385_v1  ;;  %v473_v29 = vadd.f32 %v2015_v23, %v387_v9  ;;  %v315_v9 = vld [vmem:[%s1941_s29 + $0xe0] sm:$0xff] }
  0x3f   : > { %1141 = vmatpush2.bf16.msra.mxu1 %v1706_v14  ;;  %1029 = vmatprep.subr.bf16.mxu0 %v1707_v19  ;;  %v532_v14 = vmax.f32 %v468_v50, 0.0  ;;  %v1724_v19 = vld [vmem:[%s2393_s1 + $0x180] ss:$8 sps:$4 sm:$0xff]   ;;  %v393_v50 = vmul.f32 %v1984_v3, %v307_v36  ;;  %v475_v0 = vadd.f32 %v1992_v10, %v389_v47  ;;  %v477_v7 = vadd.f32 %v2015_v23, %v391_v51 }
  0x40   : > { %1142 = vmatprep.subr.bf16.mxu1 %v1709_v20  ;;  %v534_v20 = vmax.f32 %v470_v56, 0.0  ;;  %v589_v32 = vpack.c.bf16 %v529_v13, %v525_v8  ;;  %v535_v45 = vmax.f32 %v471_v25, 0.0  ;;  %v537_v49 = vmax.f32 %v473_v29, 0.0  ;;  %v317_v13 = vld [vmem:[%s1941_s29 + $0xf0] sm:$0xff]  ;;  %v322_v25 = vld [vmem:[%s1941_s29 + $0x118] sm:$0xff] }
  0x41   : > { %v398_v56 = vmul.f32 %v1967_v58, %v312_v42  ;;  %v479_v6 = vadd.f32 %v1992_v10, %v393_v50  ;;  %v539_v26 = vmax.f32 %v475_v0, 0.0  ;;  %v401_v27 = vmul.f32 %v1984_v3, %v315_v9 }
  0x42   : > { %1030 = vmatpush2.bf16.msra.mxu0 %v1711_v33  ;;  %v592_v33 = vpack.c.bf16 %v536_v15, %v532_v14  ;;  %v591_v5 = vpack.c.bf16 %v535_v45, %v531_v44  ;;  %v593_v14 = vpack.c.bf16 %v537_v49, %v533_v46  ;;  %v403_v29 = vmul.f32 %v1995_v12, %v317_v13 }
  0x43   : > { %1143 = vmatpush2.bf16.msra.mxu1 %v1712_v34  ;;  %1031 = vmatprep.subr.bf16.mxu0 %v1713_v38  ;;  %v476_v34 = vadd.f32 %v1969_v59, %v390_v16  ;;  %v309_v38 = vld [vmem:[%s1941_s29 + $0xb0] sm:$0xff]  ;;  %v484_v16 = vadd.f32 %v1969_v59, %v398_v56  ;;  %v543_v31 = vmax.f32 %v479_v6, 0.0  ;;  %v552_v36 = vmax.f32 %v488_v17, 0.0  ;;  %v330_v6 = vld [vmem:[%s1941_s29 + $0x158] sm:$0xff] }
  0x44   : > { %1144 = vmatprep.subr.bf16.mxu1 %v1715_v39  ;;  %v594_v39 = vpack.c.bf16 %v538_v21, %v534_v20  ;;  %v395_v52 = vmul.f32 %v1995_v12, %v309_v38  ;;  %v408_v38 = vmul.f32 %v1973_v62, %v322_v25  ;;  %v412_v42 = vmul.f32 %v1973_v62, %v326_v30  ;;  %v333_v30 = vld [vmem:[%s1941_s29 + $0x170] sm:$0xff] }
  0x45   : > { %v548_v35 = vmax.f32 %v484_v16, 0.0  ;;  %v487_v43 = vadd.f32 %v1992_v10, %v401_v27  ;;  %v489_v45 = vadd.f32 %v2015_v23, %v403_v29  ;;  %v595_v46 = vpack.c.bf16 %v543_v31, %v539_v26  ;;  %v329_v29 = vld [vmem:[%s1941_s29 + $0x150] sm:$0xff] }
  0x46   : > { %1032 = vmatpush2.bf16.msra.mxu0 %v1717_v53  ;;  %v318_v53 = vld [vmem:[%s1941_s29 + $0xf8] sm:$0xff]  ;;  %v481_v8 = vadd.f32 %v2015_v23, %v395_v52  ;;  %v496_v50 = vadd.f32 %v1969_v59, %v410_v37  ;;  %v494_v51 = vadd.f32 %v1982_v2, %v408_v38  ;;  %v498_v52 = vadd.f32 %v1982_v2, %v412_v42 }
  0x47   : > { %1145 = vmatpush2.bf16.msra.mxu1 %v1718_v54  ;;  %1033 = vmatprep.subr.bf16.mxu0 %v1719_v61  ;;  %v540_v54 = vmax.f32 %v476_v34, 0.0  ;;  %v546_v61 = vmax.f32 %v482_v41, 0.0  ;;  %v404_v1 = vmul.f32 %v1973_v62, %v318_v53  ;;  %v483_v41 = vadd.f32 %v1992_v10, %v397_v22  ;;  %v323_v53 = vld [vmem:[%s1941_s29 + $0x120] sm:$0xff]  ;;  %v342_v42 = vld [vmem:[%s1941_s29 + $0x1b8] sm:$0xff] }
  0x48   : > { %1146 = vmatprep.subr.bf16.mxu1 %v1721_v63  ;;  %v400_v63 = vmul.f32 %v1973_v62, %v314_v48  ;;  %v319_v48 = vld [vmem:[%s1941_s29 + $0x100] sm:$0xff]  ;;  %v600_v56 = vpack.c.bf16 %v552_v36, %v548_v35  ;;  %v409_v9 = vmul.f32 %v1984_v3, %v323_v53  ;;  %v562_v16 = vmax.f32 %v498_v52, 0.0  ;;  %v336_v35 = vld [vmem:[%s1941_s29 + $0x188] sm:$0xff] }
  0x49   : > { %v596_v15 = vpack.c.bf16 %v544_v55, %v540_v54  ;;  %v490_v21 = vadd.f32 %v1982_v2, %v404_v1  ;;  %v321_v54 = vld [vmem:[%s1941_s29 + $0x110] sm:$0xff]  ;;  %v553_v1 = vmax.f32 %v489_v45, 0.0  ;;  %v405_v4 = vmul.f32 %v1984_v3, %v319_v48  ;;  %v327_v22 = vld [vmem:[%s1941_s29 + $0x140] sm:$0xff] }
  0x4a   : > { %1034 = vmatpush2.bf16.msra.mxu0 %v1723_v18  ;;  %v320_v18 = vld [vmem:[%s1941_s29 + $0x108] sm:$0xff]  ;;  %v486_v20 = vadd.f32 %v1982_v2, %v400_v63  ;;  %v325_v55 = vld [vmem:[%s1941_s29 + $0x130] sm:$0xff]  ;;  %v551_v63 = vmax.f32 %v487_v43, 0.0  ;;  %v495_v25 = vadd.f32 %v1992_v10, %v409_v9  ;;  %v415_v45 = vmul.f32 %v1995_v12, %v329_v29 }
  0x4b   : > { %1147 = vmatpush2.bf16.msra.mxu1 %v1724_v19  ;;  %v598_v19 = vpack.c.bf16 %v546_v61, %v542_v60  ;;  %v406_v34 = vmul.f32 %v1967_v58, %v320_v18  ;;  %v554_v40 = vmax.f32 %v490_v21, 0.0  ;;  %v547_v60 = vmax.f32 %v483_v41, 0.0  ;;  %v328_v61 = vld [vmem:[%s1941_s29 + $0x148] sm:$0xff]  ;;  %v338_v41 = vld [vmem:[%s1941_s29 + $0x198] sm:$0xff] }
  0x4c   : > { %v411_v13 = vmul.f32 %v1995_v12, %v325_v55  ;;  %v414_v17 = vmul.f32 %v1967_v58, %v328_v61  ;;  %v491_v21 = vadd.f32 %v1992_v10, %v405_v4  ;;  %v424_v53 = vmul.f32 %v1973_v62, %v338_v41 }
  0x4d   : > { %1036 = vmatmul.mubr.bf16.vlgmr.msra.gmra.mxu0 %v587_v28  ;;  %v399_v28 = vmul.f32 %v1995_v12, %v313_v11  ;;  %v492_v47 = vadd.f32 %v1969_v59, %v406_v34  ;;  %v407_v11 = vmul.f32 %v1995_v12, %v321_v54  ;;  %v599_v24 = vpack.c.bf16 %v551_v63, %v547_v60 }
  0x4e   : > { %1149 = vmatmul.mubr.bf16.vlgmr.msra.gmra.mxu1 %v589_v32  ;;  %1045 = vmatprep.mubr.bf16.mxu0 %v592_v33  ;;  %v541_v32 = vmax.f32 %v477_v7, 0.0  ;;  %v545_v33 = vmax.f32 %v481_v8, 0.0  ;;  %v334_v7 = vld [vmem:[%s1941_s29 + $0x178] sm:$0xff]  ;;  %v497_v27 = vadd.f32 %v2015_v23, %v411_v13  ;;  %v500_v34 = vadd.f32 %v1969_v59, %v414_v17  ;;  %v337_v13 = vld [vmem:[%s1941_s29 + $0x190] sm:$0xff] }
  0x4f   : > { %1158 = vmatprep.mubr.bf16.mxu1 %v594_v39  ;;  %v550_v39 = vmax.f32 %v486_v20, 0.0  ;;  %v485_v44 = vadd.f32 %v2015_v23, %v399_v28  ;;  %v556_v8 = vmax.f32 %v492_v47, 0.0  ;;  %v420_v20 = vmul.f32 %v1973_v62, %v334_v7  ;;  %v331_v28 = vld [vmem:[%s1941_s29 + $0x160] sm:$0xff] }
  0x50   : > { %v597_v49 = vpack.c.bf16 %v545_v33, %v541_v32  ;;  %v493_v26 = vadd.f32 %v2015_v23, %v407_v11  ;;  %v555_v43 = vmax.f32 %v491_v21, 0.0  ;;  %v559_v47 = vmax.f32 %v495_v25, 0.0  ;;  %v339_v11 = vld [vmem:[%s1941_s29 + $0x1a0] sm:$0xff]  ;;  %v346_v25 = vld [vmem:[%s1941_s29 + $0x1d8] sm:$0xff] }
  0x51   : > { %v602_v57 = vpack.c.bf16 %v554_v40, %v550_v39  ;;  %v549_v0 = vmax.f32 %v485_v44, 0.0  ;;  %v506_v38 = vadd.f32 %v1982_v2, %v420_v20  ;;  %v413_v39 = vmul.f32 %v1984_v3, %v327_v22  ;;  %v340_v40 = vld [vmem:[%s1941_s29 + $0x1a8] sm:$0xff] }
  0x52   : > { %v417_v44 = vmul.f32 %v1984_v3, %v331_v28  ;;  %v557_v48 = vmax.f32 %v493_v26, 0.0  ;;  %v426_v52 = vmul.f32 %v1967_v58, %v340_v40  ;;  %v428_v54 = vmul.f32 %v1973_v62, %v342_v42  ;;  %v350_v26 = vld [vmem:[%s1941_s29 + $0x1f8] sm:$0xff] }
  0x53   : > { %v601_v31 = vpack.c.bf16 %v553_v1, %v549_v0  ;;  %v499_v60 = vadd.f32 %v1992_v10, %v413_v39  ;;  %v501_v63 = vadd.f32 %v2015_v23, %v415_v45  ;;  %v603_v1 = vpack.c.bf16 %v559_v47, %v555_v43 }
  0x54   : > { %v503_v61 = vadd.f32 %v1992_v10, %v417_v44  ;;  %v512_v7 = vadd.f32 %v1969_v59, %v426_v52  ;;  %v514_v9 = vadd.f32 %v1982_v2, %v428_v54  ;;  %v425_v28 = vmul.f32 %v1984_v3, %v339_v11 }
  0x55   : > { %1046 = vmatmul.mubr.bf16.gmra.mxu0 %v591_v5  ;;  %v332_v5 = vld [vmem:[%s1941_s29 + $0x168] sm:$0xff]  ;;  %v563_v17 = vmax.f32 %v499_v60, 0.0  ;;  %v565_v20 = vmax.f32 %v501_v63, 0.0  ;;  %v423_v29 = vmul.f32 %v1995_v12, %v337_v13 }
  0x56   : > { %1159 = vmatmul.mubr.bf16.gmra.mxu1 %v593_v14  ;;  %1055 = vmatprep.mubr.bf16.mxu0 %v596_v15  ;;  %v560_v14 = vmax.f32 %v496_v50, 0.0  ;;  %v558_v15 = vmax.f32 %v494_v51, 0.0  ;;  %v418_v18 = vmul.f32 %v1967_v58, %v332_v5  ;;  %v422_v50 = vmul.f32 %v1967_v58, %v336_v35  ;;  %v335_v5 = vld [vmem:[%s1941_s29 + $0x180] sm:$0xff] }
  0x57   : > { %1168 = vmatprep.mubr.bf16.mxu1 %v598_v19  ;;  %v416_v19 = vmul.f32 %v1973_v62, %v330_v6  ;;  %v564_v51 = vmax.f32 %v500_v34, 0.0  ;;  %v421_v22 = vmul.f32 %v1984_v3, %v335_v5  ;;  %v511_v39 = vadd.f32 %v1992_v10, %v425_v28 }
  0x58   : > { %v604_v32 = vpack.c.bf16 %v560_v14, %v556_v8  ;;  %v606_v33 = vpack.c.bf16 %v562_v16, %v558_v15  ;;  %v504_v36 = vadd.f32 %v1969_v59, %v418_v18  ;;  %v508_v4 = vadd.f32 %v1969_v59, %v422_v50  ;;  %v341_v14 = vld [vmem:[%s1941_s29 + $0x1b0] sm:$0xff]  ;;  %v344_v18 = vld [vmem:[%s1941_s29 + $0x1c8] sm:$0xff] }
  0x59   : > { %v502_v37 = vadd.f32 %v1982_v2, %v416_v19  ;;  %v510_v8 = vadd.f32 %v1982_v2, %v424_v53  ;;  %v567_v19 = vmax.f32 %v503_v61, 0.0  ;;  %v430_v34 = vmul.f32 %v1967_v58, %v344_v18  ;;  %v345_v50 = vld [vmem:[%s1941_s29 + $0x1d0] sm:$0xff] }
  0x5a   : > { %v568_v55 = vmax.f32 %v504_v36, 0.0  ;;  %v432_v36 = vmul.f32 %v1973_v62, %v346_v25  ;;  %v509_v40 = vadd.f32 %v2015_v23, %v423_v29  ;;  %v575_v53 = vmax.f32 %v511_v39, 0.0 }
  0x5b   : > { %v607_v42 = vpack.c.bf16 %v567_v19, %v563_v17  ;;  %v431_v60 = vmul.f32 %v1995_v12, %v345_v50 }
  0x5c   : > { %v608_v15 = vpack.c.bf16 %v568_v55, %v564_v51  ;;  %v349_v51 = vld [vmem:[%s1941_s29 + $0x1f0] sm:$0xff]  ;;  %v573_v54 = vmax.f32 %v509_v40, 0.0 }
  0x5d   : > { %1056 = vmatmul.mubr.bf16.gmra.mxu0 %v595_v46  ;;  %v419_v46 = vmul.f32 %v1995_v12, %v333_v30  ;;  %v427_v30 = vmul.f32 %v1995_v12, %v341_v14 }
  0x5e   : > { %1169 = vmatmul.mubr.bf16.gmra.mxu1 %v597_v49  ;;  %1065 = vmatprep.mubr.bf16.mxu0 %v600_v56  ;;  %v561_v49 = vmax.f32 %v497_v27, 0.0  ;;  %v566_v56 = vmax.f32 %v502_v37, 0.0  ;;  %v572_v27 = vmax.f32 %v508_v4, 0.0  ;;  %v436_v37 = vmul.f32 %v1973_v62, %v350_v26 }
  0x5f   : > { %1178 = vmatprep.mubr.bf16.mxu1 %v602_v57  ;;  %v570_v57 = vmax.f32 %v506_v38, 0.0  ;;  %v505_v0 = vadd.f32 %v2015_v23, %v419_v46  ;;  %v507_v38 = vadd.f32 %v1992_v10, %v421_v22  ;;  %v513_v41 = vadd.f32 %v2015_v23, %v427_v30 }
  0x60   : > { %v605_v6 = vpack.c.bf16 %v561_v49, %v557_v48  ;;  %v516_v46 = vadd.f32 %v1969_v59, %v430_v34  ;;  %v518_v62 = vadd.f32 %v1982_v2, %v432_v36  ;;  %v522_v48 = vadd.f32 %v1982_v2, %v436_v37  ;;  %v347_v49 = vld [vmem:[%s1941_s29 + $0x1e0] sm:$0xff] }
  0x61   : > { %v610_v16 = vpack.c.bf16 %v570_v57, %v566_v56  ;;  %v569_v21 = vmax.f32 %v505_v0, 0.0  ;;  %v571_v52 = vmax.f32 %v507_v38, 0.0  ;;  %v577_v55 = vmax.f32 %v513_v41, 0.0 }
  0x62   : > { %v433_v57 = vmul.f32 %v1984_v3, %v347_v49  ;;  %v580_v2 = vmax.f32 %v516_v46, 0.0  ;;  %v582_v63 = vmax.f32 %v518_v62, 0.0  ;;  %v586_v0 = vmax.f32 %v522_v48, 0.0 }
  0x63   : > { %v609_v43 = vpack.c.bf16 %v569_v21, %v565_v20  ;;  %v613_v4 = vpack.c.bf16 %v577_v55, %v573_v54 }
  0x65   : > { %1066 = vmatmul.mubr.bf16.gmra.mxu0 %v599_v24  ;;  %v348_v24 = vld [vmem:[%s1941_s29 + $0x1e8] sm:$0xff] }
  0x66   : > { %1179 = vmatmul.mubr.bf16.gmra.mxu1 %v601_v31  ;;  %1075 = vmatprep.mubr.bf16.mxu0 %v604_v32  ;;  %v576_v31 = vmax.f32 %v512_v7, 0.0  ;;  %v574_v32 = vmax.f32 %v510_v8, 0.0  ;;  %v434_v35 = vmul.f32 %v1967_v58, %v348_v24  ;;  %v343_v58 = vld [vmem:[%s1941_s29 + $0x1c0] sm:$0xff]  ;;  %v517_v7 = vadd.f32 %v2015_v23, %v431_v60  ;;  %s1603_s29 = sshll.u32 %s2403_s18, 8 }
  0x67   : > { %1188 = vmatprep.mubr.bf16.mxu1 %v606_v33  ;;  %v578_v33 = vmax.f32 %v514_v9, 0.0  ;;  %v429_v56 = vmul.f32 %v1984_v3, %v343_v58  ;;  %v618_v9 = vpack.c.bf16 %v586_v0, %v582_v63  ;;  %s2225_s11 = scalar_lea.vmem %s2396_s4, %s1603_s29 }
  0x68   : > { %v612_v44 = vpack.c.bf16 %v576_v31, %v572_v27  ;;  %v520_v47 = vadd.f32 %v1969_v59, %v434_v35  ;;  %v435_v59 = vmul.f32 %v1995_v12, %v349_v51  ;;  %v581_v13 = vmax.f32 %v517_v7, 0.0 }
  0x69   : > { %v614_v45 = vpack.c.bf16 %v578_v33, %v574_v32  ;;  %v515_v5 = vadd.f32 %v1992_v10, %v429_v56 }
  0x6a   : > { %v584_v61 = vmax.f32 %v520_v47, 0.0  ;;  %v521_v3 = vadd.f32 %v2015_v23, %v435_v59 }
  0x6b   : > { %v579_v12 = vmax.f32 %v515_v5, 0.0 }
  0x6c   : > { %v616_v8 = vpack.c.bf16 %v584_v61, %v580_v2  ;;  %v585_v14 = vmax.f32 %v521_v3, 0.0 }
  0x6d   : > { %1076 = vmatmul.mubr.bf16.gmra.mxu0 %v603_v1  ;;  %v611_v1 = vpack.c.bf16 %v575_v53, %v571_v52 }
  0x6e   : > { %1189 = vmatmul.mubr.bf16.gmra.mxu1 %v605_v6  ;;  %1085 = vmatprep.mubr.bf16.mxu0 %v608_v15  ;;  %v519_v6 = vadd.f32 %v1992_v10, %v433_v57 }
  0x6f   : > { %1198 = vmatprep.mubr.bf16.mxu1 %v610_v16  ;;  %v617_v16 = vpack.c.bf16 %v585_v14, %v581_v13 }
  0x70   : > { %v583_v11 = vmax.f32 %v519_v6, 0.0 }
  0x72   : > { %v615_v15 = vpack.c.bf16 %v583_v11, %v579_v12 }
  0x75   : > { %1086 = vmatmul.mubr.bf16.gmra.mxu0 %v607_v42 }
  0x76   : > { %1199 = vmatmul.mubr.bf16.gmra.mxu1 %v609_v43  ;;  %1095 = vmatprep.mubr.bf16.mxu0 %v612_v44 }
  0x77   : > { %1208 = vmatprep.mubr.bf16.mxu1 %v614_v45 }
  0x7d   : > { %1096 = vmatmul.mubr.bf16.gmra.mxu0 %v611_v1 }
  0x7e   : > { %1209 = vmatmul.mubr.bf16.gmra.mxu1 %v613_v4  ;;  %1105 = vmatprep.mubr.bf16.mxu0 %v616_v8 }
  0x7f   : > { %1218 = vmatprep.mubr.bf16.mxu1 %v618_v9 }
  0x85   : > { %1106 = vmatmul.mubr.bf16.gmra.mxu0 %v615_v15 }
  0x86   : > { %1219 = vmatmul.mubr.bf16.gmra.mxu1 %v617_v16 }
 0x10d   : > { %v1037_v10 = vpop.f32.mrf.mxu0 }
 0x10e   : > { %v1150_v23 = vpop.f32.mrf.mxu1 }
 0x10f   : > { %v2227_v17 = vadd.f32 %v1150_v23, %v1037_v10  ;;  %v1039_v18 = vpop.f32.mrf.mxu0 }
 0x110   : > { %v1152_v19 = vpop.f32.mrf.mxu1 }
 0x111   : > { %1229 = vst [vmem:[%s2225_s11] sm:$0xff] %v2227_v17  ;;  %v2231_v20 = vadd.f32 %v1152_v19, %v1039_v18  ;;  %v1041_v21 = vpop.f32.mrf.mxu0  ;;  %v1303_v5 = vmul.f32 %v2227_v17, %v2227_v17 }
 0x112   : > { %v1154_v22 = vpop.f32.mrf.mxu1 }
 0x113   : > { %1230 = vst [vmem:[%s2225_s11 + $0x8] sm:$0xff] %v2231_v20  ;;  %v2235_v24 = vadd.f32 %v1154_v22, %v1041_v21  ;;  %v1043_v25 = vpop.f32.mrf.mxu0  ;;  %v1304_v11 = vmul.f32 %v2231_v20, %v2231_v20 }
 0x114   : > { %v1156_v26 = vpop.f32.mrf.mxu1 }
 0x115   : > { %1231 = vst [vmem:[%s2225_s11 + $0x10] sm:$0xff] %v2235_v24  ;;  %v2239_v27 = vadd.f32 %v1156_v26, %v1043_v25  ;;  %v1047_v28 = vpop.f32.mrf.mxu0  ;;  %v1305_v63 = vmul.f32 %v2235_v24, %v2235_v24  ;;  %v1261_v9 = vadd.f32 %v2235_v24, %v2227_v17 }
 0x116   : > { %v1160_v29 = vpop.f32.mrf.mxu1 }
 0x117   : > { %1232 = vst [vmem:[%s2225_s11 + $0x18] sm:$0xff] %v2239_v27  ;;  %v2243_v30 = vadd.f32 %v1160_v29, %v1047_v28  ;;  %v1049_v31 = vpop.f32.mrf.mxu0  ;;  %v1306_v6 = vmul.f32 %v2239_v27, %v2239_v27  ;;  %v1335_v13 = vadd.f32 %v1305_v63, %v1303_v5  ;;  %v1282_v23 = vadd.f32 %v2239_v27, %v2231_v20 }
 0x118   : > { %v1162_v32 = vpop.f32.mrf.mxu1 }
 0x119   : > { %1233 = vst [vmem:[%s2225_s11 + $0x20] sm:$0xff] %v2243_v30  ;;  %v2247_v33 = vadd.f32 %v1162_v32, %v1049_v31  ;;  %v1051_v34 = vpop.f32.mrf.mxu0  ;;  %v1307_v7 = vmul.f32 %v2243_v30, %v2243_v30  ;;  %v1262_v17 = vadd.f32 %v1261_v9, %v2243_v30  ;;  %v1356_v19 = vadd.f32 %v1306_v6, %v1304_v11 }
 0x11a   : > { %v1164_v35 = vpop.f32.mrf.mxu1 }
 0x11b   : > { %1234 = vst [vmem:[%s2225_s11 + $0x28] sm:$0xff] %v2247_v33  ;;  %v2251_v36 = vadd.f32 %v1164_v35, %v1051_v34  ;;  %v1053_v37 = vpop.f32.mrf.mxu0  ;;  %v1308_v14 = vmul.f32 %v2247_v33, %v2247_v33  ;;  %v1336_v21 = vadd.f32 %v1335_v13, %v1307_v7  ;;  %v1283_v28 = vadd.f32 %v1282_v23, %v2247_v33 }
 0x11c   : > { %v1166_v38 = vpop.f32.mrf.mxu1 }
 0x11d   : > { %1235 = vst [vmem:[%s2225_s11 + $0x30] sm:$0xff] %v2251_v36  ;;  %v2255_v39 = vadd.f32 %v1166_v38, %v1053_v37  ;;  %v1057_v40 = vpop.f32.mrf.mxu0  ;;  %v1309_v15 = vmul.f32 %v2251_v36, %v2251_v36  ;;  %v1263_v20 = vadd.f32 %v1262_v17, %v2251_v36  ;;  %v1357_v29 = vadd.f32 %v1356_v19, %v1308_v14 }
 0x11e   : > { %v1170_v41 = vpop.f32.mrf.mxu1 }
 0x11f   : > { %1236 = vst [vmem:[%s2225_s11 + $0x38] sm:$0xff] %v2255_v39  ;;  %v2259_v42 = vadd.f32 %v1170_v41, %v1057_v40  ;;  %v1059_v43 = vpop.f32.mrf.mxu0  ;;  %v1310_v22 = vmul.f32 %v2255_v39, %v2255_v39  ;;  %v1337_v30 = vadd.f32 %v1336_v21, %v1309_v15  ;;  %v1284_v37 = vadd.f32 %v1283_v28, %v2255_v39 }
 0x120   : > { %v1172_v44 = vpop.f32.mrf.mxu1 }
 0x121   : > { %1237 = vst [vmem:[%s2225_s11 + $0x40] sm:$0xff] %v2259_v42  ;;  %v2263_v45 = vadd.f32 %v1172_v44, %v1059_v43  ;;  %v1061_v58 = vpop.f32.mrf.mxu0  ;;  %v1311_v24 = vmul.f32 %v2259_v42, %v2259_v42  ;;  %v1264_v33 = vadd.f32 %v1263_v20, %v2259_v42  ;;  %v1358_v38 = vadd.f32 %v1357_v29, %v1310_v22 }
 0x122   : > { %v1174_v46 = vpop.f32.mrf.mxu1 }
 0x123   : > { %1238 = vst [vmem:[%s2225_s11 + $0x48] sm:$0xff] %v2263_v45  ;;  %v2267_v47 = vadd.f32 %v1174_v46, %v1061_v58  ;;  %v1063_v62 = vpop.f32.mrf.mxu0  ;;  %v1312_v31 = vmul.f32 %v2263_v45, %v2263_v45  ;;  %v1338_v40 = vadd.f32 %v1337_v30, %v1311_v24  ;;  %v1285_v46 = vadd.f32 %v1284_v37, %v2263_v45 }
 0x124   : > { %v1176_v48 = vpop.f32.mrf.mxu1 }
 0x125   : > { %1239 = vst [vmem:[%s2225_s11 + $0x50] sm:$0xff] %v2267_v47  ;;  %v2271_v49 = vadd.f32 %v1176_v48, %v1063_v62  ;;  %v1067_v50 = vpop.f32.mrf.mxu0  ;;  %v1313_v32 = vmul.f32 %v2267_v47, %v2267_v47  ;;  %v1265_v39 = vadd.f32 %v1264_v33, %v2267_v47  ;;  %v1359_v62 = vadd.f32 %v1358_v38, %v1312_v31 }
 0x126   : > { %v1180_v51 = vpop.f32.mrf.mxu1 }
 0x127   : > { %1240 = vst [vmem:[%s2225_s11 + $0x58] sm:$0xff] %v2271_v49  ;;  %v2275_v52 = vadd.f32 %v1180_v51, %v1067_v50  ;;  %v1069_v53 = vpop.f32.mrf.mxu0  ;;  %v1314_v41 = vmul.f32 %v2271_v49, %v2271_v49  ;;  %v1339_v48 = vadd.f32 %v1338_v40, %v1313_v32 }
 0x128   : > { %v1182_v54 = vpop.f32.mrf.mxu1 }
 0x129   : > { %1241 = vst [vmem:[%s2225_s11 + $0x60] sm:$0xff] %v2275_v52  ;;  %v2279_v55 = vadd.f32 %v1182_v54, %v1069_v53  ;;  %v1071_v56 = vpop.f32.mrf.mxu0  ;;  %v1315_v43 = vmul.f32 %v2275_v52, %v2275_v52  ;;  %v1360_v47 = vadd.f32 %v1359_v62, %v1314_v41 }
 0x12a   : > { %v1184_v57 = vpop.f32.mrf.mxu1 }
 0x12b   : > { %1242 = vst [vmem:[%s2225_s11 + $0x68] sm:$0xff] %v2279_v55  ;;  %v2283_v60 = vadd.f32 %v1184_v57, %v1071_v56  ;;  %v1073_v59 = vpop.f32.mrf.mxu0  ;;  %v1316_v50 = vmul.f32 %v2279_v55, %v2279_v55  ;;  %v1286_v56 = vadd.f32 %v1285_v46, %v2271_v49  ;;  %v1266_v57 = vadd.f32 %v1265_v39, %v2275_v52 }
 0x12c   : > { %v1186_v2 = vpop.f32.mrf.mxu1 }
 0x12d   : > { %1243 = vst [vmem:[%s2225_s11 + $0x70] sm:$0xff] %v2283_v60  ;;  %v2287_v61 = vadd.f32 %v1186_v2, %v1073_v59  ;;  %v1077_v0 = vpop.f32.mrf.mxu0  ;;  %v1317_v51 = vmul.f32 %v2283_v60, %v2283_v60  ;;  %v1340_v59 = vadd.f32 %v1339_v48, %v1315_v43  ;;  %v1287_v5 = vadd.f32 %v1286_v56, %v2279_v55 }
 0x12e   : > { %v1190_v1 = vpop.f32.mrf.mxu1  ;;  %v1267_v6 = vadd.f32 %v1266_v57, %v2283_v60  ;;  %v1361_v52 = vadd.f32 %v1360_v47, %v1316_v50 }
 0x12f   : > { %1244 = vst [vmem:[%s2225_s11 + $0x78] sm:$0xff] %v2287_v61  ;;  %v2293_v4 = vadd.f32 %v1190_v1, %v1077_v0  ;;  %v1079_v3 = vpop.f32.mrf.mxu0  ;;  %v1318_v2 = vmul.f32 %v2287_v61, %v2287_v61  ;;  %v1341_v7 = vadd.f32 %v1340_v59, %v1317_v51  ;;  %v1288_v13 = vadd.f32 %v1287_v5, %v2287_v61 }
 0x130   : > { %v1192_v8 = vpop.f32.mrf.mxu1 }
 0x131   : > { %1245 = vst [vmem:[%s2225_s11 + $0x80] sm:$0xff] %v2293_v4  ;;  %v2305_v12 = vadd.f32 %v1192_v8, %v1079_v3  ;;  %v1081_v16 = vpop.f32.mrf.mxu0  ;;  %v1319_v63 = vmul.f32 %v2293_v4, %v2293_v4  ;;  %v1268_v14 = vadd.f32 %v1267_v6, %v2293_v4  ;;  %v1362_v60 = vadd.f32 %v1361_v52, %v1318_v2 }
 0x132   : > { %v1194_v10 = vpop.f32.mrf.mxu1 }
 0x133   : > { %1246 = vst [vmem:[%s2225_s11 + $0x88] sm:$0xff] %v2305_v12  ;;  %v2318_v18 = vadd.f32 %v1194_v10, %v1081_v16  ;;  %v1083_v25 = vpop.f32.mrf.mxu0  ;;  %v1320_v3 = vmul.f32 %v2305_v12, %v2305_v12  ;;  %v1342_v15 = vadd.f32 %v1341_v7, %v1319_v63  ;;  %v1289_v19 = vadd.f32 %v1288_v13, %v2305_v12 }
 0x134   : > { %v1196_v26 = vpop.f32.mrf.mxu1 }
 0x135   : > { %1247 = vst [vmem:[%s2225_s11 + $0x90] sm:$0xff] %v2318_v18  ;;  %v2328_v27 = vadd.f32 %v1196_v26, %v1083_v25  ;;  %v1087_v34 = vpop.f32.mrf.mxu0  ;;  %v1321_v8 = vmul.f32 %v2318_v18, %v2318_v18  ;;  %v1269_v21 = vadd.f32 %v1268_v14, %v2318_v18  ;;  %v1363_v61 = vadd.f32 %v1362_v60, %v1320_v3 }
 0x136   : > { %v1200_v35 = vpop.f32.mrf.mxu1 }
 0x137   : > { %1248 = vst [vmem:[%s2225_s11 + $0x98] sm:$0xff] %v2328_v27  ;;  %v1201_v36 = vadd.f32 %v1200_v35, %v1087_v34  ;;  %v1089_v44 = vpop.f32.mrf.mxu0  ;;  %v1322_v16 = vmul.f32 %v2328_v27, %v2328_v27  ;;  %v1343_v24 = vadd.f32 %v1342_v15, %v1321_v8  ;;  %v1290_v20 = vadd.f32 %v1289_v19, %v2328_v27 }
 0x138   : > { %v1202_v58 = vpop.f32.mrf.mxu1 }
 0x139   : > { %1249 = vst [vmem:[%s2225_s11 + $0xa0] sm:$0xff] %v1201_v36  ;;  %v1203_v42 = vadd.f32 %v1202_v58, %v1089_v44  ;;  %v1091_v53 = vpop.f32.mrf.mxu0  ;;  %v1323_v10 = vmul.f32 %v1201_v36, %v1201_v36  ;;  %v1270_v29 = vadd.f32 %v1269_v21, %v1201_v36  ;;  %v1364_v31 = vadd.f32 %v1363_v61, %v1322_v16 }
 0x13a   : > { %v1204_v54 = vpop.f32.mrf.mxu1 }
 0x13b   : > { %1250 = vst [vmem:[%s2225_s11 + $0xa8] sm:$0xff] %v1203_v42  ;;  %v1205_v45 = vadd.f32 %v1204_v54, %v1091_v53  ;;  %v1093_v0 = vpop.f32.mrf.mxu0  ;;  %v1324_v4 = vmul.f32 %v1203_v42, %v1203_v42  ;;  %v1344_v32 = vadd.f32 %v1343_v24, %v1323_v10  ;;  %v1291_v37 = vadd.f32 %v1290_v20, %v1203_v42 }
 0x13c   : > { %v1206_v1 = vpop.f32.mrf.mxu1 }
 0x13d   : > { %1251 = vst [vmem:[%s2225_s11 + $0xb0] sm:$0xff] %v1205_v45  ;;  %v1207_v49 = vadd.f32 %v1206_v1, %v1093_v0  ;;  %v1097_v9 = vpop.f32.mrf.mxu0  ;;  %v1325_v25 = vmul.f32 %v1205_v45, %v1205_v45  ;;  %v1271_v33 = vadd.f32 %v1270_v29, %v1205_v45  ;;  %v1365_v40 = vadd.f32 %v1364_v31, %v1324_v4 }
 0x13e   : > { %v1210_v11 = vpop.f32.mrf.mxu1 }
 0x13f   : > { %1252 = vst [vmem:[%s2225_s11 + $0xb8] sm:$0xff] %v1207_v49  ;;  %v1211_v55 = vadd.f32 %v1210_v11, %v1097_v9  ;;  %v1099_v23 = vpop.f32.mrf.mxu0  ;;  %v1326_v34 = vmul.f32 %v1207_v49, %v1207_v49  ;;  %v1345_v41 = vadd.f32 %v1344_v32, %v1325_v25  ;;  %v1292_v58 = vadd.f32 %v1291_v37, %v1207_v49 }
 0x140   : > { %v1212_v17 = vpop.f32.mrf.mxu1 }
 0x141   : > { %1253 = vst [vmem:[%s2225_s11 + $0xc0] sm:$0xff] %v1211_v55  ;;  %v1213_v22 = vadd.f32 %v1212_v17, %v1099_v23  ;;  %v1101_v26 = vpop.f32.mrf.mxu0  ;;  %v1327_v12 = vmul.f32 %v1211_v55, %v1211_v55  ;;  %v1272_v46 = vadd.f32 %v1271_v33, %v1211_v55  ;;  %v1366_v62 = vadd.f32 %v1365_v40, %v1326_v34 }
 0x142   : > { %v1214_v28 = vpop.f32.mrf.mxu1 }
 0x143   : > { %1254 = vst [vmem:[%s2225_s11 + $0xc8] sm:$0xff] %v1213_v22  ;;  %v1215_v30 = vadd.f32 %v1214_v28, %v1101_v26  ;;  %v1103_v18 = vpop.f32.mrf.mxu0  ;;  %v1328_v43 = vmul.f32 %v1213_v22, %v1213_v22  ;;  %v1346_v48 = vadd.f32 %v1345_v41, %v1327_v12  ;;  %v1293_v53 = vadd.f32 %v1292_v58, %v1213_v22 }
 0x144   : > { %v1216_v35 = vpop.f32.mrf.mxu1 }
 0x145   : > { %1255 = vst [vmem:[%s2225_s11 + $0xd0] sm:$0xff] %v1215_v30  ;;  %v1217_v38 = vadd.f32 %v1216_v35, %v1103_v18  ;;  %v1329_v44 = vmul.f32 %v1215_v30, %v1215_v30  ;;  %v1107_v27 = vpop.f32.mrf.mxu0  ;;  %v1273_v54 = vadd.f32 %v1272_v46, %v1215_v30  ;;  %v1367_v45 = vadd.f32 %v1366_v62, %v1328_v43 }
 0x146   : > { %v1220_v36 = vpop.f32.mrf.mxu1 }
 0x147   : > { %1256 = vst [vmem:[%s2225_s11 + $0xd8] sm:$0xff] %v1217_v38  ;;  %v1221_v39 = vadd.f32 %v1220_v36, %v1107_v27  ;;  %v1330_v50 = vmul.f32 %v1217_v38, %v1217_v38  ;;  %v1109_v51 = vpop.f32.mrf.mxu0  ;;  %v1347_v47 = vadd.f32 %v1346_v48, %v1329_v44  ;;  %v1294_v63 = vadd.f32 %v1293_v53, %v1217_v38 }
 0x148   : > { %v1222_v42 = vpop.f32.mrf.mxu1 }
 0x149   : > { %1257 = vst [vmem:[%s2225_s11 + $0xe0] sm:$0xff] %v1221_v39  ;;  %v1331_v56 = vmul.f32 %v1221_v39, %v1221_v39  ;;  %v1223_v57 = vadd.f32 %v1222_v42, %v1109_v51  ;;  %v1111_v59 = vpop.f32.mrf.mxu0  ;;  %v1274_v0 = vadd.f32 %v1273_v54, %v1221_v39  ;;  %v1368_v6 = vadd.f32 %v1367_v45, %v1330_v50 }
 0x14a   : > { %v1224_v2 = vpop.f32.mrf.mxu1 }
 0x14b   : > { %1258 = vst [vmem:[%s2225_s11 + $0xe8] sm:$0xff] %v1223_v57  ;;  %v1332_v1 = vmul.f32 %v1223_v57, %v1223_v57  ;;  %v1225_v5 = vadd.f32 %v1224_v2, %v1111_v59  ;;  %v1348_v49 = vadd.f32 %v1347_v47, %v1331_v56  ;;  %v1113_v52 = vpop.f32.mrf.mxu0  ;;  %v1295_v3 = vadd.f32 %v1294_v63, %v1223_v57 }
 0x14c   : > { %v1226_v7 = vpop.f32.mrf.mxu1 }
 0x14d   : > { %1259 = vst [vmem:[%s2225_s11 + $0xf0] sm:$0xff] %v1225_v5  ;;  %v1275_v8 = vadd.f32 %v1274_v0, %v1225_v5  ;;  %v1333_v9 = vmul.f32 %v1225_v5, %v1225_v5  ;;  %v1227_v11 = vadd.f32 %v1226_v7, %v1113_v52  ;;  %v1369_v13 = vadd.f32 %v1368_v6, %v1332_v1 }
 0x14f   : > { %v1276_v14 = vrot.slane %v1275_v8, 4  ;;  %v1349_v55 = vadd.f32 %v1348_v49, %v1333_v9  ;;  %1260 = vst [vmem:[%s2225_s11 + $0xf8] sm:$0xff] %v1227_v11  ;;  %v1296_v60 = vadd.f32 %v1295_v3, %v1227_v11  ;;  %v1334_v15 = vmul.f32 %v1227_v11, %v1227_v11 }
 0x151   : > { %v1277_v16 = vadd.f32 %v1276_v14, %v1275_v8  ;;  %v1350_v10 = vrot.slane %v1349_v55, 4  ;;  %v1297_v23 = vrot.slane %v1296_v60, 4  ;;  %v1370_v17 = vadd.f32 %v1369_v13, %v1334_v15 }
 0x153   : > { %v1278_v19 = vrot.slane %v1277_v16, 2  ;;  %v1351_v21 = vadd.f32 %v1350_v10, %v1349_v55  ;;  %v1298_v22 = vadd.f32 %v1297_v23, %v1296_v60  ;;  %v1371_v61 = vrot.slane %v1370_v17, 4 }
 0x155   : > { %v1279_v24 = vadd.f32 %v1278_v19, %v1277_v16  ;;  %v1352_v4 = vrot.slane %v1351_v21, 2  ;;  %v1299_v25 = vrot.slane %v1298_v22, 2  ;;  %v1372_v26 = vadd.f32 %v1371_v61, %v1370_v17 }
 0x157   : > { %v1353_v28 = vadd.f32 %v1352_v4, %v1351_v21  ;;  %v1300_v20 = vadd.f32 %v1299_v25, %v1298_v22  ;;  %v1373_v29 = vrot.slane %v1372_v26, 2  ;;  %v1280_v30 = vrot.slane %v1279_v24, 1 }
 0x159   : > { %v1354_v31 = vrot.slane %v1353_v28, 1  ;;  %v1301_v32 = vrot.slane %v1300_v20, 1  ;;  %v1374_v34 = vadd.f32 %v1373_v29, %v1372_v26  ;;  %v1281_v35 = vadd.f32 %v1280_v30, %v1279_v24 }
 0x15b   : > { %v1355_v12 = vadd.f32 %v1354_v31, %v1353_v28  ;;  %v1375_v18 = vrot.slane %v1374_v34, 1  ;;  %v1302_v37 = vadd.f32 %v1301_v32, %v1300_v20 }
 0x15d   : > { %v1376_v33 = vadd.f32 %v1375_v18, %v1374_v34  ;;  %v1378_v38 = vsel %vm1377_vm0, %v1281_v35, %v1355_v12 }
 0x15f   : > { %v1379_v40 = vsel %vm1377_vm0, %v1302_v37, %v1376_v33 }
 0x160   : > { %v1382_v41 = vcombine.low %v1378_v38, %v1379_v40 }
 0x162   : > { %1599 = vst.sshfl [vmem:[%s285_s15] sm:$0x33 pattern:$0x76325410] %v1382_v41 }
 0x163 PF: > { %s16_s20 = sadd.s32 1, %s1747_s20   ;;  %s2398_s18 = smov %s1743_s19 }
 0x164   : > { %p13_p5 = scmp.ge.s32.totalorder %s16_s20, 4   ;;  %s2399_s19 = smov %s2401_s21 }
 0x166   :  { %15 = sbr.rel (!%p13_p5) target bundleno = 2 (0x2), region = 78 }

// kernel: est_coord_forward.13
= control target key start
LH: loop header
LB: loop body
LE: loop exit
PB: predicated region body
PF: predicated region fallthrough
CT: control target
= control target key end

     0   :  { %s1082_s18 = smov 0   ;;  %s1084_s19 = smov 0   ;;  %s1328_s0 = inlined_call_operand.vmem [shape: f32[2,128,256], index: 0, kind: input, shape index: {}]   ;;  %s1329_s1 = inlined_call_operand.vmem [shape: bf16[256,128], index: 1, kind: input, shape index: {}]   ;;  %s1330_s2 = inlined_call_operand.vmem [shape: f32[1,256], index: 2, kind: input, shape index: {}]   ;;  %s1331_s3 = inlined_call_operand.vmem [shape: f32[1,256], index: 3, kind: input, shape index: {}]   ;;  %s1332_s4 = inlined_call_operand.vmem [shape: f32[2,128,128], index: 4, kind: output, shape index: {0}]   ;;  %s1333_s5 = inlined_call_operand.vmem [shape: f32[2,2,128], index: 5, kind: output, shape index: {1}]  }
   0x1   :  { %s1086_s20 = smov 0  }
   0x2 LB: > { %s28_s21 = sadd.s32 1, %s1046_s19  ;;  %p882_p0 = scmp.ge.s32.totalorder %s1050_s20, 1  ;;  %s1050_s20 = sphi %s1086_s20, %s16_s20   ;;  %s1046_s19 = sphi %s1084_s19, %s1335_s19   ;;  %s1042_s18 = sphi %s1082_s18, %s1334_s18  }
   0x3   : > { %p30_p1 = scmp.ge.s32.totalorder %s28_s21, 2  ;;  %p214_p2 = scmp.lt.s32.totalorder %s1050_s20, 3 }
   0x5   : > { %s1337_s21 = smov (%p30_p1, %s28_s21), 0  ;;  %p215_p3 = pnand %p882_p0, %p214_p2 }
   0x6   : > { %p257_p4 = scmp.lt.s32.totalorder (!%p215_p3), %s1042_s18, 1 }
   0x7   : > { %218 = sbr.rel (%p215_p3) target bundleno = 304 (0x130), region = 36 }
   0xc   : > { %v1012_v0 = vld [vmem:[%s1329_s1 + $0x78] sm:$0xff]   ;;  %v1014_v2 = vld [vmem:[%s1329_s1 + $0x70] sm:$0xff]   ;;  %v1016_v4 = vld [vmem:[%s1329_s1 + $0x68] sm:$0xff]   ;;  %v318_v5 = vlaneseq  ;;  %s1339_s18 = smov (!%p257_p4, %s1042_s18), 1  ;;  %vm751_vm0 = vcmask 1040384  }
   0xd   : > { %v1013_v1 = vld [vmem:[%s1329_s1 + $0x38] sm:$0xff]   ;;  %908 = vmatprep.subr.bf16.mxu0 %v1012_v0  ;;  %972 = vmatprep.subr.bf16.mxu1 %v1012_v0  ;;  %v1015_v3 = vld [vmem:[%s1329_s1 + $0x30] sm:$0xff]   ;;  %v1017_v6 = vld [vmem:[%s1329_s1 + $0x28] sm:$0xff]   ;;  %s906_s11 = sshll.u32 %s1339_s18, 8  ;;  %s907_s16 = sshll.u32 %s1339_s18, 7 }
   0xe   : > { %909 = vmatpush3.bf16.msra.mxu0 %v1013_v1  ;;  %980 = vmatpush3.bf16.msra.mxu1 %v1013_v1  ;;  %v1018_v7 = vld [vmem:[%s1329_s1 + $0x60] sm:$0xff]   ;;  %v319_v8 = vshrl.u32 %v318_v5, 7  ;;  %v1020_v10 = vld [vmem:[%s1329_s1 + $0x58] sm:$0xff]   ;;  %s1133_s22 = scalar_lea.vmem %s1328_s0, %s906_s11  ;;  %v1022_v14 = vld [vmem:[%s1329_s1 + $0x50] sm:$0xff]   ;;  %s1273_s23 = scalar_lea.vmem %s1332_s4, %s907_s16 }
   0xf   : > { %910 = vmatprep.subr.bf16.mxu0 %v1014_v2  ;;  %973 = vmatprep.subr.bf16.mxu1 %v1014_v2  ;;  %v1019_v9 = vld [vmem:[%s1329_s1 + $0x20] sm:$0xff]   ;;  %v1021_v13 = vld [vmem:[%s1329_s1 + $0x18] sm:$0xff]   ;;  %v285_v15 = vld [vmem:[%s1133_s22 + $0x8] sm:$0xff]  ;;  %s887_s24 = sshll.u32 %s1339_s18, 1 }
  0x10   : > { %v320_v11 = vsub.s32 0, %v319_v8  ;;  %v324_v12 = vsub.s32 1, %v319_v8  ;;  %v287_v16 = vld [vmem:[%s1133_s22 + $0x18] sm:$0xff]  ;;  %v316_v17 = vld [vmem:[%s1330_s2] sm:$0x3]  ;;  %v286_v22 = vld [vmem:[%s1133_s22 + $0x10] sm:$0xff]  ;;  %s281_s27 = scalar_lea.vmem %s1333_s5, %s887_s24 }
  0x11   : > { %v360_v20 = vld [vmem:[%s1331_s3] sm:$0x3]  ;;  %v289_v25 = vld [vmem:[%s1133_s22 + $0x28] sm:$0xff]  ;;  %v291_v26 = vld [vmem:[%s1133_s22 + $0x38] sm:$0xff] }
  0x12   : > { %911 = vmatpush3.bf16.msra.mxu0 %v1015_v3  ;;  %981 = vmatpush3.bf16.msra.mxu1 %v1015_v3  ;;  %v1146_v18 = vrot.slane %v316_v17, %v320_v11  ;;  %v1148_v19 = vrot.slane %v316_v17, %v324_v12  ;;  %v284_v21 = vld [vmem:[%s1133_s22] sm:$0xff]  ;;  %v1155_v23 = vrot.slane %v360_v20, %v320_v11  ;;  %v1023_v28 = vld [vmem:[%s1329_s1 + $0x10] sm:$0xff]   ;;  %v1024_v33 = vld [vmem:[%s1329_s1 + $0x48] sm:$0xff]  }
  0x13   : > { %912 = vmatprep.subr.bf16.mxu0 %v1016_v4  ;;  %974 = vmatprep.subr.bf16.mxu1 %v1016_v4  ;;  %v1157_v24 = vrot.slane %v360_v20, %v324_v12  ;;  %v288_v27 = vld [vmem:[%s1133_s22 + $0x20] sm:$0xff]  ;;  %v290_v32 = vld [vmem:[%s1133_s22 + $0x30] sm:$0xff]  ;;  %v301_v45 = vld [vmem:[%s1133_s22 + $0x88] sm:$0xff] }
  0x14   : > { %v329_v29 = vmul.f32 %v1148_v19, %v285_v15  ;;  %v331_v30 = vmul.f32 %v1148_v19, %v287_v16  ;;  %v328_v31 = vmul.f32 %v1146_v18, %v284_v21  ;;  %v330_v34 = vmul.f32 %v1146_v18, %v286_v22  ;;  %v303_v46 = vld [vmem:[%s1133_s22 + $0x98] sm:$0xff]  ;;  %v1025_v47 = vld [vmem:[%s1329_s1 + $0x8] sm:$0xff]   ;;  %v300_v51 = vld [vmem:[%s1133_s22 + $0x80] sm:$0xff] }
  0x15   : > { %v333_v35 = vmul.f32 %v1148_v19, %v289_v25  ;;  %v335_v36 = vmul.f32 %v1148_v19, %v291_v26  ;;  %v332_v40 = vmul.f32 %v1146_v18, %v288_v27  ;;  %v334_v44 = vmul.f32 %v1146_v18, %v290_v32  ;;  %v1026_v52 = vld [vmem:[%s1329_s1 + $0x40] sm:$0xff]   ;;  %v302_v56 = vld [vmem:[%s1133_s22 + $0x90] sm:$0xff]  ;;  %v293_v60 = vld [vmem:[%s1133_s22 + $0x48] sm:$0xff] }
  0x16   : > { %913 = vmatpush3.bf16.msra.mxu0 %v1017_v6  ;;  %982 = vmatpush3.bf16.msra.mxu1 %v1017_v6  ;;  %v373_v37 = vadd.f32 %v1157_v24, %v329_v29  ;;  %v375_v38 = vadd.f32 %v1157_v24, %v331_v30  ;;  %v372_v39 = vadd.f32 %v1155_v23, %v328_v31  ;;  %v295_v1 = vld [vmem:[%s1133_s22 + $0x58] sm:$0xff]  ;;  %v1027_v2 = vld [vmem:[%s1329_s1] sm:$0xff]   ;;  %v305_v11 = vld [vmem:[%s1133_s22 + $0xa8] sm:$0xff] }
  0x17   : > { %914 = vmatprep.subr.bf16.mxu0 %v1018_v7  ;;  %975 = vmatprep.subr.bf16.mxu1 %v1018_v7  ;;  %v374_v41 = vadd.f32 %v1155_v23, %v330_v34  ;;  %v377_v42 = vadd.f32 %v1157_v24, %v333_v35  ;;  %v379_v43 = vadd.f32 %v1157_v24, %v335_v36  ;;  %v292_v6 = vld [vmem:[%s1133_s22 + $0x40] sm:$0xff]  ;;  %v294_v7 = vld [vmem:[%s1133_s22 + $0x50] sm:$0xff]  ;;  %v307_v16 = vld [vmem:[%s1133_s22 + $0xb8] sm:$0xff] }
  0x18   : > { %v405_v48 = vmax.f32 %v373_v37, 0.0  ;;  %v407_v49 = vmax.f32 %v375_v38, 0.0  ;;  %v404_v50 = vmax.f32 %v372_v39, 0.0  ;;  %v345_v58 = vmul.f32 %v1148_v19, %v301_v45  ;;  %v304_v25 = vld [vmem:[%s1133_s22 + $0xa0] sm:$0xff]  ;;  %v306_v30 = vld [vmem:[%s1133_s22 + $0xb0] sm:$0xff]  ;;  %v297_v34 = vld [vmem:[%s1133_s22 + $0x68] sm:$0xff] }
  0x19   : > { %v406_v53 = vmax.f32 %v374_v41, 0.0  ;;  %v409_v54 = vmax.f32 %v377_v42, 0.0  ;;  %v411_v55 = vmax.f32 %v379_v43, 0.0  ;;  %v347_v59 = vmul.f32 %v1148_v19, %v303_v46  ;;  %v299_v39 = vld [vmem:[%s1133_s22 + $0x78] sm:$0xff] }
  0x1a   : > { %915 = vmatpush3.bf16.msra.mxu0 %v1019_v9  ;;  %983 = vmatpush3.bf16.msra.mxu1 %v1019_v9  ;;  %v437_v57 = vpack.c.bf16 %v407_v49, %v405_v48  ;;  %v1197_v62 = vadd.f32 %v1155_v23, %v332_v40  ;;  %v378_v63 = vadd.f32 %v1155_v23, %v334_v44  ;;  %v309_v48 = vld [vmem:[%s1133_s22 + $0xc8] sm:$0xff] }
  0x1b   : > { %916 = vmatprep.subr.bf16.mxu0 %v1020_v10  ;;  %976 = vmatprep.subr.bf16.mxu1 %v1020_v10  ;;  %v436_v61 = vpack.c.bf16 %v406_v53, %v404_v50  ;;  %v344_v0 = vmul.f32 %v1146_v18, %v300_v51  ;;  %v389_v3 = vadd.f32 %v1157_v24, %v345_v58 }
  0x1c   : > { %612 = vmatprep.mubr.bf16.mxu0 %v437_v57  ;;  %v391_v4 = vadd.f32 %v1157_v24, %v347_v59  ;;  %v346_v5 = vmul.f32 %v1146_v18, %v302_v56  ;;  %v439_v8 = vpack.c.bf16 %v411_v55, %v409_v54  ;;  %v337_v10 = vmul.f32 %v1148_v19, %v293_v60  ;;  %v296_v56 = vld [vmem:[%s1133_s22 + $0x60] sm:$0xff] }
  0x1d   : > { %v388_v9 = vadd.f32 %v1155_v23, %v344_v0  ;;  %v421_v12 = vmax.f32 %v389_v3, 0.0  ;;  %v339_v15 = vmul.f32 %v1148_v19, %v295_v1  ;;  %v336_v21 = vmul.f32 %v1146_v18, %v292_v6  ;;  %v308_v57 = vld [vmem:[%s1133_s22 + $0xc0] sm:$0xff] }
  0x1e   : > { %917 = vmatpush3.bf16.msra.mxu0 %v1021_v13  ;;  %984 = vmatpush3.bf16.msra.mxu1 %v1021_v13  ;;  %v423_v13 = vmax.f32 %v391_v4, 0.0  ;;  %v381_v20 = vadd.f32 %v1157_v24, %v337_v10  ;;  %v338_v22 = vmul.f32 %v1146_v18, %v294_v7  ;;  %v349_v29 = vmul.f32 %v1148_v19, %v305_v11  ;;  %v313_v4 = vld [vmem:[%s1133_s22 + $0xe8] sm:$0xff] }
  0x1f   : > { %918 = vmatprep.subr.bf16.mxu0 %v1022_v14  ;;  %977 = vmatprep.subr.bf16.mxu1 %v1022_v14  ;;  %v390_v14 = vadd.f32 %v1155_v23, %v346_v5  ;;  %v420_v17 = vmax.f32 %v388_v9, 0.0  ;;  %v408_v31 = vmax.f32 %v1197_v62, 0.0  ;;  %v410_v32 = vmax.f32 %v378_v63, 0.0  ;;  %v310_v63 = vld [vmem:[%s1133_s22 + $0xd0] sm:$0xff]  ;;  %v315_v9 = vld [vmem:[%s1133_s22 + $0xf8] sm:$0xff] }
  0x20   : > { %v445_v26 = vpack.c.bf16 %v423_v13, %v421_v12  ;;  %v413_v36 = vmax.f32 %v381_v20, 0.0  ;;  %v393_v37 = vadd.f32 %v1157_v24, %v349_v29  ;;  %v348_v38 = vmul.f32 %v1146_v18, %v304_v25 }
  0x21   : > { %v422_v27 = vmax.f32 %v390_v14, 0.0  ;;  %v380_v40 = vadd.f32 %v1155_v23, %v336_v21  ;;  %v382_v41 = vadd.f32 %v1155_v23, %v338_v22  ;;  %v350_v43 = vmul.f32 %v1146_v18, %v306_v30  ;;  %v312_v14 = vld [vmem:[%s1133_s22 + $0xe0] sm:$0xff] }
  0x22   : > { %919 = vmatpush3.bf16.msra.mxu0 %v1023_v28  ;;  %985 = vmatpush3.bf16.msra.mxu1 %v1023_v28  ;;  %v383_v28 = vadd.f32 %v1157_v24, %v339_v15  ;;  %v425_v45 = vmax.f32 %v393_v37, 0.0  ;;  %v392_v46 = vadd.f32 %v1155_v23, %v348_v38  ;;  %v343_v51 = vmul.f32 %v1148_v19, %v299_v39  ;;  %v314_v15 = vld [vmem:[%s1133_s22 + $0xf0] sm:$0xff] }
  0x23   : > { %920 = vmatprep.subr.bf16.mxu0 %v1024_v33  ;;  %978 = vmatprep.subr.bf16.mxu1 %v1024_v33  ;;  %v351_v33 = vmul.f32 %v1148_v19, %v307_v16  ;;  %v444_v35 = vpack.c.bf16 %v422_v27, %v420_v17  ;;  %v394_v50 = vadd.f32 %v1155_v23, %v350_v43  ;;  %v412_v1 = vmax.f32 %v380_v40, 0.0 }
  0x24   : > { %644 = vmatprep.mubr.bf16.mxu1 %v445_v26  ;;  %v415_v44 = vmax.f32 %v383_v28, 0.0  ;;  %v438_v53 = vpack.c.bf16 %v410_v32, %v408_v31  ;;  %v424_v54 = vmax.f32 %v392_v46, 0.0  ;;  %v387_v60 = vadd.f32 %v1157_v24, %v343_v51 }
  0x25   : > { %v395_v42 = vadd.f32 %v1157_v24, %v351_v33  ;;  %v426_v59 = vmax.f32 %v394_v50, 0.0  ;;  %v353_v62 = vmul.f32 %v1148_v19, %v309_v48  ;;  %v340_v6 = vmul.f32 %v1146_v18, %v296_v56 }
  0x26   : > { %921 = vmatpush3.bf16.msra.mxu0 %v1025_v47  ;;  %986 = vmatpush3.bf16.msra.mxu1 %v1025_v47  ;;  %v341_v47 = vmul.f32 %v1148_v19, %v297_v34  ;;  %v441_v0 = vpack.c.bf16 %v415_v44, %v413_v36  ;;  %v354_v13 = vmul.f32 %v1146_v18, %v310_v63  ;;  %v419_v16 = vmax.f32 %v387_v60, 0.0 }
  0x27   : > { %922 = vmatprep.subr.bf16.mxu0 %v1026_v52  ;;  %979 = vmatprep.subr.bf16.mxu1 %v1026_v52  ;;  %v427_v49 = vmax.f32 %v395_v42, 0.0  ;;  %v311_v52 = vld [vmem:[%s1133_s22 + $0xd8] sm:$0xff]  ;;  %v446_v5 = vpack.c.bf16 %v426_v59, %v424_v54  ;;  %v397_v7 = vadd.f32 %v1157_v24, %v353_v62  ;;  %v357_v21 = vmul.f32 %v1148_v19, %v313_v4 }
  0x28   : > { %v385_v55 = vadd.f32 %v1157_v24, %v341_v47  ;;  %v355_v3 = vmul.f32 %v1148_v19, %v311_v52  ;;  %v398_v25 = vadd.f32 %v1155_v23, %v354_v13  ;;  %v359_v26 = vmul.f32 %v1148_v19, %v315_v9 }
  0x29   : > { %v447_v58 = vpack.c.bf16 %v427_v49, %v425_v45  ;;  %v429_v17 = vmax.f32 %v397_v7, 0.0  ;;  %v401_v28 = vadd.f32 %v1157_v24, %v357_v21  ;;  %v356_v29 = vmul.f32 %v1146_v18, %v312_v14 }
  0x2a   : > { %923 = vmatpush3.bf16.msra.mxu0 %v1027_v2  ;;  %987 = vmatpush3.bf16.msra.mxu1 %v1027_v2  ;;  %v414_v2 = vmax.f32 %v382_v41, 0.0  ;;  %v417_v10 = vmax.f32 %v385_v55, 0.0  ;;  %v399_v12 = vadd.f32 %v1157_v24, %v355_v3  ;;  %v358_v30 = vmul.f32 %v1146_v18, %v314_v15 }
  0x2b   : > { %v430_v33 = vmax.f32 %v398_v25, 0.0  ;;  %v403_v34 = vadd.f32 %v1157_v24, %v359_v26  ;;  %v384_v36 = vadd.f32 %v1155_v23, %v340_v6  ;;  %v433_v38 = vmax.f32 %v401_v28, 0.0 }
  0x2c   : > { %v431_v22 = vmax.f32 %v399_v12, 0.0  ;;  %v440_v31 = vpack.c.bf16 %v414_v2, %v412_v1  ;;  %v400_v40 = vadd.f32 %v1155_v23, %v356_v29  ;;  %v402_v41 = vadd.f32 %v1155_v23, %v358_v30 }
  0x2d   : > { %613 = vmatmul.mubr.bf16.vlgmr.msra.gmra.mxu0 %v436_v61  ;;  %645 = vmatmul.mubr.bf16.vlgmr.msra.gmra.mxu1 %v444_v35  ;;  %v298_v61 = vld [vmem:[%s1133_s22 + $0x70] sm:$0xff]  ;;  %v443_v35 = vpack.c.bf16 %v419_v16, %v417_v10  ;;  %v435_v39 = vmax.f32 %v403_v34, 0.0  ;;  %v416_v42 = vmax.f32 %v384_v36, 0.0 }
  0x2e   : > { %620 = vmatprep.mubr.bf16.mxu0 %v439_v8  ;;  %652 = vmatprep.mubr.bf16.mxu1 %v447_v58  ;;  %v352_v8 = vmul.f32 %v1146_v18, %v308_v57  ;;  %v342_v11 = vmul.f32 %v1146_v18, %v298_v61  ;;  %v449_v32 = vpack.c.bf16 %v431_v22, %v429_v17  ;;  %v432_v24 = vmax.f32 %v400_v40, 0.0 }
  0x2f   : > { %v451_v18 = vpack.c.bf16 %v435_v39, %v433_v38  ;;  %v434_v44 = vmax.f32 %v402_v41, 0.0 }
  0x30   : > { %v396_v20 = vadd.f32 %v1155_v23, %v352_v8  ;;  %v386_v37 = vadd.f32 %v1155_v23, %v342_v11 }
  0x31   : > { %v450_v46 = vpack.c.bf16 %v434_v44, %v432_v24 }
  0x32   : > { %v428_v27 = vmax.f32 %v396_v20, 0.0  ;;  %v418_v43 = vmax.f32 %v386_v37, 0.0 }
  0x34   : > { %v448_v19 = vpack.c.bf16 %v430_v33, %v428_v27  ;;  %v442_v45 = vpack.c.bf16 %v418_v43, %v416_v42 }
  0x35   : > { %621 = vmatmul.mubr.bf16.gmra.mxu0 %v438_v53  ;;  %653 = vmatmul.mubr.bf16.gmra.mxu1 %v446_v5 }
  0x36   : > { %628 = vmatprep.mubr.bf16.mxu0 %v441_v0  ;;  %660 = vmatprep.mubr.bf16.mxu1 %v449_v32 }
  0x3d   : > { %629 = vmatmul.mubr.bf16.gmra.mxu0 %v440_v31  ;;  %661 = vmatmul.mubr.bf16.gmra.mxu1 %v448_v19 }
  0x3e   : > { %636 = vmatprep.mubr.bf16.mxu0 %v443_v35  ;;  %668 = vmatprep.mubr.bf16.mxu1 %v451_v18 }
  0x45   : > { %637 = vmatmul.mubr.bf16.gmra.mxu0 %v442_v45  ;;  %669 = vmatmul.mubr.bf16.gmra.mxu1 %v450_v46 }
  0xed   : > { %v924_v47 = vpop.f32.mrf.mxu0  ;;  %v948_v48 = vpop.f32.mrf.mxu1 }
  0xef   : > { %v925_v23 = vpop.f32.mrf.mxu0  ;;  %v949_v50 = vpop.f32.mrf.mxu1 }
  0xf0   : > { %v926_v49 = vadd.f32 %v925_v23, %v924_v47  ;;  %v1275_v52 = vadd.f32 %v949_v50, %v948_v48 }
  0xf1   : > { %v927_v51 = vpop.f32.mrf.mxu0  ;;  %v951_v53 = vpop.f32.mrf.mxu1 }
  0xf2   : > { %677 = vst [vmem:[%s1273_s23] sm:$0xff] %v926_v49  ;;  %685 = vst [vmem:[%s1273_s23 + $0x40] sm:$0xff] %v1275_v52  ;;  %v714_v14 = vmul.f32 %v926_v49, %v926_v49 }
  0xf3   : > { %v928_v54 = vpop.f32.mrf.mxu0  ;;  %v952_v56 = vpop.f32.mrf.mxu1 }
  0xf4   : > { %v929_v55 = vadd.f32 %v928_v54, %v927_v51  ;;  %v1280_v58 = vadd.f32 %v952_v56, %v951_v53  ;;  %v722_v51 = vmul.f32 %v1275_v52, %v1275_v52 }
  0xf5   : > { %v930_v57 = vpop.f32.mrf.mxu0  ;;  %v954_v59 = vpop.f32.mrf.mxu1 }
  0xf6   : > { %678 = vst [vmem:[%s1273_s23 + $0x8] sm:$0xff] %v929_v55  ;;  %686 = vst [vmem:[%s1273_s23 + $0x48] sm:$0xff] %v1280_v58  ;;  %v715_v9 = vmul.f32 %v929_v55, %v929_v55  ;;  %v693_v15 = vadd.f32 %v929_v55, %v926_v49  ;;  %v723_v55 = vmul.f32 %v1280_v58, %v1280_v58 }
  0xf7   : > { %v931_v60 = vpop.f32.mrf.mxu0  ;;  %v955_v62 = vpop.f32.mrf.mxu1 }
  0xf8   : > { %v932_v61 = vadd.f32 %v931_v60, %v930_v57  ;;  %v1285_v0 = vadd.f32 %v955_v62, %v954_v59  ;;  %v730_v21 = vadd.f32 %v715_v9, %v714_v14 }
  0xf9   : > { %v933_v63 = vpop.f32.mrf.mxu0  ;;  %v957_v1 = vpop.f32.mrf.mxu1 }
  0xfa   : > { %679 = vst [vmem:[%s1273_s23 + $0x10] sm:$0xff] %v932_v61  ;;  %687 = vst [vmem:[%s1273_s23 + $0x50] sm:$0xff] %v1285_v0  ;;  %v716_v16 = vmul.f32 %v932_v61, %v932_v61  ;;  %v694_v22 = vadd.f32 %v932_v61, %v693_v15  ;;  %v724_v59 = vmul.f32 %v1285_v0, %v1285_v0 }
  0xfb   : > { %v934_v2 = vpop.f32.mrf.mxu0  ;;  %v958_v4 = vpop.f32.mrf.mxu1 }
  0xfc   : > { %v935_v3 = vadd.f32 %v934_v2, %v933_v63  ;;  %v1290_v6 = vadd.f32 %v958_v4, %v957_v1  ;;  %v731_v30 = vadd.f32 %v730_v21, %v716_v16 }
  0xfd   : > { %v936_v5 = vpop.f32.mrf.mxu0  ;;  %v960_v7 = vpop.f32.mrf.mxu1 }
  0xfe   : > { %680 = vst [vmem:[%s1273_s23 + $0x18] sm:$0xff] %v935_v3  ;;  %688 = vst [vmem:[%s1273_s23 + $0x58] sm:$0xff] %v1290_v6  ;;  %v717_v25 = vmul.f32 %v935_v3, %v935_v3  ;;  %v695_v31 = vadd.f32 %v935_v3, %v694_v22  ;;  %v725_v62 = vmul.f32 %v1290_v6, %v1290_v6 }
  0xff   : > { %v937_v8 = vpop.f32.mrf.mxu0  ;;  %v961_v11 = vpop.f32.mrf.mxu1 }
 0x100   : > { %v938_v10 = vadd.f32 %v937_v8, %v936_v5  ;;  %v962_v13 = vadd.f32 %v961_v11, %v960_v7  ;;  %v732_v35 = vadd.f32 %v731_v30, %v717_v25 }
 0x101   : > { %v939_v12 = vpop.f32.mrf.mxu0  ;;  %v963_v17 = vpop.f32.mrf.mxu1 }
 0x102   : > { %681 = vst [vmem:[%s1273_s23 + $0x20] sm:$0xff] %v938_v10  ;;  %689 = vst [vmem:[%s1273_s23 + $0x60] sm:$0xff] %v962_v13  ;;  %v718_v32 = vmul.f32 %v938_v10, %v938_v10  ;;  %v696_v36 = vadd.f32 %v938_v10, %v695_v31 }
 0x103   : > { %v940_v20 = vpop.f32.mrf.mxu0  ;;  %v964_v27 = vpop.f32.mrf.mxu1 }
 0x104   : > { %v941_v26 = vadd.f32 %v940_v20, %v939_v12  ;;  %v965_v29 = vadd.f32 %v964_v27, %v963_v17  ;;  %v733_v41 = vadd.f32 %v732_v35, %v718_v32 }
 0x105   : > { %v942_v28 = vpop.f32.mrf.mxu0  ;;  %v966_v33 = vpop.f32.mrf.mxu1 }
 0x106   : > { %682 = vst [vmem:[%s1273_s23 + $0x28] sm:$0xff] %v941_v26  ;;  %690 = vst [vmem:[%s1273_s23 + $0x68] sm:$0xff] %v965_v29  ;;  %v719_v37 = vmul.f32 %v941_v26, %v941_v26  ;;  %v697_v18 = vadd.f32 %v941_v26, %v696_v36  ;;  %v727_v5 = vmul.f32 %v965_v29, %v965_v29 }
 0x107   : > { %v943_v34 = vpop.f32.mrf.mxu0  ;;  %v967_v19 = vpop.f32.mrf.mxu1 }
 0x108   : > { %v944_v38 = vadd.f32 %v943_v34, %v942_v28  ;;  %v968_v40 = vadd.f32 %v967_v19, %v966_v33  ;;  %v734_v44 = vadd.f32 %v733_v41, %v719_v37 }
 0x109   : > { %v945_v39 = vpop.f32.mrf.mxu0  ;;  %v969_v43 = vpop.f32.mrf.mxu1 }
 0x10a   : > { %683 = vst [vmem:[%s1273_s23 + $0x30] sm:$0xff] %v944_v38  ;;  %v720_v42 = vmul.f32 %v944_v38, %v944_v38  ;;  %691 = vst [vmem:[%s1273_s23 + $0x70] sm:$0xff] %v968_v40  ;;  %v698_v45 = vadd.f32 %v944_v38, %v697_v18  ;;  %v728_v9 = vmul.f32 %v968_v40, %v968_v40 }
 0x10b   : > { %v946_v24 = vpop.f32.mrf.mxu0  ;;  %v970_v47 = vpop.f32.mrf.mxu1 }
 0x10c   : > { %v947_v46 = vadd.f32 %v946_v24, %v945_v39  ;;  %v971_v48 = vadd.f32 %v970_v47, %v969_v43  ;;  %v735_v23 = vadd.f32 %v734_v44, %v720_v42 }
 0x10e   : > { %684 = vst [vmem:[%s1273_s23 + $0x38] sm:$0xff] %v947_v46  ;;  %v699_v49 = vadd.f32 %v947_v46, %v698_v45  ;;  %v721_v50 = vmul.f32 %v947_v46, %v947_v46  ;;  %692 = vst [vmem:[%s1273_s23 + $0x78] sm:$0xff] %v971_v48  ;;  %v729_v12 = vmul.f32 %v971_v48, %v971_v48 }
 0x110   : > { %v700_v53 = vadd.f32 %v1275_v52, %v699_v49  ;;  %v736_v54 = vadd.f32 %v735_v23, %v721_v50  ;;  %v726_v52 = vmul.f32 %v962_v13, %v962_v13 }
 0x112   : > { %v701_v56 = vadd.f32 %v1280_v58, %v700_v53  ;;  %v737_v57 = vadd.f32 %v736_v54, %v722_v51 }
 0x114   : > { %v738_v60 = vadd.f32 %v737_v57, %v723_v55  ;;  %v702_v61 = vadd.f32 %v1285_v0, %v701_v56 }
 0x116   : > { %v703_v63 = vadd.f32 %v1290_v6, %v702_v61  ;;  %v739_v1 = vadd.f32 %v738_v60, %v724_v59 }
 0x118   : > { %v704_v2 = vadd.f32 %v962_v13, %v703_v63  ;;  %v740_v3 = vadd.f32 %v739_v1, %v725_v62 }
 0x11a   : > { %v705_v4 = vadd.f32 %v965_v29, %v704_v2  ;;  %v741_v7 = vadd.f32 %v740_v3, %v726_v52 }
 0x11c   : > { %v742_v58 = vadd.f32 %v741_v7, %v727_v5  ;;  %v706_v8 = vadd.f32 %v968_v40, %v705_v4 }
 0x11e   : > { %v743_v10 = vadd.f32 %v742_v58, %v728_v9  ;;  %v707_v11 = vadd.f32 %v971_v48, %v706_v8 }
 0x120   : > { %v708_v0 = vrot.slane %v707_v11, 4  ;;  %v744_v14 = vadd.f32 %v743_v10, %v729_v12 }
 0x122   : > { %v709_v15 = vadd.f32 %v708_v0, %v707_v11  ;;  %v745_v16 = vrot.slane %v744_v14, 4 }
 0x124   : > { %v710_v17 = vrot.slane %v709_v15, 2  ;;  %v746_v6 = vadd.f32 %v745_v16, %v744_v14 }
 0x126   : > { %v711_v20 = vadd.f32 %v710_v17, %v709_v15  ;;  %v747_v21 = vrot.slane %v746_v6, 2 }
 0x128   : > { %v712_v13 = vrot.slane %v711_v20, 1  ;;  %v748_v22 = vadd.f32 %v747_v21, %v746_v6 }
 0x12a   : > { %v749_v25 = vrot.slane %v748_v22, 1  ;;  %v713_v26 = vadd.f32 %v712_v13, %v711_v20 }
 0x12c   : > { %v750_v27 = vadd.f32 %v749_v25, %v748_v22 }
 0x12e   : > { %v752_v28 = vsel %vm751_vm0, %v713_v26, %v750_v27 }
 0x12f   : > { %753 = vst [vmem:[%s281_s27] sm:$0x3] %v752_v28 }
 0x130 PF: > { %s16_s20 = sadd.s32 1, %s1050_s20   ;;  %s1334_s18 = smov %s1046_s19 }
 0x131   : > { %p13_p5 = scmp.ge.s32.totalorder %s16_s20, 4   ;;  %s1335_s19 = smov %s1337_s21 }
 0x133   :  { %15 = sbr.rel (!%p13_p5) target bundleno = 2 (0x2), region = 78 }

// kernel: est_coord_forward.14
= control target key start
LH: loop header
LB: loop body
LE: loop exit
PB: predicated region body
PF: predicated region fallthrough
CT: control target
= control target key end

     0   :  { %s797_s18 = smov 0   ;;  %s799_s19 = smov 0   ;;  %s958_s0 = inlined_call_operand.vmem [shape: f32[2,128,128], index: 0, kind: input, shape index: {}]   ;;  %s959_s1 = inlined_call_operand.vmem [shape: bf16[128,3], index: 1, kind: input, shape index: {}]   ;;  %s960_s2 = inlined_call_operand.vmem [shape: f32[1,128], index: 2, kind: input, shape index: {}]   ;;  %s961_s3 = inlined_call_operand.vmem [shape: f32[1,128], index: 3, kind: input, shape index: {}]   ;;  %s962_s4 = inlined_call_operand.vmem [shape: f32[1,3], index: 4, kind: input, shape index: {}]   ;;  %s963_s5 = inlined_call_operand.vmem [shape: f32[2,128,3], index: 5, kind: output, shape index: {}]  }
   0x1   :  { %s801_s20 = smov 0  }
   0x2 LB: > { %s27_s21 = sadd.s32 1, %s761_s19  ;;  %p627_p0 = scmp.ge.s32.totalorder %s765_s20, 1  ;;  %s765_s20 = sphi %s801_s20, %s15_s20   ;;  %s761_s19 = sphi %s799_s19, %s965_s19   ;;  %s757_s18 = sphi %s797_s18, %s964_s18  }
   0x3   : > { %p29_p1 = scmp.ge.s32.totalorder %s27_s21, 2  ;;  %p208_p2 = scmp.lt.s32.totalorder %s765_s20, 3 }
   0x5   : > { %s967_s21 = smov (%p29_p1, %s27_s21), 0  ;;  %p209_p3 = pnand %p627_p0, %p208_p2 }
   0x6   : > { %p245_p4 = scmp.lt.s32.totalorder (!%p209_p3), %s757_s18, 1 }
   0x7   : > { %212 = sbr.rel (%p209_p3) target bundleno = 255 (0xff), region = 40 }
   0xc   : > { %v735_v0 = vld [vmem:[%s959_s1 + $0x38] sm:$0xff]   ;;  %v736_v1 = vld [vmem:[%s959_s1 + $0x30] sm:$0xff]   ;;  %s969_s18 = smov (!%p245_p4, %s757_s18), 1  ;;  %v737_v2 = vld [vmem:[%s959_s1 + $0x28] sm:$0xff]   ;;  %vm519_vm0 = vcmask 23552  }
   0xd   : > { %663 = vmatprep.subr.bf16.mxu0 %v735_v0  ;;  %695 = vmatprep.subr.bf16.mxu1 %v735_v0  ;;  %s645_s28 = sshll.u32 %s969_s18, 7  ;;  %v738_v3 = vld [vmem:[%s959_s1 + $0x20] sm:$0xff]   ;;  %v739_v16 = vld [vmem:[%s959_s1 + $0x18] sm:$0xff]   ;;  %v740_v27 = vld [vmem:[%s959_s1 + $0x10] sm:$0xff]  }
   0xe   : > { %664 = vmatpush3.bf16.msra.mxu0 %v735_v0  ;;  %703 = vmatpush3.bf16.msra.mxu1 %v735_v0  ;;  %s832_s6 = scalar_lea.vmem %s958_s0, %s645_s28  ;;  %v842_v6 = vld [vmem:[%s960_s2] ss:$0 sm:$0xff]  ;;  %v741_v42 = vld [vmem:[%s959_s1 + $0x8] sm:$0xff]   ;;  %s915_s30 = scalar_lea.vmem %s963_s5, %s645_s28 }
   0xf   : > { %665 = vmatprep.subr.bf16.mxu0 %v736_v1  ;;  %696 = vmatprep.subr.bf16.mxu1 %v736_v1  ;;  %v265_v4 = vld [vmem:[%s832_s6] sm:$0xff]  ;;  %v266_v5 = vld [vmem:[%s832_s6 + $0x8] sm:$0xff]  ;;  %v267_v21 = vld [vmem:[%s832_s6 + $0x10] sm:$0xff] }
  0x10   : > { %v288_v7 = vmul.f32 %v842_v6, %v265_v4  ;;  %v289_v8 = vmul.f32 %v842_v6, %v266_v5  ;;  %v849_v9 = vld [vmem:[%s961_s3] ss:$0 sm:$0xff]  ;;  %v274_v11 = vld [vmem:[%s832_s6 + $0x48] sm:$0xff]  ;;  %v268_v24 = vld [vmem:[%s832_s6 + $0x18] sm:$0xff]  ;;  %v290_v34 = vmul.f32 %v842_v6, %v267_v21 }
  0x11   : > { %v273_v10 = vld [vmem:[%s832_s6 + $0x40] sm:$0xff]  ;;  %v297_v13 = vmul.f32 %v842_v6, %v274_v11  ;;  %v275_v25 = vld [vmem:[%s832_s6 + $0x50] sm:$0xff]  ;;  %v276_v26 = vld [vmem:[%s832_s6 + $0x58] sm:$0xff]  ;;  %v291_v35 = vmul.f32 %v842_v6, %v268_v24 }
  0x12   : > { %666 = vmatpush3.bf16.msra.mxu0 %v736_v1  ;;  %704 = vmatpush3.bf16.msra.mxu1 %v736_v1  ;;  %v296_v12 = vmul.f32 %v842_v6, %v273_v10  ;;  %v311_v14 = vadd.f32 %v849_v9, %v288_v7  ;;  %v312_v15 = vadd.f32 %v849_v9, %v289_v8  ;;  %v269_v29 = vld [vmem:[%s832_s6 + $0x20] sm:$0xff]  ;;  %v270_v31 = vld [vmem:[%s832_s6 + $0x28] sm:$0xff]  ;;  %v271_v48 = vld [vmem:[%s832_s6 + $0x30] sm:$0xff] }
  0x13   : > { %667 = vmatprep.subr.bf16.mxu0 %v737_v2  ;;  %697 = vmatprep.subr.bf16.mxu1 %v737_v2  ;;  %v320_v18 = vadd.f32 %v849_v9, %v297_v13  ;;  %v277_v32 = vld [vmem:[%s832_s6 + $0x60] sm:$0xff]  ;;  %v278_v33 = vld [vmem:[%s832_s6 + $0x68] sm:$0xff]  ;;  %v298_v36 = vmul.f32 %v842_v6, %v275_v25  ;;  %v299_v37 = vmul.f32 %v842_v6, %v276_v26  ;;  %v272_v52 = vld [vmem:[%s832_s6 + $0x38] sm:$0xff] }
  0x14   : > { %v319_v17 = vadd.f32 %v849_v9, %v296_v12  ;;  %v327_v19 = vmax.f32 %v311_v14, 0.0  ;;  %v328_v20 = vmax.f32 %v312_v15, 0.0  ;;  %v292_v38 = vmul.f32 %v842_v6, %v269_v29  ;;  %v279_v53 = vld [vmem:[%s832_s6 + $0x70] sm:$0xff]  ;;  %v280_v54 = vld [vmem:[%s832_s6 + $0x78] sm:$0xff]  ;;  %v742_v55 = vld [vmem:[%s959_s1] sm:$0xff]  }
  0x15   : > { %v336_v23 = vmax.f32 %v320_v18, 0.0  ;;  %v293_v39 = vmul.f32 %v842_v6, %v270_v31  ;;  %v300_v40 = vmul.f32 %v842_v6, %v277_v32  ;;  %v301_v41 = vmul.f32 %v842_v6, %v278_v33 }
  0x16   : > { %668 = vmatpush3.bf16.msra.mxu0 %v737_v2  ;;  %705 = vmatpush3.bf16.msra.mxu1 %v737_v2  ;;  %v335_v22 = vmax.f32 %v319_v17, 0.0  ;;  %v343_v28 = vpack.c.bf16 %v328_v20, %v327_v19  ;;  %v313_v43 = vadd.f32 %v849_v9, %v290_v34  ;;  %v314_v44 = vadd.f32 %v849_v9, %v291_v35 }
  0x17   : > { %669 = vmatprep.subr.bf16.mxu0 %v738_v3  ;;  %698 = vmatprep.subr.bf16.mxu1 %v738_v3  ;;  %v321_v45 = vadd.f32 %v849_v9, %v298_v36  ;;  %v322_v46 = vadd.f32 %v849_v9, %v299_v37  ;;  %v315_v47 = vadd.f32 %v849_v9, %v292_v38 }
  0x18   : > { %v347_v30 = vpack.c.bf16 %v336_v23, %v335_v22  ;;  %679 = vmatprep.mubr.bf16.mxu0 %v343_v28  ;;  %v316_v49 = vadd.f32 %v849_v9, %v293_v39  ;;  %v323_v50 = vadd.f32 %v849_v9, %v300_v40  ;;  %v324_v51 = vadd.f32 %v849_v9, %v301_v41 }
  0x19   : > { %v329_v56 = vmax.f32 %v313_v43, 0.0  ;;  %v330_v57 = vmax.f32 %v314_v44, 0.0  ;;  %v337_v58 = vmax.f32 %v321_v45, 0.0  ;;  %v338_v59 = vmax.f32 %v322_v46, 0.0 }
  0x1a   : > { %670 = vmatpush3.bf16.msra.mxu0 %v738_v3  ;;  %706 = vmatpush3.bf16.msra.mxu1 %v738_v3  ;;  %v294_v60 = vmul.f32 %v842_v6, %v271_v48  ;;  %v295_v61 = vmul.f32 %v842_v6, %v272_v52  ;;  %v302_v62 = vmul.f32 %v842_v6, %v279_v53  ;;  %v331_v0 = vmax.f32 %v315_v47, 0.0 }
  0x1b   : > { %671 = vmatprep.subr.bf16.mxu0 %v739_v16  ;;  %699 = vmatprep.subr.bf16.mxu1 %v739_v16  ;;  %v303_v63 = vmul.f32 %v842_v6, %v280_v54  ;;  %v332_v1 = vmax.f32 %v316_v49, 0.0  ;;  %v339_v2 = vmax.f32 %v323_v50, 0.0  ;;  %v340_v3 = vmax.f32 %v324_v51, 0.0 }
  0x1c   : > { %687 = vmatprep.mubr.bf16.mxu1 %v347_v30  ;;  %v344_v4 = vpack.c.bf16 %v330_v57, %v329_v56  ;;  %v348_v5 = vpack.c.bf16 %v338_v59, %v337_v58  ;;  %v317_v7 = vadd.f32 %v849_v9, %v294_v60  ;;  %v318_v8 = vadd.f32 %v849_v9, %v295_v61 }
  0x1d   : > { %v325_v10 = vadd.f32 %v849_v9, %v302_v62  ;;  %v326_v11 = vadd.f32 %v849_v9, %v303_v63  ;;  %v345_v6 = vpack.c.bf16 %v332_v1, %v331_v0  ;;  %v349_v12 = vpack.c.bf16 %v340_v3, %v339_v2  ;;  %v634_v9 = vld [vmem:[%s962_s4] ss:$0 sm:$0xff] }
  0x1e   : > { %672 = vmatpush3.bf16.msra.mxu0 %v739_v16  ;;  %707 = vmatpush3.bf16.msra.mxu1 %v739_v16  ;;  %v333_v13 = vmax.f32 %v317_v7, 0.0  ;;  %v334_v14 = vmax.f32 %v318_v8, 0.0 }
  0x1f   : > { %673 = vmatprep.subr.bf16.mxu0 %v740_v27  ;;  %700 = vmatprep.subr.bf16.mxu1 %v740_v27  ;;  %v341_v15 = vmax.f32 %v325_v10, 0.0  ;;  %v342_v16 = vmax.f32 %v326_v11, 0.0 }
  0x20   : > { %v346_v17 = vpack.c.bf16 %v334_v14, %v333_v13 }
  0x21   : > { %v350_v18 = vpack.c.bf16 %v342_v16, %v341_v15 }
  0x22   : > { %674 = vmatpush3.bf16.msra.mxu0 %v740_v27  ;;  %708 = vmatpush3.bf16.msra.mxu1 %v740_v27 }
  0x23   : > { %675 = vmatprep.subr.bf16.mxu0 %v741_v42  ;;  %701 = vmatprep.subr.bf16.mxu1 %v741_v42 }
  0x26   : > { %676 = vmatpush3.bf16.msra.mxu0 %v741_v42  ;;  %709 = vmatpush3.bf16.msra.mxu1 %v741_v42 }
  0x27   : > { %677 = vmatprep.subr.bf16.mxu0 %v742_v55  ;;  %702 = vmatprep.subr.bf16.mxu1 %v742_v55 }
  0x2a   : > { %678 = vmatpush3.bf16.msra.mxu0 %v742_v55  ;;  %710 = vmatpush3.bf16.msra.mxu1 %v742_v55 }
  0x2d   : > { %680 = vmatmul.mubr.bf16.vlgmr.msra.gmra.mxu0 %v344_v4  ;;  %688 = vmatmul.mubr.bf16.vlgmr.msra.gmra.mxu1 %v348_v5 }
  0x2e   : > { %683 = vmatprep.mubr.bf16.mxu0 %v345_v6  ;;  %691 = vmatprep.mubr.bf16.mxu1 %v349_v12 }
  0x35   : > { %684 = vmatmul.mubr.bf16.gmra.mxu0 %v346_v17  ;;  %692 = vmatmul.mubr.bf16.gmra.mxu1 %v350_v18 }
  0xed   : > { %v681_v19 = vpop.f32.mrf.mxu0  ;;  %v689_v20 = vpop.f32.mrf.mxu1 }
  0xee   : > { %v465_v21 = vadd.f32 %v681_v19, %v634_v9  ;;  %v497_v22 = vadd.f32 %v689_v20, %v634_v9 }
  0xef   : > { %v456_v23 = vpop.f32.mrf.mxu0  ;;  %v488_v24 = vpop.f32.mrf.mxu1 }
  0xf0   : > { %522 = vst.msk [vmem:[%s915_s30 + $0x10] sm:$0xff] %vm519_vm0, %v465_v21  ;;  %530 = vst.msk [vmem:[%s915_s30 + $0x50] sm:$0xff] %vm519_vm0, %v497_v22  ;;  %v457_v25 = vadd.f32 %v634_v9, %v456_v23  ;;  %v489_v26 = vadd.f32 %v634_v9, %v488_v24 }
  0xf1   : > { %v682_v27 = vpop.f32.mrf.mxu0  ;;  %v690_v28 = vpop.f32.mrf.mxu1 }
  0xf2   : > { %520 = vst.msk [vmem:[%s915_s30] sm:$0xff] %vm519_vm0, %v457_v25  ;;  %528 = vst.msk [vmem:[%s915_s30 + $0x40] sm:$0xff] %vm519_vm0, %v489_v26  ;;  %v468_v29 = vadd.f32 %v682_v27, %v634_v9  ;;  %v500_v30 = vadd.f32 %v690_v28, %v634_v9 }
  0xf3   : > { %v459_v31 = vpop.f32.mrf.mxu0  ;;  %v491_v32 = vpop.f32.mrf.mxu1 }
  0xf4   : > { %523 = vst.msk [vmem:[%s915_s30 + $0x18] sm:$0xff] %vm519_vm0, %v468_v29  ;;  %531 = vst.msk [vmem:[%s915_s30 + $0x58] sm:$0xff] %vm519_vm0, %v500_v30  ;;  %v460_v33 = vadd.f32 %v634_v9, %v459_v31  ;;  %v492_v34 = vadd.f32 %v634_v9, %v491_v32 }
  0xf5   : > { %v685_v35 = vpop.f32.mrf.mxu0  ;;  %v693_v36 = vpop.f32.mrf.mxu1 }
  0xf6   : > { %521 = vst.msk [vmem:[%s915_s30 + $0x8] sm:$0xff] %vm519_vm0, %v460_v33  ;;  %529 = vst.msk [vmem:[%s915_s30 + $0x48] sm:$0xff] %vm519_vm0, %v492_v34  ;;  %v481_v37 = vadd.f32 %v685_v35, %v634_v9  ;;  %v513_v38 = vadd.f32 %v693_v36, %v634_v9 }
  0xf7   : > { %v472_v39 = vpop.f32.mrf.mxu0  ;;  %v504_v40 = vpop.f32.mrf.mxu1 }
  0xf8   : > { %526 = vst.msk [vmem:[%s915_s30 + $0x30] sm:$0xff] %vm519_vm0, %v481_v37  ;;  %534 = vst.msk [vmem:[%s915_s30 + $0x70] sm:$0xff] %vm519_vm0, %v513_v38  ;;  %v473_v41 = vadd.f32 %v634_v9, %v472_v39  ;;  %v505_v42 = vadd.f32 %v634_v9, %v504_v40 }
  0xf9   : > { %v686_v43 = vpop.f32.mrf.mxu0  ;;  %v694_v44 = vpop.f32.mrf.mxu1 }
  0xfa   : > { %524 = vst.msk [vmem:[%s915_s30 + $0x20] sm:$0xff] %vm519_vm0, %v473_v41  ;;  %532 = vst.msk [vmem:[%s915_s30 + $0x60] sm:$0xff] %vm519_vm0, %v505_v42  ;;  %v484_v45 = vadd.f32 %v686_v43, %v634_v9  ;;  %v516_v46 = vadd.f32 %v694_v44, %v634_v9 }
  0xfb   : > { %v475_v47 = vpop.f32.mrf.mxu0  ;;  %v507_v48 = vpop.f32.mrf.mxu1 }
  0xfc   : > { %527 = vst.msk [vmem:[%s915_s30 + $0x38] sm:$0xff] %vm519_vm0, %v484_v45  ;;  %535 = vst.msk [vmem:[%s915_s30 + $0x78] sm:$0xff] %vm519_vm0, %v516_v46  ;;  %v476_v49 = vadd.f32 %v634_v9, %v475_v47  ;;  %v508_v50 = vadd.f32 %v634_v9, %v507_v48 }
  0xfe   : > { %525 = vst.msk [vmem:[%s915_s30 + $0x28] sm:$0xff] %vm519_vm0, %v476_v49  ;;  %533 = vst.msk [vmem:[%s915_s30 + $0x68] sm:$0xff] %vm519_vm0, %v508_v50 }
  0xff PF: > { %s15_s20 = sadd.s32 1, %s765_s20   ;;  %s964_s18 = smov %s761_s19 }
 0x100   : > { %p12_p5 = scmp.ge.s32.totalorder %s15_s20, 4   ;;  %s965_s19 = smov %s967_s21 }
 0x102   :  { %14 = sbr.rel (!%p12_p5) target bundleno = 2 (0x2), region = 70 }

// kernel: est_coord_forward.15
= control target key start
LH: loop header
LB: loop body
LE: loop exit
PB: predicated region body
PF: predicated region fallthrough
CT: control target
= control target key end

     0   :  { %s1674_s21 = smov 0   ;;  %s1676_s22 = smov 0   ;;  %s2370_s0 = inlined_call_operand.vmem [shape: f32[2,128,3], index: 0, kind: input, shape index: {}]   ;;  %s2371_s1 = inlined_call_operand.vmem [shape: f32[2,128,3], index: 1, kind: input, shape index: {}]   ;;  %s2372_s2 = inlined_call_operand.vmem [shape: f32[2,3,128], index: 2, kind: input, shape index: {}]   ;;  %s2373_s3 = inlined_call_operand.vmem [shape: f32[2,128,1], index: 3, kind: output, shape index: {0}]   ;;  %s2374_s4 = inlined_call_operand.vmem [shape: f32[2,1,128], index: 4, kind: output, shape index: {1}]   ;;  %s2375_s5 = inlined_call_operand.vmem [shape: f32[2,128,1], index: 5, kind: output, shape index: {2}]   ;;  %s2376_s6 = inlined_call_operand.vmem [shape: f32[2,128,1], index: 6, kind: output, shape index: {3}]  }
   0x1   :  { %s1678_s23 = smov 0  }
   0x2 LB: > { %s29_s24 = sadd.s32 1, %s1633_s22  ;;  %p1462_p0 = scmp.ge.s32.totalorder %s1637_s23, 1  ;;  %s1637_s23 = sphi %s1678_s23, %s17_s23   ;;  %s1633_s22 = sphi %s1676_s22, %s2378_s22   ;;  %s1629_s21 = sphi %s1674_s21, %s2377_s21  }
   0x3   : > { %p31_p1 = scmp.ge.s32.totalorder %s29_s24, 2  ;;  %p270_p2 = scmp.lt.s32.totalorder %s1637_s23, 3 }
   0x5   : > { %s2380_s24 = smov (%p31_p1, %s29_s24), 0  ;;  %p271_p3 = pnand %p1462_p0, %p270_p2 }
   0x6   : > { %p343_p4 = scmp.lt.s32.totalorder (!%p271_p3), %s1629_s21, 1 }
   0x7   : > { %274 = sbr.rel (%p271_p3) target bundleno = 410 (0x19a), region = 32 }
   0xc   : > { %s2382_s21 = smov (!%p343_p4, %s1629_s21), 1  ;;  %vm448_vm0 = vcmask 23552   ;;  %vm498_vm1 = vcmask 1042432  }
   0xd   : > { %s1695_s25 = sshll.u32 %s2382_s21, 7  ;;  %s1467_s26 = sshll.u32 %s2382_s21, 2 }
   0xe   : > { %s1702_s29 = scalar_lea.vmem %s2370_s0, %s1695_s25  ;;  %s365_s8 = scalar_lea.vmem %s2372_s2, %s1467_s26 }
   0xf   : > { %v1708_v0 = vld [vmem:[%s1702_s29] sm:$0xff]  ;;  %v1718_v3 = vld [vmem:[%s1702_s29 + $0x8] sm:$0xff]  ;;  %v1728_v7 = vld [vmem:[%s1702_s29 + $0x10] sm:$0xff]  ;;  %s1832_s11 = scalar_lea.vmem %s2371_s1, %s1695_s25  ;;  %s2007_s14 = scalar_lea.vmem %s2375_s5, %s1695_s25 }
  0x10   : > { %v1711_v1 = vld [vmem:[%s1702_s29 + $0x40] sm:$0xff]  ;;  %1533 = vmatprep.mubr.msk.f32.mxu0 %vm448_vm0, %v1708_v0  ;;  %v432_v4 = vmul.f32 %v1708_v0, %v1708_v0  ;;  %v1725_v6 = vld [vmem:[%s1702_s29 + $0x48] sm:$0xff]  ;;  %v1731_v8 = vld [vmem:[%s1702_s29 + $0x50] sm:$0xff]  ;;  %v434_v10 = vmul.f32 %v1728_v7, %v1728_v7  ;;  %v433_v12 = vmul.f32 %v1718_v3, %v1718_v3  ;;  %s2097_s17 = scalar_lea.vmem %s2376_s6, %s1695_s25  ;;  %s378_s20 = scalar_lea.vmem %s2374_s4, %s2382_s21 }
  0x11   : > { %v431_v2 = vld [vmem:[%s365_s8] sm:$0x7]  ;;  %1545 = vmatprep.mubr.msk.f32.mxu1 %vm448_vm0, %v1711_v1  ;;  %v1736_v9 = vld [vmem:[%s1702_s29 + $0x18] sm:$0xff]  ;;  %v1767_v19 = vld [vmem:[%s1702_s29 + $0x28] sm:$0xff]  ;;  %v441_v35 = vmul.f32 %v1725_v6, %v1725_v6  ;;  %v440_v36 = vmul.f32 %v1711_v1, %v1711_v1  ;;  %v442_v40 = vmul.f32 %v1731_v8, %v1731_v8  ;;  %s2323_s28 = scalar_lea.vmem %s2373_s3, %s1695_s25 }
  0x12   : > { %v497_v5 = vmul.f32 %v431_v2, %v431_v2  ;;  %1531 = vmatprep.subr.msk.mxu0 %vm498_vm1, %v431_v2  ;;  %1557 = vmatprep.subr.msk.mxu1 %vm498_vm1, %v431_v2  ;;  %v449_v11 = vsel %vm448_vm0, %v432_v4, 0.0  ;;  %v435_v14 = vmul.f32 %v1736_v9, %v1736_v9  ;;  %v1757_v15 = vld [vmem:[%s1702_s29 + $0x58] sm:$0xff]  ;;  %v455_v16 = vsel %vm448_vm0, %v434_v10, 0.0  ;;  %v1761_v17 = vld [vmem:[%s1702_s29 + $0x20] sm:$0xff]  ;;  %v1784_v24 = vld [vmem:[%s1702_s29 + $0x68] sm:$0xff] }
  0x13   : > { %1532 = vmatpush3.msk.msra.mxu0 %vm498_vm1, %v431_v2  ;;  %1558 = vmatpush3.msk.msra.mxu1 %vm498_vm1, %v431_v2  ;;  %v1764_v18 = vld [vmem:[%s1702_s29 + $0x60] sm:$0xff]  ;;  %v452_v21 = vsel %vm448_vm0, %v433_v12, 0.0  ;;  %v437_v22 = vmul.f32 %v1767_v19, %v1767_v19  ;;  %v436_v23 = vmul.f32 %v1761_v17, %v1761_v17  ;;  %v1787_v25 = vld [vmem:[%s1702_s29 + $0x30] sm:$0xff]  ;;  %v1793_v27 = vld [vmem:[%s1702_s29 + $0x38] sm:$0xff]  ;;  %v476_v37 = vsel %vm448_vm0, %v441_v35, 0.0 }
  0x14   : > { %v1744_v13 = vsel %vm498_vm1, %v497_v5, 0.0  ;;  %1534 = vmatmul.mubr.msk.f32.vlgmr.msra.gmra.mxu0 %vm448_vm0, %v1718_v3  ;;  %1546 = vmatmul.mubr.msk.f32.vlgmr.msra.gmra.mxu1 %vm448_vm0, %v1725_v6  ;;  %v458_v20 = vsel %vm448_vm0, %v435_v14, 0.0  ;;  %v1790_v26 = vld [vmem:[%s1702_s29 + $0x70] sm:$0xff]  ;;  %v439_v30 = vmul.f32 %v1793_v27, %v1793_v27  ;;  %v438_v31 = vmul.f32 %v1787_v25, %v1787_v25  ;;  %v1810_v32 = vld [vmem:[%s1702_s29 + $0x78] sm:$0xff]  ;;  %v416_v45 = vld [vmem:[%s1832_s11 + $0x8] sm:$0xff] }
  0x15   : > { %1536 = vmatprep.mubr.msk.f32.mxu0 %vm448_vm0, %v1728_v7  ;;  %1548 = vmatprep.mubr.msk.f32.mxu1 %vm448_vm0, %v1731_v8  ;;  %v464_v28 = vsel %vm448_vm0, %v437_v22, 0.0  ;;  %v461_v29 = vsel %vm448_vm0, %v436_v23, 0.0  ;;  %v473_v38 = vsel %vm448_vm0, %v440_v36, 0.0  ;;  %v443_v39 = vmul.f32 %v1757_v15, %v1757_v15  ;;  %v415_v46 = vld [vmem:[%s1832_s11] sm:$0xff]  ;;  %v418_v53 = vld [vmem:[%s1832_s11 + $0x18] sm:$0xff]  ;;  %v417_v54 = vld [vmem:[%s1832_s11 + $0x10] sm:$0xff] }
  0x16   : > { %456 = vadd.xlane.f32.xlu1 %v455_v16  ;;  %450 = vadd.xlane.f32.xlu0 %v449_v11  ;;  %v470_v33 = vsel %vm448_vm0, %v439_v30, 0.0  ;;  %v467_v34 = vsel %vm448_vm0, %v438_v31, 0.0  ;;  %v479_v42 = vsel %vm448_vm0, %v442_v40, 0.0  ;;  %v445_v43 = vmul.f32 %v1784_v24, %v1784_v24  ;;  %v420_v61 = vld [vmem:[%s1832_s11 + $0x28] sm:$0xff]  ;;  %v419_v62 = vld [vmem:[%s1832_s11 + $0x20] sm:$0xff] }
  0x17   : > { %v482_v41 = vsel %vm448_vm0, %v443_v39, 0.0  ;;  %v444_v44 = vmul.f32 %v1764_v18, %v1764_v18  ;;  %v447_v47 = vmul.f32 %v1810_v32, %v1810_v32  ;;  %v1845_v48 = vsub.f32 %v1718_v3, %v416_v45  ;;  %v423_v12 = vld [vmem:[%s1832_s11 + $0x40] sm:$0xff]  ;;  %v428_v36 = vld [vmem:[%s1832_s11 + $0x68] sm:$0xff]  ;;  %v429_v45 = vld [vmem:[%s1832_s11 + $0x70] sm:$0xff] }
  0x18   : > { %1537 = vmatmul.mubr.msk.f32.gmra.mxu0 %vm448_vm0, %v1736_v9  ;;  %1549 = vmatmul.mubr.msk.f32.gmra.mxu1 %vm448_vm0, %v1757_v15  ;;  %v1848_v49 = vsub.f32 %v1708_v0, %v415_v46  ;;  %v488_v50 = vsel %vm448_vm0, %v445_v43, 0.0  ;;  %v446_v52 = vmul.f32 %v1790_v26, %v1790_v26  ;;  %v1863_v59 = vsub.f32 %v1736_v9, %v418_v53  ;;  %v421_v9 = vld [vmem:[%s1832_s11 + $0x30] sm:$0xff] }
  0x19   : > { %1539 = vmatprep.mubr.msk.f32.mxu0 %vm448_vm0, %v1761_v17  ;;  %1551 = vmatprep.mubr.msk.f32.mxu1 %vm448_vm0, %v1764_v18  ;;  %v485_v51 = vsel %vm448_vm0, %v444_v44, 0.0  ;;  %v494_v55 = vsel %vm448_vm0, %v447_v47, 0.0  ;;  %v977_v56 = vmul.f32 %v1845_v48, %v1845_v48  ;;  %v1866_v60 = vsub.f32 %v1728_v7, %v417_v54  ;;  %v422_v7 = vld [vmem:[%s1832_s11 + $0x38] sm:$0xff] }
  0x1a   : > { %459 = vadd.xlane.f32.xlu1 %v458_v20  ;;  %453 = vadd.xlane.f32.xlu0 %v452_v21  ;;  %v491_v57 = vsel %vm448_vm0, %v446_v52, 0.0  ;;  %v976_v58 = vmul.f32 %v1848_v49, %v1848_v49  ;;  %v1872_v0 = vsub.f32 %v1767_v19, %v420_v61  ;;  %v979_v3 = vmul.f32 %v1863_v59, %v1863_v59  ;;  %v424_v20 = vld [vmem:[%s1832_s11 + $0x48] sm:$0xff]  ;;  %v430_v44 = vld [vmem:[%s1832_s11 + $0x78] sm:$0xff] }
  0x1b   : > { %v995_v63 = vsel %vm448_vm0, %v977_v56, 0.0  ;;  %v978_v4 = vmul.f32 %v1866_v60, %v1866_v60  ;;  %v1880_v5 = vsub.f32 %v1761_v17, %v419_v62  ;;  %v1887_v11 = vsub.f32 %v1793_v27, %v422_v7 }
  0x1c   : > { %1540 = vmatmul.mubr.msk.f32.gmra.mxu0 %vm448_vm0, %v1767_v19  ;;  %1552 = vmatmul.mubr.msk.f32.gmra.mxu1 %vm448_vm0, %v1784_v24  ;;  %v992_v2 = vsel %vm448_vm0, %v976_v58, 0.0  ;;  %v981_v10 = vmul.f32 %v1872_v0, %v1872_v0  ;;  %v1001_v14 = vsel %vm448_vm0, %v979_v3, 0.0  ;;  %v1895_v19 = vsub.f32 %v1787_v25, %v421_v9 }
  0x1d   : > { %1542 = vmatprep.mubr.msk.f32.mxu0 %vm448_vm0, %v1787_v25  ;;  %1554 = vmatprep.mubr.msk.f32.mxu1 %vm448_vm0, %v1790_v26  ;;  %v998_v16 = vsel %vm448_vm0, %v978_v4, 0.0  ;;  %v980_v17 = vmul.f32 %v1880_v5, %v1880_v5  ;;  %v1899_v21 = vsub.f32 %v1711_v1, %v423_v12  ;;  %v983_v22 = vmul.f32 %v1887_v11, %v1887_v11  ;;  %v425_v1 = vld [vmem:[%s1832_s11 + $0x50] sm:$0xff] }
  0x1e   : > { %465 = vadd.xlane.f32.xlu1 %v464_v28  ;;  %462 = vadd.xlane.f32.xlu0 %v461_v29  ;;  %v1007_v23 = vsel %vm448_vm0, %v981_v10, 0.0  ;;  %v982_v28 = vmul.f32 %v1895_v19, %v1895_v19  ;;  %v1908_v25 = vsub.f32 %v1725_v6, %v424_v20  ;;  %v426_v29 = vld [vmem:[%s1832_s11 + $0x58] sm:$0xff]  ;;  %v1916_v31 = vsub.f32 %v1731_v8, %v425_v1 }
  0x1f   : > { %v1913_v30 = vsub.f32 %v1757_v15, %v426_v29  ;;  %v984_v35 = vmul.f32 %v1899_v21, %v1899_v21  ;;  %v1933_v40 = vsub.f32 %v1784_v24, %v428_v36  ;;  %v1057_v43 = vand.u32 2147483647, %v1845_v48 }
  0x20   : > { %1543 = vmatmul.mubr.msk.f32.gmra.mxu0 %vm448_vm0, %v1793_v27  ;;  %1555 = vmatmul.mubr.msk.f32.gmra.mxu1 %vm448_vm0, %v1810_v32  ;;  %v1004_v27 = vsel %vm448_vm0, %v980_v17, 0.0  ;;  %v985_v6 = vmul.f32 %v1908_v25, %v1908_v25  ;;  %v986_v15 = vmul.f32 %v1916_v31, %v1916_v31  ;;  %v1059_v52 = vand.u32 2147483647, %v1863_v59 }
  0x21   : > { %v987_v8 = vmul.f32 %v1913_v30, %v1913_v30  ;;  %v1016_v39 = vsel %vm448_vm0, %v984_v35, 0.0  ;;  %v1089_v48 = vmul.f32 0.5, %v1057_v43  ;;  %vm1073_vm2 = vcmp.lt.f32.partialorder %v1057_v43, 1.0 }
  0x22   : > { %471 = vadd.xlane.f32.xlu1 %v470_v33  ;;  %468 = vadd.xlane.f32.xlu0 %v467_v34  ;;  %v1013_v33 = vsel %vm448_vm0, %v983_v22, 0.0  ;;  %v1010_v34 = vsel %vm448_vm0, %v982_v28, 0.0  ;;  %v1022_v47 = vsel %vm448_vm0, %v986_v15, 0.0  ;;  %v1058_v59 = vand.u32 2147483647, %v1866_v60 }
  0x23   : > { %v1025_v46 = vsel %vm448_vm0, %v987_v8, 0.0  ;;  %v1105_v56 = vmul.f32 %v1089_v48, %v1057_v43  ;;  %v1091_v3 = vmul.f32 0.5, %v1059_v52  ;;  %v1061_v4 = vand.u32 2147483647, %v1872_v0 }
  0x24   : > { %v1494_v9 = vadd.f32 -0.5, %v1059_v52  ;;  %v1090_v10 = vmul.f32 0.5, %v1058_v59  ;;  %v1060_v12 = vand.u32 2147483647, %v1880_v5  ;;  %vm1075_vm4 = vcmp.lt.f32.partialorder %v1059_v52, 1.0 }
  0x25   : > { %v1107_v7 = vmul.f32 %v1091_v3, %v1059_v52  ;;  %v1493_v20 = vadd.f32 -0.5, %v1058_v59  ;;  %v1063_v22 = vand.u32 2147483647, %v1887_v11  ;;  %vm1074_vm5 = vcmp.lt.f32.partialorder %v1058_v59, 1.0 }
  0x26   : > { %477 = vadd.xlane.f32.xlu1 %v476_v37  ;;  %474 = vadd.xlane.f32.xlu0 %v473_v38  ;;  %v427_v37 = vld [vmem:[%s1832_s11 + $0x60] sm:$0xff]  ;;  %v1019_v38 = vsel %vm448_vm0, %v985_v6, 0.0  ;;  %v1106_v17 = vmul.f32 %v1090_v10, %v1058_v59  ;;  %v1062_v0 = vand.u32 2147483647, %v1895_v19  ;;  %v1496_v1 = vadd.f32 -0.5, %v1061_v4 }
  0x27   : > { %vm1077_vm6 = vcmp.lt.f32.partialorder %v1061_v4, 1.0  ;;  %v1495_v11 = vadd.f32 -0.5, %v1060_v12  ;;  %v1095_v36 = vmul.f32 0.5, %v1063_v22  ;;  %vm1076_vm7 = vcmp.lt.f32.partialorder %v1060_v12, 1.0 }
  0x28   : > { %v1138_v28 = vsel %vm1074_vm5, %v1106_v17, %v1493_v20  ;;  %vm1079_vm8 = vcmp.lt.f32.partialorder %v1063_v22, 1.0  ;;  %vm1078_vm9 = vcmp.lt.f32.partialorder %v1062_v0, 1.0  ;;  %vm910_vm1 = vcmask 7168  }
  0x29   : > { %v1158_v5 = vsel %vm448_vm0, %v1138_v28, 0.0  ;;  %v1111_v15 = vmul.f32 %v1095_v36, %v1063_v22 }
  0x2a   : > { %483 = vadd.xlane.f32.xlu1 %v482_v41  ;;  %480 = vadd.xlane.f32.xlu0 %v479_v42  ;;  %v1936_v41 = vsub.f32 %v1764_v18, %v427_v37  ;;  %v1056_v42 = vand.u32 2147483647, %v1848_v49  ;;  %v1949_v18 = vsub.f32 %v1810_v32, %v430_v44  ;;  %v1952_v49 = vsub.f32 %v1790_v26, %v429_v45 }
  0x2b   : > { %v1064_v37 = vand.u32 2147483647, %v1899_v21  ;;  %v1497_v45 = vadd.f32 -0.5, %v1062_v0  ;;  %v1066_v21 = vand.u32 2147483647, %v1916_v31 }
  0x2c   : > { %v988_v24 = vmul.f32 %v1936_v41, %v1936_v41  ;;  %v990_v32 = vmul.f32 %v1952_v49, %v1952_v49  ;;  %v1491_v58 = vadd.f32 -0.5, %v1056_v42  ;;  %vm1072_vm3 = vcmp.lt.f32.partialorder %v1056_v42, 1.0 }
  0x2d   : > { %v1068_v31 = vand.u32 2147483647, %v1936_v41  ;;  %vm1080_vm11 = vcmp.lt.f32.partialorder %v1064_v37, 1.0  ;;  %v1098_v59 = vmul.f32 0.5, %v1066_v21  ;;  %vm1082_vm13 = vcmp.lt.f32.partialorder %v1066_v21, 1.0 }
  0x2e   : > { %489 = vadd.xlane.f32.xlu1 %v488_v50  ;;  %486 = vadd.xlane.f32.xlu0 %v485_v51  ;;  %v989_v50 = vmul.f32 %v1933_v40, %v1933_v40  ;;  %v1088_v51 = vmul.f32 0.5, %v1056_v42  ;;  %v1028_v54 = vsel %vm448_vm0, %v988_v24, 0.0  ;;  %v1034_v62 = vsel %vm448_vm0, %v990_v32, 0.0 }
  0x2f   : > { %vm1084_vm15 = vcmp.lt.f32.partialorder %v1068_v31, 1.0 }
  0x30   : > { %v1031_v53 = vsel %vm448_vm0, %v989_v50, 0.0  ;;  %v1104_v26 = vmul.f32 %v1088_v51, %v1056_v42  ;;  %v1067_v42 = vand.u32 2147483647, %v1913_v30  ;;  %v1096_v51 = vmul.f32 0.5, %v1064_v37 }
  0x31   : > { %v1069_v30 = vand.u32 2147483647, %v1933_v40 }
  0x32   : > { %495 = vadd.xlane.f32.xlu1 %v494_v55  ;;  %492 = vadd.xlane.f32.xlu0 %v491_v57  ;;  %v991_v55 = vmul.f32 %v1949_v18, %v1949_v18  ;;  %v1492_v57 = vadd.f32 -0.5, %v1057_v43  ;;  %v1099_v32 = vmul.f32 0.5, %v1067_v42  ;;  %vm1083_vm12 = vcmp.lt.f32.partialorder %v1067_v42, 1.0 }
  0x33   : > { %vm1085_vm14 = vcmp.lt.f32.partialorder %v1069_v30, 1.0 }
  0x34   : > { %v1037_v61 = vsel %vm448_vm0, %v991_v55, 0.0  ;;  %v1499_v55 = vadd.f32 -0.5, %v1064_v37 }
  0x36   : > { %996 = vadd.xlane.f32.xlu1 %v995_v63  ;;  %993 = vadd.xlane.f32.xlu0 %v992_v2  ;;  %v1137_v63 = vsel %vm1073_vm2, %v1105_v56, %v1492_v57  ;;  %v1136_v2 = vsel %vm1072_vm3, %v1104_v26, %v1491_v58  ;;  %v1115_v26 = vmul.f32 %v1099_v32, %v1067_v42  ;;  %v1502_v58 = vadd.f32 -0.5, %v1067_v42 }
  0x37   : > { %v1155_v60 = vsel %vm448_vm0, %v1137_v63, 0.0  ;;  %v1501_v63 = vadd.f32 -0.5, %v1066_v21  ;;  %v2041_v32 = vand.u32 2147483647, %v1952_v49 }
  0x3a   : > { %1002 = vadd.xlane.f32.xlu1 %v1001_v14  ;;  %999 = vadd.xlane.f32.xlu0 %v998_v16  ;;  %v1152_v14 = vsel %vm448_vm0, %v1136_v2, 0.0  ;;  %v1139_v16 = vsel %vm1075_vm4, %v1107_v7, %v1494_v9  ;;  %v1101_v2 = vmul.f32 0.5, %v1069_v30  ;;  %v1504_v7 = vadd.f32 -0.5, %v1069_v30 }
  0x3b   : > { %v1100_v9 = vmul.f32 0.5, %v1068_v31 }
  0x3e   : > { %1008 = vadd.xlane.f32.xlu1 %v1007_v23  ;;  %1005 = vadd.xlane.f32.xlu0 %v1004_v27  ;;  %v1093_v23 = vmul.f32 0.5, %v1061_v4  ;;  %v1161_v27 = vsel %vm448_vm0, %v1139_v16, 0.0 }
  0x40   : > { %v1109_v29 = vmul.f32 %v1093_v23, %v1061_v4  ;;  %v1117_v4 = vmul.f32 %v1101_v2, %v1069_v30 }
  0x42   : > { %1014 = vadd.xlane.f32.xlu1 %v1013_v33  ;;  %1011 = vadd.xlane.f32.xlu0 %v1010_v34  ;;  %v1092_v33 = vmul.f32 0.5, %v1060_v12  ;;  %v1065_v34 = vand.u32 2147483647, %v1908_v25  ;;  %v1141_v6 = vsel %vm1077_vm6, %v1109_v29, %v1496_v1 }
  0x43   : > { %v1167_v19 = vsel %vm448_vm0, %v1141_v6, 0.0 }
  0x44   : > { %v1108_v35 = vmul.f32 %v1092_v33, %v1060_v12  ;;  %v1500_v48 = vadd.f32 -0.5, %v1065_v34  ;;  %vm1081_vm10 = vcmp.lt.f32.partialorder %v1065_v34, 1.0  ;;  %v1149_v12 = vsel %vm1085_vm14, %v1117_v4, %v1504_v7 }
  0x45   : > { %v1191_v16 = vsel %vm448_vm0, %v1149_v12, 0.0 }
  0x46   : > { %1020 = vadd.xlane.f32.xlu1 %v1019_v38  ;;  %1017 = vadd.xlane.f32.xlu0 %v1016_v39  ;;  %v1140_v8 = vsel %vm1076_vm7, %v1108_v35, %v1495_v11  ;;  %v1498_v38 = vadd.f32 -0.5, %v1063_v22  ;;  %v1094_v39 = vmul.f32 0.5, %v1062_v0 }
  0x47   : > { %v1164_v25 = vsel %vm448_vm0, %v1140_v8, 0.0  ;;  %v500_v8 = vrot.slane %v1744_v13, 4 }
  0x48   : > { %v1143_v43 = vsel %vm1079_vm8, %v1111_v15, %v1498_v38  ;;  %v1110_v44 = vmul.f32 %v1094_v39, %v1062_v0 }
  0x49   : > { %v501_v39 = vadd.f32 %v500_v8, %v1744_v13 }
  0x4a   : > { %1026 = vadd.xlane.f32.xlu1 %v1025_v46  ;;  %1023 = vadd.xlane.f32.xlu0 %v1022_v47  ;;  %v1097_v46 = vmul.f32 0.5, %v1065_v34  ;;  %v1173_v47 = vsel %vm448_vm0, %v1143_v43, 0.0  ;;  %v1142_v50 = vsel %vm1078_vm9, %v1110_v44, %v1497_v45 }
  0x4b   : > { %v1170_v52 = vsel %vm448_vm0, %v1142_v50, 0.0  ;;  %v502_v43 = vrot.slane %v501_v39, 2 }
  0x4c   : > { %v1113_v24 = vmul.f32 %v1097_v46, %v1065_v34 }
  0x4d   : > { %v503_v46 = vadd.f32 %v502_v43, %v501_v39 }
  0x4e   : > { %1032 = vadd.xlane.f32.xlu1 %v1031_v53  ;;  %1029 = vadd.xlane.f32.xlu0 %v1028_v54  ;;  %v1145_v53 = vsel %vm1081_vm10, %v1113_v24, %v1500_v48  ;;  %v1112_v54 = vmul.f32 %v1096_v51, %v1064_v37 }
  0x4f   : > { %v1179_v56 = vsel %vm448_vm0, %v1145_v53, 0.0 }
  0x50   : > { %v1144_v57 = vsel %vm1080_vm11, %v1112_v54, %v1499_v55  ;;  %v2038_v55 = vand.u32 2147483647, %v1949_v18 }
  0x51   : > { %v1176_v40 = vsel %vm448_vm0, %v1144_v57, 0.0 }
  0x52   : > { %1038 = vadd.xlane.f32.xlu1 %v1037_v61  ;;  %1035 = vadd.xlane.f32.xlu0 %v1034_v62  ;;  %v1147_v61 = vsel %vm1083_vm12, %v1115_v26, %v1502_v58  ;;  %v1114_v62 = vmul.f32 %v1098_v59, %v1066_v21 }
  0x53   : > { %v1185_v41 = vsel %vm448_vm0, %v1147_v61, 0.0 }
  0x54   : > { %v1146_v3 = vsel %vm1082_vm13, %v1114_v62, %v1501_v63 }
  0x55   : > { %v1182_v10 = vsel %vm448_vm0, %v1146_v3, 0.0 }
  0x56   : > { %1156 = vadd.xlane.f32.xlu1 %v1155_v60  ;;  %1153 = vadd.xlane.f32.xlu0 %v1152_v14  ;;  %v1116_v60 = vmul.f32 %v1100_v9, %v1068_v31  ;;  %v1503_v14 = vadd.f32 -0.5, %v1068_v31 }
  0x58   : > { %v1148_v17 = vsel %vm1084_vm15, %v1116_v60, %v1503_v14 }
  0x59   : > { %v1188_v20 = vsel %vm448_vm0, %v1148_v17, 0.0 }
  0x5a   : > { %1162 = vadd.xlane.f32.xlu1 %v1161_v27  ;;  %1159 = vadd.xlane.f32.xlu0 %v1158_v5 }
  0x5e   : > { %1168 = vadd.xlane.f32.xlu1 %v1167_v19  ;;  %1165 = vadd.xlane.f32.xlu0 %v1164_v25 }
  0x62   : > { %1174 = vadd.xlane.f32.xlu1 %v1173_v47  ;;  %1171 = vadd.xlane.f32.xlu0 %v1170_v52  ;;  %v504_v47 = vrot.slane %v503_v46, 1 }
  0x64   : > { %v2026_v48 = vadd.f32 %v504_v47, %v503_v46 }
  0x66   : > { %1180 = vadd.xlane.f32.xlu1 %v1179_v56  ;;  %1177 = vadd.xlane.f32.xlu0 %v1176_v40 }
  0x6a   : > { %1186 = vadd.xlane.f32.xlu1 %v1185_v41  ;;  %1183 = vadd.xlane.f32.xlu0 %v1182_v10 }
  0x6e   : > { %1192 = vadd.xlane.f32.xlu1 %v1191_v16  ;;  %1189 = vadd.xlane.f32.xlu0 %v1188_v20 }
  0x9f   : > { %v457_v22 = vpop.xlane.xlu1 %456  ;;  %v451_v23 = vpop.xlane.xlu0 %450 }
  0xa0   : > { %v2034_v53 = vadd.f32 %v2026_v48, %v457_v22  ;;  %v702_v54 = vadd.f32 %v2026_v48, %v451_v23 }
  0xa3   : > { %v460_v0 = vpop.xlane.xlu1 %459  ;;  %v454_v27 = vpop.xlane.xlu0 %453 }
  0xa4   : > { %v703_v57 = vadd.f32 %v2026_v48, %v454_v27  ;;  %v705_v40 = vadd.f32 %v2026_v48, %v460_v0 }
  0xa7   : > { %v466_v28 = vpop.xlane.xlu1 %465  ;;  %v463_v5 = vpop.xlane.xlu0 %462 }
  0xa8   : > { %v2051_v18 = vadd.f32 %v2026_v48, %v466_v28  ;;  %v2054_v49 = vadd.f32 %v2026_v48, %v463_v5 }
  0xab   : > { %v472_v29 = vpop.xlane.xlu1 %471  ;;  %v1988_v1 = vpop.xlane.xlu0 %468 }
  0xac   : > { %v2057_v61 = vadd.f32 %v2026_v48, %v472_v29  ;;  %v2061_v10 = vadd.f32 %v2026_v48, %v1988_v1 }
  0xaf   : > { %v478_v33 = vpop.xlane.xlu1 %477  ;;  %v475_v34 = vpop.xlane.xlu0 %474 }
  0xb0   : > { %v711_v51 = vadd.f32 %v2026_v48, %v478_v33  ;;  %v710_v59 = vadd.f32 %v2026_v48, %v475_v34 }
  0xb3   : > { %v1990_v6 = vpop.xlane.xlu1 %483  ;;  %v1992_v35 = vpop.xlane.xlu0 %480 }
  0xb4   : > { %v713_v60 = vadd.f32 %v2026_v48, %v1990_v6  ;;  %v712_v16 = vadd.f32 %v2026_v48, %v1992_v35 }
  0xb7   : > { %v1994_v11 = vpop.xlane.xlu1 %489  ;;  %v1996_v36 = vpop.xlane.xlu0 %486 }
  0xb8   : > { %v715_v17 = vadd.f32 %v2026_v48, %v1994_v11  ;;  %v714_v1 = vadd.f32 %v2026_v48, %v1996_v36 }
  0xbb   : > { %v1998_v37 = vpop.xlane.xlu1 %495  ;;  %v2000_v19 = vpop.xlane.xlu0 %492 }
  0xbc   : > { %v2081_v33 = vadd.f32 %v2026_v48, %v1998_v37 }
  0xbf   : > { %v997_v15 = vpop.xlane.xlu1 %996  ;;  %v994_v38 = vpop.xlane.xlu0 %993 }
  0xc0   : > { %1041 = vst.msk [vmem:[%s2007_s14 + $0x8] sm:$0xff] %vm910_vm1, %v997_v15  ;;  %1040 = vst.msk [vmem:[%s2007_s14] sm:$0xff] %vm910_vm1, %v994_v38 }
  0xc3   : > { %v1003_v42 = vpop.xlane.xlu1 %1002  ;;  %v1000_v25 = vpop.xlane.xlu0 %999 }
  0xc4   : > { %1043 = vst.msk [vmem:[%s2007_s14 + $0x18] sm:$0xff] %vm910_vm1, %v1003_v42  ;;  %1042 = vst.msk [vmem:[%s2007_s14 + $0x10] sm:$0xff] %vm910_vm1, %v1000_v25 }
  0xc7   : > { %v1009_v44 = vpop.xlane.xlu1 %1008  ;;  %v1006_v45 = vpop.xlane.xlu0 %1005 }
  0xc8   : > { %1045 = vst.msk [vmem:[%s2007_s14 + $0x28] sm:$0xff] %vm910_vm1, %v1009_v44  ;;  %1044 = vst.msk [vmem:[%s2007_s14 + $0x20] sm:$0xff] %vm910_vm1, %v1006_v45 }
  0xcb   : > { %v1015_v13 = vpop.xlane.xlu1 %1014  ;;  %v1012_v21 = vpop.xlane.xlu0 %1011 }
  0xcc   : > { %1047 = vst.msk [vmem:[%s2007_s14 + $0x38] sm:$0xff] %vm910_vm1, %v1015_v13  ;;  %1046 = vst.msk [vmem:[%s2007_s14 + $0x30] sm:$0xff] %vm910_vm1, %v1012_v21 }
  0xcf   : > { %v1021_v50 = vpop.xlane.xlu1 %1020  ;;  %v1018_v24 = vpop.xlane.xlu0 %1017 }
  0xd0   : > { %1049 = vst.msk [vmem:[%s2007_s14 + $0x48] sm:$0xff] %vm910_vm1, %v1021_v50  ;;  %1048 = vst.msk [vmem:[%s2007_s14 + $0x40] sm:$0xff] %vm910_vm1, %v1018_v24 }
  0xd3   : > { %v1027_v30 = vpop.xlane.xlu1 %1026  ;;  %v1024_v52 = vpop.xlane.xlu0 %1023 }
  0xd4   : > { %v1547_v31 = vpop.f32.mrf.mxu1  ;;  %v1535_v56 = vpop.f32.mrf.mxu0  ;;  %1051 = vst.msk [vmem:[%s2007_s14 + $0x58] sm:$0xff] %vm910_vm1, %v1027_v30  ;;  %1050 = vst.msk [vmem:[%s2007_s14 + $0x50] sm:$0xff] %vm910_vm1, %v1024_v52 }
  0xd5   : > { %v727_v26 = vmul.f32 2.0, %v1547_v31  ;;  %v719_v58 = vmul.f32 2.0, %v1535_v56 }
  0xd6   : > { %v623_v62 = vpop.f32.mrf.mxu0  ;;  %v663_v63 = vpop.f32.mrf.mxu1 }
  0xd7   : > { %v743_v2 = vsub.f32 %v711_v51, %v727_v26  ;;  %v735_v41 = vsub.f32 %v703_v57, %v719_v58  ;;  %v718_v3 = vmul.f32 2.0, %v623_v62  ;;  %v726_v4 = vmul.f32 2.0, %v663_v63  ;;  %v1033_v7 = vpop.xlane.xlu1 %1032  ;;  %v1030_v9 = vpop.xlane.xlu0 %1029 }
  0xd8   : > { %v1550_v12 = vpop.f32.mrf.mxu1  ;;  %v1538_v14 = vpop.f32.mrf.mxu0  ;;  %1053 = vst.msk [vmem:[%s2007_s14 + $0x68] sm:$0xff] %vm910_vm1, %v1033_v7  ;;  %1052 = vst.msk [vmem:[%s2007_s14 + $0x60] sm:$0xff] %vm910_vm1, %v1030_v9  ;;  %v716_v57 = vadd.f32 %v2026_v48, %v2000_v19 }
  0xd9   : > { %v2073_v20 = vmax.f32 %v743_v2, 0.0  ;;  %v2075_v22 = vmax.f32 %v735_v41, 0.0  ;;  %v734_v23 = vsub.f32 %v702_v54, %v718_v3  ;;  %v742_v0 = vsub.f32 %v710_v59, %v726_v4 }
  0xda   : > { %v729_v27 = vmul.f32 2.0, %v1550_v12  ;;  %v721_v28 = vmul.f32 2.0, %v1538_v14  ;;  %v633_v5 = vpop.f32.mrf.mxu0  ;;  %v673_v29 = vpop.f32.mrf.mxu1 }
  0xdb   : > { %1583 = vrsqrt.f32 %v2073_v20  ;;  %v2084_v34 = vmax.f32 %v734_v23, 0.0  ;;  %v2086_v6 = vmax.f32 %v742_v0, 0.0  ;;  %v720_v35 = vmul.f32 2.0, %v633_v5  ;;  %v1039_v11 = vpop.xlane.xlu1 %1038  ;;  %v1036_v8 = vpop.xlane.xlu0 %1035 }
  0xdc   : > { %1585 = vrsqrt.f32 %v2075_v22  ;;  %v745_v15 = vsub.f32 %v713_v60, %v729_v27  ;;  %v737_v38 = vsub.f32 %v705_v40, %v721_v28  ;;  %v728_v39 = vmul.f32 2.0, %v673_v29  ;;  %v1553_v36 = vpop.f32.mrf.mxu1  ;;  %v1541_v42 = vpop.f32.mrf.mxu0  ;;  %1055 = vst.msk [vmem:[%s2007_s14 + $0x78] sm:$0xff] %vm910_vm1, %v1039_v11  ;;  %1054 = vst.msk [vmem:[%s2007_s14 + $0x70] sm:$0xff] %vm910_vm1, %v1036_v8 }
  0xdd   : > { %1587 = vrsqrt.f32 %v2084_v34  ;;  %v736_v37 = vsub.f32 %v2034_v53, %v720_v35  ;;  %v731_v25 = vmul.f32 2.0, %v1553_v36  ;;  %v723_v43 = vmul.f32 2.0, %v1541_v42 }
  0xde   : > { %1589 = vrsqrt.f32 %v2086_v6  ;;  %v2102_v44 = vmax.f32 %v745_v15, 0.0  ;;  %v2104_v45 = vmax.f32 %v737_v38, 0.0  ;;  %v744_v46 = vsub.f32 %v712_v16, %v728_v39  ;;  %v643_v13 = vpop.f32.mrf.mxu0  ;;  %v683_v21 = vpop.f32.mrf.mxu1 }
  0xdf   : > { %v2106_v47 = vmax.f32 %v736_v37, 0.0  ;;  %v747_v50 = vsub.f32 %v715_v17, %v731_v25  ;;  %v739_v24 = vsub.f32 %v2051_v18, %v723_v43  ;;  %v722_v51 = vmul.f32 2.0, %v643_v13  ;;  %v1157_v30 = vpop.xlane.xlu1 %1156  ;;  %v1154_v52 = vpop.xlane.xlu0 %1153 }
  0xe0   : > { %1591 = vrsqrt.f32 %v2102_v44  ;;  %v2110_v53 = vmax.f32 %v744_v46, 0.0  ;;  %v730_v54 = vmul.f32 2.0, %v683_v21  ;;  %v1556_v31 = vpop.f32.mrf.mxu1  ;;  %v1544_v56 = vpop.f32.mrf.mxu0  ;;  %1201 = vst.msk [vmem:[%s2097_s17 + $0x8] sm:$0xff] %vm910_vm1, %v1157_v30  ;;  %1200 = vst.msk [vmem:[%s2097_s17] sm:$0xff] %vm910_vm1, %v1154_v52  ;;  %vm775_vm2 = vcmp.eq.f32.partialorder %v2075_v22, inf }
  0xe1   : > { %1593 = vrsqrt.f32 %v2104_v45  ;;  %v2119_v26 = vmax.f32 %v747_v50, 0.0  ;;  %v2121_v58 = vmax.f32 %v739_v24, 0.0  ;;  %v738_v59 = vsub.f32 %v2054_v49, %v722_v51 }
  0xe2   : > { %1595 = vrsqrt.f32 %v2106_v47  ;;  %v746_v40 = vsub.f32 %v714_v1, %v730_v54  ;;  %v733_v18 = vmul.f32 2.0, %v1556_v31  ;;  %v725_v62 = vmul.f32 2.0, %v1544_v56  ;;  %v653_v19 = vpop.f32.mrf.mxu0  ;;  %v693_v48 = vpop.f32.mrf.mxu1 }
  0xe3   : > { %1597 = vrsqrt.f32 %v2110_v53  ;;  %v2126_v63 = vmax.f32 %v738_v59, 0.0  ;;  %v724_v2 = vmul.f32 2.0, %v653_v19  ;;  %v732_v41 = vmul.f32 2.0, %v693_v48  ;;  %v1163_v3 = vpop.xlane.xlu1 %1162  ;;  %v1160_v4 = vpop.xlane.xlu0 %1159 }
  0xe4   : > { %1599 = vrsqrt.f32 %v2119_v26  ;;  %v2129_v49 = vmax.f32 %v746_v40, 0.0  ;;  %v749_v7 = vsub.f32 %v2081_v33, %v733_v18  ;;  %v741_v9 = vsub.f32 %v2057_v61, %v725_v62  ;;  %1203 = vst.msk [vmem:[%s2097_s17 + $0x18] sm:$0xff] %vm910_vm1, %v1163_v3  ;;  %1202 = vst.msk [vmem:[%s2097_s17 + $0x10] sm:$0xff] %vm910_vm1, %v1160_v4 }
  0xe5   : > { %1601 = vrsqrt.f32 %v2121_v58  ;;  %v740_v12 = vsub.f32 %v2061_v10, %v724_v2  ;;  %v748_v60 = vsub.f32 %v716_v57, %v732_v41  ;;  %vm777_vm3 = vcmp.eq.f32.partialorder %v2075_v22, 0.0 }
  0xe6   : > { %1603 = vrsqrt.f32 %v2126_v63  ;;  %v2140_v14 = vmax.f32 %v749_v7, 0.0  ;;  %v2142_v16 = vmax.f32 %v741_v9, 0.0  ;;  %v2147_v61 = vmul.f32 0.5, %v2038_v55 }
  0xe7   : > { %v2150_v17 = vmul.f32 0.5, %v2041_v32  ;;  %v1169_v10 = vpop.xlane.xlu1 %1168  ;;  %v1166_v23 = vpop.xlane.xlu0 %1165  ;;  %1605 = vrsqrt.f32 %v2129_v49  ;;  %v2153_v27 = vmax.f32 %v740_v12, 0.0  ;;  %v2155_v28 = vmax.f32 %v748_v60, 0.0 }
  0xe8   : > { %v1584_v0 = vpop.eup %1583  ;;  %v778_v5 = vand.u32 2147483648, %v2075_v22  ;;  %1205 = vst.msk [vmem:[%s2097_s17 + $0x28] sm:$0xff] %vm910_vm1, %v1169_v10  ;;  %1204 = vst.msk [vmem:[%s2097_s17 + $0x20] sm:$0xff] %vm910_vm1, %v1166_v23  ;;  %1607 = vrsqrt.f32 %v2140_v14  ;;  %vm768_vm4 = vcmp.eq.f32.partialorder %v2084_v34, inf  ;;  %vm770_vm5 = vcmp.eq.f32.partialorder %v2084_v34, 0.0 }
  0xe9   : > { %v1586_v29 = vpop.eup %1585  ;;  %v830_v1 = vmul.f32 %v1584_v0, %v2073_v20  ;;  %1609 = vrsqrt.f32 %v2142_v16  ;;  %v771_v11 = vand.u32 2147483648, %v2084_v34  ;;  %vm831_vm6 = vcmp.eq.f32.partialorder %v2073_v20, inf }
  0xea   : > { %v1588_v33 = vpop.eup %1587  ;;  %v774_v35 = vmul.f32 %v1586_v29, %v2075_v22  ;;  %vm833_vm7 = vcmp.eq.f32.partialorder %v2073_v20, 0.0  ;;  %v834_v39 = vand.u32 2147483648, %v2073_v20  ;;  %1611 = vrsqrt.f32 %v2153_v27 }
  0xeb   : > { %v1590_v8 = vpop.eup %1589  ;;  %v767_v15 = vmul.f32 %v1588_v33, %v2084_v34  ;;  %v832_v38 = vsel %vm831_vm6, %v2073_v20, %v830_v1  ;;  %v1175_v36 = vpop.xlane.xlu1 %1174  ;;  %vm824_vm8 = vcmp.eq.f32.partialorder %v2086_v6, inf  ;;  %1613 = vrsqrt.f32 %v2155_v28 }
  0xec   : > { %v1172_v42 = vpop.xlane.xlu0 %1171  ;;  %v776_v37 = vsel %vm775_vm2, %v2075_v22, %v774_v35  ;;  %v823_v25 = vmul.f32 %v1590_v8, %v2086_v6  ;;  %1207 = vst.msk [vmem:[%s2097_s17 + $0x38] sm:$0xff] %vm910_vm1, %v1175_v36  ;;  %vm826_vm9 = vcmp.eq.f32.partialorder %v2086_v6, 0.0  ;;  %v2200_v24 = vsel %vm833_vm7, %v834_v39, %v832_v38 }
  0xed   : > { %1206 = vst.msk [vmem:[%s2097_s17 + $0x30] sm:$0xff] %vm910_vm1, %v1172_v42  ;;  %v1592_v43 = vpop.eup %1591  ;;  %v2187_v46 = vsel %vm777_vm3, %v778_v5, %v776_v37  ;;  %v769_v13 = vsel %vm768_vm4, %v2084_v34, %v767_v15  ;;  %v827_v22 = vand.u32 2147483648, %v2086_v6  ;;  %vm789_vm10 = vcmp.eq.f32.partialorder %v2104_v45, inf }
  0xee   : > { %v1594_v21 = vpop.eup %1593  ;;  %880 = vmin.xlane.f32.xlu1 %v2187_v46  ;;  %v2196_v50 = vsel %vm770_vm5, %v771_v11, %v769_v13  ;;  %v825_v30 = vsel %vm824_vm8, %v2086_v6, %v823_v25  ;;  %vm791_vm11 = vcmp.eq.f32.partialorder %v2104_v45, 0.0  ;;  %v844_v20 = vmul.f32 %v1592_v43, %v2102_v44 }
  0xef   : > { %v1596_v51 = vpop.eup %1595  ;;  %878 = vmin.xlane.f32.xlu0 %v2196_v50  ;;  %v788_v34 = vmul.f32 %v1594_v21, %v2104_v45  ;;  %v1181_v52 = vpop.xlane.xlu1 %1180  ;;  %v792_v56 = vand.u32 2147483648, %v2104_v45  ;;  %vm782_vm12 = vcmp.eq.f32.partialorder %v2106_v47, inf  ;;  %vm784_vm13 = vcmp.eq.f32.partialorder %v2106_v47, 0.0 }
  0xf0   : > { %v1178_v54 = vpop.xlane.xlu0 %1177  ;;  %v1598_v31 = vpop.eup %1597  ;;  %v781_v57 = vmul.f32 %v1596_v51, %v2106_v47  ;;  %1209 = vst.msk [vmem:[%s2097_s17 + $0x48] sm:$0xff] %vm910_vm1, %v1181_v52  ;;  %v785_v18 = vand.u32 2147483648, %v2106_v47  ;;  %vm845_vm14 = vcmp.eq.f32.partialorder %v2102_v44, inf  ;;  %v828_v48 = vsel %vm826_vm9, %v827_v22, %v825_v30 }
  0xf1   : > { %1208 = vst.msk [vmem:[%s2097_s17 + $0x40] sm:$0xff] %vm910_vm1, %v1178_v54  ;;  %v1600_v59 = vpop.eup %1599  ;;  %v790_v40 = vsel %vm789_vm10, %v2104_v45, %v788_v34  ;;  %v837_v62 = vmul.f32 %v1598_v31, %v2110_v53  ;;  %v846_v41 = vsel %vm845_vm14, %v2102_v44, %v844_v20  ;;  %v848_v3 = vand.u32 2147483648, %v2102_v44 }
  0xf2   : > { %v1602_v19 = vpop.eup %1601  ;;  %896 = vmin.xlane.f32.xlu1 %v2200_v24  ;;  %v783_v2 = vsel %vm782_vm12, %v2106_v47, %v781_v57  ;;  %v2233_v7 = vsel %vm791_vm11, %v792_v56, %v790_v40  ;;  %vm838_vm15 = vcmp.eq.f32.partialorder %v2110_v53, inf  ;;  %vm803_vm2 = vcmp.eq.f32.partialorder %v2121_v58, inf }
  0xf3   : > { %v1604_v4 = vpop.eup %1603  ;;  %894 = vmin.xlane.f32.xlu0 %v828_v48  ;;  %v2237_v9 = vsel %vm784_vm13, %v785_v18, %v783_v2  ;;  %v802_v6 = vmul.f32 %v1602_v19, %v2121_v58  ;;  %v1187_v12 = vpop.xlane.xlu1 %1186  ;;  %v839_v10 = vsel %vm838_vm15, %v2110_v53, %v837_v62  ;;  %v806_v23 = vand.u32 2147483648, %v2121_v58 }
  0xf4   : > { %v1184_v60 = vpop.xlane.xlu0 %1183  ;;  %v795_v45 = vmul.f32 %v1604_v4, %v2126_v63  ;;  %1211 = vst.msk [vmem:[%s2097_s17 + $0x58] sm:$0xff] %vm910_vm1, %v1187_v12  ;;  %v1606_v47 = vpop.eup %1605  ;;  %v841_v0 = vand.u32 2147483648, %v2110_v53  ;;  %vm805_vm3 = vcmp.eq.f32.partialorder %v2121_v58, 0.0  ;;  %vm796_vm4 = vcmp.eq.f32.partialorder %v2126_v63, inf }
  0xf5   : > { %1210 = vst.msk [vmem:[%s2097_s17 + $0x50] sm:$0xff] %vm910_vm1, %v1184_v60  ;;  %v804_v5 = vsel %vm803_vm2, %v2121_v58, %v802_v6  ;;  %v1608_v29 = vpop.eup %1607  ;;  %v799_v35 = vand.u32 2147483648, %v2126_v63  ;;  %v858_v11 = vmul.f32 %v1600_v59, %v2119_v26  ;;  %vm847_vm5 = vcmp.eq.f32.partialorder %v2102_v44, 0.0 }
  0xf6   : > { %884 = vmin.xlane.f32.xlu1 %v2233_v7  ;;  %v807_v1 = vsel %vm805_vm3, %v806_v23, %v804_v5  ;;  %v797_v33 = vsel %vm796_vm4, %v2126_v63, %v795_v45  ;;  %v1610_v8 = vpop.eup %1609  ;;  %vm840_vm6 = vcmp.eq.f32.partialorder %v2110_v53, 0.0  ;;  %vm798_vm7 = vcmp.eq.f32.partialorder %v2126_v63, 0.0 }
  0xf7   : > { %882 = vmin.xlane.f32.xlu0 %v2237_v9  ;;  %v928_v58 = vmin.f32 %v2187_v46, %v807_v1  ;;  %v1193_v15 = vpop.xlane.xlu1 %1192  ;;  %v849_v39 = vsel %vm847_vm5, %v848_v3, %v846_v41  ;;  %v842_v36 = vsel %vm840_vm6, %v841_v0, %v839_v10  ;;  %v800_v42 = vsel %vm798_vm7, %v799_v35, %v797_v33  ;;  %v1612_v25 = vpop.eup %1611 }
  0xf8   : > { %v1190_v38 = vpop.xlane.xlu0 %1189  ;;  %v851_v37 = vmul.f32 %v1606_v47, %v2129_v49  ;;  %1213 = vst.msk [vmem:[%s2097_s17 + $0x68] sm:$0xff] %vm910_vm1, %v1193_v15  ;;  %v927_v44 = vmin.f32 %v2196_v50, %v800_v42  ;;  %vm859_vm8 = vcmp.eq.f32.partialorder %v2119_v26, inf  ;;  %vm861_vm9 = vcmp.eq.f32.partialorder %v2119_v26, 0.0  ;;  %v1614_v63 = vpop.eup %1613 }
  0xf9   : > { %1212 = vst.msk [vmem:[%s2097_s17 + $0x60] sm:$0xff] %vm910_vm1, %v1190_v38  ;;  %v862_v53 = vand.u32 2147483648, %v2119_v26  ;;  %v860_v43 = vsel %vm859_vm8, %v2119_v26, %v858_v11  ;;  %v932_v46 = vmin.f32 %v928_v58, %v2200_v24  ;;  %vm852_vm10 = vcmp.eq.f32.partialorder %v2129_v49, inf }
  0xfa   : > { %900 = vmin.xlane.f32.xlu1 %v849_v39  ;;  %v816_v13 = vmul.f32 %v1610_v8, %v2142_v16  ;;  %v853_v21 = vsel %vm852_vm10, %v2129_v49, %v851_v37  ;;  %vm854_vm11 = vcmp.eq.f32.partialorder %v2129_v49, 0.0  ;;  %vm817_vm12 = vcmp.eq.f32.partialorder %v2142_v16, inf }
  0xfb   : > { %898 = vmin.xlane.f32.xlu0 %v842_v36  ;;  %v820_v50 = vand.u32 2147483648, %v2142_v16  ;;  %v931_v22 = vmin.f32 %v927_v44, %v828_v48  ;;  %vm819_vm13 = vcmp.eq.f32.partialorder %v2142_v16, 0.0  ;;  %v809_v24 = vmul.f32 %v1612_v25, %v2153_v27 }
  0xfc   : > { %v818_v51 = vsel %vm817_vm12, %v2142_v16, %v816_v13  ;;  %vm810_vm14 = vcmp.eq.f32.partialorder %v2153_v27, inf  ;;  %vm812_vm15 = vcmp.eq.f32.partialorder %v2153_v27, 0.0  ;;  %v813_v34 = vand.u32 2147483648, %v2153_v27 }
  0xfd   : > { %v821_v30 = vsel %vm819_vm13, %v820_v50, %v818_v51  ;;  %v811_v52 = vsel %vm810_vm14, %v2153_v27, %v809_v24  ;;  %v872_v54 = vmul.f32 %v1608_v29, %v2140_v14  ;;  %vm873_vm2 = vcmp.eq.f32.partialorder %v2140_v14, inf }
  0xfe   : > { %888 = vmin.xlane.f32.xlu1 %v807_v1  ;;  %v930_v20 = vmin.f32 %v2233_v7, %v821_v30  ;;  %v855_v16 = vand.u32 2147483648, %v2129_v49  ;;  %v814_v31 = vsel %vm812_vm15, %v813_v34, %v811_v52  ;;  %vm875_vm3 = vcmp.eq.f32.partialorder %v2140_v14, 0.0 }
  0xff   : > { %886 = vmin.xlane.f32.xlu0 %v800_v42  ;;  %v876_v56 = vand.u32 2147483648, %v2140_v14  ;;  %v929_v57 = vmin.f32 %v2237_v9, %v814_v31  ;;  %v874_v59 = vsel %vm873_vm2, %v2140_v14, %v872_v54  ;;  %v865_v18 = vmul.f32 %v1614_v63, %v2155_v28 }
 0x100   : > { %v934_v40 = vmin.f32 %v930_v20, %v849_v39  ;;  %v863_v27 = vsel %vm861_vm9, %v862_v53, %v860_v43  ;;  %v856_v62 = vsel %vm854_vm11, %v855_v16, %v853_v21  ;;  %vm866_vm4 = vcmp.eq.f32.partialorder %v2155_v28, inf }
 0x101   : > { %v869_v19 = vand.u32 2147483648, %v2155_v28  ;;  %v935_v48 = vmin.f32 %v931_v22, %v856_v62  ;;  %v867_v2 = vsel %vm866_vm4, %v2155_v28, %v865_v18  ;;  %vm868_vm5 = vcmp.eq.f32.partialorder %v2155_v28, 0.0 }
 0x102   : > { %904 = vmin.xlane.f32.xlu1 %v863_v27  ;;  %v933_v41 = vmin.f32 %v929_v57, %v842_v36  ;;  %v877_v3 = vsel %vm875_vm3, %v876_v56, %v874_v59  ;;  %v1506_v4 = vadd.f32 -0.5, %v2038_v55  ;;  %v936_v49 = vmin.f32 %v932_v46, %v863_v27 }
 0x103   : > { %902 = vmin.xlane.f32.xlu0 %v856_v62  ;;  %v870_v26 = vsel %vm868_vm5, %v869_v19, %v867_v2  ;;  %v938_v7 = vmin.f32 %v934_v40, %v877_v3  ;;  %v1119_v6 = vmul.f32 %v2147_v61, %v2038_v55  ;;  %vm1087_vm6 = vcmp.lt.f32.partialorder %v2038_v55, 1.0 }
 0x104   : > { %v937_v9 = vmin.f32 %v933_v41, %v870_v26  ;;  %v1118_v12 = vmul.f32 %v2150_v17, %v2041_v32  ;;  %v1505_v28 = vadd.f32 -0.5, %v2041_v32  ;;  %v939_v60 = vmin.f32 %v935_v48, %v936_v49 }
 0x105   : > { %vm1086_vm7 = vcmp.lt.f32.partialorder %v2041_v32, 1.0  ;;  %v1151_v23 = vsel %vm1087_vm6, %v1119_v6, %v1506_v4 }
 0x106   : > { %892 = vmin.xlane.f32.xlu1 %v821_v30  ;;  %v940_v14 = vmin.f32 %v937_v9, %v938_v7  ;;  %v1150_v45 = vsel %vm1086_vm7, %v1118_v12, %v1505_v28  ;;  %v1197_v55 = vsel %vm448_vm0, %v1151_v23, 0.0 }
 0x107   : > { %890 = vmin.xlane.f32.xlu0 %v814_v31  ;;  %v1194_v17 = vsel %vm448_vm0, %v1150_v45, 0.0 }
 0x108   : > { %v941_v10 = vmin.f32 %v939_v60, %v940_v14 }
 0x10a   : > { %908 = vmin.xlane.f32.xlu1 %v877_v3  ;;  %v942_v61 = vrot.slane %v941_v10, 4 }
 0x10b   : > { %906 = vmin.xlane.f32.xlu0 %v870_v26 }
 0x10c   : > { %v943_v47 = vmin.f32 %v941_v10, %v942_v61 }
 0x10e   : > { %v944_v0 = vrot.slane %v943_v47, 2  ;;  %1198 = vadd.xlane.f32.xlu1 %v1197_v55 }
 0x10f   : > { %1195 = vadd.xlane.f32.xlu0 %v1194_v17 }
 0x110   : > { %v945_v5 = vmin.f32 %v943_v47, %v944_v0 }
 0x112   : > { %v946_v29 = vrot.slane %v945_v5, 1 }
 0x114   : > { %v947_v32 = vmin.f32 %v945_v5, %v946_v29 }
 0x116   : > { %952 = vst [vmem:[%s378_s20] sm:$0x1] %v947_v32 }
 0x177   : > { %v881_v1 = vpop.xlane.xlu1 %880 }
 0x178   : > { %912 = vst.msk [vmem:[%s2323_s28 + $0x8] sm:$0xff] %vm910_vm1, %v881_v1  ;;  %v879_v33 = vpop.xlane.xlu0 %878 }
 0x179   : > { %911 = vst.msk [vmem:[%s2323_s28] sm:$0xff] %vm910_vm1, %v879_v33 }
 0x17b   : > { %v897_v35 = vpop.xlane.xlu1 %896 }
 0x17c   : > { %920 = vst.msk [vmem:[%s2323_s28 + $0x48] sm:$0xff] %vm910_vm1, %v897_v35  ;;  %v895_v11 = vpop.xlane.xlu0 %894 }
 0x17d   : > { %919 = vst.msk [vmem:[%s2323_s28 + $0x40] sm:$0xff] %vm910_vm1, %v895_v11 }
 0x17f   : > { %v885_v8 = vpop.xlane.xlu1 %884 }
 0x180   : > { %914 = vst.msk [vmem:[%s2323_s28 + $0x18] sm:$0xff] %vm910_vm1, %v885_v8  ;;  %v883_v58 = vpop.xlane.xlu0 %882 }
 0x181   : > { %913 = vst.msk [vmem:[%s2323_s28 + $0x10] sm:$0xff] %vm910_vm1, %v883_v58 }
 0x183   : > { %v901_v15 = vpop.xlane.xlu1 %900 }
 0x184   : > { %922 = vst.msk [vmem:[%s2323_s28 + $0x58] sm:$0xff] %vm910_vm1, %v901_v15  ;;  %v899_v38 = vpop.xlane.xlu0 %898 }
 0x185   : > { %921 = vst.msk [vmem:[%s2323_s28 + $0x50] sm:$0xff] %vm910_vm1, %v899_v38 }
 0x187   : > { %v889_v39 = vpop.xlane.xlu1 %888 }
 0x188   : > { %916 = vst.msk [vmem:[%s2323_s28 + $0x28] sm:$0xff] %vm910_vm1, %v889_v39  ;;  %v887_v36 = vpop.xlane.xlu0 %886 }
 0x189   : > { %915 = vst.msk [vmem:[%s2323_s28 + $0x20] sm:$0xff] %vm910_vm1, %v887_v36 }
 0x18b   : > { %v905_v42 = vpop.xlane.xlu1 %904 }
 0x18c   : > { %924 = vst.msk [vmem:[%s2323_s28 + $0x68] sm:$0xff] %vm910_vm1, %v905_v42  ;;  %v903_v37 = vpop.xlane.xlu0 %902 }
 0x18d   : > { %923 = vst.msk [vmem:[%s2323_s28 + $0x60] sm:$0xff] %vm910_vm1, %v903_v37 }
 0x18f   : > { %v893_v25 = vpop.xlane.xlu1 %892 }
 0x190   : > { %918 = vst.msk [vmem:[%s2323_s28 + $0x38] sm:$0xff] %vm910_vm1, %v893_v25  ;;  %v891_v44 = vpop.xlane.xlu0 %890 }
 0x191   : > { %917 = vst.msk [vmem:[%s2323_s28 + $0x30] sm:$0xff] %vm910_vm1, %v891_v44 }
 0x193   : > { %v909_v53 = vpop.xlane.xlu1 %908 }
 0x194   : > { %926 = vst.msk [vmem:[%s2323_s28 + $0x78] sm:$0xff] %vm910_vm1, %v909_v53  ;;  %v907_v63 = vpop.xlane.xlu0 %906 }
 0x195   : > { %925 = vst.msk [vmem:[%s2323_s28 + $0x70] sm:$0xff] %vm910_vm1, %v907_v63 }
 0x197   : > { %v1199_v43 = vpop.xlane.xlu1 %1198 }
 0x198   : > { %1215 = vst.msk [vmem:[%s2097_s17 + $0x78] sm:$0xff] %vm910_vm1, %v1199_v43  ;;  %v1196_v46 = vpop.xlane.xlu0 %1195 }
 0x199   : > { %1214 = vst.msk [vmem:[%s2097_s17 + $0x70] sm:$0xff] %vm910_vm1, %v1196_v46 }
 0x19a PF: > { %s17_s23 = sadd.s32 1, %s1637_s23   ;;  %s2377_s21 = smov %s1633_s22 }
 0x19b   : > { %p14_p5 = scmp.ge.s32.totalorder %s17_s23, 4   ;;  %s2378_s22 = smov %s2380_s24 }
 0x19d   :  { %16 = sbr.rel (!%p14_p5) target bundleno = 2 (0x2), region = 112 }

</bundles_post_ra>
